<compile_context>
chip_gen: v7x
topology: tpu7x:2x2x1
jax: 0.10.0
libtpu: 0.0.40
codegen_flags: <defaults>
</compile_context>

<pallas_src>
import functools

import numpy as np
import jax
import jax.numpy as jnp
from jax.experimental import pallas as pl
from jax.experimental.pallas import tpu as pltpu


VMEM_LIMIT_BYTES = 48 * 1024 * 1024   # <= v7x physical 64 MiB; fine on v5e/v6e.
FC_MAX_TILE_M = 1024                  # batch rows of the fc head per grid step


def _pick_batch_tile(batch):
    """Images per conv grid step: keep >=2 grid steps when possible (both TCs on v7x),
    while capping per-step unrolling / VMEM."""
    for bt in (8, 4, 2):
        if batch % bt == 0 and batch // bt >= 2:
            return bt
    return 1


# ----------------------------------------------------------------------------
# Pallas kernel: stride-1 conv (+bias+ReLU) over a row-major activation slab.
#   x_ref : (bt, n_in,  cin)   rows are grid positions p = r*grid_w + c (bf16)
#   w_ref : (k*k*cin, cout)    rows ordered (tap_i, tap_j, cin)          (bf16)
#   b_ref : (1, cout)          bias                                      (f32)
#   o_ref : (bt, n_out, cout)  output slab on the same grid width        (bf16)
# The conv is a sum of k*k shifted matmuls: tap (i,j) contributes
#   x[rows + i*grid_w + j, :] @ w[tap block]   accumulated in f32.
# ----------------------------------------------------------------------------
def _conv_s1_relu_kernel(x_ref, w_ref, b_ref, o_ref, *, taps, n_out, cin):
    cout = o_ref.shape[-1]
    b = b_ref[...]
    for bi in range(o_ref.shape[0]):                       # static unroll over batch tile
        acc = jnp.zeros((n_out, cout), jnp.float32)
        for t, shift in enumerate(taps):                   # k*k shifted MXU matmuls
            x_t = x_ref[bi, pl.ds(shift, n_out), :]        # unit-stride row slice in VMEM
            w_t = w_ref[pl.ds(t * cin, cin), :]            # aligned weight row block
            acc = acc + jnp.dot(x_t, w_t, preferred_element_type=jnp.float32)
        o_ref[bi] = jnp.maximum(acc + b, 0.0).astype(o_ref.dtype)


def conv_s1_relu(x, w, b, *, grid_w, k, out_dtype=jnp.bfloat16):
    """x: (B, n_in, cin) slab; w: (k*k*cin, cout) bf16 (pre-prepped); b: (1, cout) f32."""
    batch, n_in, cin = x.shape
    kkc, cout = w.shape
    assert kkc == k * k * cin
    taps = tuple(i * grid_w + j for i in range(k) for j in range(k))
    n_out = n_in - taps[-1]
    bt = _pick_batch_tile(batch)
    return pl.pallas_call(
        functools.partial(_conv_s1_relu_kernel, taps=taps, n_out=n_out, cin=cin),
        out_shape=jax.ShapeDtypeStruct((batch, n_out, cout), out_dtype),
        grid=(batch // bt,),
        in_specs=[
            pl.BlockSpec((bt, n_in, cin), lambda g: (g, 0, 0)),
            pl.BlockSpec((kkc, cout), lambda g: (0, 0)),   # constant block -> DMA'd once
            pl.BlockSpec((1, cout), lambda g: (0, 0)),
        ],
        out_specs=pl.BlockSpec((bt, n_out, cout), lambda g: (g, 0, 0)),
        compiler_params=pltpu.CompilerParams(
            dimension_semantics=("parallel",),
            vmem_limit_bytes=VMEM_LIMIT_BYTES,
        ),
    )(x, w, b)


# ----------------------------------------------------------------------------
# Fused head: out = relu(x @ W1 + b1) @ W2 + b2 in one pallas_call.
# ----------------------------------------------------------------------------
def _fc_head_kernel(x_ref, w1_ref, b1_ref, w2_ref, b2_ref, o_ref):
    h = jnp.dot(x_ref[...], w1_ref[...], preferred_element_type=jnp.float32)
    h = jnp.maximum(h + b1_ref[...], 0.0)
    o = jnp.dot(h.astype(jnp.bfloat16), w2_ref[...], preferred_element_type=jnp.float32)
    o_ref[...] = (o + b2_ref[...]).astype(o_ref.dtype)


def _pick_fc_tile(m):
    if m <= FC_MAX_TILE_M:
        return m                                  # full-dim block (always legal)
    for tm in range(FC_MAX_TILE_M, 0, -8):        # largest multiple-of-8 divisor of M
        if m % tm == 0:
            return tm
    return m


def pallas_fc_head(x, w1, b1, w2, b2):
    """x: (B, K) bf16; w1: (K, H) bf16; b1: (1, H) f32; w2: (H, N) bf16; b2: (1, N) f32."""
    m, k = x.shape
    _, hdim = w1.shape
    _, n = w2.shape
    tm = _pick_fc_tile(m)
    return pl.pallas_call(
        _fc_head_kernel,
        out_shape=jax.ShapeDtypeStruct((m, n), jnp.float32),
        grid=(m // tm,),
        in_specs=[
            pl.BlockSpec((tm, k), lambda g: (g, 0)),
            pl.BlockSpec((k, hdim), lambda g: (0, 0)),     # constant blocks: weights stay
            pl.BlockSpec((1, hdim), lambda g: (0, 0)),     # VMEM-resident across steps
            pl.BlockSpec((hdim, n), lambda g: (0, 0)),
            pl.BlockSpec((1, n), lambda g: (0, 0)),
        ],
        out_specs=pl.BlockSpec((tm, n), lambda g: (g, 0)),
        compiler_params=pltpu.CompilerParams(
            dimension_semantics=("parallel",),
            vmem_limit_bytes=VMEM_LIMIT_BYTES,
        ),
    )(x, w1, b1, w2, b2)


# ----------------------------------------------------------------------------
# Tiny XLA layout glue (pure reshuffles on small tensors, no im2col blow-up).
# ----------------------------------------------------------------------------
def _input_space_to_depth(x_nchw, block):
    """NCHW image -> (B, (H/b)*(W/b), b*b*C) row-major slab; channel order (di, dj, cin)."""
    bsz, c, h, w = x_nchw.shape
    x = jnp.transpose(x_nchw, (0, 2, 3, 1))                       # NHWC
    x = x.reshape(bsz, h // block, block, w // block, block, c)
    x = jnp.transpose(x, (0, 1, 3, 2, 4, 5))
    return x.reshape(bsz, (h // block) * (w // block), block * block * c)


def _to_grid(y, grid_w, valid_h, valid_w):
    """(B, n, C) slab (row = r*grid_w + c) -> valid (B, valid_h, valid_w, C) block."""
    bsz, n, c = y.shape
    y = jnp.pad(y, ((0, 0), (0, valid_h * grid_w - n), (0, 0)))
    return y.reshape(bsz, valid_h, grid_w, c)[:, :, :valid_w, :]


def _grid_space_to_depth(y, grid_w, valid_h, valid_w, block):
    """Slab -> block-`block` space-to-depth slab; channel order (dr, dc, ch)."""
    bsz, _, c = y.shape
    y = _to_grid(y, grid_w, valid_h, valid_w)
    y = y.reshape(bsz, valid_h // block, block, valid_w // block, block, c)
    y = jnp.transpose(y, (0, 1, 3, 2, 4, 5))
    return y.reshape(bsz, (valid_h // block) * (valid_w // block), block * block * c)


# ----------------------------------------------------------------------------
# Parameters (PyTorch layout) and one-time kernel-friendly prep.
# ----------------------------------------------------------------------------
def _uniform(key, shape, fan_in):
    bound = 1.0 / jnp.sqrt(float(fan_in))
    return jax.random.uniform(key, shape, jnp.float32, -bound, bound)


def init_dqn_params(key, in_channels=4, num_actions=4):
    ks = jax.random.split(key, 10)
    p = {}
    p["w1"] = _uniform(ks[0], (32, in_channels, 8, 8), in_channels * 8 * 8)
    p["b1"] = _uniform(ks[1], (32,), in_channels * 8 * 8)
    p["w2"] = _uniform(ks[2], (64, 32, 4, 4), 32 * 4 * 4)
    p["b2"] = _uniform(ks[3], (64,), 32 * 4 * 4)
    p["w3"] = _uniform(ks[4], (64, 64, 3, 3), 64 * 3 * 3)
    p["b3"] = _uniform(ks[5], (64,), 64 * 3 * 3)
    p["wfc1"] = _uniform(ks[6], (7 * 7 * 64, 512), 7 * 7 * 64)  # rows in torch (c,h,w) order
    p["bfc1"] = _uniform(ks[7], (512,), 7 * 7 * 64)
    p["wfc2"] = _uniform(ks[8], (512, num_actions), 512)
    p["bfc2"] = _uniform(ks[9], (num_actions,), 512)            # fixed: explicit shape
    return p


def prep_params(p):
    """One-time layout permutation + bf16 cast + bias reshape (done once, not per call)."""

    def conv_w_s2d(w, block):
        # conv with stride == block (block | kernel) == stride-1 conv over a space-to-depth
        # input.  Rows ordered (tap_i, tap_j, di, dj, cin): kernel tap = (block*i+di, block*j+dj).
        cout, cin, kh, kw = w.shape
        w = jnp.transpose(w, (2, 3, 1, 0))                        # (kh, kw, cin, cout)
        w = w.reshape(kh // block, block, kw // block, block, cin, cout)
        w = jnp.transpose(w, (0, 2, 1, 3, 4, 5))                  # (i, j, di, dj, cin, cout)
        return w.reshape(kh * kw * cin, cout).astype(jnp.bfloat16)

    def conv_w_s1(w):
        cout, cin, kh, kw = w.shape
        return jnp.transpose(w, (2, 3, 1, 0)).reshape(kh * kw * cin, cout).astype(jnp.bfloat16)

    def bias(b):
        return b.astype(jnp.float32).reshape(1, -1)

    q = {}
    q["w1"], q["b1"] = conv_w_s2d(p["w1"], 4), bias(p["b1"])
    q["w2"], q["b2"] = conv_w_s2d(p["w2"], 2), bias(p["b2"])
    q["w3"], q["b3"] = conv_w_s1(p["w3"]), bias(p["b3"])
    # fc1 rows are in the torch NCHW-flatten order (c*49 + h*7 + w); our features are
    # flattened (h, w, c), so permute the rows once.
    wfc1 = p["wfc1"].reshape(64, 7, 7, 512).transpose(1, 2, 0, 3).reshape(7 * 7 * 64, 512)
    q["wfc1"], q["bfc1"] = wfc1.astype(jnp.bfloat16), bias(p["bfc1"])
    q["wfc2"], q["bfc2"] = p["wfc2"].astype(jnp.bfloat16), bias(p["bfc2"])
    return q


# ----------------------------------------------------------------------------
# Forward pass (semantics of the PyTorch DQN.forward).
# ----------------------------------------------------------------------------
def dqn_forward(qp, x_nchw):
    """x_nchw: (B, 4, 84, 84) f32 -> (B, num_actions) f32."""
    bsz = x_nchw.shape[0]
    # conv1 (8x8 s4) as a 2x2 s1 conv over the 4x4 space-to-depth input.
    x = _input_space_to_depth(x_nchw.astype(jnp.bfloat16), block=4)          # (B, 441, 64)
    y = conv_s1_relu(x, qp["w1"], qp["b1"], grid_w=21, k=2)                  # (B, 419, 32) valid 20x20
    # conv2 (4x4 s2) as a 2x2 s1 conv over the 2x2 space-to-depth of conv1's output.
    y = _grid_space_to_depth(y, grid_w=21, valid_h=20, valid_w=20, block=2)  # (B, 100, 128)
    y = conv_s1_relu(y, qp["w2"], qp["b2"], grid_w=10, k=2)                  # (B, 89, 64)  valid 9x9
    # conv3 (3x3 s1) consumes conv2's slab directly (same grid width, no glue).
    y = conv_s1_relu(y, qp["w3"], qp["b3"], grid_w=10, k=3)                  # (B, 67, 64)  valid 7x7
    feat = _to_grid(y, grid_w=10, valid_h=7, valid_w=7).reshape(bsz, 7 * 7 * 64)
    return pallas_fc_head(feat, qp["wfc1"], qp["bfc1"], qp["wfc2"], qp["bfc2"])


def dqn_reference(p, x):
    """Pure-JAX f32 reference identical to the PyTorch module (validation only)."""
    dn = ("NCHW", "OIHW", "NCHW")
    y = jax.lax.conv_general_dilated(x, p["w1"], (4, 4), "VALID", dimension_numbers=dn)
    y = jax.nn.relu(y + p["b1"].reshape(1, -1, 1, 1))
    y = jax.lax.conv_general_dilated(y, p["w2"], (2, 2), "VALID", dimension_numbers=dn)
    y = jax.nn.relu(y + p["b2"].reshape(1, -1, 1, 1))
    y = jax.lax.conv_general_dilated(y, p["w3"], (1, 1), "VALID", dimension_numbers=dn)
    y = jax.nn.relu(y + p["b3"].reshape(1, -1, 1, 1))
    y = y.reshape(y.shape[0], -1)                                   # torch NCHW flatten
    y = jax.nn.relu(y @ p["wfc1"] + p["bfc1"])
    return y @ p["wfc2"] + p["bfc2"]


if __name__ == "__main__":
    key = jax.random.PRNGKey(0)
    k_params, k_x = jax.random.split(key)

    # fc1 expects 7*7*64 features => the standard 84x84 Atari input.
    batch, in_channels, num_actions = 2, 4, 4
    x = jax.random.normal(k_x, (batch, in_channels, 84, 84), dtype=jnp.float32)

    params = init_dqn_params(k_params, in_channels=in_channels, num_actions=num_actions)
    qparams = prep_params(params)

    out = jax.jit(dqn_forward)(qparams, x)
    out = jax.block_until_ready(out)

    assert out.shape == (batch, num_actions), out.shape
    assert out.dtype == jnp.float32, out.dtype

    # Validate against the f32 XLA reference (bf16 operands => loose tolerance).
    ref = jax.block_until_ready(dqn_reference(params, x))
    np.testing.assert_allclose(np.asarray(out), np.asarray(ref), rtol=0.1, atol=2e-2)

    print("KERNEL_OK")
</pallas_src>

<mosaic_0001>
module attributes {stable_mosaic.version = 11 : i64} {
  func.func @_conv_s1_relu_kernel(%arg0: i32, %arg1: memref<1x441x64xbf16, #tpu.memory_space<vmem>>, %arg2: memref<256x32xbf16, #tpu.memory_space<vmem>>, %arg3: memref<1x32xf32, #tpu.memory_space<vmem>>, %arg4: memref<1x419x32xbf16, #tpu.memory_space<vmem>>) attributes {dimension_semantics = [#tpu.dimension_semantics<parallel>], iteration_bounds = array<i64: 2>, scalar_prefetch = 0 : i64, scratch_operands = 0 : i64, tpu.core_type = #tpu.core_type<tc>, window_params = [{transform_indices = @transform_0, window_bounds = array<i64: 1, 441, 64>}, {pipeline_mode = #tpu.pipeline_mode<synchronous>, transform_indices = @transform_1, window_bounds = array<i64: 256, 32>}, {pipeline_mode = #tpu.pipeline_mode<synchronous>, transform_indices = @transform_2, window_bounds = array<i64: 1, 32>}, {transform_indices = @transform_3, window_bounds = array<i64: 1, 419, 32>}]} {
    %c0 = arith.constant 0 : index
    %c0_0 = arith.constant 0 : index
    %0 = vector.load %arg3[%c0, %c0_0] : memref<1x32xf32, #tpu.memory_space<vmem>>, vector<1x32xf32>
    %cst = arith.constant 0.000000e+00 : f32
    %1 = vector.broadcast %cst : f32 to vector<419x32xf32>
    %c0_1 = arith.constant 0 : index
    %c0_2 = arith.constant 0 : index
    %c0_3 = arith.constant 0 : index
    %2 = vector.load %arg1[%c0_1, %c0_2, %c0_3] : memref<1x441x64xbf16, #tpu.memory_space<vmem>>, vector<1x419x64xbf16>
    %3 = vector.shape_cast %2 : vector<1x419x64xbf16> to vector<419x64xbf16>
    %c0_4 = arith.constant 0 : index
    %c0_5 = arith.constant 0 : index
    %4 = vector.load %arg2[%c0_4, %c0_5] : memref<256x32xbf16, #tpu.memory_space<vmem>>, vector<64x32xbf16>
    %cst_6 = arith.constant dense<0.000000e+00> : vector<419x32xf32>
    %5 = tpu.matmul %3, %4, %cst_6 {dimension_numbers = #tpu.dot_dimension_numbers<[1], [0], [0], [1], [0, 0, 1, 1], [], []>} : vector<419x64xbf16>, vector<64x32xbf16>, vector<419x32xf32> -> vector<419x32xf32>
    %6 = arith.addf %1, %5 : vector<419x32xf32>
    %c0_7 = arith.constant 0 : index
    %c1 = arith.constant 1 : index
    %c0_8 = arith.constant 0 : index
    %7 = vector.load %arg1[%c0_7, %c1, %c0_8] : memref<1x441x64xbf16, #tpu.memory_space<vmem>>, vector<1x419x64xbf16>
    %8 = vector.shape_cast %7 : vector<1x419x64xbf16> to vector<419x64xbf16>
    %c64 = arith.constant 64 : index
    %c0_9 = arith.constant 0 : index
    %9 = vector.load %arg2[%c64, %c0_9] : memref<256x32xbf16, #tpu.memory_space<vmem>>, vector<64x32xbf16>
    %cst_10 = arith.constant dense<0.000000e+00> : vector<419x32xf32>
    %10 = tpu.matmul %8, %9, %cst_10 {dimension_numbers = #tpu.dot_dimension_numbers<[1], [0], [0], [1], [0, 0, 1, 1], [], []>} : vector<419x64xbf16>, vector<64x32xbf16>, vector<419x32xf32> -> vector<419x32xf32>
    %11 = arith.addf %6, %10 : vector<419x32xf32>
    %c0_11 = arith.constant 0 : index
    %c21 = arith.constant 21 : index
    %c0_12 = arith.constant 0 : index
    %12 = vector.load %arg1[%c0_11, %c21, %c0_12] : memref<1x441x64xbf16, #tpu.memory_space<vmem>>, vector<1x419x64xbf16>
    %13 = vector.shape_cast %12 : vector<1x419x64xbf16> to vector<419x64xbf16>
    %c128 = arith.constant 128 : index
    %c0_13 = arith.constant 0 : index
    %14 = vector.load %arg2[%c128, %c0_13] : memref<256x32xbf16, #tpu.memory_space<vmem>>, vector<64x32xbf16>
    %cst_14 = arith.constant dense<0.000000e+00> : vector<419x32xf32>
    %15 = tpu.matmul %13, %14, %cst_14 {dimension_numbers = #tpu.dot_dimension_numbers<[1], [0], [0], [1], [0, 0, 1, 1], [], []>} : vector<419x64xbf16>, vector<64x32xbf16>, vector<419x32xf32> -> vector<419x32xf32>
    %16 = arith.addf %11, %15 : vector<419x32xf32>
    %c0_15 = arith.constant 0 : index
    %c22 = arith.constant 22 : index
    %c0_16 = arith.constant 0 : index
    %17 = vector.load %arg1[%c0_15, %c22, %c0_16] : memref<1x441x64xbf16, #tpu.memory_space<vmem>>, vector<1x419x64xbf16>
    %18 = vector.shape_cast %17 : vector<1x419x64xbf16> to vector<419x64xbf16>
    %c192 = arith.constant 192 : index
    %c0_17 = arith.constant 0 : index
    %19 = vector.load %arg2[%c192, %c0_17] : memref<256x32xbf16, #tpu.memory_space<vmem>>, vector<64x32xbf16>
    %cst_18 = arith.constant dense<0.000000e+00> : vector<419x32xf32>
    %20 = tpu.matmul %18, %19, %cst_18 {dimension_numbers = #tpu.dot_dimension_numbers<[1], [0], [0], [1], [0, 0, 1, 1], [], []>} : vector<419x64xbf16>, vector<64x32xbf16>, vector<419x32xf32> -> vector<419x32xf32>
    %21 = arith.addf %16, %20 : vector<419x32xf32>
    %22 = vector.broadcast %0 : vector<1x32xf32> to vector<419x32xf32>
    %23 = arith.addf %21, %22 : vector<419x32xf32>
    %cst_19 = arith.constant 0.000000e+00 : f32
    %24 = vector.broadcast %cst_19 : f32 to vector<419x32xf32>
    %25 = arith.maximumf %23, %24 : vector<419x32xf32>
    %26 = arith.truncf %25 : vector<419x32xf32> to vector<419x32xbf16>
    %c0_20 = arith.constant 0 : index
    %c0_21 = arith.constant 0 : index
    %c0_22 = arith.constant 0 : index
    %27 = vector.load %arg4[%c0_20, %c0_21, %c0_22] : memref<1x419x32xbf16, #tpu.memory_space<vmem>>, vector<1x419x32xbf16>
    %28 = vector.shape_cast %27 : vector<1x419x32xbf16> to vector<419x32xbf16>
    %29 = vector.shape_cast %26 : vector<419x32xbf16> to vector<1x419x32xbf16>
    tpu.vector_store %arg4[%c0_20, %c0_21, %c0_22], %29 {strides = array<i32>} : memref<1x419x32xbf16, #tpu.memory_space<vmem>>, vector<1x419x32xbf16>,
    return
  }
  func.func @transform_0(%arg0: i32) -> (i32, i32, i32) {
    %c0_i32 = arith.constant 0 : i32
    %c0_i32_0 = arith.constant 0 : i32
    %c0_i32_1 = arith.constant 0 : i32
    return %arg0, %c0_i32, %c0_i32_0 : i32, i32, i32
  }
  func.func @transform_1(%arg0: i32) -> (i32, i32) {
    %c0_i32 = arith.constant 0 : i32
    %c0_i32_0 = arith.constant 0 : i32
    %c0_i32_1 = arith.constant 0 : i32
    return %c0_i32, %c0_i32_0 : i32, i32
  }
  func.func @transform_2(%arg0: i32) -> (i32, i32) {
    %c0_i32 = arith.constant 0 : i32
    %c0_i32_0 = arith.constant 0 : i32
    %c0_i32_1 = arith.constant 0 : i32
    return %c0_i32, %c0_i32_0 : i32, i32
  }
  func.func @transform_3(%arg0: i32) -> (i32, i32, i32) {
    %c0_i32 = arith.constant 0 : i32
    %c0_i32_0 = arith.constant 0 : i32
    %c0_i32_1 = arith.constant 0 : i32
    return %arg0, %c0_i32, %c0_i32_0 : i32, i32, i32
  }
}

module attributes {stable_mosaic.version = 11 : i64} {
  func.func @_conv_s1_relu_kernel(%arg0: i32, %arg1: memref<1x100x128xbf16, #tpu.memory_space<vmem>>, %arg2: memref<512x64xbf16, #tpu.memory_space<vmem>>, %arg3: memref<1x64xf32, #tpu.memory_space<vmem>>, %arg4: memref<1x89x64xbf16, #tpu.memory_space<vmem>>) attributes {dimension_semantics = [#tpu.dimension_semantics<parallel>], iteration_bounds = array<i64: 2>, scalar_prefetch = 0 : i64, scratch_operands = 0 : i64, tpu.core_type = #tpu.core_type<tc>, window_params = [{transform_indices = @transform_0, window_bounds = array<i64: 1, 100, 128>}, {pipeline_mode = #tpu.pipeline_mode<synchronous>, transform_indices = @transform_1, window_bounds = array<i64: 512, 64>}, {pipeline_mode = #tpu.pipeline_mode<synchronous>, transform_indices = @transform_2, window_bounds = array<i64: 1, 64>}, {transform_indices = @transform_3, window_bounds = array<i64: 1, 89, 64>}]} {
    %c0 = arith.constant 0 : index
    %c0_0 = arith.constant 0 : index
    %0 = vector.load %arg3[%c0, %c0_0] : memref<1x64xf32, #tpu.memory_space<vmem>>, vector<1x64xf32>
    %cst = arith.constant 0.000000e+00 : f32
    %1 = vector.broadcast %cst : f32 to vector<89x64xf32>
    %c0_1 = arith.constant 0 : index
    %c0_2 = arith.constant 0 : index
    %c0_3 = arith.constant 0 : index
    %2 = vector.load %arg1[%c0_1, %c0_2, %c0_3] : memref<1x100x128xbf16, #tpu.memory_space<vmem>>, vector<1x89x128xbf16>
    %3 = vector.shape_cast %2 : vector<1x89x128xbf16> to vector<89x128xbf16>
    %c0_4 = arith.constant 0 : index
    %c0_5 = arith.constant 0 : index
    %4 = vector.load %arg2[%c0_4, %c0_5] : memref<512x64xbf16, #tpu.memory_space<vmem>>, vector<128x64xbf16>
    %cst_6 = arith.constant dense<0.000000e+00> : vector<89x64xf32>
    %5 = tpu.matmul %3, %4, %cst_6 {dimension_numbers = #tpu.dot_dimension_numbers<[1], [0], [0], [1], [0, 0, 1, 1], [], []>} : vector<89x128xbf16>, vector<128x64xbf16>, vector<89x64xf32> -> vector<89x64xf32>
    %6 = arith.addf %1, %5 : vector<89x64xf32>
    %c0_7 = arith.constant 0 : index
    %c1 = arith.constant 1 : index
    %c0_8 = arith.constant 0 : index
    %7 = vector.load %arg1[%c0_7, %c1, %c0_8] : memref<1x100x128xbf16, #tpu.memory_space<vmem>>, vector<1x89x128xbf16>
    %8 = vector.shape_cast %7 : vector<1x89x128xbf16> to vector<89x128xbf16>
    %c128 = arith.constant 128 : index
    %c0_9 = arith.constant 0 : index
    %9 = vector.load %arg2[%c128, %c0_9] : memref<512x64xbf16, #tpu.memory_space<vmem>>, vector<128x64xbf16>
    %cst_10 = arith.constant dense<0.000000e+00> : vector<89x64xf32>
    %10 = tpu.matmul %8, %9, %cst_10 {dimension_numbers = #tpu.dot_dimension_numbers<[1], [0], [0], [1], [0, 0, 1, 1], [], []>} : vector<89x128xbf16>, vector<128x64xbf16>, vector<89x64xf32> -> vector<89x64xf32>
    %11 = arith.addf %6, %10 : vector<89x64xf32>
    %c0_11 = arith.constant 0 : index
    %c10 = arith.constant 10 : index
    %c0_12 = arith.constant 0 : index
    %12 = vector.load %arg1[%c0_11, %c10, %c0_12] : memref<1x100x128xbf16, #tpu.memory_space<vmem>>, vector<1x89x128xbf16>
    %13 = vector.shape_cast %12 : vector<1x89x128xbf16> to vector<89x128xbf16>
    %c256 = arith.constant 256 : index
    %c0_13 = arith.constant 0 : index
    %14 = vector.load %arg2[%c256, %c0_13] : memref<512x64xbf16, #tpu.memory_space<vmem>>, vector<128x64xbf16>
    %cst_14 = arith.constant dense<0.000000e+00> : vector<89x64xf32>
    %15 = tpu.matmul %13, %14, %cst_14 {dimension_numbers = #tpu.dot_dimension_numbers<[1], [0], [0], [1], [0, 0, 1, 1], [], []>} : vector<89x128xbf16>, vector<128x64xbf16>, vector<89x64xf32> -> vector<89x64xf32>
    %16 = arith.addf %11, %15 : vector<89x64xf32>
    %c0_15 = arith.constant 0 : index
    %c11 = arith.constant 11 : index
    %c0_16 = arith.constant 0 : index
    %17 = vector.load %arg1[%c0_15, %c11, %c0_16] : memref<1x100x128xbf16, #tpu.memory_space<vmem>>, vector<1x89x128xbf16>
    %18 = vector.shape_cast %17 : vector<1x89x128xbf16> to vector<89x128xbf16>
    %c384 = arith.constant 384 : index
    %c0_17 = arith.constant 0 : index
    %19 = vector.load %arg2[%c384, %c0_17] : memref<512x64xbf16, #tpu.memory_space<vmem>>, vector<128x64xbf16>
    %cst_18 = arith.constant dense<0.000000e+00> : vector<89x64xf32>
    %20 = tpu.matmul %18, %19, %cst_18 {dimension_numbers = #tpu.dot_dimension_numbers<[1], [0], [0], [1], [0, 0, 1, 1], [], []>} : vector<89x128xbf16>, vector<128x64xbf16>, vector<89x64xf32> -> vector<89x64xf32>
    %21 = arith.addf %16, %20 : vector<89x64xf32>
    %22 = vector.broadcast %0 : vector<1x64xf32> to vector<89x64xf32>
    %23 = arith.addf %21, %22 : vector<89x64xf32>
    %cst_19 = arith.constant 0.000000e+00 : f32
    %24 = vector.broadcast %cst_19 : f32 to vector<89x64xf32>
    %25 = arith.maximumf %23, %24 : vector<89x64xf32>
    %26 = arith.truncf %25 : vector<89x64xf32> to vector<89x64xbf16>
    %c0_20 = arith.constant 0 : index
    %c0_21 = arith.constant 0 : index
    %c0_22 = arith.constant 0 : index
    %27 = vector.load %arg4[%c0_20, %c0_21, %c0_22] : memref<1x89x64xbf16, #tpu.memory_space<vmem>>, vector<1x89x64xbf16>
    %28 = vector.shape_cast %27 : vector<1x89x64xbf16> to vector<89x64xbf16>
    %29 = vector.shape_cast %26 : vector<89x64xbf16> to vector<1x89x64xbf16>
    tpu.vector_store %arg4[%c0_20, %c0_21, %c0_22], %29 {strides = array<i32>} : memref<1x89x64xbf16, #tpu.memory_space<vmem>>, vector<1x89x64xbf16>,
    return
  }
  func.func @transform_0(%arg0: i32) -> (i32, i32, i32) {
    %c0_i32 = arith.constant 0 : i32
    %c0_i32_0 = arith.constant 0 : i32
    %c0_i32_1 = arith.constant 0 : i32
    return %arg0, %c0_i32, %c0_i32_0 : i32, i32, i32
  }
  func.func @transform_1(%arg0: i32) -> (i32, i32) {
    %c0_i32 = arith.constant 0 : i32
    %c0_i32_0 = arith.constant 0 : i32
    %c0_i32_1 = arith.constant 0 : i32
    return %c0_i32, %c0_i32_0 : i32, i32
  }
  func.func @transform_2(%arg0: i32) -> (i32, i32) {
    %c0_i32 = arith.constant 0 : i32
    %c0_i32_0 = arith.constant 0 : i32
    %c0_i32_1 = arith.constant 0 : i32
    return %c0_i32, %c0_i32_0 : i32, i32
  }
  func.func @transform_3(%arg0: i32) -> (i32, i32, i32) {
    %c0_i32 = arith.constant 0 : i32
    %c0_i32_0 = arith.constant 0 : i32
    %c0_i32_1 = arith.constant 0 : i32
    return %arg0, %c0_i32, %c0_i32_0 : i32, i32, i32
  }
}

module attributes {stable_mosaic.version = 11 : i64} {
  func.func @_conv_s1_relu_kernel(%arg0: i32, %arg1: memref<1x89x64xbf16, #tpu.memory_space<vmem>>, %arg2: memref<576x64xbf16, #tpu.memory_space<vmem>>, %arg3: memref<1x64xf32, #tpu.memory_space<vmem>>, %arg4: memref<1x67x64xbf16, #tpu.memory_space<vmem>>) attributes {dimension_semantics = [#tpu.dimension_semantics<parallel>], iteration_bounds = array<i64: 2>, scalar_prefetch = 0 : i64, scratch_operands = 0 : i64, tpu.core_type = #tpu.core_type<tc>, window_params = [{transform_indices = @transform_0, window_bounds = array<i64: 1, 89, 64>}, {pipeline_mode = #tpu.pipeline_mode<synchronous>, transform_indices = @transform_1, window_bounds = array<i64: 576, 64>}, {pipeline_mode = #tpu.pipeline_mode<synchronous>, transform_indices = @transform_2, window_bounds = array<i64: 1, 64>}, {transform_indices = @transform_3, window_bounds = array<i64: 1, 67, 64>}]} {
    %c0 = arith.constant 0 : index
    %c0_0 = arith.constant 0 : index
    %0 = vector.load %arg3[%c0, %c0_0] : memref<1x64xf32, #tpu.memory_space<vmem>>, vector<1x64xf32>
    %cst = arith.constant 0.000000e+00 : f32
    %1 = vector.broadcast %cst : f32 to vector<67x64xf32>
    %c0_1 = arith.constant 0 : index
    %c0_2 = arith.constant 0 : index
    %c0_3 = arith.constant 0 : index
    %2 = vector.load %arg1[%c0_1, %c0_2, %c0_3] : memref<1x89x64xbf16, #tpu.memory_space<vmem>>, vector<1x67x64xbf16>
    %3 = vector.shape_cast %2 : vector<1x67x64xbf16> to vector<67x64xbf16>
    %c0_4 = arith.constant 0 : index
    %c0_5 = arith.constant 0 : index
    %4 = vector.load %arg2[%c0_4, %c0_5] : memref<576x64xbf16, #tpu.memory_space<vmem>>, vector<64x64xbf16>
    %cst_6 = arith.constant dense<0.000000e+00> : vector<67x64xf32>
    %5 = tpu.matmul %3, %4, %cst_6 {dimension_numbers = #tpu.dot_dimension_numbers<[1], [0], [0], [1], [0, 0, 1, 1], [], []>} : vector<67x64xbf16>, vector<64x64xbf16>, vector<67x64xf32> -> vector<67x64xf32>
    %6 = arith.addf %1, %5 : vector<67x64xf32>
    %c0_7 = arith.constant 0 : index
    %c1 = arith.constant 1 : index
    %c0_8 = arith.constant 0 : index
    %7 = vector.load %arg1[%c0_7, %c1, %c0_8] : memref<1x89x64xbf16, #tpu.memory_space<vmem>>, vector<1x67x64xbf16>
    %8 = vector.shape_cast %7 : vector<1x67x64xbf16> to vector<67x64xbf16>
    %c64 = arith.constant 64 : index
    %c0_9 = arith.constant 0 : index
    %9 = vector.load %arg2[%c64, %c0_9] : memref<576x64xbf16, #tpu.memory_space<vmem>>, vector<64x64xbf16>
    %cst_10 = arith.constant dense<0.000000e+00> : vector<67x64xf32>
    %10 = tpu.matmul %8, %9, %cst_10 {dimension_numbers = #tpu.dot_dimension_numbers<[1], [0], [0], [1], [0, 0, 1, 1], [], []>} : vector<67x64xbf16>, vector<64x64xbf16>, vector<67x64xf32> -> vector<67x64xf32>
    %11 = arith.addf %6, %10 : vector<67x64xf32>
    %c0_11 = arith.constant 0 : index
    %c2 = arith.constant 2 : index
    %c0_12 = arith.constant 0 : index
    %12 = vector.load %arg1[%c0_11, %c2, %c0_12] : memref<1x89x64xbf16, #tpu.memory_space<vmem>>, vector<1x67x64xbf16>
    %13 = vector.shape_cast %12 : vector<1x67x64xbf16> to vector<67x64xbf16>
    %c128 = arith.constant 128 : index
    %c0_13 = arith.constant 0 : index
    %14 = vector.load %arg2[%c128, %c0_13] : memref<576x64xbf16, #tpu.memory_space<vmem>>, vector<64x64xbf16>
    %cst_14 = arith.constant dense<0.000000e+00> : vector<67x64xf32>
    %15 = tpu.matmul %13, %14, %cst_14 {dimension_numbers = #tpu.dot_dimension_numbers<[1], [0], [0], [1], [0, 0, 1, 1], [], []>} : vector<67x64xbf16>, vector<64x64xbf16>, vector<67x64xf32> -> vector<67x64xf32>
    %16 = arith.addf %11, %15 : vector<67x64xf32>
    %c0_15 = arith.constant 0 : index
    %c10 = arith.constant 10 : index
    %c0_16 = arith.constant 0 : index
    %17 = vector.load %arg1[%c0_15, %c10, %c0_16] : memref<1x89x64xbf16, #tpu.memory_space<vmem>>, vector<1x67x64xbf16>
    %18 = vector.shape_cast %17 : vector<1x67x64xbf16> to vector<67x64xbf16>
    %c192 = arith.constant 192 : index
    %c0_17 = arith.constant 0 : index
    %19 = vector.load %arg2[%c192, %c0_17] : memref<576x64xbf16, #tpu.memory_space<vmem>>, vector<64x64xbf16>
    %cst_18 = arith.constant dense<0.000000e+00> : vector<67x64xf32>
    %20 = tpu.matmul %18, %19, %cst_18 {dimension_numbers = #tpu.dot_dimension_numbers<[1], [0], [0], [1], [0, 0, 1, 1], [], []>} : vector<67x64xbf16>, vector<64x64xbf16>, vector<67x64xf32> -> vector<67x64xf32>
    %21 = arith.addf %16, %20 : vector<67x64xf32>
    %c0_19 = arith.constant 0 : index
    %c11 = arith.constant 11 : index
    %c0_20 = arith.constant 0 : index
    %22 = vector.load %arg1[%c0_19, %c11, %c0_20] : memref<1x89x64xbf16, #tpu.memory_space<vmem>>, vector<1x67x64xbf16>
    %23 = vector.shape_cast %22 : vector<1x67x64xbf16> to vector<67x64xbf16>
    %c256 = arith.constant 256 : index
    %c0_21 = arith.constant 0 : index
    %24 = vector.load %arg2[%c256, %c0_21] : memref<576x64xbf16, #tpu.memory_space<vmem>>, vector<64x64xbf16>
    %cst_22 = arith.constant dense<0.000000e+00> : vector<67x64xf32>
    %25 = tpu.matmul %23, %24, %cst_22 {dimension_numbers = #tpu.dot_dimension_numbers<[1], [0], [0], [1], [0, 0, 1, 1], [], []>} : vector<67x64xbf16>, vector<64x64xbf16>, vector<67x64xf32> -> vector<67x64xf32>
    %26 = arith.addf %21, %25 : vector<67x64xf32>
    %c0_23 = arith.constant 0 : index
    %c12 = arith.constant 12 : index
    %c0_24 = arith.constant 0 : index
    %27 = vector.load %arg1[%c0_23, %c12, %c0_24] : memref<1x89x64xbf16, #tpu.memory_space<vmem>>, vector<1x67x64xbf16>
    %28 = vector.shape_cast %27 : vector<1x67x64xbf16> to vector<67x64xbf16>
    %c320 = arith.constant 320 : index
    %c0_25 = arith.constant 0 : index
    %29 = vector.load %arg2[%c320, %c0_25] : memref<576x64xbf16, #tpu.memory_space<vmem>>, vector<64x64xbf16>
    %cst_26 = arith.constant dense<0.000000e+00> : vector<67x64xf32>
    %30 = tpu.matmul %28, %29, %cst_26 {dimension_numbers = #tpu.dot_dimension_numbers<[1], [0], [0], [1], [0, 0, 1, 1], [], []>} : vector<67x64xbf16>, vector<64x64xbf16>, vector<67x64xf32> -> vector<67x64xf32>
    %31 = arith.addf %26, %30 : vector<67x64xf32>
    %c0_27 = arith.constant 0 : index
    %c20 = arith.constant 20 : index
    %c0_28 = arith.constant 0 : index
    %32 = vector.load %arg1[%c0_27, %c20, %c0_28] : memref<1x89x64xbf16, #tpu.memory_space<vmem>>, vector<1x67x64xbf16>
    %33 = vector.shape_cast %32 : vector<1x67x64xbf16> to vector<67x64xbf16>
    %c384 = arith.constant 384 : index
    %c0_29 = arith.constant 0 : index
    %34 = vector.load %arg2[%c384, %c0_29] : memref<576x64xbf16, #tpu.memory_space<vmem>>, vector<64x64xbf16>
    %cst_30 = arith.constant dense<0.000000e+00> : vector<67x64xf32>
    %35 = tpu.matmul %33, %34, %cst_30 {dimension_numbers = #tpu.dot_dimension_numbers<[1], [0], [0], [1], [0, 0, 1, 1], [], []>} : vector<67x64xbf16>, vector<64x64xbf16>, vector<67x64xf32> -> vector<67x64xf32>
    %36 = arith.addf %31, %35 : vector<67x64xf32>
    %c0_31 = arith.constant 0 : index
    %c21 = arith.constant 21 : index
    %c0_32 = arith.constant 0 : index
    %37 = vector.load %arg1[%c0_31, %c21, %c0_32] : memref<1x89x64xbf16, #tpu.memory_space<vmem>>, vector<1x67x64xbf16>
    %38 = vector.shape_cast %37 : vector<1x67x64xbf16> to vector<67x64xbf16>
    %c448 = arith.constant 448 : index
    %c0_33 = arith.constant 0 : index
    %39 = vector.load %arg2[%c448, %c0_33] : memref<576x64xbf16, #tpu.memory_space<vmem>>, vector<64x64xbf16>
    %cst_34 = arith.constant dense<0.000000e+00> : vector<67x64xf32>
    %40 = tpu.matmul %38, %39, %cst_34 {dimension_numbers = #tpu.dot_dimension_numbers<[1], [0], [0], [1], [0, 0, 1, 1], [], []>} : vector<67x64xbf16>, vector<64x64xbf16>, vector<67x64xf32> -> vector<67x64xf32>
    %41 = arith.addf %36, %40 : vector<67x64xf32>
    %c0_35 = arith.constant 0 : index
    %c22 = arith.constant 22 : index
    %c0_36 = arith.constant 0 : index
    %42 = vector.load %arg1[%c0_35, %c22, %c0_36] : memref<1x89x64xbf16, #tpu.memory_space<vmem>>, vector<1x67x64xbf16>
    %43 = vector.shape_cast %42 : vector<1x67x64xbf16> to vector<67x64xbf16>
    %c512 = arith.constant 512 : index
    %c0_37 = arith.constant 0 : index
    %44 = vector.load %arg2[%c512, %c0_37] : memref<576x64xbf16, #tpu.memory_space<vmem>>, vector<64x64xbf16>
    %cst_38 = arith.constant dense<0.000000e+00> : vector<67x64xf32>
    %45 = tpu.matmul %43, %44, %cst_38 {dimension_numbers = #tpu.dot_dimension_numbers<[1], [0], [0], [1], [0, 0, 1, 1], [], []>} : vector<67x64xbf16>, vector<64x64xbf16>, vector<67x64xf32> -> vector<67x64xf32>
    %46 = arith.addf %41, %45 : vector<67x64xf32>
    %47 = vector.broadcast %0 : vector<1x64xf32> to vector<67x64xf32>
    %48 = arith.addf %46, %47 : vector<67x64xf32>
    %cst_39 = arith.constant 0.000000e+00 : f32
    %49 = vector.broadcast %cst_39 : f32 to vector<67x64xf32>
    %50 = arith.maximumf %48, %49 : vector<67x64xf32>
    %51 = arith.truncf %50 : vector<67x64xf32> to vector<67x64xbf16>
    %c0_40 = arith.constant 0 : index
    %c0_41 = arith.constant 0 : index
    %c0_42 = arith.constant 0 : index
    %52 = vector.load %arg4[%c0_40, %c0_41, %c0_42] : memref<1x67x64xbf16, #tpu.memory_space<vmem>>, vector<1x67x64xbf16>
    %53 = vector.shape_cast %52 : vector<1x67x64xbf16> to vector<67x64xbf16>
    %54 = vector.shape_cast %51 : vector<67x64xbf16> to vector<1x67x64xbf16>
    tpu.vector_store %arg4[%c0_40, %c0_41, %c0_42], %54 {strides = array<i32>} : memref<1x67x64xbf16, #tpu.memory_space<vmem>>, vector<1x67x64xbf16>,
    return
  }
  func.func @transform_0(%arg0: i32) -> (i32, i32, i32) {
    %c0_i32 = arith.constant 0 : i32
    %c0_i32_0 = arith.constant 0 : i32
    %c0_i32_1 = arith.constant 0 : i32
    return %arg0, %c0_i32, %c0_i32_0 : i32, i32, i32
  }
  func.func @transform_1(%arg0: i32) -> (i32, i32) {
    %c0_i32 = arith.constant 0 : i32
    %c0_i32_0 = arith.constant 0 : i32
    %c0_i32_1 = arith.constant 0 : i32
    return %c0_i32, %c0_i32_0 : i32, i32
  }
  func.func @transform_2(%arg0: i32) -> (i32, i32) {
    %c0_i32 = arith.constant 0 : i32
    %c0_i32_0 = arith.constant 0 : i32
    %c0_i32_1 = arith.constant 0 : i32
    return %c0_i32, %c0_i32_0 : i32, i32
  }
  func.func @transform_3(%arg0: i32) -> (i32, i32, i32) {
    %c0_i32 = arith.constant 0 : i32
    %c0_i32_0 = arith.constant 0 : i32
    %c0_i32_1 = arith.constant 0 : i32
    return %arg0, %c0_i32, %c0_i32_0 : i32, i32, i32
  }
}

module attributes {stable_mosaic.version = 11 : i64} {
  func.func @_fc_head_kernel(%arg0: i32, %arg1: memref<2x3136xbf16, #tpu.memory_space<vmem>>, %arg2: memref<3136x512xbf16, #tpu.memory_space<vmem>>, %arg3: memref<1x512xf32, #tpu.memory_space<vmem>>, %arg4: memref<512x4xbf16, #tpu.memory_space<vmem>>, %arg5: memref<1x4xf32, #tpu.memory_space<vmem>>, %arg6: memref<2x4xf32, #tpu.memory_space<vmem>>) attributes {dimension_semantics = [#tpu.dimension_semantics<parallel>], iteration_bounds = array<i64: 1>, scalar_prefetch = 0 : i64, scratch_operands = 0 : i64, tpu.core_type = #tpu.core_type<tc>, window_params = [{transform_indices = @transform_0, window_bounds = array<i64: 2, 3136>}, {pipeline_mode = #tpu.pipeline_mode<synchronous>, transform_indices = @transform_1, window_bounds = array<i64: 3136, 512>}, {pipeline_mode = #tpu.pipeline_mode<synchronous>, transform_indices = @transform_2, window_bounds = array<i64: 1, 512>}, {pipeline_mode = #tpu.pipeline_mode<synchronous>, transform_indices = @transform_3, window_bounds = array<i64: 512, 4>}, {pipeline_mode = #tpu.pipeline_mode<synchronous>, transform_indices = @transform_4, window_bounds = array<i64: 1, 4>}, {transform_indices = @transform_5, window_bounds = array<i64: 2, 4>}]} {
    %c0 = arith.constant 0 : index
    %c0_0 = arith.constant 0 : index
    %0 = vector.load %arg1[%c0, %c0_0] : memref<2x3136xbf16, #tpu.memory_space<vmem>>, vector<2x3136xbf16>
    %c0_1 = arith.constant 0 : index
    %c0_2 = arith.constant 0 : index
    %1 = vector.load %arg2[%c0_1, %c0_2] : memref<3136x512xbf16, #tpu.memory_space<vmem>>, vector<3136x512xbf16>
    %cst = arith.constant dense<0.000000e+00> : vector<2x512xf32>
    %2 = tpu.matmul %0, %1, %cst {dimension_numbers = #tpu.dot_dimension_numbers<[1], [0], [0], [1], [0, 0, 1, 1], [], []>} : vector<2x3136xbf16>, vector<3136x512xbf16>, vector<2x512xf32> -> vector<2x512xf32>
    %c0_3 = arith.constant 0 : index
    %c0_4 = arith.constant 0 : index
    %3 = vector.load %arg3[%c0_3, %c0_4] : memref<1x512xf32, #tpu.memory_space<vmem>>, vector<1x512xf32>
    %4 = vector.broadcast %3 : vector<1x512xf32> to vector<2x512xf32>
    %5 = arith.addf %2, %4 : vector<2x512xf32>
    %cst_5 = arith.constant 0.000000e+00 : f32
    %6 = vector.broadcast %cst_5 : f32 to vector<2x512xf32>
    %7 = arith.maximumf %5, %6 : vector<2x512xf32>
    %8 = arith.truncf %7 : vector<2x512xf32> to vector<2x512xbf16>
    %c0_6 = arith.constant 0 : index
    %c0_7 = arith.constant 0 : index
    %9 = vector.load %arg4[%c0_6, %c0_7] : memref<512x4xbf16, #tpu.memory_space<vmem>>, vector<512x4xbf16>
    %cst_8 = arith.constant dense<0.000000e+00> : vector<2x4xf32>
    %10 = tpu.matmul %8, %9, %cst_8 {dimension_numbers = #tpu.dot_dimension_numbers<[1], [0], [0], [1], [0, 0, 1, 1], [], []>} : vector<2x512xbf16>, vector<512x4xbf16>, vector<2x4xf32> -> vector<2x4xf32>
    %c0_9 = arith.constant 0 : index
    %c0_10 = arith.constant 0 : index
    %11 = vector.load %arg5[%c0_9, %c0_10] : memref<1x4xf32, #tpu.memory_space<vmem>>, vector<1x4xf32>
    %12 = vector.broadcast %11 : vector<1x4xf32> to vector<2x4xf32>
    %13 = arith.addf %10, %12 : vector<2x4xf32>
    %c0_11 = arith.constant 0 : index
    %c0_12 = arith.constant 0 : index
    %14 = vector.load %arg6[%c0_11, %c0_12] : memref<2x4xf32, #tpu.memory_space<vmem>>, vector<2x4xf32>
    tpu.vector_store %arg6[%c0_11, %c0_12], %13 {strides = array<i32>} : memref<2x4xf32, #tpu.memory_space<vmem>>, vector<2x4xf32>,
    return
  }
  func.func @transform_0(%arg0: i32) -> (i32, i32) {
    %c0_i32 = arith.constant 0 : i32
    %c0_i32_0 = arith.constant 0 : i32
    return %arg0, %c0_i32 : i32, i32
  }
  func.func @transform_1(%arg0: i32) -> (i32, i32) {
    %c0_i32 = arith.constant 0 : i32
    %c0_i32_0 = arith.constant 0 : i32
    %c0_i32_1 = arith.constant 0 : i32
    return %c0_i32, %c0_i32_0 : i32, i32
  }
  func.func @transform_2(%arg0: i32) -> (i32, i32) {
    %c0_i32 = arith.constant 0 : i32
    %c0_i32_0 = arith.constant 0 : i32
    %c0_i32_1 = arith.constant 0 : i32
    return %c0_i32, %c0_i32_0 : i32, i32
  }
  func.func @transform_3(%arg0: i32) -> (i32, i32) {
    %c0_i32 = arith.constant 0 : i32
    %c0_i32_0 = arith.constant 0 : i32
    %c0_i32_1 = arith.constant 0 : i32
    return %c0_i32, %c0_i32_0 : i32, i32
  }
  func.func @transform_4(%arg0: i32) -> (i32, i32) {
    %c0_i32 = arith.constant 0 : i32
    %c0_i32_0 = arith.constant 0 : i32
    %c0_i32_1 = arith.constant 0 : i32
    return %c0_i32, %c0_i32_0 : i32, i32
  }
  func.func @transform_5(%arg0: i32) -> (i32, i32) {
    %c0_i32 = arith.constant 0 : i32
    %c0_i32_0 = arith.constant 0 : i32
    return %arg0, %c0_i32 : i32, i32
  }
}

</mosaic_0001>

<bundles_post_ra>
// kernel: dqn_forward.4
= control target key start
LH: loop header
LB: loop body
LE: loop exit
PB: predicated region body
PF: predicated region fallthrough
CT: control target
= control target key end

     0   :  { %s4259_s12 = smov 0   ;;  %s5155_s0 = inlined_call_operand.vmem [shape: bf16[2,441,64], index: 0, kind: input, shape index: {}]   ;;  %s5156_s1 = inlined_call_operand.vmem [shape: bf16[256,32], index: 1, kind: input, shape index: {}]   ;;  %s5157_s2 = inlined_call_operand.vmem [shape: f32[1,32], index: 2, kind: input, shape index: {}]   ;;  %s5158_s3 = inlined_call_operand.vmem [shape: bf16[2,419,32], index: 3, kind: output, shape index: {}]  }
   0x1 LB: > { %s3210_s13 = sadd.s32 4294967295, %s4235_s12   ;;  %p3214_p0 = scmp.ge.s32.totalorder %s4235_s12, 1  ;;  %s4235_s12 = sphi %s4259_s12, %s13_s12  }
   0x2   : > { %p137_p1 = scmp.lt.s32.totalorder %s4235_s12, 3 }
   0x4   : > { %p138_p2 = pnand %p3214_p0, %p137_p1 }
   0x6   : > { %141 = sbr.rel (%p138_p2) target bundleno = 678 (0x2a6), region = 32 }
   0xd   : > { %v4131_v0 = vld [vmem:[%s5156_s1 + $0x20] sm:$0xff]   ;;  %v5159_v1 = vmov 0.0   ;;  %v4133_v3 = vld [vmem:[%s5156_s1 + $0x28] sm:$0xff]   ;;  %vm4238_vm0 = vmmov 0   ;;  %p161_p3 = scmp.lt.s32.totalorder %s3210_s13, 1  ;;  %v4135_v5 = vld [vmem:[%s5156_s1 + $0x30] sm:$0xff]  }
   0xe   : > { %3655 = vmatprep.subr.bf16.mxu0 %v5159_v1  ;;  %3771 = vmatprep.subr.bf16.mxu1 %v5159_v1  ;;  %v4132_v2 = vld [vmem:[%s5156_s1] sm:$0xff]   ;;  %v4134_v4 = vld [vmem:[%s5156_s1 + $0x8] sm:$0xff]   ;;  %v4136_v6 = vld [vmem:[%s5156_s1 + $0x10] sm:$0xff]   ;;  %vm375_vm1 = vsmask.f32 7424  ;;  %vm615_vm2 = vcmask 523264  }
   0xf   : > { %3656 = vmatpush3.bf16.msra.mxu0 %v4131_v0  ;;  %3663 = vmatprep.mubr.msk.bf16.mxu0 %vm4238_vm0, %v5159_v1  ;;  %s5179_s13 = smov (!%p161_p3, %s3210_s13), 1  ;;  %v4137_v7 = vld [vmem:[%s5156_s1 + $0x38] sm:$0xff]   ;;  %v4141_v17 = vld [vmem:[%s5156_s1 + $0x40] sm:$0xff]   ;;  %v4149_v26 = vld [vmem:[%s5156_s1 + $0x48] sm:$0xff]   ;;  %vm2311_vm3 = vcmask 1044480   ;;  %vm3096_vm5 = vcmask 257024  }
  0x10   : > { %3772 = vmatpush3.bf16.msra.mxu1 %v4132_v2  ;;  %3657 = vmatprep.subr.bf16.mxu0 %v5159_v1  ;;  %s4119_s24 = smul.u32 224, %s5179_s13  ;;  %v4138_v8 = vld [vmem:[%s5156_s1 + $0x18] sm:$0xff]   ;;  %v4142_v18 = vld [vmem:[%s5156_s1 + $0x60] sm:$0xff]   ;;  %v4151_v27 = vld [vmem:[%s5156_s1 + $0x68] sm:$0xff]   ;;  %vm1465_vm4 = vsmask.f32 5376 }
  0x11   : > { %3773 = vmatprep.subr.bf16.mxu1 %v5159_v1  ;;  %3779 = vmatprep.mubr.msk.bf16.mxu1 %vm4238_vm0, %v5159_v1  ;;  %v4158_v37 = vld [vmem:[%s5156_s1 + $0x50] sm:$0xff]   ;;  %v4167_v51 = vld [vmem:[%s5156_s1 + $0x58] sm:$0xff]   ;;  %s4120_s27 = smul.u32 212, %s5179_s13  ;;  %vm3149_vm6 = vcmask 254976   ;;  %vm3150_vm7 = vsmask.f32 1280 }
  0x12   : > { %s4304_s4 = scalar_lea.vmem %s5155_s0, %s4119_s24  ;;  %v4159_v38 = vld [vmem:[%s5156_s1 + $0x70] sm:$0xff]   ;;  %v4168_v52 = vld [vmem:[%s5156_s1 + $0x78] sm:$0xff]   ;;  %vm3151_vm8 = vmand %vm3149_vm6, %vm3150_vm7 }
  0x13   : > { %3658 = vmatpush3.bf16.msra.mxu0 %v4133_v3  ;;  %v4139_v9 = vld [vmem:[%s4304_s4] sm:$0xff]   ;;  %v4140_v10 = vld [vmem:[%s4304_s4 + $0x8] sm:$0xff]   ;;  %v4143_v14 = vld [vmem:[%s4304_s4 + $0x10] sm:$0xff]   ;;  %s4941_s30 = scalar_lea.vmem %s5158_s3, %s4120_s27 }
  0x14   : > { %3774 = vmatpush3.bf16.msra.mxu1 %v4134_v4  ;;  %3659 = vmatprep.subr.bf16.mxu0 %v5159_v1  ;;  %v377_v11 = vshrl.u32 %v4139_v9, 16  ;;  %v379_v12 = vshll.u32 %v4139_v9, 16  ;;  %v384_v13 = vshll.u32 %v4140_v10, 16  ;;  %v388_v20 = vshrl.u32 %v4140_v10, 16  ;;  %v4144_v25 = vld [vmem:[%s4304_s4 + $0x18] sm:$0xff]   ;;  %v4145_v31 = vld [vmem:[%s4304_s4 + $0x20] sm:$0xff]  }
  0x15   : > { %3775 = vmatprep.subr.bf16.mxu1 %v5159_v1  ;;  %v392_v21 = vshll.u32 %v4143_v14, 16  ;;  %v396_v29 = vshrl.u32 %v4143_v14, 16  ;;  %v400_v30 = vshll.u32 %v4144_v25, 16  ;;  %v408_v34 = vshll.u32 %v4145_v31, 16  ;;  %v4146_v40 = vld [vmem:[%s4304_s4 + $0x28] sm:$0xff]   ;;  %v4147_v47 = vld [vmem:[%s4304_s4 + $0x30] sm:$0xff]  }
  0x16   : > { %v381_v15 = vrot.slane %v379_v12, 1  ;;  %v386_v16 = vrot.slane %v384_v13, 1  ;;  %v404_v36 = vshrl.u32 %v4144_v25, 16  ;;  %v412_v43 = vshrl.u32 %v4145_v31, 16  ;;  %v4148_v55 = vld [vmem:[%s4304_s4 + $0x38] sm:$0xff]   ;;  %v4150_v61 = vld [vmem:[%s4304_s4 + $0x40] sm:$0xff]  }
  0x17   : > { %3660 = vmatpush3.bf16.msra.mxu0 %v4135_v5  ;;  %v394_v24 = vrot.slane %v392_v21, 1  ;;  %v402_v33 = vrot.slane %v400_v30, 1  ;;  %v410_v39 = vrot.slane %v408_v34, 1  ;;  %v416_v44 = vshll.u32 %v4146_v40, 16  ;;  %v4152_v4 = vld [vmem:[%s4304_s4 + $0x48] sm:$0xff]   ;;  %v4157_v34 = vld [vmem:[%s4304_s4 + $0x70] sm:$0xff]  }
  0x18   : > { %3776 = vmatpush3.bf16.msra.mxu1 %v4136_v6  ;;  %3661 = vmatprep.subr.bf16.mxu0 %v5159_v1  ;;  %v382_v19 = vor.u32 %v381_v15, %v377_v11  ;;  %v390_v23 = vor.u32 %v388_v20, %v386_v16  ;;  %v420_v49 = vshrl.u32 %v4146_v40, 16  ;;  %v424_v50 = vshll.u32 %v4147_v47, 16 }
  0x19   : > { %3777 = vmatprep.subr.bf16.mxu1 %v5159_v1  ;;  %v398_v32 = vor.u32 %v396_v29, %v394_v24  ;;  %v406_v41 = vor.u32 %v404_v36, %v402_v33  ;;  %v414_v45 = vor.u32 %v412_v43, %v410_v39  ;;  %v418_v46 = vrot.slane %v416_v44, 1 }
  0x1a   : > { %v387_v22 = vsel %vm375_vm1, %v382_v19, %v386_v16  ;;  %v395_v28 = vsel %vm375_vm1, %v390_v23, %v394_v24  ;;  %v426_v54 = vrot.slane %v424_v50, 1  ;;  %v428_v57 = vshrl.u32 %v4147_v47, 16  ;;  %v4154_v16 = vld [vmem:[%s4304_s4 + $0x58] sm:$0xff]  }
  0x1b   : > { %3662 = vmatpush3.bf16.msra.mxu0 %v4137_v7  ;;  %v403_v35 = vsel %vm375_vm1, %v398_v32, %v402_v33  ;;  %v411_v42 = vsel %vm375_vm1, %v406_v41, %v410_v39  ;;  %v419_v48 = vsel %vm375_vm1, %v414_v45, %v418_v46  ;;  %v422_v53 = vor.u32 %v420_v49, %v418_v46  ;;  %v4161_v46 = vld [vmem:[%s4304_s4 + $0x80] sm:$0xff]  }
  0x1c   : > { %3778 = vmatpush3.bf16.msra.mxu1 %v4138_v8  ;;  %3887 = vmatprep.subr.bf16.mxu0 %v5159_v1  ;;  %v432_v58 = vshll.u32 %v4148_v55, 16  ;;  %v430_v59 = vor.u32 %v428_v57, %v426_v54  ;;  %v436_v63 = vshrl.u32 %v4148_v55, 16  ;;  %v440_v0 = vshll.u32 %v4150_v61, 16 }
  0x1d   : > { %4003 = vmatprep.subr.bf16.mxu1 %v5159_v1  ;;  %v427_v56 = vsel %vm375_vm1, %v422_v53, %v426_v54  ;;  %v444_v6 = vshrl.u32 %v4150_v61, 16  ;;  %v448_v7 = vshll.u32 %v4152_v4, 16  ;;  %v452_v12 = vshrl.u32 %v4152_v4, 16 }
  0x1e   : > { %3664 = vmatmul.mubr.msk.bf16.vlgmr.msra.gmra.mrb[0].mxu0 %vm615_vm2, %v387_v22  ;;  %v434_v60 = vrot.slane %v432_v58, 1  ;;  %v442_v3 = vrot.slane %v440_v0, 1  ;;  %v464_v19 = vshll.u32 %v4154_v16, 16  ;;  %v4155_v22 = vld [vmem:[%s4304_s4 + $0x60] sm:$0xff]   ;;  %v468_v24 = vshrl.u32 %v4154_v16, 16  ;;  %v4163_v58 = vld [vmem:[%s4304_s4 + $0x90] sm:$0xff]  }
  0x1f   : > { %3780 = vmatmul.mubr.msk.bf16.vlgmr.msra.gmra.mrb[0].mxu1 %vm615_vm2, %v4139_v9  ;;  %3888 = vmatpush3.bf16.msra.mxu0 %v4141_v17  ;;  %v450_v9 = vrot.slane %v448_v7, 1  ;;  %v476_v30 = vshrl.u32 %v4155_v22, 16  ;;  %v504_v49 = vshll.u32 %v4161_v46, 16  ;;  %v508_v54 = vshrl.u32 %v4161_v46, 16  ;;  %v4164_v0 = vld [vmem:[%s4304_s4 + $0x98] sm:$0xff]   ;;  %v4165_v7 = vld [vmem:[%s4304_s4 + $0xa0] sm:$0xff]  }
  0x20   : > { %4004 = vmatpush3.bf16.msra.mxu1 %v4142_v18  ;;  %3667 = vmatprep.mubr.msk.bf16.mxu0 %vm4238_vm0, %v5159_v1  ;;  %v435_v62 = vsel %vm375_vm1, %v430_v59, %v434_v60  ;;  %v438_v2 = vor.u32 %v436_v63, %v434_v60  ;;  %v446_v8 = vor.u32 %v444_v6, %v442_v3  ;;  %v466_v21 = vrot.slane %v464_v19, 1  ;;  %v4169_v19 = vld [vmem:[%s4304_s4 + $0xb0] sm:$0xff]  }
  0x21   : > { %3783 = vmatprep.mubr.msk.bf16.mxu1 %vm4238_vm0, %v5159_v1  ;;  %3889 = vmatprep.subr.bf16.mxu0 %v5159_v1 }
  0x22   : > { %4005 = vmatprep.subr.bf16.mxu1 %v5159_v1  ;;  %v443_v5 = vsel %vm375_vm1, %v438_v2, %v442_v3  ;;  %v451_v11 = vsel %vm375_vm1, %v446_v8, %v450_v9  ;;  %v524_v3 = vshrl.u32 %v4163_v58, 16 }
  0x23   : > { %3890 = vmatpush3.bf16.msra.mxu0 %v4149_v26  ;;  %v470_v26 = vor.u32 %v468_v24, %v466_v21 }
  0x24   : > { %4006 = vmatpush3.bf16.msra.mxu1 %v4151_v27  ;;  %3891 = vmatprep.subr.bf16.mxu0 %v5159_v1 }
  0x25   : > { %4007 = vmatprep.subr.bf16.mxu1 %v5159_v1 }
  0x26   : > { %3668 = vmatmul.mubr.msk.bf16.gmra.mrb[4].mxu0 %vm615_vm2, %v395_v28  ;;  %v4156_v28 = vld [vmem:[%s4304_s4 + $0x68] sm:$0xff]  }
  0x27   : > { %3784 = vmatmul.mubr.msk.bf16.gmra.mrb[4].mxu1 %vm615_vm2, %v4140_v10  ;;  %3671 = vmatprep.mubr.msk.bf16.mxu0 %vm4238_vm0, %v5159_v1  ;;  %v4153_v10 = vld [vmem:[%s4304_s4 + $0x50] sm:$0xff]   ;;  %v484_v36 = vshrl.u32 %v4156_v28, 16 }
  0x28   : > { %3787 = vmatprep.mubr.msk.bf16.mxu1 %vm4238_vm0, %v5159_v1  ;;  %3892 = vmatpush3.bf16.msra.mxu0 %v4158_v37  ;;  %v456_v13 = vshll.u32 %v4153_v10, 16  ;;  %v460_v18 = vshrl.u32 %v4153_v10, 16  ;;  %v488_v37 = vshll.u32 %v4157_v34, 16 }
  0x29   : > { %4008 = vmatpush3.bf16.msra.mxu1 %v4159_v38  ;;  %3893 = vmatprep.subr.bf16.mxu0 %v5159_v1 }
  0x2a   : > { %4009 = vmatprep.subr.bf16.mxu1 %v5159_v1  ;;  %v458_v15 = vrot.slane %v456_v13, 1  ;;  %v490_v39 = vrot.slane %v488_v37, 1  ;;  %v4166_v13 = vld [vmem:[%s4304_s4 + $0xa8] sm:$0xff]  }
  0x2b   : > { %v4172_v37 = vld [vmem:[%s4304_s4 + $0xc8] sm:$0xff]  }
  0x2c   : > { %3894 = vmatpush3.bf16.msra.mxu0 %v4167_v51  ;;  %v462_v20 = vor.u32 %v460_v18, %v458_v15  ;;  %v506_v51 = vrot.slane %v504_v49, 1  ;;  %v4174_v49 = vld [vmem:[%s4304_s4 + $0x8] sm:$0xfc]  }
  0x2d   : > { %4010 = vmatpush3.bf16.msra.mxu1 %v4168_v52  ;;  %v4162_v52 = vld [vmem:[%s4304_s4 + $0x88] sm:$0xff]  }
  0x2e   : > { %3672 = vmatmul.mubr.msk.bf16.gmra.mrb[8].mxu0 %vm615_vm2, %v403_v35  ;;  %v467_v23 = vsel %vm375_vm1, %v462_v20, %v466_v21  ;;  %v516_v60 = vshrl.u32 %v4162_v52, 16  ;;  %v548_v21 = vshrl.u32 %v4166_v13, 16 }
  0x2f   : > { %3788 = vmatmul.mubr.msk.bf16.gmra.mrb[8].mxu1 %vm615_vm2, %v4143_v14  ;;  %3675 = vmatprep.mubr.msk.bf16.mxu0 %vm4238_vm0, %v5159_v1  ;;  %v454_v14 = vor.u32 %v452_v12, %v450_v9  ;;  %v532_v9 = vshrl.u32 %v4164_v0, 16 }
  0x30   : > { %3791 = vmatprep.mubr.msk.bf16.mxu1 %vm4238_vm0, %v5159_v1 }
  0x31   : > { %v459_v17 = vsel %vm375_vm1, %v454_v14, %v458_v15  ;;  %v540_v15 = vshrl.u32 %v4165_v7, 16 }
  0x36   : > { %3676 = vmatmul.mubr.msk.bf16.gmra.mrb[12].mxu0 %vm615_vm2, %v411_v42  ;;  %v492_v42 = vshrl.u32 %v4157_v34, 16 }
  0x37   : > { %3792 = vmatmul.mubr.msk.bf16.gmra.mrb[12].mxu1 %vm615_vm2, %v4144_v25  ;;  %3679 = vmatprep.mubr.msk.bf16.mxu0 %vm4238_vm0, %v5159_v1  ;;  %v472_v25 = vshll.u32 %v4155_v22, 16 }
  0x38   : > { %3795 = vmatprep.mubr.msk.bf16.mxu1 %vm4238_vm0, %v5159_v1  ;;  %v494_v44 = vor.u32 %v492_v42, %v490_v39 }
  0x39   : > { %v474_v27 = vrot.slane %v472_v25, 1  ;;  %v4170_v25 = vld [vmem:[%s4304_s4 + $0xb8] sm:$0xff]  }
  0x3b   : > { %v475_v29 = vsel %vm375_vm1, %v470_v26, %v474_v27  ;;  %v478_v32 = vor.u32 %v476_v30, %v474_v27  ;;  %v556_v27 = vshrl.u32 %v4169_v19, 16 }
  0x3e   : > { %3680 = vmatmul.mubr.msk.bf16.gmra.mrb[16].mxu0 %vm615_vm2, %v419_v48 }
  0x3f   : > { %3796 = vmatmul.mubr.msk.bf16.gmra.mrb[16].mxu1 %vm615_vm2, %v4145_v31  ;;  %3683 = vmatprep.mubr.msk.bf16.mxu0 %vm4238_vm0, %v5159_v1  ;;  %v480_v31 = vshll.u32 %v4156_v28, 16 }
  0x40   : > { %3799 = vmatprep.mubr.msk.bf16.mxu1 %vm4238_vm0, %v5159_v1 }
  0x41   : > { %v482_v33 = vrot.slane %v480_v31, 1  ;;  %v4171_v31 = vld [vmem:[%s4304_s4 + $0xc0] sm:$0xff]  }
  0x43   : > { %v483_v35 = vsel %vm375_vm1, %v478_v32, %v482_v33  ;;  %v486_v38 = vor.u32 %v484_v36, %v482_v33  ;;  %v564_v33 = vshrl.u32 %v4170_v25, 16 }
  0x45   : > { %v491_v41 = vsel %vm375_vm1, %v486_v38, %v490_v39  ;;  %v572_v39 = vshrl.u32 %v4171_v31, 16 }
  0x46   : > { %3684 = vmatmul.mubr.msk.bf16.gmra.mrb[20].mxu0 %vm615_vm2, %v427_v56  ;;  %v510_v56 = vor.u32 %v508_v54, %v506_v51  ;;  %v1470_v54 = vshll.u32 %v4174_v49, 16 }
  0x47   : > { %3800 = vmatmul.mubr.msk.bf16.gmra.mrb[20].mxu1 %vm615_vm2, %v4146_v40  ;;  %3687 = vmatprep.mubr.msk.bf16.mxu0 %vm4238_vm0, %v5159_v1  ;;  %v4160_v40 = vld [vmem:[%s4304_s4 + $0x78] sm:$0xff]  }
  0x48   : > { %3803 = vmatprep.mubr.msk.bf16.mxu1 %vm4238_vm0, %v5159_v1  ;;  %v496_v43 = vshll.u32 %v4160_v40, 16  ;;  %v500_v48 = vshrl.u32 %v4160_v40, 16 }
  0x4a   : > { %v498_v45 = vrot.slane %v496_v43, 1  ;;  %v4173_v43 = vld [vmem:[%s4304_s4 + $0xd0] ss:$0 sps:$4 sm:$0x33]  }
  0x4c   : > { %v502_v50 = vor.u32 %v500_v48, %v498_v45 }
  0x4e   : > { %3688 = vmatmul.mubr.msk.bf16.gmra.mrb[24].mxu0 %vm615_vm2, %v435_v62  ;;  %v507_v53 = vsel %vm375_vm1, %v502_v50, %v506_v51  ;;  %v4175_v51 = vld [vmem:[%s4304_s4 + $0x10] sm:$0xff]  }
  0x4f   : > { %3804 = vmatmul.mubr.msk.bf16.gmra.mrb[24].mxu1 %vm615_vm2, %v4147_v47  ;;  %3691 = vmatprep.mubr.msk.bf16.mxu0 %vm4238_vm0, %v5159_v1  ;;  %v499_v47 = vsel %vm375_vm1, %v494_v44, %v498_v45  ;;  %v580_v45 = vshrl.u32 %v4172_v37, 16 }
  0x50   : > { %3807 = vmatprep.mubr.msk.bf16.mxu1 %vm4238_vm0, %v5159_v1 }
  0x56   : > { %3692 = vmatmul.mubr.msk.bf16.gmra.mrb[28].mxu0 %vm615_vm2, %v443_v5 }
  0x57   : > { %3808 = vmatmul.mubr.msk.bf16.gmra.mrb[28].mxu1 %vm615_vm2, %v4148_v55  ;;  %3695 = vmatprep.mubr.msk.bf16.mxu0 %vm4238_vm0, %v5159_v1  ;;  %v512_v55 = vshll.u32 %v4162_v52, 16 }
  0x58   : > { %3811 = vmatprep.mubr.msk.bf16.mxu1 %vm4238_vm0, %v5159_v1 }
  0x59   : > { %v514_v57 = vrot.slane %v512_v55, 1  ;;  %v1475_v55 = vshrl.u32 %v4175_v51, 16 }
  0x5b   : > { %v515_v59 = vsel %vm375_vm1, %v510_v56, %v514_v57  ;;  %v518_v62 = vor.u32 %v516_v60, %v514_v57  ;;  %v1478_v56 = vshll.u32 %v4175_v51, 16  ;;  %v4176_v60 = vld [vmem:[%s4304_s4 + $0x8] sm:$0xf8]  }
  0x5e   : > { %3696 = vmatmul.mubr.msk.bf16.gmra.mrb[32].mxu0 %vm615_vm2, %v451_v11 }
  0x5f   : > { %3812 = vmatmul.mubr.msk.bf16.gmra.mrb[32].mxu1 %vm615_vm2, %v4150_v61  ;;  %3699 = vmatprep.mubr.msk.bf16.mxu0 %vm4238_vm0, %v5159_v1  ;;  %v520_v61 = vshll.u32 %v4163_v58, 16 }
  0x60   : > { %3815 = vmatprep.mubr.msk.bf16.mxu1 %vm4238_vm0, %v5159_v1 }
  0x61   : > { %v522_v63 = vrot.slane %v520_v61, 1  ;;  %v4177_v61 = vld [vmem:[%s4304_s4 + $0x10] sm:$0xff]  }
  0x63   : > { %v523_v2 = vsel %vm375_vm1, %v518_v62, %v522_v63  ;;  %v526_v5 = vor.u32 %v524_v3, %v522_v63  ;;  %v1477_v62 = vrot.slane %v1475_v55, 2  ;;  %v1480_v63 = vrot.slane %v1478_v56, 3  ;;  %v4183_v55 = vld [vmem:[%s4304_s4 + $0x28] sm:$0xff]  }
  0x64   : > { %v2312_v3 = vrot.slane %v4176_v60, 3 }
  0x66   : > { %3700 = vmatmul.mubr.msk.bf16.gmra.mrb[36].mxu0 %vm615_vm2, %v459_v17 }
  0x67   : > { %3816 = vmatmul.mubr.msk.bf16.gmra.mrb[36].mxu1 %vm615_vm2, %v4152_v4  ;;  %3703 = vmatprep.mubr.msk.bf16.mxu0 %vm4238_vm0, %v5159_v1  ;;  %v528_v4 = vshll.u32 %v4164_v0, 16 }
  0x68   : > { %3819 = vmatprep.mubr.msk.bf16.mxu1 %vm4238_vm0, %v5159_v1 }
  0x69   : > { %v530_v6 = vrot.slane %v528_v4, 1  ;;  %v2313_v4 = vrot.slane %v4177_v61, 3  ;;  %v4184_v61 = vld [vmem:[%s4304_s4 + $0x30] sm:$0xff]  }
  0x6b   : > { %v531_v8 = vsel %vm375_vm1, %v526_v5, %v530_v6  ;;  %v534_v11 = vor.u32 %v532_v9, %v530_v6  ;;  %v1481_v5 = vor.u32 %v1480_v63, %v1477_v62 }
  0x6e   : > { %3704 = vmatmul.mubr.msk.bf16.gmra.mrb[40].mxu0 %vm615_vm2, %v467_v23 }
  0x6f   : > { %3820 = vmatmul.mubr.msk.bf16.gmra.mrb[40].mxu1 %vm615_vm2, %v4153_v10  ;;  %3707 = vmatprep.mubr.msk.bf16.mxu0 %vm4238_vm0, %v5159_v1  ;;  %v536_v10 = vshll.u32 %v4165_v7, 16 }
  0x70   : > { %3823 = vmatprep.mubr.msk.bf16.mxu1 %vm4238_vm0, %v5159_v1 }
  0x71   : > { %v538_v12 = vrot.slane %v536_v10, 1 }
  0x73   : > { %v539_v14 = vsel %vm375_vm1, %v534_v11, %v538_v12  ;;  %v542_v17 = vor.u32 %v540_v15, %v538_v12  ;;  %v4179_v15 = vld [vmem:[%s4304_s4 + $0x18] sm:$0xff]  }
  0x76   : > { %3708 = vmatmul.mubr.msk.bf16.gmra.mrb[44].mxu0 %vm615_vm2, %v475_v29 }
  0x77   : > { %3824 = vmatmul.mubr.msk.bf16.gmra.mrb[44].mxu1 %vm615_vm2, %v4154_v16  ;;  %3711 = vmatprep.mubr.msk.bf16.mxu0 %vm4238_vm0, %v5159_v1  ;;  %v544_v16 = vshll.u32 %v4166_v13, 16 }
  0x78   : > { %3827 = vmatprep.mubr.msk.bf16.mxu1 %vm4238_vm0, %v5159_v1 }
  0x79   : > { %v546_v18 = vrot.slane %v544_v16, 1 }
  0x7b   : > { %v547_v20 = vsel %vm375_vm1, %v542_v17, %v546_v18  ;;  %v550_v23 = vor.u32 %v548_v21, %v546_v18  ;;  %v4180_v21 = vld [vmem:[%s4304_s4 + $0x20] sm:$0xff]  }
  0x7e   : > { %3712 = vmatmul.mubr.msk.bf16.gmra.mrb[48].mxu0 %vm615_vm2, %v483_v35 }
  0x7f   : > { %3828 = vmatmul.mubr.msk.bf16.gmra.mrb[48].mxu1 %vm615_vm2, %v4155_v22  ;;  %3715 = vmatprep.mubr.msk.bf16.mxu0 %vm4238_vm0, %v5159_v1  ;;  %v552_v22 = vshll.u32 %v4169_v19, 16 }
  0x80   : > { %3831 = vmatprep.mubr.msk.bf16.mxu1 %vm4238_vm0, %v5159_v1 }
  0x81   : > { %v554_v24 = vrot.slane %v552_v22, 1 }
  0x83   : > { %v555_v26 = vsel %vm375_vm1, %v550_v23, %v554_v24  ;;  %v558_v29 = vor.u32 %v556_v27, %v554_v24  ;;  %v2315_v24 = vrot.slane %v4179_v15, 3  ;;  %v1496_v27 = vshll.u32 %v4180_v21, 16 }
  0x86   : > { %3716 = vmatmul.mubr.msk.bf16.gmra.mrb[52].mxu0 %vm615_vm2, %v491_v41 }
  0x87   : > { %3832 = vmatmul.mubr.msk.bf16.gmra.mrb[52].mxu1 %vm615_vm2, %v4156_v28  ;;  %3719 = vmatprep.mubr.msk.bf16.mxu0 %vm4238_vm0, %v5159_v1  ;;  %v560_v28 = vshll.u32 %v4170_v25, 16 }
  0x88   : > { %3835 = vmatprep.mubr.msk.bf16.mxu1 %vm4238_vm0, %v5159_v1 }
  0x89   : > { %v562_v30 = vrot.slane %v560_v28, 1 }
  0x8b   : > { %v563_v32 = vsel %vm375_vm1, %v558_v29, %v562_v30  ;;  %v566_v35 = vor.u32 %v564_v33, %v562_v30 }
  0x8e   : > { %3720 = vmatmul.mubr.msk.bf16.gmra.mrb[56].mxu0 %vm615_vm2, %v499_v47 }
  0x8f   : > { %3836 = vmatmul.mubr.msk.bf16.gmra.mrb[56].mxu1 %vm615_vm2, %v4157_v34  ;;  %3723 = vmatprep.mubr.msk.bf16.mxu0 %vm4238_vm0, %v5159_v1  ;;  %v568_v34 = vshll.u32 %v4171_v31, 16 }
  0x90   : > { %3839 = vmatprep.mubr.msk.bf16.mxu1 %vm4238_vm0, %v5159_v1 }
  0x91   : > { %v570_v36 = vrot.slane %v568_v34, 1  ;;  %v2316_v34 = vsel %vm2311_vm3, %v2313_v4, %v2315_v24 }
  0x93   : > { %v571_v38 = vsel %vm375_vm1, %v566_v35, %v570_v36  ;;  %v574_v41 = vor.u32 %v572_v39, %v570_v36  ;;  %v4181_v35 = vld [vmem:[%s4304_s4 + $0x20] sm:$0xff]  }
  0x96   : > { %3724 = vmatmul.mubr.msk.bf16.gmra.mrb[60].mxu0 %vm615_vm2, %v507_v53  ;;  %v1467_v53 = vshrl.u32 %v4174_v49, 16 }
  0x97   : > { %3840 = vmatmul.mubr.msk.bf16.gmra.mrb[60].mxu1 %vm615_vm2, %v4160_v40  ;;  %3727 = vmatprep.mubr.msk.bf16.mxu0 %vm4238_vm0, %v5159_v1  ;;  %v576_v40 = vshll.u32 %v4172_v37, 16 }
  0x98   : > { %3843 = vmatprep.mubr.msk.bf16.mxu1 %vm4238_vm0, %v5159_v1 }
  0x99   : > { %v578_v42 = vrot.slane %v576_v40, 1  ;;  %v1498_v40 = vrot.slane %v1496_v27, 3 }
  0x9b   : > { %v579_v44 = vsel %vm375_vm1, %v574_v41, %v578_v42  ;;  %v582_v47 = vor.u32 %v580_v45, %v578_v42  ;;  %v4182_v41 = vld [vmem:[%s4304_s4 + $0x28] sm:$0xff]  }
  0x9e   : > { %3728 = vmatmul.mubr.msk.bf16.gmra.mrb[64].mxu0 %vm615_vm2, %v515_v59  ;;  %v1472_v59 = vrot.slane %v1470_v54, 3 }
  0x9f   : > { %3844 = vmatmul.mubr.msk.bf16.gmra.mrb[64].mxu1 %vm615_vm2, %v4161_v46  ;;  %3731 = vmatprep.mubr.msk.bf16.mxu0 %vm4238_vm0, %v5159_v1  ;;  %v584_v46 = vshll.u32 %v4173_v43, 16 }
  0xa0   : > { %3847 = vmatprep.mubr.msk.bf16.mxu1 %vm4238_vm0, %v5159_v1 }
  0xa1   : > { %v586_v48 = vrot.slane %v584_v46, 1  ;;  %v1502_v46 = vshrl.u32 %v4182_v41, 16 }
  0xa3   : > { %v587_v50 = vsel %vm375_vm1, %v582_v47, %v586_v48  ;;  %v1505_v47 = vshll.u32 %v4182_v41, 16  ;;  %v4188_v41 = vld [vmem:[%s4304_s4 + $0x40] sm:$0xff]  }
  0xa5   : > { %v1507_v60 = vrot.slane %v1505_v47, 3  ;;  %v1529_v47 = vshrl.u32 %v4188_v41, 16 }
  0xa6   : > { %3732 = vmatmul.mubr.msk.bf16.gmra.mrb[68].mxu0 %vm615_vm2, %v523_v2 }
  0xa7   : > { %3848 = vmatmul.mubr.msk.bf16.gmra.mrb[68].mxu1 %vm615_vm2, %v4162_v52  ;;  %3735 = vmatprep.mubr.msk.bf16.mxu0 %vm4238_vm0, %v5159_v1  ;;  %v588_v52 = vshrl.u32 %v4173_v43, 16 }
  0xa8   : > { %3851 = vmatprep.mubr.msk.bf16.mxu1 %vm4238_vm0, %v5159_v1 }
  0xa9   : > { %v590_v57 = vor.u32 %v588_v52, %v586_v48 }
  0xae   : > { %3736 = vmatmul.mubr.msk.bf16.gmra.mrb[72].mxu0 %vm615_vm2, %v531_v8 }
  0xaf   : > { %3852 = vmatmul.mubr.msk.bf16.gmra.mrb[72].mxu1 %vm615_vm2, %v4163_v58  ;;  %3739 = vmatprep.mubr.msk.bf16.mxu0 %vm4238_vm0, %v5159_v1  ;;  %v1469_v58 = vrot.slane %v1467_v53, 2 }
  0xb0   : > { %3855 = vmatprep.mubr.msk.bf16.mxu1 %vm4238_vm0, %v5159_v1 }
  0xb1   : > { %v1473_v2 = vor.u32 %v1472_v59, %v1469_v58  ;;  %v1504_v59 = vrot.slane %v1502_v46, 2 }
  0xb3   : > { %v1482_v18 = vsel %vm1465_vm4, %v1473_v2, %v1481_v5  ;;  %v1508_v2 = vor.u32 %v1507_v60, %v1504_v59 }
  0xb6   : > { %3740 = vmatmul.mubr.msk.bf16.gmra.mrb[76].mxu0 %vm615_vm2, %v539_v14  ;;  %v2314_v14 = vsel %vm2311_vm3, %v2312_v3, %v2313_v4  ;;  %v1511_v3 = vshrl.u32 %v4184_v61, 16  ;;  %v1514_v4 = vshll.u32 %v4184_v61, 16  ;;  %v1531_v61 = vrot.slane %v1529_v47, 2 }
  0xb7   : > { %3856 = vmatmul.mubr.msk.bf16.gmra.mrb[76].mxu1 %vm615_vm2, %v4164_v0  ;;  %3743 = vmatprep.mubr.msk.bf16.mxu0 %vm4238_vm0, %v5159_v1  ;;  %v4178_v0 = vld [vmem:[%s4304_s4 + $0x18] sm:$0xff]  }
  0xb8   : > { %3859 = vmatprep.mubr.msk.bf16.mxu1 %vm4238_vm0, %v5159_v1  ;;  %v1484_v6 = vshrl.u32 %v4178_v0, 16 }
  0xbe   : > { %3744 = vmatmul.mubr.msk.bf16.gmra.mrb[80].mxu0 %vm615_vm2, %v547_v20 }
  0xbf   : > { %3860 = vmatmul.mubr.msk.bf16.gmra.mrb[80].mxu1 %vm615_vm2, %v4165_v7  ;;  %3747 = vmatprep.mubr.msk.bf16.mxu0 %vm4238_vm0, %v5159_v1  ;;  %v1487_v7 = vshll.u32 %v4178_v0, 16  ;;  %v2319_v0 = vrot.slane %v4183_v55, 3 }
  0xc0   : > { %3863 = vmatprep.mubr.msk.bf16.mxu1 %vm4238_vm0, %v5159_v1 }
  0xc1   : > { %v1489_v20 = vrot.slane %v1487_v7, 3 }
  0xc6   : > { %3748 = vmatmul.mubr.msk.bf16.gmra.mrb[84].mxu0 %vm615_vm2, %v555_v26  ;;  %v1493_v26 = vshrl.u32 %v4180_v21, 16 }
  0xc7   : > { %3864 = vmatmul.mubr.msk.bf16.gmra.mrb[84].mxu1 %vm615_vm2, %v4166_v13  ;;  %3751 = vmatprep.mubr.msk.bf16.mxu0 %vm4238_vm0, %v5159_v1 }
  0xc8   : > { %3867 = vmatprep.mubr.msk.bf16.mxu1 %vm4238_vm0, %v5159_v1  ;;  %v1495_v39 = vrot.slane %v1493_v26, 2 }
  0xca   : > { %v1499_v45 = vor.u32 %v1498_v40, %v1495_v39 }
  0xce   : > { %3752 = vmatmul.mubr.msk.bf16.gmra.mrb[88].mxu0 %vm615_vm2, %v563_v32 }
  0xcf   : > { %3868 = vmatmul.mubr.msk.bf16.gmra.mrb[88].mxu1 %vm615_vm2, %v4169_v19  ;;  %3755 = vmatprep.mubr.msk.bf16.mxu0 %vm4238_vm0, %v5159_v1  ;;  %v1486_v19 = vrot.slane %v1484_v6, 2 }
  0xd0   : > { %3871 = vmatprep.mubr.msk.bf16.mxu1 %vm4238_vm0, %v5159_v1 }
  0xd6   : > { %3756 = vmatmul.mubr.msk.bf16.gmra.mrb[92].mxu0 %vm615_vm2, %v571_v38 }
  0xd7   : > { %3872 = vmatmul.mubr.msk.bf16.gmra.mrb[92].mxu1 %vm615_vm2, %v4170_v25  ;;  %3759 = vmatprep.mubr.msk.bf16.mxu0 %vm4238_vm0, %v5159_v1  ;;  %v1490_v25 = vor.u32 %v1489_v20, %v1486_v19  ;;  %v4186_v19 = vld [vmem:[%s4304_s4 + $0x38] sm:$0xff]  }
  0xd8   : > { %3875 = vmatprep.mubr.msk.bf16.mxu1 %vm4238_vm0, %v5159_v1  ;;  %v1523_v26 = vshll.u32 %v4186_v19, 16 }
  0xd9   : > { %v1491_v38 = vsel %vm1465_vm4, %v1481_v5, %v1490_v25  ;;  %v1500_v58 = vsel %vm1465_vm4, %v1490_v25, %v1499_v45  ;;  %v1520_v25 = vshrl.u32 %v4186_v19, 16 }
  0xda   : > { %v1525_v40 = vrot.slane %v1523_v26, 3 }
  0xdb   : > { %v1522_v39 = vrot.slane %v1520_v25, 2  ;;  %v4192_v25 = vld [vmem:[%s4304_s4 + $0x50] sm:$0xff]  }
  0xdd   : > { %v1526_v46 = vor.u32 %v1525_v40, %v1522_v39 }
  0xde   : > { %3760 = vmatmul.mubr.msk.bf16.gmra.mrb[96].mxu0 %vm615_vm2, %v579_v44  ;;  %v2317_v44 = vrot.slane %v4181_v35, 3  ;;  %v4187_v35 = vld [vmem:[%s4304_s4 + $0x38] sm:$0xff]  }
  0xdf   : > { %3876 = vmatmul.mubr.msk.bf16.gmra.mrb[96].mxu1 %vm615_vm2, %v4171_v31  ;;  %3763 = vmatprep.mubr.msk.bf16.mxu0 %vm4238_vm0, %v5159_v1 }
  0xe0   : > { %3879 = vmatprep.mubr.msk.bf16.mxu1 %vm4238_vm0, %v5159_v1  ;;  %v2318_v54 = vsel %vm2311_vm3, %v2315_v24, %v2317_v44 }
  0xe6   : > { %3764 = vmatmul.mubr.msk.bf16.gmra.mrb[100].mxu0 %vm615_vm2, %v587_v50 }
  0xe7   : > { %3880 = vmatmul.mubr.msk.bf16.gmra.mrb[100].mxu1 %vm615_vm2, %v4172_v37  ;;  %3767 = vmatprep.mubr.msk.bf16.mxu0 %vm4238_vm0, %v5159_v1 }
  0xe8   : > { %3883 = vmatprep.mubr.msk.bf16.mxu1 %vm4238_vm0, %v5159_v1 }
  0xee   : > { %3768 = vmatmul.mubr.msk.bf16.gmra.mrb[104].mxu0 %vm615_vm2, %v590_v57 }
  0xef   : > { %3884 = vmatmul.mubr.msk.bf16.gmra.mrb[104].mxu1 %vm615_vm2, %v4173_v43  ;;  %3895 = vmatprep.mubr.msk.bf16.mxu0 %vm4238_vm0, %v5159_v1 }
  0xf0   : > { %4011 = vmatprep.mubr.msk.bf16.mxu1 %vm4238_vm0, %v5159_v1 }
  0xf1   : > { %v731_v9 = vpop.f32.mrb[0].mxu0 }
  0xf2   : > { %v1057_v8 = vpop.f32.mrb[0].mxu1  ;;  %v3665_v12 = vpop.f32.mrb[1].mxu0 }
  0xf3   : > { %v3781_v10 = vpop.f32.mrb[1].mxu1  ;;  %v4563_v11 = vadd.f32 %v1057_v8, %v731_v9  ;;  %v734_v16 = vpop.f32.mrb[2].mxu0  ;;  %v2320_v12 = vsel %vm2311_vm3, %v2317_v44, %v2319_v0 }
  0xf4   : > { %v1060_v13 = vpop.f32.mrb[2].mxu1  ;;  %v3666_v23 = vpop.f32.mrb[3].mxu0 }
  0xf5   : > { %v3782_v17 = vpop.f32.mrb[3].mxu1  ;;  %v4569_v22 = vadd.f32 %v1060_v13, %v734_v16  ;;  %v4185_v13 = vld [vmem:[%s4304_s4 + $0x30] sm:$0xff]   ;;  %v1509_v16 = vsel %vm1465_vm4, %v1499_v45, %v1508_v2  ;;  %v2323_v45 = vrot.slane %v4187_v35, 3 }
  0xf6   : > { %3896 = vmatmul.mubr.msk.bf16.vlgmr.msra.gmra.mrb[108].mxu0 %vm615_vm2, %v1482_v18  ;;  %v1513_v17 = vrot.slane %v1511_v3, 2  ;;  %v1516_v18 = vrot.slane %v1514_v4, 3  ;;  %v2321_v23 = vrot.slane %v4185_v13, 3 }
  0xf7   : > { %4012 = vmatmul.mubr.msk.bf16.vlgmr.msra.gmra.mrb[108].mxu1 %vm615_vm2, %v2314_v14  ;;  %3899 = vmatprep.mubr.msk.bf16.mxu0 %vm4238_vm0, %v5159_v1 }
  0xf8   : > { %4015 = vmatprep.mubr.msk.bf16.mxu1 %vm4238_vm0, %v5159_v1  ;;  %v1517_v24 = vor.u32 %v1516_v18, %v1513_v17  ;;  %v4191_v17 = vld [vmem:[%s4304_s4 + $0x48] sm:$0xff]  }
  0xf9   : > { %v739_v29 = vpop.f32.mrb[4].mxu0 }
  0xfa   : > { %v1065_v28 = vpop.f32.mrb[4].mxu1  ;;  %v3669_v32 = vpop.f32.mrb[5].mxu0  ;;  %v1527_v60 = vsel %vm1465_vm4, %v1517_v24, %v1526_v46 }
  0xfb   : > { %v3785_v30 = vpop.f32.mrb[5].mxu1  ;;  %v4577_v31 = vadd.f32 %v1065_v28, %v739_v29  ;;  %v742_v36 = vpop.f32.mrb[6].mxu0 }
  0xfc   : > { %v1068_v33 = vpop.f32.mrb[6].mxu1  ;;  %v3670_v43 = vpop.f32.mrb[7].mxu0 }
  0xfd   : > { %v3786_v37 = vpop.f32.mrb[7].mxu1  ;;  %v4583_v42 = vadd.f32 %v1068_v33, %v742_v36 }
  0xfe   : > { %3900 = vmatmul.mubr.msk.bf16.gmra.mrb[112].mxu0 %vm615_vm2, %v1491_v38  ;;  %v1518_v38 = vsel %vm1465_vm4, %v1508_v2, %v1517_v24 }
  0xff   : > { %4016 = vmatmul.mubr.msk.bf16.gmra.mrb[112].mxu1 %vm615_vm2, %v2316_v34  ;;  %3903 = vmatprep.mubr.msk.bf16.mxu0 %vm4238_vm0, %v5159_v1  ;;  %v2322_v34 = vsel %vm2311_vm3, %v2319_v0, %v2321_v23  ;;  %v4190_v0 = vld [vmem:[%s4304_s4 + $0x48] sm:$0xff]  }
 0x100   : > { %4019 = vmatprep.mubr.msk.bf16.mxu1 %vm4238_vm0, %v5159_v1 }
 0x101   : > { %v747_v49 = vpop.f32.mrb[8].mxu0 }
 0x102   : > { %v1073_v48 = vpop.f32.mrb[8].mxu1  ;;  %v3673_v52 = vpop.f32.mrb[9].mxu0 }
 0x103   : > { %v3789_v50 = vpop.f32.mrb[9].mxu1  ;;  %v4591_v51 = vadd.f32 %v1073_v48, %v747_v49  ;;  %v750_v56 = vpop.f32.mrb[10].mxu0  ;;  %v1532_v48 = vshll.u32 %v4188_v41, 16  ;;  %v4193_v41 = vld [vmem:[%s4304_s4 + $0x50] sm:$0xff]  }
 0x104   : > { %v1076_v53 = vpop.f32.mrb[10].mxu1  ;;  %v3674_v63 = vpop.f32.mrb[11].mxu0 }
 0x105   : > { %v3790_v57 = vpop.f32.mrb[11].mxu1  ;;  %v4597_v62 = vadd.f32 %v1076_v53, %v750_v56  ;;  %v2324_v56 = vsel %vm2311_vm3, %v2321_v23, %v2323_v45  ;;  %v1534_v63 = vrot.slane %v1532_v48, 3 }
 0x106   : > { %3904 = vmatmul.mubr.msk.bf16.gmra.mrb[116].mxu0 %vm615_vm2, %v1500_v58  ;;  %v4189_v57 = vld [vmem:[%s4304_s4 + $0x40] sm:$0xff]  }
 0x107   : > { %4020 = vmatmul.mubr.msk.bf16.gmra.mrb[116].mxu1 %vm615_vm2, %v2318_v54  ;;  %3907 = vmatprep.mubr.msk.bf16.mxu0 %vm4238_vm0, %v5159_v1  ;;  %v2325_v4 = vrot.slane %v4189_v57, 3 }
 0x108   : > { %4023 = vmatprep.mubr.msk.bf16.mxu1 %vm4238_vm0, %v5159_v1 }
 0x109   : > { %v755_v6 = vpop.f32.mrb[12].mxu0 }
 0x10a   : > { %v1081_v5 = vpop.f32.mrb[12].mxu1  ;;  %v3677_v9 = vpop.f32.mrb[13].mxu0 }
 0x10b   : > { %v3793_v7 = vpop.f32.mrb[13].mxu1  ;;  %v4605_v8 = vadd.f32 %v1081_v5, %v755_v6  ;;  %v758_v14 = vpop.f32.mrb[14].mxu0  ;;  %v1535_v5 = vor.u32 %v1534_v63, %v1531_v61  ;;  %v1538_v6 = vshrl.u32 %v4190_v0, 16 }
 0x10c   : > { %v1084_v10 = vpop.f32.mrb[14].mxu1  ;;  %v3678_v21 = vpop.f32.mrb[15].mxu0  ;;  %v1541_v7 = vshll.u32 %v4190_v0, 16 }
 0x10d   : > { %v3794_v15 = vpop.f32.mrb[15].mxu1  ;;  %v4611_v20 = vadd.f32 %v1084_v10, %v758_v14  ;;  %v1536_v21 = vsel %vm1465_vm4, %v1526_v46, %v1535_v5  ;;  %v1540_v23 = vrot.slane %v1538_v6, 2 }
 0x10e   : > { %3908 = vmatmul.mubr.msk.bf16.gmra.mrb[120].mxu0 %vm615_vm2, %v1509_v16  ;;  %v2326_v16 = vsel %vm2311_vm3, %v2323_v45, %v2325_v4  ;;  %v1543_v24 = vrot.slane %v1541_v7, 3 }
 0x10f   : > { %4024 = vmatmul.mubr.msk.bf16.gmra.mrb[120].mxu1 %vm615_vm2, %v2320_v12  ;;  %3911 = vmatprep.mubr.msk.bf16.mxu0 %vm4238_vm0, %v5159_v1 }
 0x110   : > { %4027 = vmatprep.mubr.msk.bf16.mxu1 %vm4238_vm0, %v5159_v1 }
 0x111   : > { %v763_v28 = vpop.f32.mrb[16].mxu0 }
 0x112   : > { %v1089_v27 = vpop.f32.mrb[16].mxu1  ;;  %v3681_v32 = vpop.f32.mrb[17].mxu0 }
 0x113   : > { %v3797_v29 = vpop.f32.mrb[17].mxu1  ;;  %v4619_v30 = vadd.f32 %v1089_v27, %v763_v28  ;;  %v766_v36 = vpop.f32.mrb[18].mxu0  ;;  %v2327_v28 = vrot.slane %v4191_v17, 3  ;;  %v1547_v32 = vshrl.u32 %v4192_v25, 16 }
 0x114   : > { %v1092_v33 = vpop.f32.mrb[18].mxu1  ;;  %v3682_v44 = vpop.f32.mrb[19].mxu0  ;;  %v1544_v29 = vor.u32 %v1543_v24, %v1540_v23 }
 0x115   : > { %v3798_v37 = vpop.f32.mrb[19].mxu1  ;;  %v4625_v43 = vadd.f32 %v1092_v33, %v766_v36  ;;  %v1550_v33 = vshll.u32 %v4192_v25, 16  ;;  %v2328_v40 = vsel %vm2311_vm3, %v2325_v4, %v2327_v28  ;;  %v1549_v47 = vrot.slane %v1547_v32, 2  ;;  %v4195_v4 = vld [vmem:[%s4304_s4 + $0x58] sm:$0xff]   ;;  %v4197_v32 = vld [vmem:[%s4304_s4 + $0x60] sm:$0xff]  }
 0x116   : > { %3912 = vmatmul.mubr.msk.bf16.gmra.mrb[124].mxu0 %vm615_vm2, %v1518_v38  ;;  %v1545_v46 = vsel %vm1465_vm4, %v1535_v5, %v1544_v29 }
 0x117   : > { %4028 = vmatmul.mubr.msk.bf16.gmra.mrb[124].mxu1 %vm615_vm2, %v2322_v34  ;;  %3915 = vmatprep.mubr.msk.bf16.mxu0 %vm4238_vm0, %v5159_v1  ;;  %v1552_v48 = vrot.slane %v1550_v33, 3 }
 0x118   : > { %4031 = vmatprep.mubr.msk.bf16.mxu1 %vm4238_vm0, %v5159_v1 }
 0x119   : > { %v771_v50 = vpop.f32.mrb[20].mxu0 }
 0x11a   : > { %v1097_v49 = vpop.f32.mrb[20].mxu1  ;;  %v3685_v54 = vpop.f32.mrb[21].mxu0 }
 0x11b   : > { %v3801_v52 = vpop.f32.mrb[21].mxu1  ;;  %v4633_v53 = vadd.f32 %v1097_v49, %v771_v50  ;;  %v774_v58 = vpop.f32.mrb[22].mxu0  ;;  %v4194_v49 = vld [vmem:[%s4304_s4 + $0x58] sm:$0xff]   ;;  %v2329_v54 = vrot.slane %v4193_v41, 3 }
 0x11c   : > { %v1100_v55 = vpop.f32.mrb[22].mxu1  ;;  %v3686_v3 = vpop.f32.mrb[23].mxu0  ;;  %v1559_v57 = vshll.u32 %v4194_v49, 16 }
 0x11d   : > { %v3802_v59 = vpop.f32.mrb[23].mxu1  ;;  %v4639_v2 = vadd.f32 %v1100_v55, %v774_v58  ;;  %v1553_v55 = vor.u32 %v1552_v48, %v1549_v47  ;;  %v2330_v3 = vsel %vm2311_vm3, %v2327_v28, %v2329_v54 }
 0x11e   : > { %3916 = vmatmul.mubr.msk.bf16.gmra.mrb[128].mxu0 %vm615_vm2, %v1527_v60 }
 0x11f   : > { %4032 = vmatmul.mubr.msk.bf16.gmra.mrb[128].mxu1 %vm615_vm2, %v2324_v56  ;;  %3919 = vmatprep.mubr.msk.bf16.mxu0 %vm4238_vm0, %v5159_v1  ;;  %v1556_v56 = vshrl.u32 %v4194_v49, 16  ;;  %v1554_v7 = vsel %vm1465_vm4, %v1544_v29, %v1553_v55 }
 0x120   : > { %4035 = vmatprep.mubr.msk.bf16.mxu1 %vm4238_vm0, %v5159_v1 }
 0x121   : > { %v779_v10 = vpop.f32.mrb[24].mxu0 }
 0x122   : > { %v1105_v9 = vpop.f32.mrb[24].mxu1  ;;  %v3689_v14 = vpop.f32.mrb[25].mxu0 }
 0x123   : > { %v3805_v12 = vpop.f32.mrb[25].mxu1  ;;  %v4647_v13 = vadd.f32 %v1105_v9, %v779_v10  ;;  %v782_v18 = vpop.f32.mrb[26].mxu0  ;;  %v1558_v9 = vrot.slane %v1556_v56, 2  ;;  %v1561_v10 = vrot.slane %v1559_v57, 3 }
 0x124   : > { %v1108_v15 = vpop.f32.mrb[26].mxu1  ;;  %v3690_v27 = vpop.f32.mrb[27].mxu0  ;;  %v4196_v12 = vld [vmem:[%s4304_s4 + $0x60] sm:$0xff]  }
 0x125   : > { %v3806_v19 = vpop.f32.mrb[27].mxu1  ;;  %v4653_v26 = vadd.f32 %v1108_v15, %v782_v18  ;;  %v1562_v17 = vor.u32 %v1561_v10, %v1558_v9  ;;  %v1565_v18 = vshrl.u32 %v4196_v12, 16 }
 0x126   : > { %3920 = vmatmul.mubr.msk.bf16.gmra.mrb[132].mxu0 %vm615_vm2, %v1536_v21  ;;  %v1568_v19 = vshll.u32 %v4196_v12, 16 }
 0x127   : > { %4036 = vmatmul.mubr.msk.bf16.gmra.mrb[132].mxu1 %vm615_vm2, %v2326_v16  ;;  %3923 = vmatprep.mubr.msk.bf16.mxu0 %vm4238_vm0, %v5159_v1  ;;  %v2331_v16 = vrot.slane %v4195_v4, 3  ;;  %v4200_v4 = vld [vmem:[%s4304_s4 + $0x70] sm:$0xff]  }
 0x128   : > { %4039 = vmatprep.mubr.msk.bf16.mxu1 %vm4238_vm0, %v5159_v1  ;;  %v1583_v10 = vshrl.u32 %v4200_v4, 16  ;;  %v1586_v12 = vshll.u32 %v4200_v4, 16 }
 0x129   : > { %v787_v35 = vpop.f32.mrb[28].mxu0  ;;  %v2332_v29 = vsel %vm2311_vm3, %v2329_v54, %v2331_v16 }
 0x12a   : > { %v1113_v34 = vpop.f32.mrb[28].mxu1  ;;  %v3693_v38 = vpop.f32.mrb[29].mxu0 }
 0x12b   : > { %v3809_v36 = vpop.f32.mrb[29].mxu1  ;;  %v4661_v37 = vadd.f32 %v1113_v34, %v787_v35  ;;  %v790_v44 = vpop.f32.mrb[30].mxu0  ;;  %v1563_v35 = vsel %vm1465_vm4, %v1553_v55, %v1562_v17  ;;  %v1570_v38 = vrot.slane %v1568_v19, 3 }
 0x12c   : > { %v1116_v39 = vpop.f32.mrb[30].mxu1  ;;  %v3694_v52 = vpop.f32.mrb[31].mxu0  ;;  %v1567_v36 = vrot.slane %v1565_v18, 2 }
 0x12d   : > { %v3810_v45 = vpop.f32.mrb[31].mxu1  ;;  %v4667_v50 = vadd.f32 %v1116_v39, %v790_v44  ;;  %v4198_v39 = vld [vmem:[%s4304_s4 + $0x68] sm:$0xff]   ;;  %v2333_v44 = vrot.slane %v4197_v32, 3  ;;  %v1585_v32 = vrot.slane %v1583_v10, 2 }
 0x12e   : > { %3924 = vmatmul.mubr.msk.bf16.gmra.mrb[136].mxu0 %vm615_vm2, %v1545_v46  ;;  %v1571_v45 = vor.u32 %v1570_v38, %v1567_v36  ;;  %v1574_v46 = vshrl.u32 %v4198_v39, 16  ;;  %v1577_v47 = vshll.u32 %v4198_v39, 16 }
 0x12f   : > { %4040 = vmatmul.mubr.msk.bf16.gmra.mrb[136].mxu1 %vm615_vm2, %v2328_v40  ;;  %3927 = vmatprep.mubr.msk.bf16.mxu0 %vm4238_vm0, %v5159_v1  ;;  %v2334_v57 = vsel %vm2311_vm3, %v2331_v16, %v2333_v44 }
 0x130   : > { %4043 = vmatprep.mubr.msk.bf16.mxu1 %vm4238_vm0, %v5159_v1 }
 0x131   : > { %v795_v59 = vpop.f32.mrb[32].mxu0 }
 0x132   : > { %v1121_v58 = vpop.f32.mrb[32].mxu1  ;;  %v3697_v63 = vpop.f32.mrb[33].mxu0 }
 0x133   : > { %v3813_v60 = vpop.f32.mrb[33].mxu1  ;;  %v4675_v61 = vadd.f32 %v1121_v58, %v795_v59  ;;  %v798_v5 = vpop.f32.mrb[34].mxu0  ;;  %v4199_v58 = vld [vmem:[%s4304_s4 + $0x68] sm:$0xff]   ;;  %v1572_v63 = vsel %vm1465_vm4, %v1562_v17, %v1571_v45 }
 0x134   : > { %v1124_v0 = vpop.f32.mrb[34].mxu1  ;;  %v3698_v15 = vpop.f32.mrb[35].mxu0 }
 0x135   : > { %v3814_v6 = vpop.f32.mrb[35].mxu1  ;;  %v4681_v14 = vadd.f32 %v1124_v0, %v798_v5  ;;  %v1576_v0 = vrot.slane %v1574_v46, 2 }
 0x136   : > { %3928 = vmatmul.mubr.msk.bf16.gmra.mrb[140].mxu0 %vm615_vm2, %v1554_v7  ;;  %v2335_v7 = vrot.slane %v4199_v58, 3 }
 0x137   : > { %4044 = vmatmul.mubr.msk.bf16.gmra.mrb[140].mxu1 %vm615_vm2, %v2330_v3  ;;  %3931 = vmatprep.mubr.msk.bf16.mxu0 %vm4238_vm0, %v5159_v1  ;;  %v1579_v3 = vrot.slane %v1577_v47, 3 }
 0x138   : > { %4047 = vmatprep.mubr.msk.bf16.mxu1 %vm4238_vm0, %v5159_v1 }
 0x139   : > { %v803_v23 = vpop.f32.mrb[36].mxu0  ;;  %v1580_v9 = vor.u32 %v1579_v3, %v1576_v0  ;;  %v4204_v0 = vld [vmem:[%s4304_s4 + $0x80] sm:$0xff]  }
 0x13a   : > { %v1129_v21 = vpop.f32.mrb[36].mxu1  ;;  %v3701_v27 = vpop.f32.mrb[37].mxu0  ;;  %v1604_v10 = vshll.u32 %v4204_v0, 16 }
 0x13b   : > { %v3817_v24 = vpop.f32.mrb[37].mxu1  ;;  %v4689_v25 = vadd.f32 %v1129_v21, %v803_v23  ;;  %v806_v33 = vpop.f32.mrb[38].mxu0  ;;  %v2336_v23 = vsel %vm2311_vm3, %v2333_v44, %v2335_v7 }
 0x13c   : > { %v1132_v28 = vpop.f32.mrb[38].mxu1  ;;  %v3702_v41 = vpop.f32.mrb[39].mxu0  ;;  %v4201_v24 = vld [vmem:[%s4304_s4 + $0x70] sm:$0xff]  }
 0x13d   : > { %v3818_v34 = vpop.f32.mrb[39].mxu1  ;;  %v4695_v40 = vadd.f32 %v1132_v28, %v806_v33  ;;  %v1588_v33 = vrot.slane %v1586_v12, 3  ;;  %v2337_v38 = vrot.slane %v4201_v24, 3  ;;  %v4205_v24 = vld [vmem:[%s4304_s4 + $0x80] sm:$0xff]  }
 0x13e   : > { %3932 = vmatmul.mubr.msk.bf16.gmra.mrb[144].mxu0 %vm615_vm2, %v1563_v35  ;;  %v4202_v34 = vld [vmem:[%s4304_s4 + $0x78] sm:$0xff]  }
 0x13f   : > { %4048 = vmatmul.mubr.msk.bf16.gmra.mrb[144].mxu1 %vm615_vm2, %v2332_v29  ;;  %3935 = vmatprep.mubr.msk.bf16.mxu0 %vm4238_vm0, %v5159_v1  ;;  %v1581_v29 = vsel %vm1465_vm4, %v1571_v45, %v1580_v9  ;;  %v1589_v39 = vor.u32 %v1588_v33, %v1585_v32  ;;  %v1592_v41 = vshrl.u32 %v4202_v34, 16  ;;  %v1595_v44 = vshll.u32 %v4202_v34, 16  ;;  %v4206_v34 = vld [vmem:[%s4304_s4 + $0x88] sm:$0xff]  }
 0x140   : > { %4051 = vmatprep.mubr.msk.bf16.mxu1 %vm4238_vm0, %v5159_v1  ;;  %v1606_v33 = vrot.slane %v1604_v10, 3 }
 0x141   : > { %v811_v49 = vpop.f32.mrb[40].mxu0 }
 0x142   : > { %v1137_v48 = vpop.f32.mrb[40].mxu1  ;;  %v3705_v55 = vpop.f32.mrb[41].mxu0 }
 0x143   : > { %v3821_v52 = vpop.f32.mrb[41].mxu1  ;;  %v4703_v54 = vadd.f32 %v1137_v48, %v811_v49  ;;  %v814_v59 = vpop.f32.mrb[42].mxu0  ;;  %v2338_v55 = vsel %vm2311_vm3, %v2335_v7, %v2337_v38 }
 0x144   : > { %v1140_v56 = vpop.f32.mrb[42].mxu1  ;;  %v3706_v6 = vpop.f32.mrb[43].mxu0 }
 0x145   : > { %v3822_v60 = vpop.f32.mrb[43].mxu1  ;;  %v4709_v5 = vadd.f32 %v1140_v56, %v814_v59  ;;  %v4203_v56 = vld [vmem:[%s4304_s4 + $0x78] sm:$0xff]   ;;  %v1590_v59 = vsel %vm1465_vm4, %v1580_v9, %v1589_v39  ;;  %v1601_v9 = vshrl.u32 %v4204_v0, 16 }
 0x146   : > { %3936 = vmatmul.mubr.msk.bf16.gmra.mrb[148].mxu0 %vm615_vm2, %v1572_v63  ;;  %v1594_v60 = vrot.slane %v1592_v41, 2  ;;  %v1597_v63 = vrot.slane %v1595_v44, 3  ;;  %v2339_v6 = vrot.slane %v4203_v56, 3 }
 0x147   : > { %4052 = vmatmul.mubr.msk.bf16.gmra.mrb[148].mxu1 %vm615_vm2, %v2334_v57  ;;  %3939 = vmatprep.mubr.msk.bf16.mxu0 %vm4238_vm0, %v5159_v1  ;;  %v1603_v32 = vrot.slane %v1601_v9, 2  ;;  %v4208_v9 = vld [vmem:[%s4304_s4 + $0x90] sm:$0xff]  }
 0x148   : > { %4055 = vmatprep.mubr.msk.bf16.mxu1 %vm4238_vm0, %v5159_v1  ;;  %v1598_v7 = vor.u32 %v1597_v63, %v1594_v60 }
 0x149   : > { %v819_v16 = vpop.f32.mrb[44].mxu0  ;;  %v1607_v44 = vor.u32 %v1606_v33, %v1603_v32  ;;  %v4209_v32 = vld [vmem:[%s4304_s4 + $0x90] sm:$0xff]  }
 0x14a   : > { %v1145_v15 = vpop.f32.mrb[44].mxu1  ;;  %v3709_v19 = vpop.f32.mrb[45].mxu0 }
 0x14b   : > { %v3825_v17 = vpop.f32.mrb[45].mxu1  ;;  %v4717_v18 = vadd.f32 %v1145_v15, %v819_v16  ;;  %v822_v27 = vpop.f32.mrb[46].mxu0  ;;  %v1608_v63 = vsel %vm1465_vm4, %v1598_v7, %v1607_v44 }
 0x14c   : > { %v1148_v21 = vpop.f32.mrb[46].mxu1  ;;  %v3710_v36 = vpop.f32.mrb[47].mxu0 }
 0x14d   : > { %v3826_v28 = vpop.f32.mrb[47].mxu1  ;;  %v4723_v35 = vadd.f32 %v1148_v21, %v822_v27 }
 0x14e   : > { %3940 = vmatmul.mubr.msk.bf16.gmra.mrb[152].mxu0 %vm615_vm2, %v1581_v29  ;;  %v1599_v29 = vsel %vm1465_vm4, %v1589_v39, %v1598_v7  ;;  %v1610_v39 = vshrl.u32 %v4206_v34, 16  ;;  %v1619_v7 = vshrl.u32 %v4208_v9, 16 }
 0x14f   : > { %4056 = vmatmul.mubr.msk.bf16.gmra.mrb[152].mxu1 %vm615_vm2, %v2336_v23  ;;  %3943 = vmatprep.mubr.msk.bf16.mxu0 %vm4238_vm0, %v5159_v1  ;;  %v2340_v23 = vsel %vm2311_vm3, %v2337_v38, %v2339_v6  ;;  %v2341_v38 = vrot.slane %v4205_v24, 3 }
 0x150   : > { %4059 = vmatprep.mubr.msk.bf16.mxu1 %vm4238_vm0, %v5159_v1  ;;  %v1612_v0 = vrot.slane %v1610_v39, 2  ;;  %v1621_v39 = vrot.slane %v1619_v7, 2 }
 0x151   : > { %v827_v46 = vpop.f32.mrb[48].mxu0 }
 0x152   : > { %v1153_v45 = vpop.f32.mrb[48].mxu1  ;;  %v3713_v49 = vpop.f32.mrb[49].mxu0 }
 0x153   : > { %v3829_v47 = vpop.f32.mrb[49].mxu1  ;;  %v4731_v48 = vadd.f32 %v1153_v45, %v827_v46  ;;  %v830_v57 = vpop.f32.mrb[50].mxu0  ;;  %v1613_v45 = vshll.u32 %v4206_v34, 16 }
 0x154   : > { %v1156_v52 = vpop.f32.mrb[50].mxu1  ;;  %v3714_v4 = vpop.f32.mrb[51].mxu0 }
 0x155   : > { %v3830_v58 = vpop.f32.mrb[51].mxu1  ;;  %v4737_v3 = vadd.f32 %v1156_v52, %v830_v57  ;;  %v2342_v57 = vsel %vm2311_vm3, %v2339_v6, %v2341_v38  ;;  %v1615_v4 = vrot.slane %v1613_v45, 3 }
 0x156   : > { %3944 = vmatmul.mubr.msk.bf16.gmra.mrb[156].mxu0 %vm615_vm2, %v1590_v59  ;;  %v4207_v58 = vld [vmem:[%s4304_s4 + $0x88] sm:$0xff]  }
 0x157   : > { %4060 = vmatmul.mubr.msk.bf16.gmra.mrb[156].mxu1 %vm615_vm2, %v2338_v55  ;;  %3947 = vmatprep.mubr.msk.bf16.mxu0 %vm4238_vm0, %v5159_v1  ;;  %v2343_v6 = vrot.slane %v4207_v58, 3 }
 0x158   : > { %4063 = vmatprep.mubr.msk.bf16.mxu1 %vm4238_vm0, %v5159_v1 }
 0x159   : > { %v835_v15 = vpop.f32.mrb[52].mxu0 }
 0x15a   : > { %v1161_v12 = vpop.f32.mrb[52].mxu1  ;;  %v3717_v19 = vpop.f32.mrb[53].mxu0 }
 0x15b   : > { %v3833_v16 = vpop.f32.mrb[53].mxu1  ;;  %v4745_v17 = vadd.f32 %v1161_v12, %v835_v15  ;;  %v838_v27 = vpop.f32.mrb[54].mxu0  ;;  %v1616_v15 = vor.u32 %v1615_v4, %v1612_v0 }
 0x15c   : > { %v1164_v21 = vpop.f32.mrb[54].mxu1  ;;  %v3718_v41 = vpop.f32.mrb[55].mxu0  ;;  %v1622_v16 = vshll.u32 %v4208_v9, 16  ;;  %v4211_v9 = vld [vmem:[%s4304_s4 + $0x98] sm:$0xff]  }
 0x15d   : > { %v3834_v28 = vpop.f32.mrb[55].mxu1  ;;  %v4751_v36 = vadd.f32 %v1164_v21, %v838_v27  ;;  %v1617_v41 = vsel %vm1465_vm4, %v1607_v44, %v1616_v15 }
 0x15e   : > { %3948 = vmatmul.mubr.msk.bf16.gmra.mrb[160].mxu0 %vm615_vm2, %v1599_v29  ;;  %v2344_v29 = vsel %vm2311_vm3, %v2341_v38, %v2343_v6  ;;  %v1624_v45 = vrot.slane %v1622_v16, 3  ;;  %v2345_v38 = vrot.slane %v4209_v32, 3 }
 0x15f   : > { %4064 = vmatmul.mubr.msk.bf16.gmra.mrb[160].mxu1 %vm615_vm2, %v2340_v23  ;;  %3951 = vmatprep.mubr.msk.bf16.mxu0 %vm4238_vm0, %v5159_v1 }
 0x160   : > { %4067 = vmatprep.mubr.msk.bf16.mxu1 %vm4238_vm0, %v5159_v1  ;;  %v2346_v4 = vsel %vm2311_vm3, %v2343_v6, %v2345_v38  ;;  %v2347_v6 = vrot.slane %v4211_v9, 3 }
 0x161   : > { %v843_v47 = vpop.f32.mrb[56].mxu0 }
 0x162   : > { %v1169_v46 = vpop.f32.mrb[56].mxu1  ;;  %v3721_v55 = vpop.f32.mrb[57].mxu0 }
 0x163   : > { %v3837_v49 = vpop.f32.mrb[57].mxu1  ;;  %v4759_v52 = vadd.f32 %v1169_v46, %v843_v47  ;;  %v846_v59 = vpop.f32.mrb[58].mxu0  ;;  %v4210_v46 = vld [vmem:[%s4304_s4 + $0x98] sm:$0xff]   ;;  %v1625_v55 = vor.u32 %v1624_v45, %v1621_v39 }
 0x164   : > { %v1172_v56 = vpop.f32.mrb[58].mxu1  ;;  %v3722_v12 = vpop.f32.mrb[59].mxu0  ;;  %v1628_v44 = vshrl.u32 %v4210_v46, 16 }
 0x165   : > { %v3838_v60 = vpop.f32.mrb[59].mxu1  ;;  %v4765_v10 = vadd.f32 %v1172_v56, %v846_v59  ;;  %v1631_v56 = vshll.u32 %v4210_v46, 16  ;;  %v1626_v16 = vsel %vm1465_vm4, %v1616_v15, %v1625_v55 }
 0x166   : > { %3952 = vmatmul.mubr.msk.bf16.gmra.mrb[164].mxu0 %vm615_vm2, %v1608_v63 }
 0x167   : > { %4068 = vmatmul.mubr.msk.bf16.gmra.mrb[164].mxu1 %vm615_vm2, %v2342_v57  ;;  %3955 = vmatprep.mubr.msk.bf16.mxu0 %vm4238_vm0, %v5159_v1 }
 0x168   : > { %4071 = vmatprep.mubr.msk.bf16.mxu1 %vm4238_vm0, %v5159_v1 }
 0x169   : > { %v851_v21 = vpop.f32.mrb[60].mxu0 }
 0x16a   : > { %v1177_v19 = vpop.f32.mrb[60].mxu1  ;;  %v3725_v27 = vpop.f32.mrb[61].mxu0 }
 0x16b   : > { %v3841_v23 = vpop.f32.mrb[61].mxu1  ;;  %v4773_v24 = vadd.f32 %v1177_v19, %v851_v21  ;;  %v854_v33 = vpop.f32.mrb[62].mxu0  ;;  %v1630_v19 = vrot.slane %v1628_v44, 2  ;;  %v1633_v21 = vrot.slane %v1631_v56, 3  ;;  %v4213_v44 = vld [vmem:[%s4304_s4 + $0xa0] sm:$0xff]  }
 0x16c   : > { %v1180_v28 = vpop.f32.mrb[62].mxu1  ;;  %v3726_v49 = vpop.f32.mrb[63].mxu0  ;;  %v4212_v23 = vld [vmem:[%s4304_s4 + $0xa0] sm:$0xff]  }
 0x16d   : > { %v3842_v34 = vpop.f32.mrb[63].mxu1  ;;  %v4779_v47 = vadd.f32 %v1180_v28, %v854_v33  ;;  %v1637_v15 = vshrl.u32 %v4212_v23, 16  ;;  %v1640_v32 = vshll.u32 %v4212_v23, 16  ;;  %v2348_v49 = vsel %vm2311_vm3, %v2345_v38, %v2347_v6 }
 0x16e   : > { %3956 = vmatmul.mubr.msk.bf16.gmra.mrb[168].mxu0 %vm615_vm2, %v1617_v41  ;;  %v2349_v38 = vrot.slane %v4213_v44, 3  ;;  %v4216_v44 = vld [vmem:[%s4304_s4 + $0xb0] sm:$0xff]  }
 0x16f   : > { %4072 = vmatmul.mubr.msk.bf16.gmra.mrb[168].mxu1 %vm615_vm2, %v2344_v29  ;;  %3959 = vmatprep.mubr.msk.bf16.mxu0 %vm4238_vm0, %v5159_v1  ;;  %v1634_v29 = vor.u32 %v1633_v21, %v1630_v19 }
 0x170   : > { %4075 = vmatprep.mubr.msk.bf16.mxu1 %vm4238_vm0, %v5159_v1 }
 0x171   : > { %v859_v58 = vpop.f32.mrb[64].mxu0 }
 0x172   : > { %v1185_v57 = vpop.f32.mrb[64].mxu1  ;;  %v3729_v63 = vpop.f32.mrb[65].mxu0 }
 0x173   : > { %v3845_v59 = vpop.f32.mrb[65].mxu1  ;;  %v4787_v60 = vadd.f32 %v1185_v57, %v859_v58  ;;  %v862_v12 = vpop.f32.mrb[66].mxu0  ;;  %v1635_v58 = vsel %vm1465_vm4, %v1625_v55, %v1634_v29  ;;  %v1642_v63 = vrot.slane %v1640_v32, 3  ;;  %v2350_v32 = vsel %vm2311_vm3, %v2347_v6, %v2349_v38 }
 0x174   : > { %v1188_v0 = vpop.f32.mrb[66].mxu1  ;;  %v3730_v28 = vpop.f32.mrb[67].mxu0  ;;  %v1639_v59 = vrot.slane %v1637_v15, 2 }
 0x175   : > { %v3846_v7 = vpop.f32.mrb[67].mxu1  ;;  %v4793_v27 = vadd.f32 %v1188_v0, %v862_v12  ;;  %v4214_v0 = vld [vmem:[%s4304_s4 + $0xa8] sm:$0xff]  }
 0x176   : > { %3960 = vmatmul.mubr.msk.bf16.gmra.mrb[172].mxu0 %vm615_vm2, %v1626_v16  ;;  %v1643_v12 = vor.u32 %v1642_v63, %v1639_v59  ;;  %v1646_v55 = vshrl.u32 %v4214_v0, 16  ;;  %v1649_v7 = vshll.u32 %v4214_v0, 16  ;;  %v1658_v59 = vshll.u32 %v4216_v44, 16 }
 0x177   : > { %4076 = vmatmul.mubr.msk.bf16.gmra.mrb[172].mxu1 %vm615_vm2, %v2346_v4  ;;  %3963 = vmatprep.mubr.msk.bf16.mxu0 %vm4238_vm0, %v5159_v1 }
 0x178   : > { %4079 = vmatprep.mubr.msk.bf16.mxu1 %vm4238_vm0, %v5159_v1 }
 0x179   : > { %v867_v34 = vpop.f32.mrb[68].mxu0 }
 0x17a   : > { %v1193_v33 = vpop.f32.mrb[68].mxu1  ;;  %v3733_v45 = vpop.f32.mrb[69].mxu0 }
 0x17b   : > { %v3849_v41 = vpop.f32.mrb[69].mxu1  ;;  %v4801_v39 = vadd.f32 %v1193_v33, %v867_v34  ;;  %v870_v56 = vpop.f32.mrb[70].mxu0  ;;  %v4215_v33 = vld [vmem:[%s4304_s4 + $0xa8] sm:$0xff]   ;;  %v1644_v45 = vsel %vm1465_vm4, %v1634_v29, %v1643_v12  ;;  %v1655_v29 = vshrl.u32 %v4216_v44, 16 }
 0x17c   : > { %v1196_v46 = vpop.f32.mrb[70].mxu1  ;;  %v3734_v9 = vpop.f32.mrb[71].mxu0  ;;  %v2351_v6 = vrot.slane %v4215_v33, 3 }
 0x17d   : > { %v3850_v57 = vpop.f32.mrb[71].mxu1  ;;  %v4807_v4 = vadd.f32 %v1196_v46, %v870_v56  ;;  %v1648_v46 = vrot.slane %v1646_v55, 2  ;;  %v1657_v33 = vrot.slane %v1655_v29, 2 }
 0x17e   : > { %3964 = vmatmul.mubr.msk.bf16.gmra.mrb[176].mxu0 %vm615_vm2, %v1635_v58 }
 0x17f   : > { %4080 = vmatmul.mubr.msk.bf16.gmra.mrb[176].mxu1 %vm615_vm2, %v2348_v49  ;;  %3967 = vmatprep.mubr.msk.bf16.mxu0 %vm4238_vm0, %v5159_v1  ;;  %v1651_v49 = vrot.slane %v1649_v7, 3 }
 0x180   : > { %4083 = vmatprep.mubr.msk.bf16.mxu1 %vm4238_vm0, %v5159_v1 }
 0x181   : > { %v875_v19 = vpop.f32.mrb[72].mxu0  ;;  %v1652_v58 = vor.u32 %v1651_v49, %v1648_v46 }
 0x182   : > { %v1201_v16 = vpop.f32.mrb[72].mxu1  ;;  %v3737_v28 = vpop.f32.mrb[73].mxu0 }
 0x183   : > { %v3853_v21 = vpop.f32.mrb[73].mxu1  ;;  %v4815_v23 = vadd.f32 %v1201_v16, %v875_v19  ;;  %v878_v34 = vpop.f32.mrb[74].mxu0  ;;  %v2352_v19 = vsel %vm2311_vm3, %v2349_v38, %v2351_v6 }
 0x184   : > { %v1204_v15 = vpop.f32.mrb[74].mxu1  ;;  %v3738_v57 = vpop.f32.mrb[75].mxu0  ;;  %v4217_v21 = vld [vmem:[%s4304_s4 + $0xb0] sm:$0xff]  }
 0x185   : > { %v3854_v41 = vpop.f32.mrb[75].mxu1  ;;  %v4821_v56 = vadd.f32 %v1204_v15, %v878_v34  ;;  %v1660_v34 = vrot.slane %v1658_v59, 3  ;;  %v2353_v38 = vrot.slane %v4217_v21, 3 }
 0x186   : > { %3968 = vmatmul.mubr.msk.bf16.gmra.mrb[180].mxu0 %vm615_vm2, %v1644_v45  ;;  %v4218_v41 = vld [vmem:[%s4304_s4 + $0xb8] sm:$0xff]  }
 0x187   : > { %4084 = vmatmul.mubr.msk.bf16.gmra.mrb[180].mxu1 %vm615_vm2, %v2350_v32  ;;  %3971 = vmatprep.mubr.msk.bf16.mxu0 %vm4238_vm0, %v5159_v1  ;;  %v1653_v32 = vsel %vm1465_vm4, %v1643_v12, %v1652_v58  ;;  %v1661_v49 = vor.u32 %v1660_v34, %v1657_v33  ;;  %v1664_v12 = vshrl.u32 %v4218_v41, 16  ;;  %v1667_v44 = vshll.u32 %v4218_v41, 16  ;;  %v4220_v33 = vld [vmem:[%s4304_s4 + $0xc0] sm:$0xff]  }
 0x188   : > { %4087 = vmatprep.mubr.msk.bf16.mxu1 %vm4238_vm0, %v5159_v1 }
 0x189   : > { %v883_v0 = vpop.f32.mrb[76].mxu0  ;;  %v1662_v21 = vsel %vm1465_vm4, %v1652_v58, %v1661_v49  ;;  %v1673_v58 = vshrl.u32 %v4220_v33, 16 }
 0x18a   : > { %v1209_v63 = vpop.f32.mrb[76].mxu1  ;;  %v3741_v7 = vpop.f32.mrb[77].mxu0 }
 0x18b   : > { %v3857_v9 = vpop.f32.mrb[77].mxu1  ;;  %v4829_v55 = vadd.f32 %v1209_v63, %v883_v0  ;;  %v886_v28 = vpop.f32.mrb[78].mxu0  ;;  %v2354_v7 = vsel %vm2311_vm3, %v2351_v6, %v2353_v38 }
 0x18c   : > { %v1212_v16 = vpop.f32.mrb[78].mxu1  ;;  %v3742_v46 = vpop.f32.mrb[79].mxu0 }
 0x18d   : > { %v3858_v15 = vpop.f32.mrb[79].mxu1  ;;  %v4835_v45 = vadd.f32 %v1212_v16, %v886_v28  ;;  %v4219_v16 = vld [vmem:[%s4304_s4 + $0xb8] sm:$0xff]  }
 0x18e   : > { %3972 = vmatmul.mubr.msk.bf16.gmra.mrb[184].mxu0 %vm615_vm2, %v1653_v32  ;;  %v1666_v15 = vrot.slane %v1664_v12, 2  ;;  %v1669_v32 = vrot.slane %v1667_v44, 3  ;;  %v2355_v6 = vrot.slane %v4219_v16, 3  ;;  %v1676_v12 = vshll.u32 %v4220_v33, 16 }
 0x18f   : > { %4088 = vmatmul.mubr.msk.bf16.gmra.mrb[184].mxu1 %vm615_vm2, %v2352_v19  ;;  %3975 = vmatprep.mubr.msk.bf16.mxu0 %vm4238_vm0, %v5159_v1 }
 0x190   : > { %4091 = vmatprep.mubr.msk.bf16.mxu1 %vm4238_vm0, %v5159_v1  ;;  %v1670_v46 = vor.u32 %v1669_v32, %v1666_v15  ;;  %v4222_v15 = vld [vmem:[%s4304_s4 + $0xc8] sm:$0xff]  }
 0x191   : > { %v891_v29 = vpop.f32.mrb[80].mxu0 }
 0x192   : > { %v1217_v57 = vpop.f32.mrb[80].mxu1  ;;  %v3745_v0 = vpop.f32.mrb[81].mxu0  ;;  %v1671_v16 = vsel %vm1465_vm4, %v1661_v49, %v1670_v46  ;;  %v1682_v49 = vshrl.u32 %v4222_v15, 16 }
 0x193   : > { %v3861_v59 = vpop.f32.mrb[81].mxu1  ;;  %v4843_v63 = vadd.f32 %v1217_v57, %v891_v29  ;;  %v894_v19 = vpop.f32.mrb[82].mxu0 }
 0x194   : > { %v1220_v9 = vpop.f32.mrb[82].mxu1  ;;  %v3746_v41 = vpop.f32.mrb[83].mxu0 }
 0x195   : > { %5161 = vst [vmem:[#allocation2_spill] sm:$0xff] %v4843_v63  ;;  %v3862_v28 = vpop.f32.mrb[83].mxu1  ;;  %v4849_v34 = vadd.f32 %v1220_v9, %v894_v19  ;;  %v4221_v19 = vld [vmem:[%s4304_s4 + $0xc0] sm:$0xff]   ;;  %v1675_v41 = vrot.slane %v1673_v58, 2  ;;  %v1685_v58 = vshll.u32 %v4222_v15, 16 }
 0x196   : > { %3976 = vmatmul.mubr.msk.bf16.gmra.mrb[188].mxu0 %vm615_vm2, %v1662_v21 }
 0x197   : > { %5162 = vst [vmem:[#allocation3_spill] sm:$0xff] %v4849_v34  ;;  %4092 = vmatmul.mubr.msk.bf16.gmra.mrb[188].mxu1 %vm615_vm2, %v2354_v7  ;;  %3979 = vmatprep.mubr.msk.bf16.mxu0 %vm4238_vm0, %v5159_v1  ;;  %v2356_v7 = vsel %vm2311_vm3, %v2353_v38, %v2355_v6  ;;  %v2357_v38 = vrot.slane %v4221_v19, 3  ;;  %v1687_v34 = vrot.slane %v1685_v58, 3 }
 0x198   : > { %4095 = vmatprep.mubr.msk.bf16.mxu1 %vm4238_vm0, %v5159_v1  ;;  %v1678_v1 = vrot.slane %v1676_v12, 3 }
 0x199   : > { %v899_v57 = vpop.f32.mrb[84].mxu0 }
 0x19a   : > { %v1225_v44 = vpop.f32.mrb[84].mxu1  ;;  %v3749_v0 = vpop.f32.mrb[85].mxu0 }
 0x19b   : > { %v3865_v29 = vpop.f32.mrb[85].mxu1  ;;  %v4857_v59 = vadd.f32 %v1225_v44, %v899_v57  ;;  %v902_v28 = vpop.f32.mrb[86].mxu0  ;;  %v5165_v44 = vmov 0.0   ;;  %v1679_v57 = vor.u32 %v1678_v1, %v1675_v41  ;;  %v4224_v1 = vld [vmem:[%s4304_s4 + $0xd0] sm:$0xff]  }
 0x19c   : > { %v1228_v9 = vpop.f32.mrb[86].mxu1  ;;  %v3750_v33 = vpop.f32.mrb[87].mxu0 }
 0x19d   : > { %5163 = vst [vmem:[#allocation4_spill] sm:$0xff] %v4857_v59  ;;  %v3866_v21 = vpop.f32.mrb[87].mxu1  ;;  %v4863_v32 = vadd.f32 %v1228_v9, %v902_v28  ;;  %v1680_v19 = vsel %vm1465_vm4, %v1670_v46, %v1679_v57  ;;  %v1684_v59 = vrot.slane %v1682_v49, 2  ;;  %v1691_v46 = vshrl.u32 %v4224_v1, 16 }
 0x19e   : > { %3980 = vmatmul.mubr.msk.bf16.gmra.mrb[192].mxu0 %vm615_vm2, %v1671_v16  ;;  %v2358_v21 = vsel %vm2311_vm3, %v2355_v6, %v2357_v38  ;;  %v4223_v16 = vld [vmem:[%s4304_s4 + $0xc8] sm:$0xff]   ;;  %v1694_v49 = vshll.u32 %v4224_v1, 16 }
 0x19f   : > { %5164 = vst [vmem:[#allocation5_spill] sm:$0xff] %v4863_v32  ;;  %4096 = vmatmul.mubr.msk.bf16.gmra.mrb[192].mxu1 %vm615_vm2, %v2356_v7  ;;  %3983 = vmatprep.mubr.msk.bf16.mxu0 %vm4238_vm0, %v5165_v44  ;;  %v2359_v6 = vrot.slane %v4223_v16, 3 }
 0x1a0   : > { %4099 = vmatprep.mubr.msk.bf16.mxu1 %vm4238_vm0, %v5165_v44 }
 0x1a1   : > { %v907_v29 = vpop.f32.mrb[88].mxu0 }
 0x1a2   : > { %v1233_v12 = vpop.f32.mrb[88].mxu1  ;;  %v3753_v28 = vpop.f32.mrb[89].mxu0 }
 0x1a3   : > { %v3869_v0 = vpop.f32.mrb[89].mxu1  ;;  %v4871_v9 = vadd.f32 %v1233_v12, %v907_v29  ;;  %v910_v33 = vpop.f32.mrb[90].mxu0 }
 0x1a4   : > { %v1236_v7 = vpop.f32.mrb[90].mxu1  ;;  %v3754_v15 = vpop.f32.mrb[91].mxu0 }
 0x1a5   : > { %5166 = vst [vmem:[#allocation6_spill] sm:$0xff] %v4871_v9  ;;  %v3870_v32 = vpop.f32.mrb[91].mxu1  ;;  %v4877_v41 = vadd.f32 %v1236_v7, %v910_v33  ;;  %v4225_v33 = vld [vmem:[%s4304_s4 + $0xd0] sm:$0xff]   ;;  %v1696_v9 = vrot.slane %v1694_v49, 3 }
 0x1a6   : > { %3984 = vmatmul.mubr.msk.bf16.gmra.mrb[196].mxu0 %vm615_vm2, %v1680_v19  ;;  %v1688_v32 = vor.u32 %v1687_v34, %v1684_v59  ;;  %v4226_v34 = vld [vmem:[%s4304_s4 + $0xd8] ss:$0 sps:$4 sm:$0xff]  }
 0x1a7   : > { %5167 = vst [vmem:[#allocation7_spill] sm:$0xff] %v4877_v41  ;;  %4100 = vmatmul.mubr.msk.bf16.gmra.mrb[196].mxu1 %vm615_vm2, %v2358_v21  ;;  %3987 = vmatprep.mubr.msk.bf16.mxu0 %vm4238_vm0, %v5165_v44  ;;  %v2360_v21 = vsel %vm2311_vm3, %v2357_v38, %v2359_v6  ;;  %v1693_v41 = vrot.slane %v1691_v46, 2  ;;  %v2361_v38 = vrot.slane %v4225_v33, 3  ;;  %v1703_v46 = vshll.u32 %v4226_v34, 16 }
 0x1a8   : > { %4103 = vmatprep.mubr.msk.bf16.mxu1 %vm4238_vm0, %v5165_v44  ;;  %v1689_v16 = vsel %vm1465_vm4, %v1679_v57, %v1688_v32  ;;  %v1700_v57 = vshrl.u32 %v4226_v34, 16 }
 0x1a9   : > { %v915_v12 = vpop.f32.mrb[92].mxu0 }
 0x1aa   : > { %v1241_v58 = vpop.f32.mrb[92].mxu1  ;;  %v3757_v28 = vpop.f32.mrb[93].mxu0 }
 0x1ab   : > { %v3873_v29 = vpop.f32.mrb[93].mxu1  ;;  %v4885_v0 = vadd.f32 %v1241_v58, %v915_v12  ;;  %v918_v19 = vpop.f32.mrb[94].mxu0  ;;  %v1697_v58 = vor.u32 %v1696_v9, %v1693_v41 }
 0x1ac   : > { %v1244_v7 = vpop.f32.mrb[94].mxu1  ;;  %v3758_v1 = vpop.f32.mrb[95].mxu0 }
 0x1ad   : > { %5168 = vst [vmem:[#allocation8_spill] sm:$0xff] %v4885_v0  ;;  %v3874_v15 = vpop.f32.mrb[95].mxu1  ;;  %v4891_v59 = vadd.f32 %v1244_v7, %v918_v19  ;;  %v1698_v33 = vsel %vm1465_vm4, %v1688_v32, %v1697_v58  ;;  %v1705_v0 = vrot.slane %v1703_v46, 3 }
 0x1ae   : > { %3988 = vmatmul.mubr.msk.bf16.gmra.mrb[200].mxu0 %vm615_vm2, %v1689_v16  ;;  %v4227_v15 = vld [vmem:[%s4304_s4 + $0xd8] sm:$0x1f]  }
 0x1af   : > { %5169 = vst [vmem:[#allocation9_spill] sm:$0xff] %v4891_v59  ;;  %4104 = vmatmul.mubr.msk.bf16.gmra.mrb[200].mxu1 %vm615_vm2, %v2360_v21  ;;  %3991 = vmatprep.mubr.msk.bf16.mxu0 %vm4238_vm0, %v5165_v44  ;;  %v2362_v21 = vsel %vm2311_vm3, %v2359_v6, %v2361_v38  ;;  %v1702_v59 = vrot.slane %v1700_v57, 2  ;;  %v2363_v41 = vrot.slane %v4227_v15, 3 }
 0x1b0   : > { %4107 = vmatprep.mubr.msk.bf16.mxu1 %vm4238_vm0, %v5165_v44 }
 0x1b1   : > { %v923_v12 = vpop.f32.mrb[96].mxu0  ;;  %v1706_v6 = vor.u32 %v1705_v0, %v1702_v59 }
 0x1b2   : > { %v1249_v49 = vpop.f32.mrb[96].mxu1  ;;  %v3761_v7 = vpop.f32.mrb[97].mxu0 }
 0x1b3   : > { %v3877_v29 = vpop.f32.mrb[97].mxu1  ;;  %v4899_v28 = vadd.f32 %v1249_v49, %v923_v12  ;;  %v926_v16 = vpop.f32.mrb[98].mxu0 }
 0x1b4   : > { %v1252_v19 = vpop.f32.mrb[98].mxu1  ;;  %v3762_v9 = vpop.f32.mrb[99].mxu0  ;;  %v2364_v29 = vsel %vm2311_vm3, %v2361_v38, %v2363_v41 }
 0x1b5   : > { %v3878_v1 = vpop.f32.mrb[99].mxu1  ;;  %v4904_v63 = vadd.f32 %v1252_v19, %v926_v16 }
 0x1b6   : > { %3992 = vmatmul.mubr.msk.bf16.gmra.mrb[204].mxu0 %vm615_vm2, %v1698_v33 }
 0x1b7   : > { %4108 = vmatmul.mubr.msk.bf16.gmra.mrb[204].mxu1 %vm615_vm2, %v2362_v21  ;;  %3995 = vmatprep.mubr.msk.bf16.mxu0 %vm4238_vm0, %v5165_v44  ;;  %v1707_v21 = vsel %vm1465_vm4, %v1697_v58, %v1706_v6 }
 0x1b8   : > { %4111 = vmatprep.mubr.msk.bf16.mxu1 %vm4238_vm0, %v5165_v44 }
 0x1b9   : > { %v931_v49 = vpop.f32.mrb[100].mxu0 }
 0x1ba   : > { %v1257_v34 = vpop.f32.mrb[100].mxu1  ;;  %v3765_v46 = vpop.f32.mrb[101].mxu0 }
 0x1bb   : > { %v3881_v32 = vpop.f32.mrb[101].mxu1  ;;  %v4912_v57 = vadd.f32 %v1257_v34, %v931_v49  ;;  %v934_v7 = vpop.f32.mrb[102].mxu0 }
 0x1bc   : > { %v1260_v12 = vpop.f32.mrb[102].mxu1  ;;  %v3766_v15 = vpop.f32.mrb[103].mxu0 }
 0x1bd   : > { %v3882_v19 = vpop.f32.mrb[103].mxu1  ;;  %v4916_v16 = vadd.f32 %v1260_v12, %v934_v7 }
 0x1be   : > { %3996 = vmatmul.mubr.msk.bf16.gmra.mrb[208].mxu0 %vm615_vm2, %v1707_v21  ;;  %v4932_v19 = vld [vmem:[%s5157_s2] ss:$0 sm:$0xff] }
 0x1bf   : > { %4112 = vmatmul.mubr.msk.bf16.gmra.mrb[208].mxu1 %vm615_vm2, %v2364_v29  ;;  %3999 = vmatprep.mubr.msk.bf16.mxu0 %vm4238_vm0, %v5165_v44 }
 0x1c0   : > { %4115 = vmatprep.mubr.msk.bf16.mxu1 %vm4238_vm0, %v5165_v44 }
 0x1c1   : > { %v939_v59 = vpop.f32.mrb[104].mxu0 }
 0x1c2   : > { %v1265_v0 = vpop.f32.mrb[104].mxu1  ;;  %v3769_v33 = vpop.f32.mrb[105].mxu0 }
 0x1c3   : > { %v3885_v38 = vpop.f32.mrb[105].mxu1  ;;  %v4924_v1 = vadd.f32 %v1265_v0, %v939_v59  ;;  %v942_v9 = vpop.f32.mrb[106].mxu0 }
 0x1c4   : > { %v1268_v58 = vpop.f32.mrb[106].mxu1  ;;  %v3770_v49 = vpop.f32.mrb[107].mxu0 }
 0x1c5   : > { %v3886_v34 = vpop.f32.mrb[107].mxu1 }
 0x1c6   : > { %4000 = vmatmul.mubr.msk.bf16.gmra.mrb[212].mxu0 %vm615_vm2, %v1706_v6 }
 0x1c7   : > { %4116 = vmatmul.mubr.msk.bf16.gmra.mrb[212].mxu1 %vm615_vm2, %v2363_v41 }
 0x1c9   : > { %v1847_v46 = vpop.f32.mrb[108].mxu0 }
 0x1ca   : > { %v2504_v32 = vpop.f32.mrb[108].mxu1  ;;  %v2061_v44 = vadd.f32 %v1847_v46, %v4563_v11  ;;  %v3897_v29 = vpop.f32.mrb[109].mxu0 }
 0x1cb   : > { %v4013_v12 = vpop.f32.mrb[109].mxu1  ;;  %v1850_v21 = vpop.f32.mrb[110].mxu0 }
 0x1cc   : > { %v2507_v7 = vpop.f32.mrb[110].mxu1  ;;  %v2718_v0 = vadd.f32 %v2504_v32, %v2061_v44  ;;  %v2062_v59 = vadd.f32 %v1850_v21, %v4569_v22  ;;  %v3898_v41 = vpop.f32.mrb[111].mxu0 }
 0x1cd   : > { %v4014_v15 = vpop.f32.mrb[111].mxu1 }
 0x1ce   : > { %v2777_v6 = vadd.f32 %v4932_v19, %v2718_v0  ;;  %v2719_v38 = vadd.f32 %v2507_v7, %v2062_v59 }
 0x1d0   : > { %v2830_v33 = vmax.f32 %v2777_v6, 0.0  ;;  %v2778_v11 = vadd.f32 %v4932_v19, %v2719_v38 }
 0x1d1   : > { %v1855_v9 = vpop.f32.mrb[112].mxu0 }
 0x1d2   : > { %v2512_v58 = vpop.f32.mrb[112].mxu1  ;;  %v3478_v22 = vpack.c.bf16 %v2830_v33, %v2830_v33  ;;  %v2831_v49 = vmax.f32 %v2778_v11, 0.0  ;;  %v2063_v32 = vadd.f32 %v1855_v9, %v4577_v31  ;;  %v3901_v46 = vpop.f32.mrb[113].mxu0 }
 0x1d3   : > { %v4017_v34 = vpop.f32.mrb[113].mxu1  ;;  %v1858_v44 = vpop.f32.mrb[114].mxu0 }
 0x1d4   : > { %v2515_v12 = vpop.f32.mrb[114].mxu1  ;;  %3097 = vst.msk [vmem:[%s4941_s30] sm:$0xf] %vm3096_vm5, %v3478_v22  ;;  %v3479_v7 = vpack.c.bf16 %v2831_v49, %v2831_v49  ;;  %v2720_v21 = vadd.f32 %v2512_v58, %v2063_v32  ;;  %v2064_v15 = vadd.f32 %v1858_v44, %v4583_v42  ;;  %v3902_v0 = vpop.f32.mrb[115].mxu0 }
 0x1d5   : > { %v4018_v29 = vpop.f32.mrb[115].mxu1 }
 0x1d6   : > { %3098 = vst.msk [vmem:[%s4941_s30 + $0x4] sm:$0xf] %vm3096_vm5, %v3479_v7  ;;  %v2779_v59 = vadd.f32 %v4932_v19, %v2720_v21  ;;  %v2721_v41 = vadd.f32 %v2515_v12, %v2064_v15 }
 0x1d8   : > { %v2832_v6 = vmax.f32 %v2779_v59, 0.0  ;;  %v2780_v31 = vadd.f32 %v4932_v19, %v2721_v41 }
 0x1d9   : > { %v1863_v33 = vpop.f32.mrb[116].mxu0 }
 0x1da   : > { %v2520_v38 = vpop.f32.mrb[116].mxu1  ;;  %v3480_v9 = vpack.c.bf16 %v2832_v6, %v2832_v6  ;;  %v2833_v34 = vmax.f32 %v2780_v31, 0.0  ;;  %v2065_v58 = vadd.f32 %v1863_v33, %v4591_v51  ;;  %v3905_v22 = vpop.f32.mrb[117].mxu0 }
 0x1db   : > { %v4021_v11 = vpop.f32.mrb[117].mxu1  ;;  %v1866_v49 = vpop.f32.mrb[118].mxu0 }
 0x1dc   : > { %v2523_v42 = vpop.f32.mrb[118].mxu1  ;;  %3099 = vst.msk [vmem:[%s4941_s30 + $0x8] sm:$0xf] %vm3096_vm5, %v3480_v9  ;;  %v3481_v46 = vpack.c.bf16 %v2833_v34, %v2833_v34  ;;  %v2722_v44 = vadd.f32 %v2520_v38, %v2065_v58  ;;  %v2066_v12 = vadd.f32 %v1866_v49, %v4597_v62  ;;  %v3906_v29 = vpop.f32.mrb[119].mxu0 }
 0x1dd   : > { %v4022_v32 = vpop.f32.mrb[119].mxu1 }
 0x1de   : > { %3100 = vst.msk [vmem:[%s4941_s30 + $0xc] sm:$0xf] %vm3096_vm5, %v3481_v46  ;;  %v2781_v7 = vadd.f32 %v4932_v19, %v2722_v44  ;;  %v2723_v21 = vadd.f32 %v2523_v42, %v2066_v12 }
 0x1e0   : > { %v2834_v15 = vmax.f32 %v2781_v7, 0.0  ;;  %v2782_v51 = vadd.f32 %v4932_v19, %v2723_v21 }
 0x1e1   : > { %v1871_v59 = vpop.f32.mrb[120].mxu0 }
 0x1e2   : > { %v2528_v0 = vpop.f32.mrb[120].mxu1  ;;  %v3482_v6 = vpack.c.bf16 %v2834_v15, %v2834_v15  ;;  %v2835_v31 = vmax.f32 %v2782_v51, 0.0  ;;  %v2067_v38 = vadd.f32 %v1871_v59, %v4605_v8  ;;  %v3909_v33 = vpop.f32.mrb[121].mxu0 }
 0x1e3   : > { %v4025_v41 = vpop.f32.mrb[121].mxu1  ;;  %v1874_v11 = vpop.f32.mrb[122].mxu0 }
 0x1e4   : > { %v2531_v62 = vpop.f32.mrb[122].mxu1  ;;  %3101 = vst.msk [vmem:[%s4941_s30 + $0x10] sm:$0xf] %vm3096_vm5, %v3482_v6  ;;  %v3483_v34 = vpack.c.bf16 %v2835_v31, %v2835_v31  ;;  %v2724_v58 = vadd.f32 %v2528_v0, %v2067_v38  ;;  %v2068_v22 = vadd.f32 %v1874_v11, %v4611_v20  ;;  %v3910_v42 = vpop.f32.mrb[123].mxu0 }
 0x1e5   : > { %v4026_v9 = vpop.f32.mrb[123].mxu1 }
 0x1e6   : > { %3102 = vst.msk [vmem:[%s4941_s30 + $0x14] sm:$0xf] %vm3096_vm5, %v3483_v34  ;;  %v2783_v49 = vadd.f32 %v4932_v19, %v2724_v58  ;;  %v2725_v32 = vadd.f32 %v2531_v62, %v2068_v22 }
 0x1e8   : > { %v2836_v46 = vmax.f32 %v2783_v49, 0.0  ;;  %v2784_v8 = vadd.f32 %v4932_v19, %v2725_v32 }
 0x1e9   : > { %v1879_v12 = vpop.f32.mrb[124].mxu0 }
 0x1ea   : > { %v2536_v44 = vpop.f32.mrb[124].mxu1  ;;  %v3484_v7 = vpack.c.bf16 %v2836_v46, %v2836_v46  ;;  %v2837_v21 = vmax.f32 %v2784_v8, 0.0  ;;  %v2069_v15 = vadd.f32 %v1879_v12, %v4619_v30  ;;  %v3913_v51 = vpop.f32.mrb[125].mxu0 }
 0x1eb   : > { %v4029_v29 = vpop.f32.mrb[125].mxu1  ;;  %v1882_v0 = vpop.f32.mrb[126].mxu0 }
 0x1ec   : > { %v2539_v20 = vpop.f32.mrb[126].mxu1  ;;  %3103 = vst.msk [vmem:[%s4941_s30 + $0x18] sm:$0xf] %vm3096_vm5, %v3484_v7  ;;  %v3485_v41 = vpack.c.bf16 %v2837_v21, %v2837_v21  ;;  %v2726_v6 = vadd.f32 %v2536_v44, %v2069_v15  ;;  %v2070_v31 = vadd.f32 %v1882_v0, %v4625_v43  ;;  %v3914_v38 = vpop.f32.mrb[127].mxu0 }
 0x1ed   : > { %v4030_v59 = vpop.f32.mrb[127].mxu1 }
 0x1ee   : > { %3104 = vst.msk [vmem:[%s4941_s30 + $0x1c] sm:$0xf] %vm3096_vm5, %v3485_v41  ;;  %v2785_v33 = vadd.f32 %v4932_v19, %v2726_v6  ;;  %v2727_v62 = vadd.f32 %v2539_v20, %v2070_v31 }
 0x1f0   : > { %v2838_v11 = vmax.f32 %v2785_v33, 0.0  ;;  %v2786_v30 = vadd.f32 %v4932_v19, %v2727_v62 }
 0x1f1   : > { %v1887_v34 = vpop.f32.mrb[128].mxu0 }
 0x1f2   : > { %v2544_v9 = vpop.f32.mrb[128].mxu1  ;;  %v3486_v22 = vpack.c.bf16 %v2838_v11, %v2838_v11  ;;  %v2839_v42 = vmax.f32 %v2786_v30, 0.0  ;;  %v2071_v49 = vadd.f32 %v1887_v34, %v4633_v53  ;;  %v3917_v32 = vpop.f32.mrb[129].mxu0 }
 0x1f3   : > { %v4033_v58 = vpop.f32.mrb[129].mxu1  ;;  %v1890_v46 = vpop.f32.mrb[130].mxu0 }
 0x1f4   : > { %v2547_v43 = vpop.f32.mrb[130].mxu1  ;;  %3105 = vst.msk [vmem:[%s4941_s30 + $0x20] sm:$0xf] %vm3096_vm5, %v3486_v22  ;;  %v3487_v44 = vpack.c.bf16 %v2839_v42, %v2839_v42  ;;  %v2728_v12 = vadd.f32 %v2544_v9, %v2071_v49  ;;  %v2072_v29 = vadd.f32 %v1890_v46, %v4639_v2  ;;  %v3918_v7 = vpop.f32.mrb[131].mxu0 }
 0x1f5   : > { %v4034_v8 = vpop.f32.mrb[131].mxu1 }
 0x1f6   : > { %3106 = vst.msk [vmem:[%s4941_s30 + $0x24] sm:$0xf] %vm3096_vm5, %v3487_v44  ;;  %v2787_v21 = vadd.f32 %v4932_v19, %v2728_v12  ;;  %v2729_v15 = vadd.f32 %v2547_v43, %v2072_v29 }
 0x1f8   : > { %v2840_v51 = vmax.f32 %v2787_v21, 0.0  ;;  %v2788_v53 = vadd.f32 %v4932_v19, %v2729_v15 }
 0x1f9   : > { %v1895_v0 = vpop.f32.mrb[132].mxu0 }
 0x1fa   : > { %v2552_v20 = vpop.f32.mrb[132].mxu1  ;;  %v3488_v41 = vpack.c.bf16 %v2840_v51, %v2840_v51  ;;  %v2841_v6 = vmax.f32 %v2788_v53, 0.0  ;;  %v2073_v31 = vadd.f32 %v1895_v0, %v4647_v13  ;;  %v3921_v38 = vpop.f32.mrb[133].mxu0 }
 0x1fb   : > { %v4037_v59 = vpop.f32.mrb[133].mxu1  ;;  %v1898_v33 = vpop.f32.mrb[134].mxu0 }
 0x1fc   : > { %v2555_v2 = vpop.f32.mrb[134].mxu1  ;;  %3107 = vst.msk [vmem:[%s4941_s30 + $0x28] sm:$0xf] %vm3096_vm5, %v3488_v41  ;;  %v3489_v11 = vpack.c.bf16 %v2841_v6, %v2841_v6  ;;  %v2730_v30 = vadd.f32 %v2552_v20, %v2073_v31  ;;  %v2074_v9 = vadd.f32 %v1898_v33, %v4653_v26  ;;  %v3922_v34 = vpop.f32.mrb[135].mxu0 }
 0x1fd   : > { %v4038_v62 = vpop.f32.mrb[135].mxu1 }
 0x1fe   : > { %3108 = vst.msk [vmem:[%s4941_s30 + $0x2c] sm:$0xf] %vm3096_vm5, %v3489_v11  ;;  %v2789_v58 = vadd.f32 %v4932_v19, %v2730_v30  ;;  %v2731_v22 = vadd.f32 %v2555_v2, %v2074_v9 }
 0x200   : > { %v2842_v42 = vmax.f32 %v2789_v58, 0.0  ;;  %v2790_v13 = vadd.f32 %v4932_v19, %v2731_v22 }
 0x201   : > { %v1903_v32 = vpop.f32.mrb[136].mxu0 }
 0x202   : > { %v2560_v49 = vpop.f32.mrb[136].mxu1  ;;  %v3490_v46 = vpack.c.bf16 %v2842_v42, %v2842_v42  ;;  %v2843_v8 = vmax.f32 %v2790_v13, 0.0  ;;  %v2075_v44 = vadd.f32 %v1903_v32, %v4661_v37  ;;  %v3925_v12 = vpop.f32.mrb[137].mxu0 }
 0x203   : > { %v4041_v43 = vpop.f32.mrb[137].mxu1  ;;  %v1906_v29 = vpop.f32.mrb[138].mxu0 }
 0x204   : > { %v2563_v26 = vpop.f32.mrb[138].mxu1  ;;  %3109 = vst.msk [vmem:[%s4941_s30 + $0x30] sm:$0xf] %vm3096_vm5, %v3490_v46  ;;  %v3491_v21 = vpack.c.bf16 %v2843_v8, %v2843_v8  ;;  %v2732_v15 = vadd.f32 %v2560_v49, %v2075_v44  ;;  %v2076_v51 = vadd.f32 %v1906_v29, %v4667_v50  ;;  %v3926_v53 = vpop.f32.mrb[139].mxu0 }
 0x205   : > { %v4042_v7 = vpop.f32.mrb[139].mxu1 }
 0x206   : > { %3110 = vst.msk [vmem:[%s4941_s30 + $0x34] sm:$0xf] %vm3096_vm5, %v3491_v21  ;;  %v2791_v20 = vadd.f32 %v4932_v19, %v2732_v15  ;;  %v2733_v0 = vadd.f32 %v2563_v26, %v2076_v51 }
 0x208   : > { %v2844_v59 = vmax.f32 %v2791_v20, 0.0  ;;  %v2792_v37 = vadd.f32 %v4932_v19, %v2733_v0 }
 0x209   : > { %v1911_v6 = vpop.f32.mrb[140].mxu0 }
 0x20a   : > { %v2568_v41 = vpop.f32.mrb[140].mxu1  ;;  %v3492_v38 = vpack.c.bf16 %v2844_v59, %v2844_v59  ;;  %v2845_v2 = vmax.f32 %v2792_v37, 0.0  ;;  %v2077_v33 = vadd.f32 %v1911_v6, %v4675_v61  ;;  %v3929_v62 = vpop.f32.mrb[141].mxu0 }
 0x20b   : > { %v4045_v31 = vpop.f32.mrb[141].mxu1  ;;  %v1914_v11 = vpop.f32.mrb[142].mxu0 }
 0x20c   : > { %v2571_v50 = vpop.f32.mrb[142].mxu1  ;;  %3111 = vst.msk [vmem:[%s4941_s30 + $0x38] sm:$0xf] %vm3096_vm5, %v3492_v38  ;;  %v3493_v9 = vpack.c.bf16 %v2845_v2, %v2845_v2  ;;  %v2734_v34 = vadd.f32 %v2568_v41, %v2077_v33  ;;  %v2078_v58 = vadd.f32 %v1914_v11, %v4681_v14  ;;  %v3930_v22 = vpop.f32.mrb[143].mxu0 }
 0x20d   : > { %v4046_v30 = vpop.f32.mrb[143].mxu1 }
 0x20e   : > { %3112 = vst.msk [vmem:[%s4941_s30 + $0x3c] sm:$0xf] %vm3096_vm5, %v3493_v9  ;;  %v2793_v42 = vadd.f32 %v4932_v19, %v2734_v34  ;;  %v2735_v13 = vadd.f32 %v2571_v50, %v2078_v58 }
 0x210   : > { %v2846_v49 = vmax.f32 %v2793_v42, 0.0  ;;  %v2794_v61 = vadd.f32 %v4932_v19, %v2735_v13 }
 0x211   : > { %v1919_v43 = vpop.f32.mrb[144].mxu0 }
 0x212   : > { %v2576_v32 = vpop.f32.mrb[144].mxu1  ;;  %v3494_v8 = vpack.c.bf16 %v2846_v49, %v2846_v49  ;;  %v2847_v44 = vmax.f32 %v2794_v61, 0.0  ;;  %v2079_v12 = vadd.f32 %v1919_v43, %v4689_v25  ;;  %v3933_v26 = vpop.f32.mrb[145].mxu0 }
 0x213   : > { %v4049_v46 = vpop.f32.mrb[145].mxu1  ;;  %v1922_v29 = vpop.f32.mrb[146].mxu0 }
 0x214   : > { %v2579_v14 = vpop.f32.mrb[146].mxu1  ;;  %3113 = vst.msk [vmem:[%s4941_s30 + $0x40] sm:$0xf] %vm3096_vm5, %v3494_v8  ;;  %v3495_v21 = vpack.c.bf16 %v2847_v44, %v2847_v44  ;;  %v2736_v15 = vadd.f32 %v2576_v32, %v2079_v12  ;;  %v2080_v51 = vadd.f32 %v1922_v29, %v4695_v40  ;;  %v3934_v53 = vpop.f32.mrb[147].mxu0 }
 0x215   : > { %v4050_v7 = vpop.f32.mrb[147].mxu1 }
 0x216   : > { %3114 = vst.msk [vmem:[%s4941_s30 + $0x44] sm:$0xf] %vm3096_vm5, %v3495_v21  ;;  %v2795_v20 = vadd.f32 %v4932_v19, %v2736_v15  ;;  %v2737_v0 = vadd.f32 %v2579_v14, %v2080_v51 }
 0x218   : > { %v2848_v59 = vmax.f32 %v2795_v20, 0.0  ;;  %v2796_v25 = vadd.f32 %v4932_v19, %v2737_v0 }
 0x219   : > { %v1927_v41 = vpop.f32.mrb[148].mxu0 }
 0x21a   : > { %v2584_v37 = vpop.f32.mrb[148].mxu1  ;;  %v3496_v31 = vpack.c.bf16 %v2848_v59, %v2848_v59  ;;  %v2849_v38 = vmax.f32 %v2796_v25, 0.0  ;;  %v2081_v2 = vadd.f32 %v1927_v41, %v4703_v54  ;;  %v3937_v33 = vpop.f32.mrb[149].mxu0 }
 0x21b   : > { %v4053_v6 = vpop.f32.mrb[149].mxu1  ;;  %v1930_v62 = vpop.f32.mrb[150].mxu0 }
 0x21c   : > { %v2587_v40 = vpop.f32.mrb[150].mxu1  ;;  %3115 = vst.msk [vmem:[%s4941_s30 + $0x48] sm:$0xf] %vm3096_vm5, %v3496_v31  ;;  %v3497_v11 = vpack.c.bf16 %v2849_v38, %v2849_v38  ;;  %v2738_v30 = vadd.f32 %v2584_v37, %v2081_v2  ;;  %v2082_v9 = vadd.f32 %v1930_v62, %v4709_v5  ;;  %v3938_v34 = vpop.f32.mrb[151].mxu0 }
 0x21d   : > { %v4054_v50 = vpop.f32.mrb[151].mxu1 }
 0x21e   : > { %3116 = vst.msk [vmem:[%s4941_s30 + $0x4c] sm:$0xf] %vm3096_vm5, %v3497_v11  ;;  %v2797_v58 = vadd.f32 %v4932_v19, %v2738_v30  ;;  %v2739_v22 = vadd.f32 %v2587_v40, %v2082_v9 }
 0x220   : > { %v2850_v42 = vmax.f32 %v2797_v58, 0.0  ;;  %v2798_v54 = vadd.f32 %v4932_v19, %v2739_v22 }
 0x221   : > { %v1935_v49 = vpop.f32.mrb[152].mxu0 }
 0x222   : > { %v2592_v13 = vpop.f32.mrb[152].mxu1  ;;  %v3498_v32 = vpack.c.bf16 %v2850_v42, %v2850_v42  ;;  %v2851_v43 = vmax.f32 %v2798_v54, 0.0  ;;  %v2083_v46 = vadd.f32 %v1935_v49, %v4717_v18  ;;  %v3941_v8 = vpop.f32.mrb[153].mxu0 }
 0x223   : > { %v4057_v61 = vpop.f32.mrb[153].mxu1  ;;  %v1938_v44 = vpop.f32.mrb[154].mxu0 }
 0x224   : > { %v2595_v5 = vpop.f32.mrb[154].mxu1  ;;  %3117 = vst.msk [vmem:[%s4941_s30 + $0x50] sm:$0xf] %vm3096_vm5, %v3498_v32  ;;  %v3499_v26 = vpack.c.bf16 %v2851_v43, %v2851_v43  ;;  %v2740_v14 = vadd.f32 %v2592_v13, %v2083_v46  ;;  %v2084_v29 = vadd.f32 %v1938_v44, %v4723_v35  ;;  %v3942_v7 = vpop.f32.mrb[155].mxu0 }
 0x225   : > { %v4058_v12 = vpop.f32.mrb[155].mxu1 }
 0x226   : > { %3118 = vst.msk [vmem:[%s4941_s30 + $0x54] sm:$0xf] %vm3096_vm5, %v3499_v26  ;;  %v2799_v21 = vadd.f32 %v4932_v19, %v2740_v14  ;;  %v2741_v15 = vadd.f32 %v2595_v5, %v2084_v29 }
 0x228   : > { %v2852_v51 = vmax.f32 %v2799_v21, 0.0  ;;  %v2800_v18 = vadd.f32 %v4932_v19, %v2741_v15 }
 0x229   : > { %v1943_v20 = vpop.f32.mrb[156].mxu0 }
 0x22a   : > { %v2600_v53 = vpop.f32.mrb[156].mxu1  ;;  %v3500_v59 = vpack.c.bf16 %v2852_v51, %v2852_v51  ;;  %v2853_v25 = vmax.f32 %v2800_v18, 0.0  ;;  %v2085_v37 = vadd.f32 %v1943_v20, %v4731_v48  ;;  %v3945_v41 = vpop.f32.mrb[157].mxu0 }
 0x22b   : > { %v4061_v0 = vpop.f32.mrb[157].mxu1  ;;  %v1946_v6 = vpop.f32.mrb[158].mxu0 }
 0x22c   : > { %v2603_v35 = vpop.f32.mrb[158].mxu1  ;;  %3119 = vst.msk [vmem:[%s4941_s30 + $0x58] sm:$0xf] %vm3096_vm5, %v3500_v59  ;;  %v3501_v38 = vpack.c.bf16 %v2853_v25, %v2853_v25  ;;  %v2742_v2 = vadd.f32 %v2600_v53, %v2085_v37  ;;  %v2086_v33 = vadd.f32 %v1946_v6, %v4737_v3  ;;  %v3946_v40 = vpop.f32.mrb[159].mxu0 }
 0x22d   : > { %v4062_v31 = vpop.f32.mrb[159].mxu1 }
 0x22e   : > { %3120 = vst.msk [vmem:[%s4941_s30 + $0x5c] sm:$0xf] %vm3096_vm5, %v3501_v38  ;;  %v2801_v62 = vadd.f32 %v4932_v19, %v2742_v2  ;;  %v2743_v50 = vadd.f32 %v2603_v35, %v2086_v33 }
 0x230   : > { %v2854_v11 = vmax.f32 %v2801_v62, 0.0  ;;  %v2802_v48 = vadd.f32 %v4932_v19, %v2743_v50 }
 0x231   : > { %v1951_v9 = vpop.f32.mrb[160].mxu0 }
 0x232   : > { %v2608_v30 = vpop.f32.mrb[160].mxu1  ;;  %v3502_v58 = vpack.c.bf16 %v2854_v11, %v2854_v11  ;;  %v2855_v22 = vmax.f32 %v2802_v48, 0.0  ;;  %v2087_v42 = vadd.f32 %v1951_v9, %v4745_v17  ;;  %v3949_v54 = vpop.f32.mrb[161].mxu0 }
 0x233   : > { %v4065_v34 = vpop.f32.mrb[161].mxu1  ;;  %v1954_v13 = vpop.f32.mrb[162].mxu0 }
 0x234   : > { %v2611_v3 = vpop.f32.mrb[162].mxu1  ;;  %3121 = vst.msk [vmem:[%s4941_s30 + $0x60] sm:$0xf] %vm3096_vm5, %v3502_v58  ;;  %v3503_v61 = vpack.c.bf16 %v2855_v22, %v2855_v22  ;;  %v2744_v32 = vadd.f32 %v2608_v30, %v2087_v42  ;;  %v2088_v43 = vadd.f32 %v1954_v13, %v4751_v36  ;;  %v3950_v46 = vpop.f32.mrb[163].mxu0 }
 0x235   : > { %v4066_v49 = vpop.f32.mrb[163].mxu1 }
 0x236   : > { %3122 = vst.msk [vmem:[%s4941_s30 + $0x64] sm:$0xf] %vm3096_vm5, %v3503_v61  ;;  %v2803_v8 = vadd.f32 %v4932_v19, %v2744_v32  ;;  %v2745_v5 = vadd.f32 %v2611_v3, %v2088_v43 }
 0x238   : > { %v2856_v44 = vmax.f32 %v2803_v8, 0.0  ;;  %v2804_v17 = vadd.f32 %v4932_v19, %v2745_v5 }
 0x239   : > { %v1959_v26 = vpop.f32.mrb[164].mxu0 }
 0x23a   : > { %v2616_v12 = vpop.f32.mrb[164].mxu1  ;;  %v3504_v29 = vpack.c.bf16 %v2856_v44, %v2856_v44  ;;  %v2857_v7 = vmax.f32 %v2804_v17, 0.0  ;;  %v2089_v21 = vadd.f32 %v1959_v26, %v4759_v52  ;;  %v3953_v15 = vpop.f32.mrb[165].mxu0 }
 0x23b   : > { %v4069_v14 = vpop.f32.mrb[165].mxu1  ;;  %v1962_v51 = vpop.f32.mrb[166].mxu0 }
 0x23c   : > { %v2619_v36 = vpop.f32.mrb[166].mxu1  ;;  %3123 = vst.msk [vmem:[%s4941_s30 + $0x68] sm:$0xf] %vm3096_vm5, %v3504_v29  ;;  %v3505_v53 = vpack.c.bf16 %v2857_v7, %v2857_v7  ;;  %v2746_v20 = vadd.f32 %v2616_v12, %v2089_v21  ;;  %v2090_v0 = vadd.f32 %v1962_v51, %v4765_v10  ;;  %v3954_v59 = vpop.f32.mrb[167].mxu0 }
 0x23d   : > { %v4070_v18 = vpop.f32.mrb[167].mxu1 }
 0x23e   : > { %3124 = vst.msk [vmem:[%s4941_s30 + $0x6c] sm:$0xf] %vm3096_vm5, %v3505_v53  ;;  %v2805_v25 = vadd.f32 %v4932_v19, %v2746_v20  ;;  %v2747_v37 = vadd.f32 %v2619_v36, %v2090_v0 }
 0x240   : > { %v2858_v41 = vmax.f32 %v2805_v25, 0.0  ;;  %v2806_v52 = vadd.f32 %v4932_v19, %v2747_v37 }
 0x241   : > { %v1967_v6 = vpop.f32.mrb[168].mxu0 }
 0x242   : > { %v2624_v35 = vpop.f32.mrb[168].mxu1  ;;  %v3506_v38 = vpack.c.bf16 %v2858_v41, %v2858_v41  ;;  %v2859_v2 = vmax.f32 %v2806_v52, 0.0  ;;  %v2091_v33 = vadd.f32 %v1967_v6, %v4773_v24  ;;  %v3957_v40 = vpop.f32.mrb[169].mxu0 }
 0x243   : > { %v4073_v31 = vpop.f32.mrb[169].mxu1  ;;  %v1970_v62 = vpop.f32.mrb[170].mxu0 }
 0x244   : > { %v2627_v10 = vpop.f32.mrb[170].mxu1  ;;  %3125 = vst.msk [vmem:[%s4941_s30 + $0x70] sm:$0xf] %vm3096_vm5, %v3506_v38  ;;  %v3507_v11 = vpack.c.bf16 %v2859_v2, %v2859_v2  ;;  %v2748_v48 = vadd.f32 %v2624_v35, %v2091_v33  ;;  %v2092_v30 = vadd.f32 %v1970_v62, %v4779_v47  ;;  %v3958_v9 = vpop.f32.mrb[171].mxu0 }
 0x245   : > { %v4074_v50 = vpop.f32.mrb[171].mxu1 }
 0x246   : > { %3126 = vst.msk [vmem:[%s4941_s30 + $0x74] sm:$0xf] %vm3096_vm5, %v3507_v11  ;;  %v2807_v34 = vadd.f32 %v4932_v19, %v2748_v48  ;;  %v2749_v58 = vadd.f32 %v2627_v10, %v2092_v30 }
 0x248   : > { %v2860_v22 = vmax.f32 %v2807_v34, 0.0  ;;  %v2808_v24 = vadd.f32 %v4932_v19, %v2749_v58 }
 0x249   : > { %v1975_v54 = vpop.f32.mrb[172].mxu0 }
 0x24a   : > { %v2632_v42 = vpop.f32.mrb[172].mxu1  ;;  %v3508_v13 = vpack.c.bf16 %v2860_v22, %v2860_v22  ;;  %v2861_v49 = vmax.f32 %v2808_v24, 0.0  ;;  %v2093_v61 = vadd.f32 %v1975_v54, %v4787_v60  ;;  %v3961_v32 = vpop.f32.mrb[173].mxu0 }
 0x24b   : > { %v4077_v3 = vpop.f32.mrb[173].mxu1  ;;  %v1978_v43 = vpop.f32.mrb[174].mxu0 }
 0x24c   : > { %v2635_v47 = vpop.f32.mrb[174].mxu1  ;;  %3127 = vst.msk [vmem:[%s4941_s30 + $0x78] sm:$0xf] %vm3096_vm5, %v3508_v13  ;;  %v3509_v8 = vpack.c.bf16 %v2861_v49, %v2861_v49  ;;  %v2750_v5 = vadd.f32 %v2632_v42, %v2093_v61  ;;  %v2094_v44 = vadd.f32 %v1978_v43, %v4793_v27  ;;  %v3962_v17 = vpop.f32.mrb[175].mxu0 }
 0x24d   : > { %v4078_v46 = vpop.f32.mrb[175].mxu1 }
 0x24e   : > { %3128 = vst.msk [vmem:[%s4941_s30 + $0x7c] sm:$0xf] %vm3096_vm5, %v3509_v8  ;;  %v2809_v12 = vadd.f32 %v4932_v19, %v2750_v5  ;;  %v2751_v26 = vadd.f32 %v2635_v47, %v2094_v44 }
 0x250   : > { %v2862_v14 = vmax.f32 %v2809_v12, 0.0  ;;  %v2810_v60 = vadd.f32 %v4932_v19, %v2751_v26 }
 0x251   : > { %v1983_v7 = vpop.f32.mrb[176].mxu0 }
 0x252   : > { %v2640_v29 = vpop.f32.mrb[176].mxu1  ;;  %v3510_v15 = vpack.c.bf16 %v2862_v14, %v2862_v14  ;;  %v2863_v36 = vmax.f32 %v2810_v60, 0.0  ;;  %v2095_v51 = vadd.f32 %v1983_v7, %v4801_v39  ;;  %v3965_v18 = vpop.f32.mrb[177].mxu0 }
 0x253   : > { %v4081_v21 = vpop.f32.mrb[177].mxu1  ;;  %v1986_v53 = vpop.f32.mrb[178].mxu0 }
 0x254   : > { %v2643_v27 = vpop.f32.mrb[178].mxu1  ;;  %3129 = vst.msk [vmem:[%s4941_s30 + $0x80] sm:$0xf] %vm3096_vm5, %v3510_v15  ;;  %v3511_v0 = vpack.c.bf16 %v2863_v36, %v2863_v36  ;;  %v2752_v59 = vadd.f32 %v2640_v29, %v2095_v51  ;;  %v2096_v25 = vadd.f32 %v1986_v53, %v4807_v4  ;;  %v3966_v37 = vpop.f32.mrb[179].mxu0  ;;  %v5170_v21 = vld [vmem:[#allocation2_spill] sm:$0xff] }
 0x255   : > { %v4082_v20 = vpop.f32.mrb[179].mxu1 }
 0x256   : > { %3130 = vst.msk [vmem:[%s4941_s30 + $0x84] sm:$0xf] %vm3096_vm5, %v3511_v0  ;;  %v2811_v41 = vadd.f32 %v4932_v19, %v2752_v59  ;;  %v2753_v52 = vadd.f32 %v2643_v27, %v2096_v25  ;;  %v5171_v20 = vld [vmem:[#allocation3_spill] sm:$0xff] }
 0x258   : > { %v2864_v35 = vmax.f32 %v2811_v41, 0.0  ;;  %v2812_v39 = vadd.f32 %v4932_v19, %v2753_v52 }
 0x259   : > { %v1991_v31 = vpop.f32.mrb[180].mxu0 }
 0x25a   : > { %v2648_v6 = vpop.f32.mrb[180].mxu1  ;;  %v3512_v2 = vpack.c.bf16 %v2864_v35, %v2864_v35  ;;  %v2865_v33 = vmax.f32 %v2812_v39, 0.0  ;;  %v2097_v40 = vadd.f32 %v1991_v31, %v4815_v23  ;;  %v3969_v10 = vpop.f32.mrb[181].mxu0 }
 0x25b   : > { %v4085_v38 = vpop.f32.mrb[181].mxu1  ;;  %v1994_v62 = vpop.f32.mrb[182].mxu0 }
 0x25c   : > { %v2651_v4 = vpop.f32.mrb[182].mxu1  ;;  %3131 = vst.msk [vmem:[%s4941_s30 + $0x88] sm:$0xf] %vm3096_vm5, %v3512_v2  ;;  %v3513_v11 = vpack.c.bf16 %v2865_v33, %v2865_v33  ;;  %v2754_v48 = vadd.f32 %v2648_v6, %v2097_v40  ;;  %v2098_v30 = vadd.f32 %v1994_v62, %v4821_v56  ;;  %v3970_v9 = vpop.f32.mrb[183].mxu0  ;;  %v5172_v2 = vld [vmem:[#allocation4_spill] sm:$0xff] }
 0x25d   : > { %v4086_v50 = vpop.f32.mrb[183].mxu1 }
 0x25e   : > { %3132 = vst.msk [vmem:[%s4941_s30 + $0x8c] sm:$0xf] %vm3096_vm5, %v3513_v11  ;;  %v2813_v34 = vadd.f32 %v4932_v19, %v2754_v48  ;;  %v2755_v58 = vadd.f32 %v2651_v4, %v2098_v30  ;;  %v5173_v48 = vld [vmem:[#allocation5_spill] sm:$0xff] }
 0x260   : > { %v2866_v22 = vmax.f32 %v2813_v34, 0.0  ;;  %v2814_v23 = vadd.f32 %v4932_v19, %v2755_v58 }
 0x261   : > { %v1999_v42 = vpop.f32.mrb[184].mxu0 }
 0x262   : > { %v2656_v24 = vpop.f32.mrb[184].mxu1  ;;  %v3514_v3 = vpack.c.bf16 %v2866_v22, %v2866_v22  ;;  %v2867_v13 = vmax.f32 %v2814_v23, 0.0  ;;  %v2099_v49 = vadd.f32 %v1999_v42, %v4829_v55  ;;  %v3973_v61 = vpop.f32.mrb[185].mxu0 }
 0x263   : > { %v4089_v54 = vpop.f32.mrb[185].mxu1  ;;  %v2002_v32 = vpop.f32.mrb[186].mxu0 }
 0x264   : > { %v2659_v56 = vpop.f32.mrb[186].mxu1  ;;  %3133 = vst.msk [vmem:[%s4941_s30 + $0x90] sm:$0xf] %vm3096_vm5, %v3514_v3  ;;  %v3515_v43 = vpack.c.bf16 %v2867_v13, %v2867_v13  ;;  %v2756_v46 = vadd.f32 %v2656_v24, %v2099_v49  ;;  %v2100_v8 = vadd.f32 %v2002_v32, %v4835_v45  ;;  %v3974_v5 = vpop.f32.mrb[187].mxu0  ;;  %v5174_v49 = vld [vmem:[#allocation6_spill] sm:$0xff] }
 0x265   : > { %v4090_v47 = vpop.f32.mrb[187].mxu1  ;;  %v5175_v5 = vld [vmem:[#allocation7_spill] sm:$0xff] }
 0x266   : > { %3134 = vst.msk [vmem:[%s4941_s30 + $0x94] sm:$0xf] %vm3096_vm5, %v3515_v43  ;;  %v2815_v44 = vadd.f32 %v4932_v19, %v2756_v46  ;;  %v2757_v17 = vadd.f32 %v2659_v56, %v2100_v8 }
 0x268   : > { %v2868_v12 = vmax.f32 %v2815_v44, 0.0  ;;  %v2816_v55 = vadd.f32 %v4932_v19, %v2757_v17 }
 0x269   : > { %v2007_v14 = vpop.f32.mrb[188].mxu0 }
 0x26a   : > { %v2664_v26 = vpop.f32.mrb[188].mxu1  ;;  %v3516_v29 = vpack.c.bf16 %v2868_v12, %v2868_v12  ;;  %v2869_v7 = vmax.f32 %v2816_v55, 0.0  ;;  %v2101_v15 = vadd.f32 %v2007_v14, %v5170_v21  ;;  %v3977_v36 = vpop.f32.mrb[189].mxu0 }
 0x26b   : > { %v4093_v60 = vpop.f32.mrb[189].mxu1  ;;  %v2010_v51 = vpop.f32.mrb[190].mxu0  ;;  %v5176_v36 = vld [vmem:[#allocation8_spill] sm:$0xff] }
 0x26c   : > { %v2667_v45 = vpop.f32.mrb[190].mxu1  ;;  %3135 = vst.msk [vmem:[%s4941_s30 + $0x98] sm:$0xf] %vm3096_vm5, %v3516_v29  ;;  %v3517_v27 = vpack.c.bf16 %v2869_v7, %v2869_v7  ;;  %v2758_v53 = vadd.f32 %v2664_v26, %v2101_v15  ;;  %v2102_v0 = vadd.f32 %v2010_v51, %v5171_v20  ;;  %v3978_v59 = vpop.f32.mrb[191].mxu0 }
 0x26d   : > { %v4094_v18 = vpop.f32.mrb[191].mxu1  ;;  %v5177_v59 = vld [vmem:[#allocation9_spill] sm:$0xff] }
 0x26e   : > { %3136 = vst.msk [vmem:[%s4941_s30 + $0x9c] sm:$0xf] %vm3096_vm5, %v3517_v27  ;;  %v2817_v25 = vadd.f32 %v4932_v19, %v2758_v53  ;;  %v2759_v37 = vadd.f32 %v2667_v45, %v2102_v0 }
 0x270   : > { %v2870_v41 = vmax.f32 %v2817_v25, 0.0  ;;  %v2818_v52 = vadd.f32 %v4932_v19, %v2759_v37 }
 0x271   : > { %v2015_v39 = vpop.f32.mrb[192].mxu0 }
 0x272   : > { %v2672_v35 = vpop.f32.mrb[192].mxu1  ;;  %v3518_v31 = vpack.c.bf16 %v2870_v41, %v2870_v41  ;;  %v2871_v38 = vmax.f32 %v2818_v52, 0.0  ;;  %v2103_v33 = vadd.f32 %v2015_v39, %v5172_v2  ;;  %v3981_v40 = vpop.f32.mrb[193].mxu0 }
 0x273   : > { %v4097_v6 = vpop.f32.mrb[193].mxu1  ;;  %v2018_v4 = vpop.f32.mrb[194].mxu0 }
 0x274   : > { %v2675_v10 = vpop.f32.mrb[194].mxu1  ;;  %3137 = vst.msk [vmem:[%s4941_s30 + $0xa0] sm:$0xf] %vm3096_vm5, %v3518_v31  ;;  %v3519_v50 = vpack.c.bf16 %v2871_v38, %v2871_v38  ;;  %v2760_v11 = vadd.f32 %v2672_v35, %v2103_v33  ;;  %v2104_v30 = vadd.f32 %v2018_v4, %v5173_v48  ;;  %v3982_v9 = vpop.f32.mrb[195].mxu0 }
 0x275   : > { %v4098_v62 = vpop.f32.mrb[195].mxu1 }
 0x276   : > { %3138 = vst.msk [vmem:[%s4941_s30 + $0xa4] sm:$0xf] %vm3096_vm5, %v3519_v50  ;;  %v2819_v34 = vadd.f32 %v4932_v19, %v2760_v11  ;;  %v2761_v58 = vadd.f32 %v2675_v10, %v2104_v30 }
 0x278   : > { %v2872_v22 = vmax.f32 %v2819_v34, 0.0  ;;  %v2820_v23 = vadd.f32 %v4932_v19, %v2761_v58 }
 0x279   : > { %v2023_v42 = vpop.f32.mrb[196].mxu0 }
 0x27a   : > { %v2680_v24 = vpop.f32.mrb[196].mxu1  ;;  %v3520_v3 = vpack.c.bf16 %v2872_v22, %v2872_v22  ;;  %v2873_v13 = vmax.f32 %v2820_v23, 0.0  ;;  %v2105_v61 = vadd.f32 %v2023_v42, %v5174_v49  ;;  %v3985_v56 = vpop.f32.mrb[197].mxu0 }
 0x27b   : > { %v4101_v54 = vpop.f32.mrb[197].mxu1  ;;  %v2026_v47 = vpop.f32.mrb[198].mxu0 }
 0x27c   : > { %v2683_v32 = vpop.f32.mrb[198].mxu1  ;;  %3139 = vst.msk [vmem:[%s4941_s30 + $0xa8] sm:$0xf] %vm3096_vm5, %v3520_v3  ;;  %v3521_v46 = vpack.c.bf16 %v2873_v13, %v2873_v13  ;;  %v2762_v8 = vadd.f32 %v2680_v24, %v2105_v61  ;;  %v2106_v44 = vadd.f32 %v2026_v47, %v5175_v5  ;;  %v3986_v17 = vpop.f32.mrb[199].mxu0 }
 0x27d   : > { %v4102_v43 = vpop.f32.mrb[199].mxu1 }
 0x27e   : > { %3140 = vst.msk [vmem:[%s4941_s30 + $0xac] sm:$0xf] %vm3096_vm5, %v3521_v46  ;;  %v2821_v12 = vadd.f32 %v4932_v19, %v2762_v8  ;;  %v2763_v55 = vadd.f32 %v2683_v32, %v2106_v44 }
 0x280   : > { %v2874_v26 = vmax.f32 %v2821_v12, 0.0  ;;  %v2822_v14 = vadd.f32 %v4932_v19, %v2763_v55 }
 0x281   : > { %v2031_v29 = vpop.f32.mrb[200].mxu0 }
 0x282   : > { %v2688_v60 = vpop.f32.mrb[200].mxu1  ;;  %v3522_v21 = vpack.c.bf16 %v2874_v26, %v2874_v26  ;;  %v2875_v15 = vmax.f32 %v2822_v14, 0.0  ;;  %v2107_v45 = vadd.f32 %v2031_v29, %v5176_v36  ;;  %v3989_v51 = vpop.f32.mrb[201].mxu0 }
 0x283   : > { %v4105_v7 = vpop.f32.mrb[201].mxu1  ;;  %v2034_v27 = vpop.f32.mrb[202].mxu0 }
 0x284   : > { %v2691_v18 = vpop.f32.mrb[202].mxu1  ;;  %3141 = vst.msk [vmem:[%s4941_s30 + $0xb0] sm:$0xf] %vm3096_vm5, %v3522_v21  ;;  %v3523_v20 = vpack.c.bf16 %v2875_v15, %v2875_v15  ;;  %v2764_v0 = vadd.f32 %v2688_v60, %v2107_v45  ;;  %v2108_v25 = vadd.f32 %v2034_v27, %v5177_v59  ;;  %v3990_v37 = vpop.f32.mrb[203].mxu0  ;;  %v3152_v27 = vld [vmem:[%s4941_s30 + $0xd0] sm:$0x3] }
 0x285   : > { %v4106_v53 = vpop.f32.mrb[203].mxu1 }
 0x286   : > { %3142 = vst.msk [vmem:[%s4941_s30 + $0xb4] sm:$0xf] %vm3096_vm5, %v3523_v20  ;;  %v2823_v41 = vadd.f32 %v4932_v19, %v2764_v0  ;;  %v2765_v52 = vadd.f32 %v2691_v18, %v2108_v25 }
 0x288   : > { %v2876_v35 = vmax.f32 %v2823_v41, 0.0  ;;  %v2824_v39 = vadd.f32 %v4932_v19, %v2765_v52 }
 0x289   : > { %v2039_v31 = vpop.f32.mrb[204].mxu0 }
 0x28a   : > { %v2696_v6 = vpop.f32.mrb[204].mxu1  ;;  %v3524_v2 = vpack.c.bf16 %v2876_v35, %v2876_v35  ;;  %v2877_v33 = vmax.f32 %v2824_v39, 0.0  ;;  %v2109_v40 = vadd.f32 %v2039_v31, %v4899_v28  ;;  %v3993_v10 = vpop.f32.mrb[205].mxu0 }
 0x28b   : > { %v4109_v38 = vpop.f32.mrb[205].mxu1  ;;  %v2042_v62 = vpop.f32.mrb[206].mxu0 }
 0x28c   : > { %v2699_v4 = vpop.f32.mrb[206].mxu1  ;;  %3143 = vst.msk [vmem:[%s4941_s30 + $0xb8] sm:$0xf] %vm3096_vm5, %v3524_v2  ;;  %v3525_v11 = vpack.c.bf16 %v2877_v33, %v2877_v33  ;;  %v2766_v48 = vadd.f32 %v2696_v6, %v2109_v40  ;;  %v2110_v30 = vadd.f32 %v2042_v62, %v4904_v63  ;;  %v3994_v9 = vpop.f32.mrb[207].mxu0 }
 0x28d   : > { %v4110_v50 = vpop.f32.mrb[207].mxu1 }
 0x28e   : > { %3144 = vst.msk [vmem:[%s4941_s30 + $0xbc] sm:$0xf] %vm3096_vm5, %v3525_v11  ;;  %v2825_v34 = vadd.f32 %v4932_v19, %v2766_v48  ;;  %v2767_v58 = vadd.f32 %v2699_v4, %v2110_v30 }
 0x290   : > { %v2878_v22 = vmax.f32 %v2825_v34, 0.0  ;;  %v2826_v28 = vadd.f32 %v4932_v19, %v2767_v58 }
 0x291   : > { %v2047_v24 = vpop.f32.mrb[208].mxu0 }
 0x292   : > { %v2704_v23 = vpop.f32.mrb[208].mxu1  ;;  %v3526_v54 = vpack.c.bf16 %v2878_v22, %v2878_v22  ;;  %v2879_v3 = vmax.f32 %v2826_v28, 0.0  ;;  %v2111_v13 = vadd.f32 %v2047_v24, %v4912_v57  ;;  %v3997_v49 = vpop.f32.mrb[209].mxu0  ;;  %v4228_v57 = vld [vmem:[%s5157_s2] ss:$0 sm:$0xff] }
 0x293   : > { %v4113_v42 = vpop.f32.mrb[209].mxu1  ;;  %v2050_v61 = vpop.f32.mrb[210].mxu0 }
 0x294   : > { %v2707_v63 = vpop.f32.mrb[210].mxu1  ;;  %3145 = vst.msk [vmem:[%s4941_s30 + $0xc0] sm:$0xf] %vm3096_vm5, %v3526_v54  ;;  %v3527_v32 = vpack.c.bf16 %v2879_v3, %v2879_v3  ;;  %v2768_v47 = vadd.f32 %v2704_v23, %v2111_v13  ;;  %v2112_v43 = vadd.f32 %v2050_v61, %v4916_v16  ;;  %v3998_v46 = vpop.f32.mrb[211].mxu0 }
 0x295   : > { %v4114_v56 = vpop.f32.mrb[211].mxu1 }
 0x296   : > { %3146 = vst.msk [vmem:[%s4941_s30 + $0xc4] sm:$0xf] %vm3096_vm5, %v3527_v32  ;;  %v2827_v8 = vadd.f32 %v4932_v19, %v2768_v47  ;;  %v2769_v5 = vadd.f32 %v2707_v63, %v2112_v43 }
 0x298   : > { %v2880_v44 = vmax.f32 %v2827_v8, 0.0  ;;  %v2828_v17 = vadd.f32 %v4228_v57, %v2769_v5 }
 0x299   : > { %v2055_v55 = vpop.f32.mrb[212].mxu0 }
 0x29a   : > { %v2712_v12 = vpop.f32.mrb[212].mxu1  ;;  %v3528_v14 = vpack.c.bf16 %v2880_v44, %v2880_v44  ;;  %v2881_v60 = vmax.f32 %v2828_v17, 0.0  ;;  %v2113_v16 = vadd.f32 %v2055_v55, %v4924_v1  ;;  %v4001_v29 = vpop.f32.mrb[213].mxu0 }
 0x29b   : > { %v4117_v26 = vpop.f32.mrb[213].mxu1  ;;  %v2058_v19 = vpop.f32.mrb[214].mxu0 }
 0x29c   : > { %v2715_v7 = vpop.f32.mrb[214].mxu1  ;;  %3147 = vst.msk [vmem:[%s4941_s30 + $0xc8] sm:$0xf] %vm3096_vm5, %v3528_v14  ;;  %v3529_v15 = vpack.c.bf16 %v2881_v60, %v2881_v60  ;;  %v2770_v36 = vadd.f32 %v2712_v12, %v2113_v16  ;;  %v4002_v45 = vpop.f32.mrb[215].mxu0 }
 0x29d   : > { %v4118_v21 = vpop.f32.mrb[215].mxu1 }
 0x29e   : > { %3148 = vst.msk [vmem:[%s4941_s30 + $0xcc] sm:$0xf] %vm3096_vm5, %v3529_v15  ;;  %v2829_v51 = vadd.f32 %v4228_v57, %v2770_v36 }
 0x2a0   : > { %v2882_v18 = vmax.f32 %v2829_v51, 0.0 }
 0x2a2   : > { %v3530_v53 = vpack.c.bf16 %v2882_v18, %v2882_v18 }
 0x2a4   : > { %v3153_v1 = vsel %vm3151_vm8, %v3530_v53, %v3152_v27 }
 0x2a5   : > { %3154 = vst [vmem:[%s4941_s30 + $0xd0] sm:$0x3] %v3153_v1 }
 0x2a6 PF: > { %s13_s12 = sadd.s32 1, %s4235_s12  }
 0x2a7   : > { %p10_p4 = scmp.ge.s32.totalorder %s13_s12, 4  }
 0x2a9   :  { %12 = sbr.rel (!%p10_p4) target bundleno = 1 (0x1), region = 62 }

// kernel: dqn_forward.5
= control target key start
LH: loop header
LB: loop body
LE: loop exit
PB: predicated region body
PF: predicated region fallthrough
CT: control target
= control target key end

     0   :  { %s1514_s12 = smov 0   ;;  %s1763_s0 = inlined_call_operand.vmem [shape: bf16[2,100,128], index: 0, kind: input, shape index: {}]   ;;  %s1764_s1 = inlined_call_operand.vmem [shape: bf16[512,64], index: 1, kind: input, shape index: {}]   ;;  %s1765_s2 = inlined_call_operand.vmem [shape: f32[1,64], index: 2, kind: input, shape index: {}]   ;;  %s1766_s3 = inlined_call_operand.vmem [shape: bf16[2,89,64], index: 3, kind: output, shape index: {}]  }
   0x1 LB: > { %s1150_s13 = sadd.s32 4294967295, %s1492_s12   ;;  %p1154_p0 = scmp.ge.s32.totalorder %s1492_s12, 1  ;;  %s1492_s12 = sphi %s1514_s12, %s13_s12  }
   0x2   : > { %p137_p1 = scmp.lt.s32.totalorder %s1492_s12, 3 }
   0x4   : > { %p138_p2 = pnand %p1154_p0, %p137_p1 }
   0x5   : > { %v1442_v0 = vld [vmem:[%s1764_s1 + $0x40] sm:$0xff] (!%p138_p2)   ;;  %v1444_v2 = vld [vmem:[%s1764_s1 + $0x48] sm:$0xff] (!%p138_p2)   ;;  %p161_p3 = scmp.lt.s32.totalorder (!%p138_p2), %s1150_s13, 1  ;;  %v1446_v4 = vld [vmem:[%s1764_s1 + $0x50] sm:$0xff] (!%p138_p2)   ;;  %vm623_vm0 = vcmask (!%p138_p2), 1046528   ;;  %vm1077_vm3 = vcmask (!%p138_p2), 519168  }
   0x6   : > { %141 = sbr.rel (%p138_p2) target bundleno = 311 (0x137), region = 32  ;;  %v1443_v1 = vld [vmem:[%s1764_s1 + $0x80] sm:$0xff] (!%p138_p2)   ;;  %1284 = vmatprep.subr.bf16.mxu1 (!%p138_p2), %v1442_v0  ;;  %v1445_v3 = vld [vmem:[%s1764_s1 + $0x88] sm:$0xff] (!%p138_p2)   ;;  %v1447_v5 = vld [vmem:[%s1764_s1 + $0x90] sm:$0xff] (!%p138_p2)   ;;  %vm247_vm1 = vsmask.f32 (!%p138_p2), 7424 }
   0x7   : > { %1340 = vmatprep.subr.bf16.mxu0 (!%p138_p2), %v1443_v1  ;;  %1285 = vmatpush3.bf16.msra.mxu1 (!%p138_p2), %v1442_v0  ;;  %v1448_v6 = vld [vmem:[%s1764_s1 + $0x58] sm:$0xff] (!%p138_p2)   ;;  %v1450_v8 = vld [vmem:[%s1764_s1 + $0x60] sm:$0xff] (!%p138_p2)   ;;  %v1452_v10 = vld [vmem:[%s1764_s1 + $0x68] sm:$0xff] (!%p138_p2)   ;;  %vm798_vm2 = vsmask.f32 (!%p138_p2), 6400  ;;  %vm1089_vm4 = vcmask (!%p138_p2), 516096  }
   0x8   : > { %1341 = vmatpush3.bf16.msra.mxu0 (!%p138_p2), %v1443_v1  ;;  %1286 = vmatprep.subr.bf16.mxu1 (!%p138_p2), %v1444_v2  ;;  %v1449_v7 = vld [vmem:[%s1764_s1 + $0x98] sm:$0xff] (!%p138_p2)   ;;  %v1451_v9 = vld [vmem:[%s1764_s1 + $0xa0] sm:$0xff] (!%p138_p2)   ;;  %v1453_v11 = vld [vmem:[%s1764_s1 + $0xa8] sm:$0xff] (!%p138_p2)   ;;  %vm1090_vm5 = vsmask.f32 (!%p138_p2), 256 }
   0x9   : > { %1342 = vmatprep.subr.bf16.mxu0 (!%p138_p2), %v1445_v3  ;;  %v1454_v14 = vld [vmem:[%s1764_s1 + $0x70] sm:$0xff] (!%p138_p2)   ;;  %v1456_v24 = vld [vmem:[%s1764_s1 + $0x78] sm:$0xff] (!%p138_p2)   ;;  %v1460_v36 = vld [vmem:[%s1764_s1] sm:$0xff] (!%p138_p2)  }
   0xa   : > { %v1455_v19 = vld [vmem:[%s1764_s1 + $0xb0] sm:$0xff] (!%p138_p2)   ;;  %v1457_v30 = vld [vmem:[%s1764_s1 + $0xb8] sm:$0xff] (!%p138_p2)   ;;  %v1463_v38 = vld [vmem:[%s1764_s1 + $0xc0] sm:$0xff] (!%p138_p2)  }
   0xb   : > { %1287 = vmatpush3.bf16.msra.mxu1 (!%p138_p2), %v1444_v2  ;;  %v1466_v40 = vld [vmem:[%s1764_s1 + $0x8] sm:$0xff] (!%p138_p2)   ;;  %v1468_v50 = vld [vmem:[%s1764_s1 + $0x10] sm:$0xff] (!%p138_p2)   ;;  %v1470_v62 = vld [vmem:[%s1764_s1 + $0x18] sm:$0xff] (!%p138_p2)  }
   0xc   : > { %1343 = vmatpush3.bf16.msra.mxu0 (!%p138_p2), %v1445_v3  ;;  %1288 = vmatprep.subr.bf16.mxu1 (!%p138_p2), %v1446_v4  ;;  %v1467_v45 = vld [vmem:[%s1764_s1 + $0xc8] sm:$0xff] (!%p138_p2)   ;;  %v1469_v55 = vld [vmem:[%s1764_s1 + $0xd0] sm:$0xff] (!%p138_p2)   ;;  %v1471_v1 = vld [vmem:[%s1764_s1 + $0xd8] sm:$0xff] (!%p138_p2)  }
   0xd   : > { %s1768_s13 = smov (!%p161_p3, %s1150_s13), 1  ;;  %1344 = vmatprep.subr.bf16.mxu0 %v1447_v5  ;;  %vm1091_vm6 = vmand %vm1089_vm4, %vm1090_vm5 }
   0xe   : > { %s1432_s30 = smul.u32 52, %s1768_s13 }
   0xf   : > { %1289 = vmatpush3.bf16.msra.mxu1 %v1446_v4  ;;  %s1433_s7 = smul.u32 48, %s1768_s13 }
  0x10   : > { %1345 = vmatpush3.bf16.msra.mxu0 %v1447_v5  ;;  %1290 = vmatprep.subr.bf16.mxu1 %v1448_v6  ;;  %s1561_s14 = scalar_lea.vmem %s1763_s0, %s1432_s30 }
  0x11   : > { %1346 = vmatprep.subr.bf16.mxu0 %v1449_v7  ;;  %v1567_v12 = vld [vmem:[%s1561_s14] sm:$0xff]   ;;  %v1570_v13 = vld [vmem:[%s1561_s14 + $0x8] sm:$0xff]   ;;  %v1593_v27 = vld [vmem:[%s1561_s14 + $0x10] sm:$0xff]   ;;  %s1725_s10 = scalar_lea.vmem %s1766_s3, %s1433_s7 }
  0x12   : > { %v249_v15 = vshrl.u32 %v1567_v12, 16  ;;  %v251_v16 = vshll.u32 %v1567_v12, 16  ;;  %v256_v17 = vshll.u32 %v1570_v13, 16  ;;  %v1579_v18 = vld [vmem:[%s1561_s14 + $0xc] sm:$0xff]   ;;  %v1585_v22 = vld [vmem:[%s1561_s14 + $0x4] sm:$0xfe]  }
  0x13   : > { %1291 = vmatpush3.bf16.msra.mxu1 %v1448_v6  ;;  %v625_v23 = vrot.slane %v1579_v18, 1  ;;  %v624_v26 = vrot.slane %v1585_v22, 1  ;;  %v260_v28 = vshrl.u32 %v1570_v13, 16  ;;  %v1597_v29 = vld [vmem:[%s1561_s14 + $0x14] sm:$0xff]   ;;  %v264_v33 = vshll.u32 %v1593_v27, 16  ;;  %v1622_v44 = vld [vmem:[%s1561_s14 + $0x1c] sm:$0xff]  }
  0x14   : > { %1347 = vmatpush3.bf16.msra.mxu0 %v1449_v7  ;;  %1292 = vmatprep.subr.bf16.mxu1 %v1450_v8  ;;  %v253_v20 = vrot.slane %v251_v16, 1  ;;  %v258_v21 = vrot.slane %v256_v17, 1  ;;  %v627_v37 = vrot.slane %v1597_v29, 1  ;;  %v268_v39 = vshrl.u32 %v1593_v27, 16  ;;  %v1618_v42 = vld [vmem:[%s1561_s14 + $0x18] sm:$0xff]   ;;  %v1629_v48 = vld [vmem:[%s1561_s14 + $0x20] sm:$0xff]  }
  0x15   : > { %1348 = vmatprep.subr.bf16.mxu0 %v1451_v9  ;;  %v626_v32 = vsel %vm623_vm0, %v624_v26, %v625_v23  ;;  %v266_v35 = vrot.slane %v264_v33, 1  ;;  %v272_v47 = vshll.u32 %v1618_v42, 16  ;;  %v276_v49 = vshrl.u32 %v1618_v42, 16  ;;  %v1637_v52 = vld [vmem:[%s1561_s14 + $0x24] sm:$0xff]   ;;  %v1661_v5 = vld [vmem:[%s1561_s14 + $0x2c] sm:$0x3f]  }
  0x16   : > { %v254_v25 = vor.u32 %v253_v20, %v249_v15  ;;  %1356 = vmatprep.mubr.bf16.mxu0 %v626_v32  ;;  %v262_v34 = vor.u32 %v260_v28, %v258_v21  ;;  %v628_v43 = vsel %vm623_vm0, %v625_v23, %v627_v37  ;;  %v629_v51 = vrot.slane %v1622_v44, 1  ;;  %v1657_v3 = vld [vmem:[%s1561_s14 + $0x28] sm:$0x1f]   ;;  %v1475_v15 = vld [vmem:[%s1764_s1 + $0x20] sm:$0xff]  }
  0x17   : > { %1293 = vmatpush3.bf16.msra.mxu1 %v1450_v8  ;;  %v270_v46 = vor.u32 %v268_v39, %v266_v35  ;;  %v274_v53 = vrot.slane %v272_v47, 1  ;;  %v280_v54 = vshll.u32 %v1629_v48, 16  ;;  %v631_v57 = vrot.slane %v1637_v52, 1  ;;  %v1478_v26 = vld [vmem:[%s1764_s1 + $0x28] sm:$0xff]   ;;  %v1485_v39 = vld [vmem:[%s1764_s1 + $0xf8] sm:$0xff]  }
  0x18   : > { %1349 = vmatpush3.bf16.msra.mxu0 %v1451_v9  ;;  %1294 = vmatprep.subr.bf16.mxu1 %v1452_v10  ;;  %v259_v31 = vsel %vm247_vm1, %v254_v25, %v258_v21  ;;  %v267_v41 = vsel %vm247_vm1, %v262_v34, %v266_v35  ;;  %v630_v56 = vsel %vm623_vm0, %v627_v37, %v629_v51  ;;  %v800_v61 = vshrl.u32 %v1585_v22, 16  ;;  %v1479_v28 = vld [vmem:[%s1764_s1 + $0xe8] sm:$0xff]   ;;  %v1483_v34 = vld [vmem:[%s1764_s1 + $0xf0] sm:$0xff]   ;;  %v1484_v37 = vld [vmem:[%s1764_s1 + $0x38] sm:$0xff]  }
  0x19   : > { %1350 = vmatprep.subr.bf16.mxu0 %v1453_v11  ;;  %1300 = vmatprep.mubr.bf16.mxu1 %v259_v31  ;;  %v275_v58 = vsel %vm247_vm1, %v270_v46, %v274_v53  ;;  %v278_v59 = vor.u32 %v276_v49, %v274_v53  ;;  %v282_v60 = vrot.slane %v280_v54, 1  ;;  %v284_v63 = vshrl.u32 %v1629_v48, 16  ;;  %v1482_v31 = vld [vmem:[%s1764_s1 + $0x30] sm:$0xff]  }
  0x1a   : > { %v803_v0 = vshll.u32 %v1585_v22, 16  ;;  %v632_v4 = vsel %vm623_vm0, %v629_v51, %v631_v57  ;;  %v288_v7 = vshll.u32 %v1657_v3, 16  ;;  %v802_v8 = vrot.slane %v800_v61, 1 }
  0x1b   : > { %1295 = vmatpush3.bf16.msra.mxu1 %v1452_v10  ;;  %v283_v2 = vsel %vm247_vm1, %v278_v59, %v282_v60  ;;  %v286_v6 = vor.u32 %v284_v63, %v282_v60  ;;  %v633_v9 = vrot.slane %v1661_v5, 1  ;;  %v292_v10 = vshrl.u32 %v1657_v3, 16 }
  0x1c   : > { %1351 = vmatpush3.bf16.msra.mxu0 %v1453_v11  ;;  %1296 = vmatprep.subr.bf16.mxu1 %v1454_v14  ;;  %v290_v11 = vrot.slane %v288_v7, 1  ;;  %v808_v17 = vshrl.u32 %v1579_v18, 16  ;;  %v811_v21 = vshll.u32 %v1579_v18, 16  ;;  %v817_v32 = vshrl.u32 %v1597_v29, 16 }
  0x1d   : > { %1352 = vmatprep.subr.bf16.mxu0 %v1455_v19  ;;  %v634_v16 = vsel %vm623_vm0, %v631_v57, %v633_v9  ;;  %v820_v33 = vshll.u32 %v1597_v29, 16  ;;  %v826_v35 = vshrl.u32 %v1622_v44, 16  ;;  %v844_v46 = vshrl.u32 %v1661_v5, 16 }
  0x1e   : > { %v291_v20 = vsel %vm247_vm1, %v286_v6, %v290_v11  ;;  %v294_v22 = vor.u32 %v292_v10, %v290_v11  ;;  %v810_v23 = vrot.slane %v808_v17, 1  ;;  %v813_v25 = vrot.slane %v811_v21, 2 }
  0x1f   : > { %1297 = vmatpush3.bf16.msra.mxu1 %v1454_v14  ;;  %v805_v14 = vrot.slane %v803_v0, 2  ;;  %v819_v29 = vrot.slane %v817_v32, 1  ;;  %v847_v47 = vshll.u32 %v1661_v5, 16  ;;  %v846_v54 = vrot.slane %v844_v46, 1 }
  0x20   : > { %1353 = vmatpush3.bf16.msra.mxu0 %v1455_v19  ;;  %1298 = vmatprep.subr.bf16.mxu1 %v1456_v24  ;;  %v1477_v19 = vld [vmem:[%s1764_s1 + $0xe0] sm:$0xff]  }
  0x21   : > { %1354 = vmatprep.subr.bf16.mxu0 %v1457_v30 }
  0x23   : > { %1299 = vmatpush3.bf16.msra.mxu1 %v1456_v24  ;;  %v806_v24 = vor.u32 %v805_v14, %v802_v8 }
  0x24   : > { %1355 = vmatpush3.bf16.msra.mxu0 %v1457_v30  ;;  %1312 = vmatprep.subr.bf16.mxu1 %v1460_v36  ;;  %v814_v30 = vor.u32 %v813_v25, %v810_v23 }
  0x25   : > { %1368 = vmatprep.subr.bf16.mxu0 %v1463_v38 }
  0x26   : > { %1301 = vmatmul.mubr.bf16.vlgmr.msra.gmra.mrb[0].mxu1 %v267_v41  ;;  %v815_v18 = vsel %vm798_vm2, %v806_v24, %v814_v30 }
  0x27   : > { %1313 = vmatpush3.bf16.msra.mxu1 %v1460_v36  ;;  %1357 = vmatmul.mubr.bf16.vlgmr.msra.gmra.mrb[0].mxu0 %v628_v43  ;;  %v829_v36 = vshll.u32 %v1622_v44, 16  ;;  %v835_v43 = vshrl.u32 %v1637_v52, 16  ;;  %v838_v44 = vshll.u32 %v1637_v52, 16 }
  0x28   : > { %1369 = vmatpush3.bf16.msra.mxu0 %v1463_v38  ;;  %1314 = vmatprep.subr.bf16.mxu1 %v1466_v40  ;;  %v822_v38 = vrot.slane %v820_v33, 2 }
  0x29   : > { %1370 = vmatprep.subr.bf16.mxu0 %v1467_v45  ;;  %1360 = vmatprep.mubr.bf16.mxu0 %v630_v56  ;;  %v840_v51 = vrot.slane %v838_v44, 2 }
  0x2a   : > { %1304 = vmatprep.mubr.bf16.mxu1 %v275_v58  ;;  %v823_v41 = vor.u32 %v822_v38, %v819_v29 }
  0x2b   : > { %1315 = vmatpush3.bf16.msra.mxu1 %v1466_v40  ;;  %v831_v40 = vrot.slane %v829_v36, 2 }
  0x2c   : > { %1371 = vmatpush3.bf16.msra.mxu0 %v1467_v45  ;;  %1316 = vmatprep.subr.bf16.mxu1 %v1468_v50  ;;  %v824_v49 = vsel %vm798_vm2, %v814_v30, %v823_v41 }
  0x2d   : > { %1372 = vmatprep.subr.bf16.mxu0 %v1469_v55 }
  0x2e   : > { %1305 = vmatmul.mubr.bf16.gmra.mrb[4].mxu1 %v283_v2 }
  0x2f   : > { %1317 = vmatpush3.bf16.msra.mxu1 %v1468_v50  ;;  %1361 = vmatmul.mubr.bf16.gmra.mrb[4].mxu0 %v632_v4  ;;  %v837_v50 = vrot.slane %v835_v43, 1 }
  0x30   : > { %1373 = vmatpush3.bf16.msra.mxu0 %v1469_v55  ;;  %1318 = vmatprep.subr.bf16.mxu1 %v1470_v62  ;;  %v849_v55 = vrot.slane %v847_v47, 2 }
  0x31   : > { %1374 = vmatprep.subr.bf16.mxu0 %v1471_v1  ;;  %1364 = vmatprep.mubr.bf16.mxu0 %v634_v16  ;;  %v841_v52 = vor.u32 %v840_v51, %v837_v50 }
  0x32   : > { %1308 = vmatprep.mubr.bf16.mxu1 %v291_v20  ;;  %v850_v56 = vor.u32 %v849_v55, %v846_v54 }
  0x33   : > { %1319 = vmatpush3.bf16.msra.mxu1 %v1470_v62 }
  0x34   : > { %1375 = vmatpush3.bf16.msra.mxu0 %v1471_v1  ;;  %1320 = vmatprep.subr.bf16.mxu1 %v1475_v15  ;;  %v851_v58 = vsel %vm798_vm2, %v841_v52, %v850_v56 }
  0x35   : > { %1376 = vmatprep.subr.bf16.mxu0 %v1477_v19 }
  0x36   : > { %1309 = vmatmul.mubr.bf16.gmra.mrb[8].mxu1 %v294_v22 }
  0x37   : > { %1321 = vmatpush3.bf16.msra.mxu1 %v1475_v15  ;;  %1365 = vmatmul.mubr.bf16.gmra.mrb[8].mxu0 %v633_v9 }
  0x38   : > { %1377 = vmatpush3.bf16.msra.mxu0 %v1477_v19  ;;  %1322 = vmatprep.subr.bf16.mxu1 %v1478_v26 }
  0x39   : > { %1378 = vmatprep.subr.bf16.mxu0 %v1479_v28  ;;  %1328 = vmatprep.mubr.bf16.mxu1 %v1567_v12  ;;  %v828_v12 = vrot.slane %v826_v35, 1 }
  0x3a   : > { %1384 = vmatprep.mubr.bf16.mxu0 %v815_v18 }
  0x3b   : > { %1323 = vmatpush3.bf16.msra.mxu1 %v1478_v26  ;;  %v832_v45 = vor.u32 %v831_v40, %v828_v12 }
  0x3c   : > { %1379 = vmatpush3.bf16.msra.mxu0 %v1479_v28  ;;  %1324 = vmatprep.subr.bf16.mxu1 %v1482_v31 }
  0x3d   : > { %1380 = vmatprep.subr.bf16.mxu0 %v1483_v34  ;;  %v833_v53 = vsel %vm798_vm2, %v823_v41, %v832_v45  ;;  %v842_v57 = vsel %vm798_vm2, %v832_v45, %v841_v52 }
  0x3f   : > { %1325 = vmatpush3.bf16.msra.mxu1 %v1482_v31 }
  0x40   : > { %1381 = vmatpush3.bf16.msra.mxu0 %v1483_v34  ;;  %1326 = vmatprep.subr.bf16.mxu1 %v1484_v37 }
  0x41   : > { %1382 = vmatprep.subr.bf16.mxu0 %v1485_v39 }
  0x43   : > { %1327 = vmatpush3.bf16.msra.mxu1 %v1484_v37 }
  0x44   : > { %1383 = vmatpush3.bf16.msra.mxu0 %v1485_v39 }
  0x46   : > { %1329 = vmatmul.mubr.bf16.vlgmr.msra.gmra.mrb[0].mxu1 %v1570_v13 }
  0x47   : > { %1385 = vmatmul.mubr.bf16.vlgmr.msra.gmra.mrb[0].mxu0 %v824_v49  ;;  %1332 = vmatprep.mubr.bf16.mxu1 %v1593_v27  ;;  %v1716_v27 = vld [vmem:[%s1765_s2] ss:$0 sm:$0xff] }
  0x48   : > { %1388 = vmatprep.mubr.bf16.mxu0 %v833_v53 }
  0x4e   : > { %1333 = vmatmul.mubr.bf16.gmra.mrb[4].mxu1 %v1618_v42 }
  0x4f   : > { %1389 = vmatmul.mubr.bf16.gmra.mrb[4].mxu0 %v842_v57  ;;  %1336 = vmatprep.mubr.bf16.mxu1 %v1629_v48 }
  0x50   : > { %1392 = vmatprep.mubr.bf16.mxu0 %v851_v58 }
  0x56   : > { %1337 = vmatmul.mubr.bf16.gmra.mrb[8].mxu1 %v1657_v3 }
  0x57   : > { %1393 = vmatmul.mubr.bf16.gmra.mrb[8].mxu0 %v850_v56 }
 0x119   : > { %v1330_v13 = vpop.f32.mrb[0].mxu1 }
 0x11a   : > { %v1386_v59 = vpop.f32.mrb[0].mxu0  ;;  %v518_v60 = vpop.f32.mrb[1].mxu1 }
 0x11b   : > { %v1396_v61 = vadd.f32 %v1386_v59, %v1330_v13  ;;  %v940_v62 = vpop.f32.mrb[1].mxu0  ;;  %v1331_v63 = vpop.f32.mrb[2].mxu1 }
 0x11c   : > { %v1397_v42 = vadd.f32 %v940_v62, %v518_v60  ;;  %v1387_v0 = vpop.f32.mrb[2].mxu0  ;;  %v521_v1 = vpop.f32.mrb[3].mxu1 }
 0x11d   : > { %v1007_v48 = vadd.f32 %v1396_v61, %v1716_v27  ;;  %v1398_v2 = vadd.f32 %v1387_v0, %v1331_v63  ;;  %v943_v3 = vpop.f32.mrb[3].mxu0 }
 0x11e   : > { %v1005_v4 = vadd.f32 %v1397_v42, %v1716_v27  ;;  %v1399_v5 = vadd.f32 %v943_v3, %v521_v1  ;;  %v1092_v42 = vld [vmem:[%s1725_s10 + $0x2c] sm:$0x1] }
 0x11f   : > { %v1019_v6 = vmax.f32 %v1007_v48, 0.0  ;;  %v1008_v7 = vadd.f32 %v1398_v2, %v1716_v27 }
 0x120   : > { %v1017_v8 = vmax.f32 %v1005_v4, 0.0  ;;  %v1006_v9 = vadd.f32 %v1399_v5, %v1716_v27 }
 0x121   : > { %v1218_v10 = vpack.c.bf16 %v1019_v6, %v1019_v6  ;;  %v1020_v11 = vmax.f32 %v1008_v7, 0.0  ;;  %v1334_v14 = vpop.f32.mrb[4].mxu1 }
 0x122   : > { %v1216_v15 = vpack.c.bf16 %v1017_v8, %v1017_v8  ;;  %v1018_v16 = vmax.f32 %v1006_v9, 0.0  ;;  %v1390_v17 = vpop.f32.mrb[4].mxu0  ;;  %v534_v19 = vpop.f32.mrb[5].mxu1 }
 0x123   : > { %1080 = vst.msk [vmem:[%s1725_s10 + $0x8] sm:$0xf] %vm1077_vm3, %v1218_v10  ;;  %v1219_v20 = vpack.c.bf16 %v1020_v11, %v1020_v11  ;;  %v1400_v21 = vadd.f32 %v1390_v17, %v1334_v14  ;;  %v956_v22 = vpop.f32.mrb[5].mxu0  ;;  %v1335_v23 = vpop.f32.mrb[6].mxu1 }
 0x124   : > { %1078 = vst.msk [vmem:[%s1725_s10] sm:$0xf] %vm1077_vm3, %v1216_v15  ;;  %v1217_v24 = vpack.c.bf16 %v1018_v16, %v1018_v16  ;;  %v1401_v25 = vadd.f32 %v956_v22, %v534_v19  ;;  %v1391_v26 = vpop.f32.mrb[6].mxu0  ;;  %v537_v28 = vpop.f32.mrb[7].mxu1 }
 0x125   : > { %1081 = vst.msk [vmem:[%s1725_s10 + $0xc] sm:$0xf] %vm1077_vm3, %v1219_v20  ;;  %v1011_v30 = vadd.f32 %v1400_v21, %v1716_v27  ;;  %v1402_v18 = vadd.f32 %v1391_v26, %v1335_v23  ;;  %v959_v31 = vpop.f32.mrb[7].mxu0 }
 0x126   : > { %1079 = vst.msk [vmem:[%s1725_s10 + $0x4] sm:$0xf] %vm1077_vm3, %v1217_v24  ;;  %v1009_v32 = vadd.f32 %v1401_v25, %v1716_v27  ;;  %v1403_v33 = vadd.f32 %v959_v31, %v537_v28 }
 0x127   : > { %v1023_v34 = vmax.f32 %v1011_v30, 0.0  ;;  %v1012_v35 = vadd.f32 %v1402_v18, %v1716_v27 }
 0x128   : > { %v1021_v36 = vmax.f32 %v1009_v32, 0.0  ;;  %v1010_v37 = vadd.f32 %v1403_v33, %v1716_v27 }
 0x129   : > { %v1222_v29 = vpack.c.bf16 %v1023_v34, %v1023_v34  ;;  %v1024_v38 = vmax.f32 %v1012_v35, 0.0  ;;  %v1338_v39 = vpop.f32.mrb[8].mxu1 }
 0x12a   : > { %v1220_v12 = vpack.c.bf16 %v1021_v36, %v1021_v36  ;;  %v1022_v40 = vmax.f32 %v1010_v37, 0.0  ;;  %v1394_v41 = vpop.f32.mrb[8].mxu0  ;;  %v550_v43 = vpop.f32.mrb[9].mxu1 }
 0x12b   : > { %1084 = vst.msk [vmem:[%s1725_s10 + $0x18] sm:$0xf] %vm1077_vm3, %v1222_v29  ;;  %v1223_v44 = vpack.c.bf16 %v1024_v38, %v1024_v38  ;;  %v1404_v45 = vadd.f32 %v1394_v41, %v1338_v39  ;;  %v972_v46 = vpop.f32.mrb[9].mxu0  ;;  %v1339_v47 = vpop.f32.mrb[10].mxu1 }
 0x12c   : > { %1082 = vst.msk [vmem:[%s1725_s10 + $0x10] sm:$0xf] %vm1077_vm3, %v1220_v12  ;;  %v1221_v49 = vpack.c.bf16 %v1022_v40, %v1022_v40  ;;  %v1405_v50 = vadd.f32 %v972_v46, %v550_v43  ;;  %v1395_v51 = vpop.f32.mrb[10].mxu0  ;;  %v553_v53 = vpop.f32.mrb[11].mxu1 }
 0x12d   : > { %1085 = vst.msk [vmem:[%s1725_s10 + $0x1c] sm:$0xf] %vm1077_vm3, %v1223_v44  ;;  %v1015_v54 = vadd.f32 %v1404_v45, %v1716_v27  ;;  %v1406_v55 = vadd.f32 %v1395_v51, %v1339_v47  ;;  %v975_v52 = vpop.f32.mrb[11].mxu0 }
 0x12e   : > { %1083 = vst.msk [vmem:[%s1725_s10 + $0x14] sm:$0xf] %vm1077_vm3, %v1221_v49  ;;  %v1013_v56 = vadd.f32 %v1405_v50, %v1716_v27  ;;  %v1407_v57 = vadd.f32 %v975_v52, %v553_v53 }
 0x12f   : > { %v1027_v58 = vmax.f32 %v1015_v54, 0.0  ;;  %v1016_v13 = vadd.f32 %v1406_v55, %v1716_v27 }
 0x130   : > { %v1025_v59 = vmax.f32 %v1013_v56, 0.0  ;;  %v1014_v60 = vadd.f32 %v1407_v57, %v1716_v27 }
 0x131   : > { %v1226_v61 = vpack.c.bf16 %v1027_v58, %v1027_v58  ;;  %v1028_v62 = vmax.f32 %v1016_v13, 0.0 }
 0x132   : > { %v1224_v63 = vpack.c.bf16 %v1025_v59, %v1025_v59  ;;  %v1026_v0 = vmax.f32 %v1014_v60, 0.0 }
 0x133   : > { %1088 = vst.msk [vmem:[%s1725_s10 + $0x28] sm:$0xf] %vm1077_vm3, %v1226_v61  ;;  %v1227_v1 = vpack.c.bf16 %v1028_v62, %v1028_v62 }
 0x134   : > { %1086 = vst.msk [vmem:[%s1725_s10 + $0x20] sm:$0xf] %vm1077_vm3, %v1224_v63  ;;  %v1225_v48 = vpack.c.bf16 %v1026_v0, %v1026_v0 }
 0x135   : > { %v1093_v2 = vsel %vm1091_vm6, %v1227_v1, %v1092_v42 }
 0x136   : > { %1094 = vst [vmem:[%s1725_s10 + $0x2c] sm:$0x1] %v1093_v2  ;;  %1087 = vst.msk [vmem:[%s1725_s10 + $0x24] sm:$0xf] %vm1077_vm3, %v1225_v48 }
 0x137 PF: > { %s13_s12 = sadd.s32 1, %s1492_s12  }
 0x138   : > { %p10_p4 = scmp.ge.s32.totalorder %s13_s12, 4  }
 0x13a   :  { %12 = sbr.rel (!%p10_p4) target bundleno = 1 (0x1), region = 62 }

// kernel: dqn_forward.6
= control target key start
LH: loop header
LB: loop body
LE: loop exit
PB: predicated region body
PF: predicated region fallthrough
CT: control target
= control target key end

     0   :  { %s2335_s12 = smov 0   ;;  %s2845_s0 = inlined_call_operand.vmem [shape: bf16[2,89,64], index: 0, kind: input, shape index: {}]   ;;  %s2846_s1 = inlined_call_operand.vmem [shape: bf16[576,64], index: 1, kind: input, shape index: {}]   ;;  %s2847_s2 = inlined_call_operand.vmem [shape: f32[1,64], index: 2, kind: input, shape index: {}]   ;;  %s2848_s3 = inlined_call_operand.vmem [shape: bf16[2,67,64], index: 3, kind: output, shape index: {}]  }
   0x1 LB: > { %s1759_s13 = sadd.s32 4294967295, %s2311_s12   ;;  %p1763_p0 = scmp.ge.s32.totalorder %s2311_s12, 1  ;;  %s2311_s12 = sphi %s2335_s12, %s13_s12  }
   0x2   : > { %p137_p1 = scmp.lt.s32.totalorder %s2311_s12, 3 }
   0x4   : > { %p138_p2 = pnand %p1763_p0, %p137_p1 }
   0x5   : > { %v2245_v0 = vld [vmem:[%s2846_s1 + $0x20] sm:$0xff] (!%p138_p2)   ;;  %v2313_v1 = vmov (!%p138_p2), 0.0   ;;  %v2246_v2 = vld [vmem:[%s2846_s1 + $0x28] sm:$0xff] (!%p138_p2)   ;;  %p161_p3 = scmp.lt.s32.totalorder (!%p138_p2), %s1759_s13, 1  ;;  %vm2314_vm0 = vmmov (!%p138_p2), 0   ;;  %v2247_v3 = vld [vmem:[%s2846_s1 + $0x30] sm:$0xff] (!%p138_p2)  }
   0x6   : > { %141 = sbr.rel (%p138_p2) target bundleno = 425 (0x1a9), region = 32  ;;  %2225 = vmatprep.subr.bf16.mxu1 (!%p138_p2), %v2313_v1  ;;  %1973 = vmatprep.subr.bf16.mxu0 (!%p138_p2), %v2313_v1  ;;  %v2248_v4 = vld [vmem:[%s2846_s1 + $0x38] sm:$0xff] (!%p138_p2)   ;;  %vm221_vm1 = vsmask.f32 (!%p138_p2), 7424  ;;  %vm285_vm2 = vcmask (!%p138_p2), 523264   ;;  %v2251_v19 = vld [vmem:[%s2846_s1] sm:$0xff] (!%p138_p2)  }
   0x7   : > { %2229 = vmatpush3.bf16.msra.mxu1 (!%p138_p2), %v2245_v0  ;;  %1974 = vmatpush3.bf16.msra.mxu0 (!%p138_p2), %v2245_v0  ;;  %v2256_v28 = vld [vmem:[%s2846_s1 + $0x40] sm:$0xff] (!%p138_p2)   ;;  %v2252_v30 = vld [vmem:[%s2846_s1 + $0x8] sm:$0xff] (!%p138_p2)   ;;  %v2257_v38 = vld [vmem:[%s2846_s1 + $0x10] sm:$0xff] (!%p138_p2)   ;;  %vm495_vm3 = vcmask (!%p138_p2), 1046528   ;;  %vm802_vm4 = vsmask.f32 (!%p138_p2), 6400 }
   0x8   : > { %2226 = vmatprep.subr.bf16.mxu1 (!%p138_p2), %v2313_v1  ;;  %1975 = vmatprep.subr.bf16.mxu0 (!%p138_p2), %v2313_v1  ;;  %v2258_v34 = vld [vmem:[%s2846_s1 + $0x48] sm:$0xff] (!%p138_p2)   ;;  %v2259_v39 = vld [vmem:[%s2846_s1 + $0x50] sm:$0xff] (!%p138_p2)   ;;  %v2260_v43 = vld [vmem:[%s2846_s1 + $0x18] sm:$0xff] (!%p138_p2)   ;;  %vm983_vm5 = vcmask (!%p138_p2), 1045504   ;;  %vm1498_vm6 = vcmask (!%p138_p2), 1044480   ;;  %vm1689_vm8 = vcmask (!%p138_p2), 519168  }
   0x9   : > { %1989 = vmatprep.mubr.msk.bf16.mxu1 (!%p138_p2), %vm2314_vm0, %v2313_v1  ;;  %1981 = vmatprep.mubr.msk.bf16.mxu0 (!%p138_p2), %vm2314_vm0, %v2313_v1  ;;  %v2261_v44 = vld [vmem:[%s2846_s1 + $0x58] sm:$0xff] (!%p138_p2)   ;;  %v2264_v49 = vld [vmem:[%s2846_s1 + $0x80] sm:$0xff] (!%p138_p2)   ;;  %v2266_v51 = vld [vmem:[%s2846_s1 + $0x88] sm:$0xff] (!%p138_p2)   ;;  %vm1290_vm7 = vsmask.f32 (!%p138_p2), 5376  ;;  %vm1698_vm9 = vcmask (!%p138_p2), 517120  }
   0xa   : > { %v2263_v52 = vld [vmem:[%s2846_s1 + $0x60] sm:$0xff] (!%p138_p2)   ;;  %v2268_v56 = vld [vmem:[%s2846_s1 + $0x90] sm:$0xff] (!%p138_p2)   ;;  %v2265_v59 = vld [vmem:[%s2846_s1 + $0x68] sm:$0xff] (!%p138_p2)   ;;  %vm1699_vm10 = vsmask.f32 (!%p138_p2), 1280 }
   0xb   : > { %2230 = vmatpush3.bf16.msra.mxu1 (!%p138_p2), %v2246_v2  ;;  %1976 = vmatpush3.bf16.msra.mxu0 (!%p138_p2), %v2246_v2  ;;  %v2271_v62 = vld [vmem:[%s2846_s1 + $0x98] sm:$0xff] (!%p138_p2)   ;;  %v2267_v63 = vld [vmem:[%s2846_s1 + $0x70] sm:$0xff] (!%p138_p2)   ;;  %vm1700_vm11 = vmand (!%p138_p2), %vm1698_vm9, %vm1699_vm10 }
   0xc   : > { %2227 = vmatprep.subr.bf16.mxu1 (!%p138_p2), %v2313_v1  ;;  %1977 = vmatprep.subr.bf16.mxu0 (!%p138_p2), %v2313_v1 }
   0xd   : > { %s2850_s13 = smov (!%p161_p3, %s1759_s13), 1 }
   0xe   : > { %s2233_s20 = smul.u32 48, %s2850_s13 }
   0xf   : > { %2231 = vmatpush3.bf16.msra.mxu1 %v2247_v3  ;;  %1978 = vmatpush3.bf16.msra.mxu0 %v2247_v3  ;;  %v2270_v3 = vld [vmem:[%s2846_s1 + $0x78] sm:$0xff]   ;;  %s2234_s18 = smul.u32 36, %s2850_s13 }
  0x10   : > { %s2371_s25 = scalar_lea.vmem %s2845_s0, %s2233_s20  ;;  %2228 = vmatprep.subr.bf16.mxu1 %v2313_v1  ;;  %1979 = vmatprep.subr.bf16.mxu0 %v2313_v1 }
  0x11   : > { %v2374_v5 = vld [vmem:[%s2371_s25 + $0x10] sm:$0xff]   ;;  %v2377_v6 = vld [vmem:[%s2371_s25 + $0x18] sm:$0xff]   ;;  %v173_v7 = vld [vmem:[%s2371_s25] sm:$0xf]  ;;  %s2808_s21 = scalar_lea.vmem %s2848_s3, %s2234_s18 }
  0x12   : > { %v174_v8 = vld [vmem:[%s2371_s25 + $0x4] sm:$0xf]  ;;  %v238_v9 = vshll.u32 %v2374_v5, 16  ;;  %v242_v10 = vshrl.u32 %v2374_v5, 16  ;;  %v246_v11 = vshll.u32 %v2377_v6, 16  ;;  %v2389_v13 = vld [vmem:[%s2371_s25 + $0x8] sm:$0xff]  }
  0x13   : > { %v2386_v12 = vcombine.low %v173_v7, %v174_v8  ;;  %v2392_v14 = vld [vmem:[%s2371_s25 + $0x20] ss:$0 sps:$4 sm:$0x33]   ;;  %2232 = vmatpush3.bf16.msra.mxu1 %v2248_v4  ;;  %1980 = vmatpush3.bf16.msra.mxu0 %v2248_v4  ;;  %v230_v20 = vshll.u32 %v2389_v13, 16  ;;  %v250_v21 = vshrl.u32 %v2377_v6, 16  ;;  %v234_v29 = vshrl.u32 %v2389_v13, 16 }
  0x14   : > { %v240_v15 = vrot.slane %v238_v9, 1  ;;  %v248_v16 = vrot.slane %v246_v11, 1  ;;  %2001 = vmatprep.subr.bf16.mxu1 %v2313_v1  ;;  %2029 = vmatprep.subr.bf16.mxu0 %v2313_v1  ;;  %v254_v24 = vshll.u32 %v2392_v14, 16  ;;  %v479_v36 = vld [vmem:[%s2371_s25] sm:$0xe]  ;;  %v258_v42 = vshrl.u32 %v2392_v14, 16 }
  0x15   : > { %v223_v17 = vshrl.u32 %v2386_v12, 16  ;;  %v225_v18 = vshll.u32 %v2386_v12, 16  ;;  %v232_v25 = vrot.slane %v230_v20, 1  ;;  %v1789_v41 = vcombine.low %v479_v36, %v174_v8  ;;  %v2472_v53 = vld [vmem:[%s2371_s25 + $0x1c] sm:$0xff]   ;;  %v625_v7 = vld [vmem:[%s2371_s25 + $0x4] sm:$0xe] }
  0x16   : > { %v244_v22 = vor.u32 %v242_v10, %v240_v15  ;;  %v252_v32 = vor.u32 %v250_v21, %v248_v16  ;;  %v256_v33 = vrot.slane %v254_v24, 1  ;;  %v497_v46 = vrot.slane %v2389_v13, 1  ;;  %v2475_v54 = vld [vmem:[%s2371_s25 + $0x24] ss:$0 sps:$4 sm:$0x77]   ;;  %v2530_v9 = vld [vmem:[%s2371_s25 + $0xc] sm:$0xff]  }
  0x17   : > { %v227_v23 = vrot.slane %v225_v18, 1  ;;  %v236_v35 = vor.u32 %v234_v29, %v232_v25  ;;  %v496_v45 = vrot.slane %v1789_v41, 1  ;;  %v499_v50 = vrot.slane %v2374_v5, 1  ;;  %v2269_v0 = vld [vmem:[%s2371_s25 + $0x20] ss:$0 sps:$4 sm:$0x77]  }
  0x18   : > { %v249_v26 = vsel %vm221_vm1, %v244_v22, %v248_v16  ;;  %v257_v37 = vsel %vm221_vm1, %v252_v32, %v256_v33  ;;  %v260_v47 = vor.u32 %v258_v42, %v256_v33  ;;  %v670_v57 = vrot.slane %v2472_v53, 1  ;;  %v2527_v8 = vld [vmem:[%s2371_s25 + $0x8] sm:$0xf]  ;;  %v2545_v21 = vld [vmem:[%s2371_s25 + $0x14] sm:$0xff]  }
  0x19   : > { %v228_v27 = vor.u32 %v227_v23, %v223_v17  ;;  %1990 = vmatmul.mubr.msk.bf16.vlgmr.msra.gmra.mrb[0].mxu1 %vm285_vm2, %v249_v26  ;;  %v241_v40 = vsel %vm221_vm1, %v236_v35, %v240_v15  ;;  %v498_v48 = vsel %vm495_vm3, %v496_v45, %v497_v46  ;;  %v500_v55 = vsel %vm495_vm3, %v497_v46, %v499_v50  ;;  %v2280_v46 = vld [vmem:[%s2846_s1 + $0xb0] sm:$0xff]  }
  0x1a   : > { %2002 = vmatpush3.bf16.msra.mxu1 %v2251_v19  ;;  %1993 = vmatprep.mubr.msk.bf16.mxu1 %vm2314_vm0, %v2313_v1  ;;  %v672_v58 = vrot.slane %v2475_v54, 1  ;;  %v501_v61 = vrot.slane %v2377_v6, 1  ;;  %v503_v4 = vrot.slane %v2269_v0, 1  ;;  %v1800_v11 = vcombine.low %v625_v7, %v2527_v8 }
  0x1b   : > { %v233_v31 = vsel %vm221_vm1, %v228_v27, %v232_v25  ;;  %2003 = vmatprep.subr.bf16.mxu1 %v2313_v1  ;;  %v812_v15 = vshrl.u32 %v2530_v9, 16  ;;  %v815_v16 = vshll.u32 %v2530_v9, 16  ;;  %v821_v23 = vshrl.u32 %v2545_v21, 16 }
  0x1c   : > { %1982 = vmatmul.mubr.msk.bf16.vlgmr.msra.gmra.mrb[0].mxu0 %vm285_vm2, %v233_v31  ;;  %v2496_v60 = vsel %vm495_vm3, %v670_v57, %v672_v58  ;;  %v502_v2 = vsel %vm495_vm3, %v499_v50, %v501_v61  ;;  %v504_v10 = vsel %vm495_vm3, %v501_v61, %v503_v4  ;;  %v824_v24 = vshll.u32 %v2545_v21, 16  ;;  %v2278_v31 = vld [vmem:[%s2846_s1 + $0xc8] sm:$0xff]   ;;  %v2283_v50 = vld [vmem:[%s2846_s1 + $0xb8] sm:$0xff]  }
  0x1d   : > { %2030 = vmatpush3.bf16.msra.mxu0 %v2256_v28  ;;  %1985 = vmatprep.mubr.msk.bf16.mxu0 %vm2314_vm0, %v2313_v1  ;;  %v814_v19 = vrot.slane %v812_v15, 1  ;;  %v817_v20 = vrot.slane %v815_v16, 2  ;;  %v823_v26 = vrot.slane %v821_v23, 1  ;;  %v665_v28 = vrot.slane %v1800_v11, 1  ;;  %v2299_v16 = vld [vmem:[%s2846_s1 + $0x118] sm:$0xff]  }
  0x1e   : > { %2031 = vmatprep.subr.bf16.mxu0 %v2313_v1  ;;  %2004 = vmatpush3.bf16.msra.mxu1 %v2252_v30  ;;  %v826_v27 = vrot.slane %v824_v24, 2  ;;  %v666_v29 = vrot.slane %v2530_v9, 1  ;;  %v830_v32 = vshrl.u32 %v2472_v53, 16  ;;  %v839_v42 = vshrl.u32 %v2475_v54, 16  ;;  %v2296_v24 = vld [vmem:[%s2371_s25 + $0x24] ss:$0 sps:$4 sm:$0xff]  }
  0x1f   : > { %2005 = vmatprep.subr.bf16.mxu1 %v2313_v1  ;;  %v818_v22 = vor.u32 %v817_v20, %v814_v19  ;;  %v2701_v20 = vld [vmem:[%s2371_s25 + $0x28] ss:$0 sps:$4 sm:$0xff]  }
  0x20   : > { %v827_v30 = vor.u32 %v826_v27, %v823_v26  ;;  %v667_v33 = vsel %vm495_vm3, %v665_v28, %v666_v29  ;;  %v832_v36 = vrot.slane %v830_v32, 1  ;;  %v2300_v26 = vld [vmem:[%s2371_s25 + $0x8] sm:$0xf8]   ;;  %v2301_v27 = vld [vmem:[%s2371_s25 + $0x10] sm:$0xff]  }
  0x21   : > { %2032 = vmatpush3.bf16.msra.mxu0 %v2258_v34  ;;  %1994 = vmatmul.mubr.msk.bf16.gmra.mrb[4].mxu1 %vm285_vm2, %v257_v37  ;;  %v2274_v34 = vld [vmem:[%s2846_s1 + $0xa0] sm:$0xff]   ;;  %v1499_v32 = vrot.slane %v2300_v26, 3 }
  0x22   : > { %2033 = vmatprep.subr.bf16.mxu0 %v2313_v1  ;;  %2006 = vmatpush3.bf16.msra.mxu1 %v2257_v38  ;;  %v828_v35 = vsel %vm802_vm4, %v818_v22, %v827_v30  ;;  %v2281_v38 = vld [vmem:[%s2846_s1 + $0xd0] sm:$0xff]  }
  0x23   : > { %1997 = vmatprep.mubr.msk.bf16.mxu1 %vm2314_vm0, %v2313_v1  ;;  %2007 = vmatprep.subr.bf16.mxu1 %v2313_v1 }
  0x24   : > { %1986 = vmatmul.mubr.msk.bf16.gmra.mrb[4].mxu0 %vm285_vm2, %v241_v40  ;;  %v2277_v40 = vld [vmem:[%s2846_s1 + $0xa8] sm:$0xff]  }
  0x25   : > { %2034 = vmatpush3.bf16.msra.mxu0 %v2259_v39  ;;  %2037 = vmatprep.mubr.msk.bf16.mxu0 %vm2314_vm0, %v2313_v1  ;;  %v668_v39 = vrot.slane %v2545_v21, 1 }
  0x26   : > { %2035 = vmatprep.subr.bf16.mxu0 %v2313_v1  ;;  %2008 = vmatpush3.bf16.msra.mxu1 %v2260_v43  ;;  %v842_v43 = vshll.u32 %v2475_v54, 16  ;;  %v2292_v54 = vld [vmem:[%s2846_s1 + $0x108] sm:$0xff]  }
  0x27   : > { %2057 = vmatprep.subr.bf16.mxu1 %v2313_v1  ;;  %v669_v45 = vsel %vm495_vm3, %v666_v29, %v668_v39 }
  0x29   : > { %2036 = vmatpush3.bf16.msra.mxu0 %v2261_v44  ;;  %1998 = vmatmul.mubr.msk.bf16.gmra.mrb[8].mxu1 %vm285_vm2, %v260_v47  ;;  %v2284_v44 = vld [vmem:[%s2846_s1 + $0xd8] sm:$0xff]  }
  0x2a   : > { %2085 = vmatprep.subr.bf16.mxu0 %v2313_v1  ;;  %2009 = vmatprep.mubr.msk.bf16.mxu1 %vm2314_vm0, %v2313_v1 }
  0x2c   : > { %2038 = vmatmul.mubr.msk.bf16.vlgmr.msra.gmra.mrb[8].mxu0 %vm285_vm2, %v498_v48  ;;  %v841_v48 = vrot.slane %v839_v42, 1 }
  0x2d   : > { %2086 = vmatpush3.bf16.msra.mxu0 %v2264_v49  ;;  %2041 = vmatprep.mubr.msk.bf16.mxu0 %vm2314_vm0, %v2313_v1  ;;  %v844_v49 = vrot.slane %v842_v43, 2 }
  0x2e   : > { %2087 = vmatprep.subr.bf16.mxu0 %v2313_v1 }
  0x31   : > { %2088 = vmatpush3.bf16.msra.mxu0 %v2266_v51  ;;  %2010 = vmatmul.mubr.msk.bf16.vlgmr.msra.gmra.mrb[12].mxu1 %vm285_vm2, %v2386_v12  ;;  %v804_v12 = vshrl.u32 %v1800_v11, 16  ;;  %v845_v51 = vor.u32 %v844_v49, %v841_v48  ;;  %v2303_v48 = vld [vmem:[%s2371_s25 + $0x20] sm:$0xff]  }
  0x32   : > { %2089 = vmatprep.subr.bf16.mxu0 %v2313_v1  ;;  %2058 = vmatpush3.bf16.msra.mxu1 %v2263_v52  ;;  %v671_v52 = vsel %vm495_vm3, %v668_v39, %v670_v57  ;;  %v967_v57 = vld [vmem:[%s2371_s25 + $0x4] sm:$0xc] }
  0x33   : > { %2013 = vmatprep.mubr.msk.bf16.mxu1 %vm2314_vm0, %v2313_v1  ;;  %2059 = vmatprep.subr.bf16.mxu1 %v2313_v1  ;;  %v806_v17 = vrot.slane %v804_v12, 1  ;;  %v987_v12 = vrot.slane %v2545_v21, 2  ;;  %v989_v21 = vrot.slane %v2472_v53, 2 }
  0x34   : > { %2042 = vmatmul.mubr.msk.bf16.gmra.mrb[12].mxu0 %vm285_vm2, %v500_v55 }
  0x35   : > { %2045 = vmatprep.mubr.msk.bf16.mxu0 %vm2314_vm0, %v2313_v1  ;;  %2090 = vmatpush3.bf16.msra.mxu0 %v2268_v56  ;;  %v2629_v56 = vld [vmem:[%s2371_s25 + $0x8] sm:$0xfc]   ;;  %v990_v23 = vsel %vm983_vm5, %v987_v12, %v989_v21 }
  0x36   : > { %2091 = vmatprep.subr.bf16.mxu0 %v2313_v1  ;;  %2060 = vmatpush3.bf16.msra.mxu1 %v2265_v59  ;;  %v2632_v59 = vld [vmem:[%s2371_s25 + $0x10] sm:$0xff]   ;;  %v1153_v61 = vrot.slane %v2629_v56, 2  ;;  %v1292_v28 = vshrl.u32 %v2629_v56, 16  ;;  %v1295_v29 = vshll.u32 %v2629_v56, 16 }
  0x37   : > { %2061 = vmatprep.subr.bf16.mxu1 %v2313_v1 }
  0x39   : > { %2092 = vmatpush3.bf16.msra.mxu0 %v2271_v62  ;;  %2014 = vmatmul.mubr.msk.bf16.gmra.mrb[16].mxu1 %vm285_vm2, %v2389_v13  ;;  %v807_v13 = vshll.u32 %v1800_v11, 16  ;;  %v1154_v62 = vrot.slane %v2632_v59, 2  ;;  %v2295_v11 = vld [vmem:[%s2846_s1 + $0x110] sm:$0xff]  }
  0x3a   : > { %2141 = vmatprep.subr.bf16.mxu0 %v2313_v1  ;;  %2017 = vmatprep.mubr.msk.bf16.mxu1 %vm2314_vm0, %v2313_v1 }
  0x3b   : > { %2062 = vmatpush3.bf16.msra.mxu1 %v2267_v63  ;;  %v809_v18 = vrot.slane %v807_v13, 2  ;;  %v1823_v63 = vcombine.low %v967_v57, %v2527_v8  ;;  %v1155_v0 = vsel %vm983_vm5, %v1153_v61, %v1154_v62  ;;  %v2288_v8 = vld [vmem:[%s2846_s1 + $0xe0] sm:$0xff]   ;;  %v2291_v13 = vld [vmem:[%s2846_s1 + $0xe8] sm:$0xff]  }
  0x3c   : > { %2046 = vmatmul.mubr.msk.bf16.gmra.mrb[16].mxu0 %vm285_vm2, %v502_v2  ;;  %2063 = vmatprep.subr.bf16.mxu1 %v2313_v1  ;;  %v2650_v2 = vld [vmem:[%s2371_s25 + $0x18] sm:$0xff]   ;;  %v2304_v61 = vld [vmem:[%s2371_s25 + $0x28] sm:$0x1f]  }
  0x3d   : > { %2049 = vmatprep.mubr.msk.bf16.mxu0 %vm2314_vm0, %v2313_v1  ;;  %v1156_v7 = vrot.slane %v2650_v2, 2  ;;  %v1312_v42 = vshll.u32 %v2650_v2, 16 }
  0x3f   : > { %2064 = vmatpush3.bf16.msra.mxu1 %v2270_v3  ;;  %v984_v3 = vrot.slane %v1823_v63, 2  ;;  %v1327_v63 = vshrl.u32 %v2701_v20, 16 }
  0x40   : > { %2113 = vmatprep.subr.bf16.mxu1 %v2313_v1 }
  0x41   : > { %2018 = vmatmul.mubr.msk.bf16.gmra.mrb[20].mxu1 %vm285_vm2, %v2374_v5  ;;  %v810_v5 = vor.u32 %v809_v18, %v806_v17  ;;  %v2294_v18 = vld [vmem:[%s2846_s1 + $0xf0] sm:$0xff]  }
  0x42   : > { %2021 = vmatprep.mubr.msk.bf16.mxu1 %vm2314_vm0, %v2313_v1 }
  0x43   : > { %v819_v25 = vsel %vm802_vm4, %v810_v5, %v818_v22  ;;  %v2298_v5 = vld [vmem:[%s2846_s1 + $0xf8] sm:$0xff]   ;;  %v1160_v22 = vrot.slane %v2701_v20, 2 }
  0x44   : > { %2050 = vmatmul.mubr.msk.bf16.gmra.mrb[20].mxu0 %vm285_vm2, %v504_v10  ;;  %v2672_v10 = vld [vmem:[%s2371_s25 + $0x20] sm:$0xff]  }
  0x45   : > { %2053 = vmatprep.mubr.msk.bf16.mxu0 %vm2314_vm0, %v2313_v1  ;;  %v1158_v15 = vrot.slane %v2672_v10, 2 }
  0x47   : > { %v1159_v19 = vsel %vm983_vm5, %v1156_v7, %v1158_v15 }
  0x49   : > { %2022 = vmatmul.mubr.msk.bf16.gmra.mrb[24].mxu1 %vm285_vm2, %v2377_v6  ;;  %v2275_v6 = vld [vmem:[%s2846_s1 + $0xc0] sm:$0xff]  }
  0x4a   : > { %2025 = vmatprep.mubr.msk.bf16.mxu1 %vm2314_vm0, %v2313_v1 }
  0x4c   : > { %2054 = vmatmul.mubr.msk.bf16.gmra.mrb[24].mxu0 %vm285_vm2, %v503_v4  ;;  %v985_v4 = vrot.slane %v2530_v9, 2  ;;  %v1157_v9 = vsel %vm983_vm5, %v1154_v62, %v1156_v7 }
  0x4d   : > { %2093 = vmatprep.mubr.msk.bf16.mxu0 %vm2314_vm0, %v2313_v1 }
  0x4e   : > { %v988_v17 = vsel %vm983_vm5, %v985_v4, %v987_v12 }
  0x51   : > { %2026 = vmatmul.mubr.msk.bf16.gmra.mrb[28].mxu1 %vm285_vm2, %v2392_v14  ;;  %v833_v14 = vshll.u32 %v2472_v53, 16  ;;  %v1161_v53 = vsel %vm983_vm5, %v1158_v15, %v1160_v22 }
  0x52   : > { %2065 = vmatprep.mubr.msk.bf16.mxu1 %vm2314_vm0, %v2313_v1 }
  0x53   : > { %v835_v37 = vrot.slane %v833_v14, 2  ;;  %v1500_v14 = vrot.slane %v2301_v27, 3 }
  0x54   : > { %2094 = vmatmul.mubr.msk.bf16.vlgmr.msra.gmra.mrb[28].mxu0 %vm285_vm2, %v819_v25  ;;  %v991_v25 = vrot.slane %v2296_v24, 2 }
  0x55   : > { %2142 = vmatpush3.bf16.msra.mxu0 %v2275_v6  ;;  %2097 = vmatprep.mubr.msk.bf16.mxu0 %vm2314_vm0, %v2313_v1  ;;  %v836_v41 = vor.u32 %v835_v37, %v832_v36  ;;  %v1501_v37 = vsel %vm1498_vm6, %v1499_v32, %v1500_v14 }
  0x56   : > { %2143 = vmatprep.subr.bf16.mxu0 %v2313_v1  ;;  %v992_v6 = vsel %vm983_vm5, %v989_v21, %v991_v25 }
  0x57   : > { %v837_v47 = vsel %vm802_vm4, %v827_v30, %v836_v41  ;;  %v846_v55 = vsel %vm802_vm4, %v836_v41, %v845_v51  ;;  %v1300_v30 = vshrl.u32 %v2632_v59, 16  ;;  %v1309_v41 = vshrl.u32 %v2650_v2, 16 }
  0x59   : > { %2144 = vmatpush3.bf16.msra.mxu0 %v2278_v31  ;;  %2066 = vmatmul.mubr.msk.bf16.vlgmr.msra.gmra.mrb[32].mxu1 %vm285_vm2, %v667_v33  ;;  %v1303_v31 = vshll.u32 %v2632_v59, 16  ;;  %v1294_v33 = vrot.slane %v1292_v28, 2 }
  0x5a   : > { %2145 = vmatprep.subr.bf16.mxu0 %v2313_v1  ;;  %2114 = vmatpush3.bf16.msra.mxu1 %v2274_v34  ;;  %v1297_v34 = vrot.slane %v1295_v29, 3 }
  0x5b   : > { %2069 = vmatprep.mubr.msk.bf16.mxu1 %vm2314_vm0, %v2313_v1  ;;  %2115 = vmatprep.subr.bf16.mxu1 %v2313_v1  ;;  %v1305_v36 = vrot.slane %v1303_v31, 3 }
  0x5c   : > { %2098 = vmatmul.mubr.msk.bf16.gmra.mrb[32].mxu0 %vm285_vm2, %v828_v35  ;;  %v1302_v35 = vrot.slane %v1300_v30, 2  ;;  %v1298_v39 = vor.u32 %v1297_v34, %v1294_v33 }
  0x5d   : > { %2101 = vmatprep.mubr.msk.bf16.mxu0 %vm2314_vm0, %v2313_v1  ;;  %2146 = vmatpush3.bf16.msra.mxu0 %v2281_v38  ;;  %v2302_v38 = vld [vmem:[%s2371_s25 + $0x18] sm:$0xff]  }
  0x5e   : > { %2147 = vmatprep.subr.bf16.mxu0 %v2313_v1  ;;  %2116 = vmatpush3.bf16.msra.mxu1 %v2277_v40  ;;  %v1306_v40 = vor.u32 %v1305_v36, %v1302_v35  ;;  %v1502_v43 = vrot.slane %v2302_v38, 3 }
  0x5f   : > { %2117 = vmatprep.subr.bf16.mxu1 %v2313_v1 }
  0x61   : > { %2148 = vmatpush3.bf16.msra.mxu0 %v2284_v44  ;;  %2070 = vmatmul.mubr.msk.bf16.gmra.mrb[36].mxu1 %vm285_vm2, %v669_v45  ;;  %v1307_v44 = vsel %vm1290_vm7, %v1298_v39, %v1306_v40  ;;  %v1311_v45 = vrot.slane %v1309_v41, 2 }
  0x62   : > { %2197 = vmatprep.subr.bf16.mxu0 %v2313_v1  ;;  %2073 = vmatprep.mubr.msk.bf16.mxu1 %vm2314_vm0, %v2313_v1 }
  0x63   : > { %2118 = vmatpush3.bf16.msra.mxu1 %v2280_v46  ;;  %v1314_v46 = vrot.slane %v1312_v42, 3 }
  0x64   : > { %2102 = vmatmul.mubr.msk.bf16.gmra.mrb[36].mxu0 %vm285_vm2, %v837_v47  ;;  %2119 = vmatprep.subr.bf16.mxu1 %v2313_v1  ;;  %v1503_v47 = vsel %vm1498_vm6, %v1500_v14, %v1502_v43 }
  0x65   : > { %2105 = vmatprep.mubr.msk.bf16.mxu0 %vm2314_vm0, %v2313_v1  ;;  %v1315_v49 = vor.u32 %v1314_v46, %v1311_v45 }
  0x67   : > { %2120 = vmatpush3.bf16.msra.mxu1 %v2283_v50  ;;  %v1318_v50 = vshrl.u32 %v2672_v10, 16 }
  0x68   : > { %2169 = vmatprep.subr.bf16.mxu1 %v2313_v1 }
  0x69   : > { %2074 = vmatmul.mubr.msk.bf16.gmra.mrb[40].mxu1 %vm285_vm2, %v671_v52  ;;  %v1504_v52 = vrot.slane %v2303_v48, 3  ;;  %v1320_v56 = vrot.slane %v1318_v50, 2 }
  0x6a   : > { %2077 = vmatprep.mubr.msk.bf16.mxu1 %vm2314_vm0, %v2313_v1 }
  0x6b   : > { %v1505_v57 = vsel %vm1498_vm6, %v1502_v43, %v1504_v52 }
  0x6c   : > { %2106 = vmatmul.mubr.msk.bf16.gmra.mrb[40].mxu0 %vm285_vm2, %v846_v55  ;;  %v1316_v55 = vsel %vm1290_vm7, %v1306_v40, %v1315_v49 }
  0x6d   : > { %2109 = vmatprep.mubr.msk.bf16.mxu0 %vm2314_vm0, %v2313_v1 }
  0x71   : > { %2078 = vmatmul.mubr.msk.bf16.gmra.mrb[44].mxu1 %vm285_vm2, %v2496_v60  ;;  %v2289_v60 = vld [vmem:[%s2846_s1 + $0x100] sm:$0xff]  }
  0x72   : > { %2081 = vmatprep.mubr.msk.bf16.mxu1 %vm2314_vm0, %v2313_v1 }
  0x74   : > { %2110 = vmatmul.mubr.msk.bf16.gmra.mrb[44].mxu0 %vm285_vm2, %v845_v51  ;;  %v1321_v51 = vshll.u32 %v2672_v10, 16 }
  0x75   : > { %2149 = vmatprep.mubr.msk.bf16.mxu0 %vm2314_vm0, %v2313_v1 }
  0x76   : > { %v1323_v59 = vrot.slane %v1321_v51, 3 }
  0x78   : > { %v1324_v62 = vor.u32 %v1323_v59, %v1320_v56 }
  0x79   : > { %2082 = vmatmul.mubr.msk.bf16.gmra.mrb[48].mxu1 %vm285_vm2, %v672_v58  ;;  %v986_v58 = vsel %vm983_vm5, %v984_v3, %v985_v4  ;;  %v1329_v3 = vrot.slane %v1327_v63, 2 }
  0x7a   : > { %2121 = vmatprep.mubr.msk.bf16.mxu1 %vm2314_vm0, %v2313_v1  ;;  %v1325_v2 = vsel %vm1290_vm7, %v1315_v49, %v1324_v62 }
  0x7c   : > { %2150 = vmatmul.mubr.msk.bf16.vlgmr.msra.gmra.mrb[48].mxu0 %vm285_vm2, %v1155_v0  ;;  %v1330_v0 = vshll.u32 %v2701_v20, 16 }
  0x7d   : > { %2198 = vmatpush3.bf16.msra.mxu0 %v2289_v60  ;;  %2153 = vmatprep.mubr.msk.bf16.mxu0 %vm2314_vm0, %v2313_v1  ;;  %v1506_v60 = vrot.slane %v2304_v61, 3 }
  0x7e   : > { %2199 = vmatprep.subr.bf16.mxu0 %v2313_v1  ;;  %v1332_v4 = vrot.slane %v1330_v0, 3 }
  0x7f   : > { %v1507_v7 = vsel %vm1498_vm6, %v1504_v52, %v1506_v60 }
  0x81   : > { %2200 = vmatpush3.bf16.msra.mxu0 %v2292_v54  ;;  %2122 = vmatmul.mubr.msk.bf16.vlgmr.msra.gmra.mrb[52].mxu1 %vm285_vm2, %v986_v58  ;;  %v1333_v54 = vor.u32 %v1332_v4, %v1329_v3 }
  0x82   : > { %2201 = vmatprep.subr.bf16.mxu0 %v2313_v1  ;;  %2170 = vmatpush3.bf16.msra.mxu1 %v2288_v8 }
  0x83   : > { %2125 = vmatprep.mubr.msk.bf16.mxu1 %vm2314_vm0, %v2313_v1  ;;  %2171 = vmatprep.subr.bf16.mxu1 %v2313_v1  ;;  %v1334_v58 = vsel %vm1290_vm7, %v1324_v62, %v1333_v54 }
  0x84   : > { %2154 = vmatmul.mubr.msk.bf16.gmra.mrb[52].mxu0 %vm285_vm2, %v1157_v9 }
  0x85   : > { %2157 = vmatprep.mubr.msk.bf16.mxu0 %vm2314_vm0, %v2313_v1  ;;  %2202 = vmatpush3.bf16.msra.mxu0 %v2295_v11 }
  0x86   : > { %2203 = vmatprep.subr.bf16.mxu0 %v2313_v1  ;;  %2172 = vmatpush3.bf16.msra.mxu1 %v2291_v13 }
  0x87   : > { %2173 = vmatprep.subr.bf16.mxu1 %v2313_v1 }
  0x89   : > { %2204 = vmatpush3.bf16.msra.mxu0 %v2299_v16  ;;  %2126 = vmatmul.mubr.msk.bf16.gmra.mrb[56].mxu1 %vm285_vm2, %v988_v17 }
  0x8a   : > { %2129 = vmatprep.mubr.msk.bf16.mxu1 %vm2314_vm0, %v2313_v1  ;;  %2174 = vmatpush3.bf16.msra.mxu1 %v2294_v18 }
  0x8b   : > { %2175 = vmatprep.subr.bf16.mxu1 %v2313_v1 }
  0x8c   : > { %2158 = vmatmul.mubr.msk.bf16.gmra.mrb[56].mxu0 %vm285_vm2, %v1159_v19 }
  0x8d   : > { %2161 = vmatprep.mubr.msk.bf16.mxu0 %vm2314_vm0, %v2313_v1 }
  0x8e   : > { %2176 = vmatpush3.bf16.msra.mxu1 %v2298_v5 }
  0x91   : > { %2130 = vmatmul.mubr.msk.bf16.gmra.mrb[60].mxu1 %vm285_vm2, %v990_v23 }
  0x92   : > { %2133 = vmatprep.mubr.msk.bf16.mxu1 %vm2314_vm0, %v2313_v1 }
  0x94   : > { %2162 = vmatmul.mubr.msk.bf16.gmra.mrb[60].mxu0 %vm285_vm2, %v1161_v53 }
  0x95   : > { %2165 = vmatprep.mubr.msk.bf16.mxu0 %vm2314_vm0, %v2313_v1 }
  0x99   : > { %2134 = vmatmul.mubr.msk.bf16.gmra.mrb[64].mxu1 %vm285_vm2, %v992_v6 }
  0x9a   : > { %2137 = vmatprep.mubr.msk.bf16.mxu1 %vm2314_vm0, %v2313_v1 }
  0x9c   : > { %2166 = vmatmul.mubr.msk.bf16.gmra.mrb[64].mxu0 %vm285_vm2, %v1160_v22 }
  0x9d   : > { %2205 = vmatprep.mubr.msk.bf16.mxu0 %vm2314_vm0, %v2313_v1 }
  0xa1   : > { %2138 = vmatmul.mubr.msk.bf16.gmra.mrb[68].mxu1 %vm285_vm2, %v991_v25 }
  0xa2   : > { %2177 = vmatprep.mubr.msk.bf16.mxu1 %vm2314_vm0, %v2313_v1 }
  0xa4   : > { %2206 = vmatmul.mubr.msk.bf16.vlgmr.msra.gmra.mrb[68].mxu0 %vm285_vm2, %v1501_v37 }
  0xa5   : > { %2209 = vmatprep.mubr.msk.bf16.mxu0 %vm2314_vm0, %v2313_v1 }
  0xa9   : > { %2178 = vmatmul.mubr.msk.bf16.vlgmr.msra.gmra.mrb[72].mxu1 %vm285_vm2, %v1307_v44 }
  0xaa   : > { %2181 = vmatprep.mubr.msk.bf16.mxu1 %vm2314_vm0, %v2313_v1 }
  0xac   : > { %2210 = vmatmul.mubr.msk.bf16.gmra.mrb[72].mxu0 %vm285_vm2, %v1503_v47 }
  0xad   : > { %2213 = vmatprep.mubr.msk.bf16.mxu0 %vm2314_vm0, %v2313_v1 }
  0xb1   : > { %2182 = vmatmul.mubr.msk.bf16.gmra.mrb[76].mxu1 %vm285_vm2, %v1316_v55 }
  0xb2   : > { %2185 = vmatprep.mubr.msk.bf16.mxu1 %vm2314_vm0, %v2313_v1 }
  0xb4   : > { %2214 = vmatmul.mubr.msk.bf16.gmra.mrb[76].mxu0 %vm285_vm2, %v1505_v57 }
  0xb5   : > { %2217 = vmatprep.mubr.msk.bf16.mxu0 %vm2314_vm0, %v2313_v1 }
  0xb9   : > { %2186 = vmatmul.mubr.msk.bf16.gmra.mrb[80].mxu1 %vm285_vm2, %v1325_v2 }
  0xba   : > { %2189 = vmatprep.mubr.msk.bf16.mxu1 %vm2314_vm0, %v2313_v1 }
  0xbc   : > { %2218 = vmatmul.mubr.msk.bf16.gmra.mrb[80].mxu0 %vm285_vm2, %v1507_v7 }
  0xbd   : > { %2221 = vmatprep.mubr.msk.bf16.mxu0 %vm2314_vm0, %v2313_v1 }
  0xc1   : > { %2190 = vmatmul.mubr.msk.bf16.gmra.mrb[84].mxu1 %vm285_vm2, %v1334_v58 }
  0xc2   : > { %2193 = vmatprep.mubr.msk.bf16.mxu1 %vm2314_vm0, %v2313_v1 }
  0xc4   : > { %2222 = vmatmul.mubr.msk.bf16.gmra.mrb[84].mxu0 %vm285_vm2, %v1506_v60 }
  0xc9   : > { %2194 = vmatmul.mubr.msk.bf16.gmra.mrb[88].mxu1 %vm285_vm2, %v1333_v54 }
  0xec   : > { %v351_v8 = vpop.f32.mrb[0].mxu1 }
  0xed   : > { %v1991_v9 = vpop.f32.mrb[1].mxu1 }
  0xee   : > { %v354_v10 = vpop.f32.mrb[2].mxu1 }
  0xef   : > { %v335_v11 = vpop.f32.mrb[0].mxu0  ;;  %v1992_v12 = vpop.f32.mrb[3].mxu1 }
  0xf0   : > { %v1983_v13 = vpop.f32.mrb[1].mxu0 }
  0xf1   : > { %v338_v15 = vpop.f32.mrb[2].mxu0 }
  0xf2   : > { %v1984_v16 = vpop.f32.mrb[3].mxu0 }
  0xf4   : > { %v359_v17 = vpop.f32.mrb[4].mxu1 }
  0xf5   : > { %v1995_v18 = vpop.f32.mrb[5].mxu1 }
  0xf6   : > { %v362_v19 = vpop.f32.mrb[6].mxu1 }
  0xf7   : > { %v343_v20 = vpop.f32.mrb[4].mxu0  ;;  %v1996_v21 = vpop.f32.mrb[7].mxu1 }
  0xf8   : > { %v1987_v5 = vpop.f32.mrb[5].mxu0 }
  0xf9   : > { %v346_v22 = vpop.f32.mrb[6].mxu0 }
  0xfa   : > { %v1988_v1 = vpop.f32.mrb[7].mxu0 }
  0xfc   : > { %v367_v23 = vpop.f32.mrb[8].mxu1 }
  0xfd   : > { %v1999_v24 = vpop.f32.mrb[9].mxu1 }
  0xfe   : > { %v370_v53 = vpop.f32.mrb[10].mxu1 }
  0xff   : > { %v578_v25 = vpop.f32.mrb[8].mxu0  ;;  %v2000_v6 = vpop.f32.mrb[11].mxu1 }
 0x100   : > { %v2039_v26 = vpop.f32.mrb[9].mxu0 }
 0x101   : > { %v581_v27 = vpop.f32.mrb[10].mxu0 }
 0x102   : > { %v2040_v28 = vpop.f32.mrb[11].mxu0 }
 0x104   : > { %v441_v29 = vpop.f32.mrb[12].mxu1 }
 0x105   : > { %v442_v30 = vadd.f32 %v441_v29, %v335_v11  ;;  %v2011_v31 = vpop.f32.mrb[13].mxu1 }
 0x106   : > { %v444_v32 = vpop.f32.mrb[14].mxu1 }
 0x107   : > { %v586_v14 = vpop.f32.mrb[12].mxu0  ;;  %v616_v33 = vadd.f32 %v578_v25, %v442_v30  ;;  %v445_v34 = vadd.f32 %v444_v32, %v338_v15  ;;  %v2012_v35 = vpop.f32.mrb[15].mxu1 }
 0x108   : > { %v2043_v36 = vpop.f32.mrb[13].mxu0 }
 0x109   : > { %v589_v37 = vpop.f32.mrb[14].mxu0  ;;  %v617_v38 = vadd.f32 %v581_v27, %v445_v34 }
 0x10a   : > { %v2044_v39 = vpop.f32.mrb[15].mxu0 }
 0x10c   : > { %v449_v40 = vpop.f32.mrb[16].mxu1 }
 0x10d   : > { %v450_v41 = vadd.f32 %v449_v40, %v343_v20  ;;  %v2015_v42 = vpop.f32.mrb[17].mxu1 }
 0x10e   : > { %v452_v43 = vpop.f32.mrb[18].mxu1 }
 0x10f   : > { %v594_v44 = vpop.f32.mrb[16].mxu0  ;;  %v618_v45 = vadd.f32 %v586_v14, %v450_v41  ;;  %v453_v46 = vadd.f32 %v452_v43, %v346_v22  ;;  %v2016_v47 = vpop.f32.mrb[19].mxu1 }
 0x110   : > { %v2047_v48 = vpop.f32.mrb[17].mxu0 }
 0x111   : > { %v597_v49 = vpop.f32.mrb[18].mxu0  ;;  %v619_v50 = vadd.f32 %v589_v37, %v453_v46 }
 0x112   : > { %v2048_v51 = vpop.f32.mrb[19].mxu0 }
 0x114   : > { %v457_v52 = vpop.f32.mrb[20].mxu1 }
 0x115   : > { %v458_v55 = vadd.f32 %v457_v52, %v351_v8  ;;  %v2019_v56 = vpop.f32.mrb[21].mxu1 }
 0x116   : > { %v460_v59 = vpop.f32.mrb[22].mxu1 }
 0x117   : > { %v602_v57 = vpop.f32.mrb[20].mxu0  ;;  %v620_v61 = vadd.f32 %v594_v44, %v458_v55  ;;  %v461_v62 = vadd.f32 %v460_v59, %v354_v10  ;;  %v2020_v63 = vpop.f32.mrb[23].mxu1 }
 0x118   : > { %v2051_v0 = vpop.f32.mrb[21].mxu0 }
 0x119   : > { %v605_v60 = vpop.f32.mrb[22].mxu0  ;;  %v621_v2 = vadd.f32 %v597_v49, %v461_v62 }
 0x11a   : > { %v2052_v3 = vpop.f32.mrb[23].mxu0 }
 0x11c   : > { %v465_v4 = vpop.f32.mrb[24].mxu1 }
 0x11d   : > { %v466_v7 = vadd.f32 %v465_v4, %v359_v17  ;;  %v2023_v54 = vpop.f32.mrb[25].mxu1 }
 0x11e   : > { %v468_v58 = vpop.f32.mrb[26].mxu1 }
 0x11f   : > { %v610_v9 = vpop.f32.mrb[24].mxu0  ;;  %v622_v11 = vadd.f32 %v602_v57, %v466_v7  ;;  %v469_v12 = vadd.f32 %v468_v58, %v362_v19  ;;  %v2024_v13 = vpop.f32.mrb[27].mxu1 }
 0x120   : > { %v2055_v15 = vpop.f32.mrb[25].mxu0 }
 0x121   : > { %v613_v8 = vpop.f32.mrb[26].mxu0  ;;  %v623_v16 = vadd.f32 %v605_v60, %v469_v12 }
 0x122   : > { %v2056_v18 = vpop.f32.mrb[27].mxu0 }
 0x124   : > { %v473_v20 = vpop.f32.mrb[28].mxu1 }
 0x125   : > { %v474_v21 = vadd.f32 %v473_v20, %v367_v23  ;;  %v2027_v10 = vpop.f32.mrb[29].mxu1 }
 0x126   : > { %v476_v5 = vpop.f32.mrb[30].mxu1 }
 0x127   : > { %v920_v22 = vpop.f32.mrb[28].mxu0  ;;  %v624_v1 = vadd.f32 %v610_v9, %v474_v21  ;;  %v2028_v24 = vpop.f32.mrb[31].mxu1 }
 0x128   : > { %v2095_v53 = vpop.f32.mrb[29].mxu0 }
 0x129   : > { %v923_v25 = vpop.f32.mrb[30].mxu0 }
 0x12a   : > { %v2096_v17 = vpop.f32.mrb[31].mxu0 }
 0x12c   : > { %v747_v6 = vpop.f32.mrb[32].mxu1 }
 0x12d   : > { %v785_v26 = vadd.f32 %v747_v6, %v616_v33  ;;  %v2067_v27 = vpop.f32.mrb[33].mxu1 }
 0x12e   : > { %v750_v28 = vpop.f32.mrb[34].mxu1 }
 0x12f   : > { %v928_v19 = vpop.f32.mrb[32].mxu0  ;;  %v958_v29 = vadd.f32 %v920_v22, %v785_v26  ;;  %v786_v30 = vadd.f32 %v750_v28, %v617_v38  ;;  %v2068_v31 = vpop.f32.mrb[35].mxu1 }
 0x130   : > { %v2099_v32 = vpop.f32.mrb[33].mxu0 }
 0x131   : > { %v931_v14 = vpop.f32.mrb[34].mxu0  ;;  %v959_v34 = vadd.f32 %v923_v25, %v786_v30 }
 0x132   : > { %v2100_v23 = vpop.f32.mrb[35].mxu0 }
 0x134   : > { %v755_v35 = vpop.f32.mrb[36].mxu1 }
 0x135   : > { %v787_v36 = vadd.f32 %v755_v35, %v618_v45  ;;  %v2071_v37 = vpop.f32.mrb[37].mxu1 }
 0x136   : > { %v758_v39 = vpop.f32.mrb[38].mxu1 }
 0x137   : > { %v936_v40 = vpop.f32.mrb[36].mxu0  ;;  %v960_v41 = vadd.f32 %v928_v19, %v787_v36  ;;  %v788_v42 = vadd.f32 %v758_v39, %v619_v50  ;;  %v2072_v43 = vpop.f32.mrb[39].mxu1 }
 0x138   : > { %v2103_v44 = vpop.f32.mrb[37].mxu0 }
 0x139   : > { %v939_v33 = vpop.f32.mrb[38].mxu0  ;;  %v961_v46 = vadd.f32 %v931_v14, %v788_v42 }
 0x13a   : > { %v2104_v47 = vpop.f32.mrb[39].mxu0 }
 0x13c   : > { %v763_v48 = vpop.f32.mrb[40].mxu1 }
 0x13d   : > { %v789_v49 = vadd.f32 %v763_v48, %v620_v61  ;;  %v2075_v38 = vpop.f32.mrb[41].mxu1 }
 0x13e   : > { %v766_v51 = vpop.f32.mrb[42].mxu1 }
 0x13f   : > { %v944_v52 = vpop.f32.mrb[40].mxu0  ;;  %v962_v55 = vadd.f32 %v936_v40, %v789_v49  ;;  %v790_v56 = vadd.f32 %v766_v51, %v621_v2  ;;  %v2076_v59 = vpop.f32.mrb[43].mxu1 }
 0x140   : > { %v2107_v57 = vpop.f32.mrb[41].mxu0 }
 0x141   : > { %v947_v45 = vpop.f32.mrb[42].mxu0  ;;  %v963_v62 = vadd.f32 %v939_v33, %v790_v56 }
 0x142   : > { %v2108_v63 = vpop.f32.mrb[43].mxu0 }
 0x144   : > { %v771_v0 = vpop.f32.mrb[44].mxu1 }
 0x145   : > { %v791_v60 = vadd.f32 %v771_v0, %v622_v11  ;;  %v2079_v50 = vpop.f32.mrb[45].mxu1 }
 0x146   : > { %v774_v3 = vpop.f32.mrb[46].mxu1 }
 0x147   : > { %v952_v4 = vpop.f32.mrb[44].mxu0  ;;  %v964_v7 = vadd.f32 %v944_v52, %v791_v60  ;;  %v792_v54 = vadd.f32 %v774_v3, %v623_v16  ;;  %v2080_v58 = vpop.f32.mrb[47].mxu1 }
 0x148   : > { %v2111_v9 = vpop.f32.mrb[45].mxu0 }
 0x149   : > { %v955_v61 = vpop.f32.mrb[46].mxu0  ;;  %v965_v12 = vadd.f32 %v947_v45, %v792_v54 }
 0x14a   : > { %v2112_v13 = vpop.f32.mrb[47].mxu0 }
 0x14c   : > { %v779_v15 = vpop.f32.mrb[48].mxu1 }
 0x14d   : > { %v793_v8 = vadd.f32 %v779_v15, %v624_v1  ;;  %v2083_v2 = vpop.f32.mrb[49].mxu1 }
 0x14e   : > { %v782_v18 = vpop.f32.mrb[50].mxu1 }
 0x14f   : > { %v1235_v20 = vpop.f32.mrb[48].mxu0  ;;  %v966_v21 = vadd.f32 %v952_v4, %v793_v8  ;;  %v2084_v10 = vpop.f32.mrb[51].mxu1 }
 0x150   : > { %v2151_v5 = vpop.f32.mrb[49].mxu0 }
 0x151   : > { %v1238_v22 = vpop.f32.mrb[50].mxu0 }
 0x152   : > { %v2152_v11 = vpop.f32.mrb[51].mxu0 }
 0x154   : > { %v1066_v24 = vpop.f32.mrb[52].mxu1 }
 0x155   : > { %v1104_v53 = vadd.f32 %v1066_v24, %v958_v29  ;;  %v2123_v25 = vpop.f32.mrb[53].mxu1 }
 0x156   : > { %v1069_v17 = vpop.f32.mrb[54].mxu1 }
 0x157   : > { %v1243_v16 = vpop.f32.mrb[52].mxu0  ;;  %v1273_v6 = vadd.f32 %v1235_v20, %v1104_v53  ;;  %v1105_v26 = vadd.f32 %v1069_v17, %v959_v34  ;;  %v2124_v27 = vpop.f32.mrb[55].mxu1 }
 0x158   : > { %v2155_v28 = vpop.f32.mrb[53].mxu0 }
 0x159   : > { %v1246_v19 = vpop.f32.mrb[54].mxu0  ;;  %v1274_v30 = vadd.f32 %v1238_v22, %v1105_v26  ;;  %v2800_v22 = vld [vmem:[%s2847_s2] ss:$0 sm:$0xff] }
 0x15a   : > { %v2156_v1 = vpop.f32.mrb[55].mxu0 }
 0x15c   : > { %v1074_v31 = vpop.f32.mrb[56].mxu1 }
 0x15d   : > { %v1106_v32 = vadd.f32 %v1074_v31, %v960_v41  ;;  %v2127_v14 = vpop.f32.mrb[57].mxu1 }
 0x15e   : > { %v1077_v23 = vpop.f32.mrb[58].mxu1 }
 0x15f   : > { %v1251_v35 = vpop.f32.mrb[56].mxu0  ;;  %v2783_v36 = vadd.f32 %v1243_v16, %v1106_v32  ;;  %v1107_v37 = vadd.f32 %v1077_v23, %v961_v46  ;;  %v2128_v39 = vpop.f32.mrb[59].mxu1 }
 0x160   : > { %v2159_v29 = vpop.f32.mrb[57].mxu0 }
 0x161   : > { %v1254_v40 = vpop.f32.mrb[58].mxu0  ;;  %v2785_v42 = vadd.f32 %v1246_v19, %v1107_v37 }
 0x162   : > { %v2160_v43 = vpop.f32.mrb[59].mxu0 }
 0x164   : > { %v1082_v34 = vpop.f32.mrb[60].mxu1 }
 0x165   : > { %v1108_v44 = vadd.f32 %v1082_v34, %v962_v55  ;;  %v2131_v33 = vpop.f32.mrb[61].mxu1 }
 0x166   : > { %v1085_v47 = vpop.f32.mrb[62].mxu1 }
 0x167   : > { %v1259_v48 = vpop.f32.mrb[60].mxu0  ;;  %v2787_v49 = vadd.f32 %v1251_v35, %v1108_v44  ;;  %v1109_v41 = vadd.f32 %v1085_v47, %v963_v62  ;;  %v2132_v38 = vpop.f32.mrb[63].mxu1 }
 0x168   : > { %v2163_v51 = vpop.f32.mrb[61].mxu0 }
 0x169   : > { %v1262_v52 = vpop.f32.mrb[62].mxu0  ;;  %v2789_v56 = vadd.f32 %v1254_v40, %v1109_v41 }
 0x16a   : > { %v2164_v46 = vpop.f32.mrb[63].mxu0 }
 0x16c   : > { %v1090_v59 = vpop.f32.mrb[64].mxu1 }
 0x16d   : > { %v1110_v57 = vadd.f32 %v1090_v59, %v964_v7  ;;  %v2135_v45 = vpop.f32.mrb[65].mxu1 }
 0x16e   : > { %v1093_v63 = vpop.f32.mrb[66].mxu1 }
 0x16f   : > { %v1267_v0 = vpop.f32.mrb[64].mxu0  ;;  %v2791_v60 = vadd.f32 %v1259_v48, %v1110_v57  ;;  %v1111_v55 = vadd.f32 %v1093_v63, %v965_v12  ;;  %v2136_v50 = vpop.f32.mrb[67].mxu1 }
 0x170   : > { %v2167_v3 = vpop.f32.mrb[65].mxu0 }
 0x171   : > { %v1270_v4 = vpop.f32.mrb[66].mxu0  ;;  %v2793_v54 = vadd.f32 %v1262_v52, %v1111_v55 }
 0x172   : > { %v2168_v62 = vpop.f32.mrb[67].mxu0 }
 0x174   : > { %v1098_v58 = vpop.f32.mrb[68].mxu1 }
 0x175   : > { %v1112_v9 = vadd.f32 %v1098_v58, %v966_v21  ;;  %v2139_v61 = vpop.f32.mrb[69].mxu1 }
 0x176   : > { %v1101_v13 = vpop.f32.mrb[70].mxu1 }
 0x177   : > { %v1581_v15 = vpop.f32.mrb[68].mxu0  ;;  %v2795_v8 = vadd.f32 %v1267_v0, %v1112_v9  ;;  %v2140_v7 = vpop.f32.mrb[71].mxu1 }
 0x178   : > { %v2207_v2 = vpop.f32.mrb[69].mxu0 }
 0x179   : > { %v1584_v18 = vpop.f32.mrb[70].mxu0 }
 0x17a   : > { %v2208_v20 = vpop.f32.mrb[71].mxu0 }
 0x17c   : > { %v1408_v10 = vpop.f32.mrb[72].mxu1 }
 0x17d   : > { %v1446_v12 = vadd.f32 %v1408_v10, %v1273_v6  ;;  %v2179_v5 = vpop.f32.mrb[73].mxu1 }
 0x17e   : > { %v1411_v11 = vpop.f32.mrb[74].mxu1 }
 0x17f   : > { %v1589_v21 = vpop.f32.mrb[72].mxu0  ;;  %v1619_v24 = vadd.f32 %v1581_v15, %v1446_v12  ;;  %v1447_v53 = vadd.f32 %v1411_v11, %v1274_v30  ;;  %v2180_v25 = vpop.f32.mrb[75].mxu1 }
 0x180   : > { %v2211_v17 = vpop.f32.mrb[73].mxu0 }
 0x181   : > { %v1592_v16 = vpop.f32.mrb[74].mxu0  ;;  %v1634_v26 = vadd.f32 %v2800_v22, %v1619_v24  ;;  %v1620_v27 = vadd.f32 %v1584_v18, %v1447_v53 }
 0x182   : > { %v2212_v28 = vpop.f32.mrb[75].mxu0 }
 0x183   : > { %v1643_v19 = vmax.f32 %v1634_v26, 0.0  ;;  %v1635_v6 = vadd.f32 %v2800_v22, %v1620_v27 }
 0x184   : > { %v1416_v30 = vpop.f32.mrb[76].mxu1 }
 0x185   : > { %v1883_v1 = vpack.c.bf16 %v1643_v19, %v1643_v19  ;;  %v1644_v31 = vmax.f32 %v1635_v6, 0.0  ;;  %v1448_v32 = vadd.f32 %v1416_v30, %v2783_v36  ;;  %v2183_v14 = vpop.f32.mrb[77].mxu1 }
 0x186   : > { %v1419_v23 = vpop.f32.mrb[78].mxu1 }
 0x187   : > { %v1597_v35 = vpop.f32.mrb[76].mxu0  ;;  %1690 = vst.msk [vmem:[%s2808_s21] sm:$0xf] %vm1689_vm8, %v1883_v1  ;;  %v1884_v37 = vpack.c.bf16 %v1644_v31, %v1644_v31  ;;  %v1621_v39 = vadd.f32 %v1589_v21, %v1448_v32  ;;  %v1449_v29 = vadd.f32 %v1419_v23, %v2785_v42  ;;  %v2184_v40 = vpop.f32.mrb[79].mxu1  ;;  %v1701_v32 = vld [vmem:[%s2808_s21 + $0x20] sm:$0x3] }
 0x188   : > { %v2215_v43 = vpop.f32.mrb[77].mxu0 }
 0x189   : > { %v1600_v34 = vpop.f32.mrb[78].mxu0  ;;  %1691 = vst.msk [vmem:[%s2808_s21 + $0x4] sm:$0xf] %vm1689_vm8, %v1884_v37  ;;  %v1636_v44 = vadd.f32 %v2800_v22, %v1621_v39  ;;  %v1622_v33 = vadd.f32 %v1592_v16, %v1449_v29 }
 0x18a   : > { %v2216_v47 = vpop.f32.mrb[79].mxu0 }
 0x18b   : > { %v1645_v36 = vmax.f32 %v1636_v44, 0.0  ;;  %v1637_v48 = vadd.f32 %v2800_v22, %v1622_v33 }
 0x18c   : > { %v1424_v41 = vpop.f32.mrb[80].mxu1 }
 0x18d   : > { %v1885_v38 = vpack.c.bf16 %v1645_v36, %v1645_v36  ;;  %v1646_v51 = vmax.f32 %v1637_v48, 0.0  ;;  %v1450_v52 = vadd.f32 %v1424_v41, %v2787_v49  ;;  %v2187_v42 = vpop.f32.mrb[81].mxu1 }
 0x18e   : > { %v1427_v46 = vpop.f32.mrb[82].mxu1 }
 0x18f   : > { %v1605_v59 = vpop.f32.mrb[80].mxu0  ;;  %1692 = vst.msk [vmem:[%s2808_s21 + $0x8] sm:$0xf] %vm1689_vm8, %v1885_v38  ;;  %v1886_v57 = vpack.c.bf16 %v1646_v51, %v1646_v51  ;;  %v1623_v45 = vadd.f32 %v1597_v35, %v1450_v52  ;;  %v1451_v63 = vadd.f32 %v1427_v46, %v2789_v56  ;;  %v2188_v0 = vpop.f32.mrb[83].mxu1 }
 0x190   : > { %v2219_v55 = vpop.f32.mrb[81].mxu0 }
 0x191   : > { %v1608_v50 = vpop.f32.mrb[82].mxu0  ;;  %1693 = vst.msk [vmem:[%s2808_s21 + $0xc] sm:$0xf] %vm1689_vm8, %v1886_v57  ;;  %v1638_v3 = vadd.f32 %v2800_v22, %v1623_v45  ;;  %v1624_v4 = vadd.f32 %v1600_v34, %v1451_v63 }
 0x192   : > { %v2220_v62 = vpop.f32.mrb[83].mxu0 }
 0x193   : > { %v1647_v49 = vmax.f32 %v1638_v3, 0.0  ;;  %v1639_v58 = vadd.f32 %v2800_v22, %v1624_v4 }
 0x194   : > { %v1432_v9 = vpop.f32.mrb[84].mxu1 }
 0x195   : > { %v1887_v61 = vpack.c.bf16 %v1647_v49, %v1647_v49  ;;  %v1648_v13 = vmax.f32 %v1639_v58, 0.0  ;;  %v1452_v15 = vadd.f32 %v1432_v9, %v2791_v60  ;;  %v2191_v56 = vpop.f32.mrb[85].mxu1 }
 0x196   : > { %v1435_v7 = vpop.f32.mrb[86].mxu1 }
 0x197   : > { %v1613_v2 = vpop.f32.mrb[84].mxu0  ;;  %1694 = vst.msk [vmem:[%s2808_s21 + $0x10] sm:$0xf] %vm1689_vm8, %v1887_v61  ;;  %v1888_v18 = vpack.c.bf16 %v1648_v13, %v1648_v13  ;;  %v1625_v20 = vadd.f32 %v1605_v59, %v1452_v15  ;;  %v1453_v10 = vadd.f32 %v1435_v7, %v2793_v54  ;;  %v2192_v12 = vpop.f32.mrb[87].mxu1 }
 0x198   : > { %v2223_v5 = vpop.f32.mrb[85].mxu0 }
 0x199   : > { %v1616_v11 = vpop.f32.mrb[86].mxu0  ;;  %1695 = vst.msk [vmem:[%s2808_s21 + $0x14] sm:$0xf] %vm1689_vm8, %v1888_v18  ;;  %v1640_v21 = vadd.f32 %v2800_v22, %v1625_v20  ;;  %v1626_v24 = vadd.f32 %v1608_v50, %v1453_v10 }
 0x19a   : > { %v2224_v60 = vpop.f32.mrb[87].mxu0 }
 0x19b   : > { %v1649_v53 = vmax.f32 %v1640_v21, 0.0  ;;  %v1641_v25 = vadd.f32 %v2800_v22, %v1626_v24 }
 0x19c   : > { %v1440_v17 = vpop.f32.mrb[88].mxu1 }
 0x19d   : > { %v1889_v16 = vpack.c.bf16 %v1649_v53, %v1649_v53  ;;  %v1650_v26 = vmax.f32 %v1641_v25, 0.0  ;;  %v1454_v54 = vadd.f32 %v1440_v17, %v2795_v8  ;;  %v2195_v27 = vpop.f32.mrb[89].mxu1 }
 0x19e   : > { %v1443_v28 = vpop.f32.mrb[90].mxu1 }
 0x19f   : > { %1696 = vst.msk [vmem:[%s2808_s21 + $0x18] sm:$0xf] %vm1689_vm8, %v1889_v16  ;;  %v1890_v19 = vpack.c.bf16 %v1650_v26, %v1650_v26  ;;  %v1627_v6 = vadd.f32 %v1613_v2, %v1454_v54  ;;  %v2196_v30 = vpop.f32.mrb[91].mxu1 }
 0x1a1   : > { %1697 = vst.msk [vmem:[%s2808_s21 + $0x1c] sm:$0xf] %vm1689_vm8, %v1890_v19  ;;  %v1642_v1 = vadd.f32 %v2800_v22, %v1627_v6 }
 0x1a3   : > { %v1651_v31 = vmax.f32 %v1642_v1, 0.0 }
 0x1a5   : > { %v1891_v14 = vpack.c.bf16 %v1651_v31, %v1651_v31 }
 0x1a7   : > { %v1702_v23 = vsel %vm1700_vm11, %v1891_v14, %v1701_v32 }
 0x1a8   : > { %1703 = vst [vmem:[%s2808_s21 + $0x20] sm:$0x3] %v1702_v23 }
 0x1a9 PF: > { %s13_s12 = sadd.s32 1, %s2311_s12  }
 0x1aa   : > { %p10_p4 = scmp.ge.s32.totalorder %s13_s12, 4  }
 0x1ac   :  { %12 = sbr.rel (!%p10_p4) target bundleno = 1 (0x1), region = 62 }

// kernel: dqn_forward.7
= control target key start
LH: loop header
LB: loop body
LE: loop exit
PB: predicated region body
PF: predicated region fallthrough
CT: control target
= control target key end

     0   :  { %v812_v36 = vlaneseq  ;;  %v8582_v37 = vmov 1966171168   ;;  %s11224_s0 = inlined_call_operand.vmem [shape: bf16[2,3136], index: 0, kind: input, shape index: {}]   ;;  %s11225_s1 = inlined_call_operand.vmem [shape: bf16[3136,512], index: 1, kind: input, shape index: {}]   ;;  %s11226_s2 = inlined_call_operand.vmem [shape: f32[1,512], index: 2, kind: input, shape index: {}]   ;;  %s11227_s3 = inlined_call_operand.vmem [shape: bf16[512,4], index: 3, kind: input, shape index: {}]   ;;  %s11228_s4 = inlined_call_operand.vmem [shape: f32[1,4], index: 4, kind: input, shape index: {}]   ;;  %s11229_s5 = inlined_call_operand.hbm [shape: f32[2,4], index: 5, kind: output, shape index: {}]  }
   0x1   :  { %v7345_v0 = vld [vmem:[%s11225_s1 + $0x4] ss:$16 sps:$4 sm:$0xff]   ;;  %v7347_v1 = vld [vmem:[%s11225_s1 + $0xc] ss:$16 sps:$4 sm:$0xff]   ;;  %v7349_v2 = vld [vmem:[%s11225_s1] ss:$16 sps:$4 sm:$0xff]   ;;  %v838_v38 = vunpack.c.l.s4 %v8582_v37 }
   0x2   :  { %4945 = vmatprep.subr.bf16.mxu0 %v7345_v0  ;;  %v7350_v3 = vld [vmem:[%s11225_s1 + $0x8] ss:$16 sps:$4 sm:$0xff]   ;;  %5478 = vmatprep.subr.bf16.mxu1 %v7347_v1  ;;  %v7351_v4 = vld [vmem:[%s11225_s1 + $0x24] ss:$16 sps:$4 sm:$0xff]   ;;  %v7353_v5 = vld [vmem:[%s11225_s1 + $0x2c] ss:$16 sps:$4 sm:$0xff]  }
   0x3   :  { %4946 = vmatpush1.bf16.msra.mxu0 %v7349_v2  ;;  %5479 = vmatpush1.bf16.msra.mxu1 %v7350_v3  ;;  %v7355_v6 = vld [vmem:[%s11225_s1 + $0x20] ss:$16 sps:$4 sm:$0xff]   ;;  %v7356_v7 = vld [vmem:[%s11225_s1 + $0x28] ss:$16 sps:$4 sm:$0xff]   ;;  %v7357_v8 = vld [vmem:[%s11225_s1 + $0x44] ss:$16 sps:$4 sm:$0xff]   ;;  %v839_v43 = vunpack.c.0.s8 %v838_v38 }
   0x4   :  { %4947 = vmatprep.subr.bf16.mxu0 %v7351_v4  ;;  %5480 = vmatprep.subr.bf16.mxu1 %v7353_v5  ;;  %v7359_v9 = vld [vmem:[%s11225_s1 + $0x4c] ss:$16 sps:$4 sm:$0xff]   ;;  %v7361_v10 = vld [vmem:[%s11225_s1 + $0x40] ss:$16 sps:$4 sm:$0xff]   ;;  %v7362_v11 = vld [vmem:[%s11225_s1 + $0x48] ss:$16 sps:$4 sm:$0xff]  }
   0x5   :  { %v7363_v12 = vld [vmem:[%s11225_s1 + $0x64] ss:$16 sps:$4 sm:$0xff]   ;;  %v7365_v13 = vld [vmem:[%s11225_s1 + $0x6c] ss:$16 sps:$4 sm:$0xff]   ;;  %v7367_v14 = vld [vmem:[%s11225_s1 + $0x60] ss:$16 sps:$4 sm:$0xff]  }
   0x6   :  { %v7368_v15 = vld [vmem:[%s11225_s1 + $0x68] ss:$16 sps:$4 sm:$0xff]   ;;  %v7369_v16 = vld [vmem:[%s11225_s1 + $0x84] ss:$16 sps:$4 sm:$0xff]   ;;  %v7371_v17 = vld [vmem:[%s11225_s1 + $0x8c] ss:$16 sps:$4 sm:$0xff]  }
   0x7   :  { %4948 = vmatpush1.bf16.msra.mxu0 %v7355_v6  ;;  %5481 = vmatpush1.bf16.msra.mxu1 %v7356_v7  ;;  %v7373_v18 = vld [vmem:[%s11225_s1 + $0x80] ss:$16 sps:$4 sm:$0xff]   ;;  %v7374_v19 = vld [vmem:[%s11225_s1 + $0x88] ss:$16 sps:$4 sm:$0xff]   ;;  %v7375_v20 = vld [vmem:[%s11225_s1 + $0xa4] ss:$16 sps:$4 sm:$0xff]  }
   0x8   :  { %4949 = vmatprep.subr.bf16.mxu0 %v7357_v8  ;;  %5482 = vmatprep.subr.bf16.mxu1 %v7359_v9  ;;  %v7377_v21 = vld [vmem:[%s11225_s1 + $0xac] ss:$16 sps:$4 sm:$0xff]   ;;  %v7379_v22 = vld [vmem:[%s11225_s1 + $0xa0] ss:$16 sps:$4 sm:$0xff]   ;;  %v7380_v23 = vld [vmem:[%s11225_s1 + $0xa8] ss:$16 sps:$4 sm:$0xff]  }
   0x9   :  { %v7381_v24 = vld [vmem:[%s11225_s1 + $0xc4] ss:$16 sps:$4 sm:$0xff]   ;;  %v7383_v25 = vld [vmem:[%s11225_s1 + $0xcc] ss:$16 sps:$4 sm:$0xff]   ;;  %v7385_v26 = vld [vmem:[%s11225_s1 + $0xc0] ss:$16 sps:$4 sm:$0xff]  }
   0xa   :  { %v7386_v27 = vld [vmem:[%s11225_s1 + $0xc8] ss:$16 sps:$4 sm:$0xff]   ;;  %v7387_v28 = vld [vmem:[%s11225_s1 + $0xe4] ss:$16 sps:$4 sm:$0xff]   ;;  %v7389_v29 = vld [vmem:[%s11225_s1 + $0xec] ss:$16 sps:$4 sm:$0xff]  }
   0xb   :  { %4950 = vmatpush1.bf16.msra.mxu0 %v7361_v10  ;;  %5483 = vmatpush1.bf16.msra.mxu1 %v7362_v11  ;;  %v7391_v30 = vld [vmem:[%s11225_s1 + $0xe0] ss:$16 sps:$4 sm:$0xff]   ;;  %v7392_v31 = vld [vmem:[%s11225_s1 + $0xe8] ss:$16 sps:$4 sm:$0xff]   ;;  %v7393_v32 = vld [vmem:[%s11225_s1 + $0x104] ss:$16 sps:$4 sm:$0xff]  }
   0xc   :  { %4951 = vmatprep.subr.bf16.mxu0 %v7363_v12  ;;  %5484 = vmatprep.subr.bf16.mxu1 %v7365_v13  ;;  %v7395_v33 = vld [vmem:[%s11225_s1 + $0x10c] ss:$16 sps:$4 sm:$0xff]   ;;  %v7397_v34 = vld [vmem:[%s11225_s1 + $0x100] ss:$16 sps:$4 sm:$0xff]   ;;  %v7398_v35 = vld [vmem:[%s11225_s1 + $0x108] ss:$16 sps:$4 sm:$0xff]  }
   0xd   :  { %v7399_v39 = vld [vmem:[%s11225_s1 + $0x124] ss:$16 sps:$4 sm:$0xff]   ;;  %v7401_v40 = vld [vmem:[%s11225_s1 + $0x12c] ss:$16 sps:$4 sm:$0xff]   ;;  %v7403_v41 = vld [vmem:[%s11225_s1 + $0x120] ss:$16 sps:$4 sm:$0xff]  }
   0xe   :  { %v8732_v42 = vshrl.u32 %v812_v36, 7  ;;  %v7404_v44 = vld [vmem:[%s11225_s1 + $0x128] ss:$16 sps:$4 sm:$0xff]   ;;  %v7405_v45 = vld [vmem:[%s11225_s1 + $0x144] ss:$16 sps:$4 sm:$0xff]  }
   0xf   :  { %4952 = vmatpush1.bf16.msra.mxu0 %v7367_v14  ;;  %5485 = vmatpush1.bf16.msra.mxu1 %v7368_v15  ;;  %v7407_v46 = vld [vmem:[%s11225_s1 + $0x14c] ss:$16 sps:$4 sm:$0xff]   ;;  %v7409_v47 = vld [vmem:[%s11225_s1 + $0x140] ss:$16 sps:$4 sm:$0xff]   ;;  %v7410_v48 = vld [vmem:[%s11225_s1 + $0x148] ss:$16 sps:$4 sm:$0xff]  }
  0x10   :  { %4953 = vmatprep.subr.bf16.mxu0 %v7369_v16  ;;  %5486 = vmatprep.subr.bf16.mxu1 %v7371_v17  ;;  %v8750_v49 = vsub.s32 %v839_v43, %v8732_v42  ;;  %v7411_v50 = vld [vmem:[%s11225_s1 + $0x164] ss:$16 sps:$4 sm:$0xff]   ;;  %v7413_v51 = vld [vmem:[%s11225_s1 + $0x16c] ss:$16 sps:$4 sm:$0xff]   ;;  %v7415_v53 = vld [vmem:[%s11225_s1 + $0x160] ss:$16 sps:$4 sm:$0xff]  }
  0x11   :  { %v8761_v52 = vld [vmem:[%s11224_s0] sm:$0xff]  ;;  %v7416_v55 = vld [vmem:[%s11225_s1 + $0x168] ss:$16 sps:$4 sm:$0xff]   ;;  %v7419_v57 = vld [vmem:[%s11225_s1 + $0x18c] ss:$16 sps:$4 sm:$0xff]  }
  0x12   :  { %v843_v54 = vrot.slane %v8761_v52, %v8750_v49  ;;  %v7417_v56 = vld [vmem:[%s11225_s1 + $0x184] ss:$16 sps:$4 sm:$0xff]   ;;  %v7421_v59 = vld [vmem:[%s11225_s1 + $0x180] ss:$16 sps:$4 sm:$0xff]   ;;  %v7422_v61 = vld [vmem:[%s11225_s1 + $0x188] ss:$16 sps:$4 sm:$0xff]  }
  0x13   :  { %4954 = vmatpush1.bf16.msra.mxu0 %v7373_v18  ;;  %5487 = vmatpush1.bf16.msra.mxu1 %v7374_v19  ;;  %v7423_v62 = vld [vmem:[%s11225_s1 + $0x1a4] ss:$16 sps:$4 sm:$0xff]   ;;  %v7425_v63 = vld [vmem:[%s11225_s1 + $0x1ac] ss:$16 sps:$4 sm:$0xff]   ;;  %v7427_v0 = vld [vmem:[%s11225_s1 + $0x1a0] ss:$16 sps:$4 sm:$0xff]  }
  0x14   :  { %4955 = vmatprep.subr.bf16.mxu0 %v7375_v20  ;;  %5488 = vmatprep.subr.bf16.mxu1 %v7377_v21  ;;  %v851_v58 = vcombine.high %v843_v54, %v843_v54  ;;  %v7428_v1 = vld [vmem:[%s11225_s1 + $0x1a8] ss:$16 sps:$4 sm:$0xff]   ;;  %v7429_v2 = vld [vmem:[%s11225_s1 + $0x1c4] ss:$16 sps:$4 sm:$0xff]   ;;  %v7431_v3 = vld [vmem:[%s11225_s1 + $0x1cc] ss:$16 sps:$4 sm:$0xff]   ;;  %v8830_v13 = vrot.slane %v843_v54, %v8750_v49 }
  0x15   :  { %v7433_v4 = vld [vmem:[%s11225_s1 + $0x1c0] ss:$16 sps:$4 sm:$0xff]   ;;  %v7434_v5 = vld [vmem:[%s11225_s1 + $0x1c8] ss:$16 sps:$4 sm:$0xff]   ;;  %v7435_v6 = vld [vmem:[%s11225_s1 + $0x1e4] ss:$16 sps:$4 sm:$0xff]  }
  0x16   :  { %v873_v60 = vrot.slane %v851_v58, %v8750_v49  ;;  %v7437_v7 = vld [vmem:[%s11225_s1 + $0x1ec] ss:$16 sps:$4 sm:$0xff]   ;;  %v7439_v8 = vld [vmem:[%s11225_s1 + $0x1e0] ss:$16 sps:$4 sm:$0xff]   ;;  %v7440_v9 = vld [vmem:[%s11225_s1 + $0x1e8] ss:$16 sps:$4 sm:$0xff]  }
  0x17   :  { %4956 = vmatpush1.bf16.msra.mxu0 %v7379_v22  ;;  %5489 = vmatpush1.bf16.msra.mxu1 %v7380_v23  ;;  %v7443_v10 = vld [vmem:[%s11225_s1 + $0x204] ss:$16 sps:$4 sm:$0xff]   ;;  %v7446_v11 = vld [vmem:[%s11225_s1 + $0x20c] ss:$16 sps:$4 sm:$0xff]   ;;  %v7441_v12 = vld [vmem:[%s11225_s1 + $0x200] ss:$16 sps:$4 sm:$0xff]  }
  0x18   :  { %4957 = vmatprep.subr.bf16.mxu0 %v7381_v24  ;;  %5490 = vmatprep.subr.bf16.mxu1 %v7383_v25  ;;  %v7444_v14 = vld [vmem:[%s11225_s1 + $0x208] ss:$16 sps:$4 sm:$0xff]   ;;  %v7449_v15 = vld [vmem:[%s11225_s1 + $0x224] ss:$16 sps:$4 sm:$0xff]   ;;  %v7452_v16 = vld [vmem:[%s11225_s1 + $0x22c] ss:$16 sps:$4 sm:$0xff]   ;;  %v883_v17 = vcombine.high %v873_v60, %v873_v60 }
  0x19   :  { %4977 = vmatprep.mubr.bf16.mxu0 %v873_v60  ;;  %5510 = vmatprep.mubr.bf16.mxu1 %v873_v60  ;;  %v7447_v18 = vld [vmem:[%s11225_s1 + $0x220] ss:$16 sps:$4 sm:$0xff]   ;;  %v7450_v19 = vld [vmem:[%s11225_s1 + $0x228] ss:$16 sps:$4 sm:$0xff]   ;;  %v7455_v20 = vld [vmem:[%s11225_s1 + $0x244] ss:$16 sps:$4 sm:$0xff]  }
  0x1a   :  { %v7458_v21 = vld [vmem:[%s11225_s1 + $0x24c] ss:$16 sps:$4 sm:$0xff]   ;;  %v7453_v22 = vld [vmem:[%s11225_s1 + $0x240] ss:$16 sps:$4 sm:$0xff]   ;;  %v7456_v23 = vld [vmem:[%s11225_s1 + $0x248] ss:$16 sps:$4 sm:$0xff]  }
  0x1b   :  { %4958 = vmatpush1.bf16.msra.mxu0 %v7385_v26  ;;  %5491 = vmatpush1.bf16.msra.mxu1 %v7386_v27  ;;  %v7461_v24 = vld [vmem:[%s11225_s1 + $0x264] ss:$16 sps:$4 sm:$0xff]   ;;  %v7464_v25 = vld [vmem:[%s11225_s1 + $0x26c] ss:$16 sps:$4 sm:$0xff]   ;;  %v7459_v26 = vld [vmem:[%s11225_s1 + $0x260] ss:$16 sps:$4 sm:$0xff]  }
  0x1c   :  { %4959 = vmatprep.subr.bf16.mxu0 %v7387_v28  ;;  %5492 = vmatprep.subr.bf16.mxu1 %v7389_v29  ;;  %v7462_v27 = vld [vmem:[%s11225_s1 + $0x268] ss:$16 sps:$4 sm:$0xff]   ;;  %v7467_v28 = vld [vmem:[%s11225_s1 + $0x284] ss:$16 sps:$4 sm:$0xff]   ;;  %v7470_v29 = vld [vmem:[%s11225_s1 + $0x28c] ss:$16 sps:$4 sm:$0xff]  }
  0x1d   :  { %v7479_v36 = vld [vmem:[%s11225_s1 + $0x2c4] ss:$16 sps:$4 sm:$0xff]   ;;  %v7482_v37 = vld [vmem:[%s11225_s1 + $0x2cc] ss:$16 sps:$4 sm:$0xff]   ;;  %v7477_v38 = vld [vmem:[%s11225_s1 + $0x2c0] ss:$16 sps:$4 sm:$0xff]  }
  0x1e   :  { %v7483_v43 = vld [vmem:[%s11225_s1 + $0x2e0] ss:$16 sps:$4 sm:$0xff]   ;;  %v7498_v54 = vld [vmem:[%s11225_s1 + $0x328] ss:$16 sps:$4 sm:$0xff]   ;;  %v7512_v60 = vld [vmem:[%s11225_s1 + $0x36c] ss:$16 sps:$4 sm:$0xff]  }
  0x1f   :  { %4960 = vmatpush1.bf16.msra.mxu0 %v7391_v30  ;;  %5493 = vmatpush1.bf16.msra.mxu1 %v7392_v31  ;;  %v7465_v30 = vld [vmem:[%s11225_s1 + $0x280] ss:$16 sps:$4 sm:$0xff]   ;;  %v7468_v31 = vld [vmem:[%s11225_s1 + $0x288] ss:$16 sps:$4 sm:$0xff]  }
  0x20   :  { %4961 = vmatprep.subr.bf16.mxu0 %v7393_v32  ;;  %5494 = vmatprep.subr.bf16.mxu1 %v7395_v33  ;;  %v7473_v32 = vld [vmem:[%s11225_s1 + $0x2a4] ss:$16 sps:$4 sm:$0xff]   ;;  %v7476_v33 = vld [vmem:[%s11225_s1 + $0x2ac] ss:$16 sps:$4 sm:$0xff]   ;;  %v7504_v58 = vld [vmem:[%s11225_s1 + $0x348] ss:$16 sps:$4 sm:$0xff]  }
  0x23   :  { %4962 = vmatpush1.bf16.msra.mxu0 %v7397_v34  ;;  %5495 = vmatpush1.bf16.msra.mxu1 %v7398_v35  ;;  %v7471_v34 = vld [vmem:[%s11225_s1 + $0x2a0] ss:$16 sps:$4 sm:$0xff]   ;;  %v7474_v35 = vld [vmem:[%s11225_s1 + $0x2a8] ss:$16 sps:$4 sm:$0xff]  }
  0x24   :  { %4963 = vmatprep.subr.bf16.mxu0 %v7399_v39  ;;  %5496 = vmatprep.subr.bf16.mxu1 %v7401_v40  ;;  %v7480_v39 = vld [vmem:[%s11225_s1 + $0x2c8] ss:$16 sps:$4 sm:$0xff]   ;;  %v7485_v40 = vld [vmem:[%s11225_s1 + $0x2e4] ss:$16 sps:$4 sm:$0xff]  }
  0x27   :  { %4964 = vmatpush1.bf16.msra.mxu0 %v7403_v41  ;;  %5497 = vmatpush1.bf16.msra.mxu1 %v7404_v44  ;;  %v7488_v41 = vld [vmem:[%s11225_s1 + $0x2ec] ss:$16 sps:$4 sm:$0xff]   ;;  %v7486_v44 = vld [vmem:[%s11225_s1 + $0x2e8] ss:$16 sps:$4 sm:$0xff]  }
  0x28   :  { %4965 = vmatprep.subr.bf16.mxu0 %v7405_v45  ;;  %5498 = vmatprep.subr.bf16.mxu1 %v7407_v46  ;;  %v7491_v45 = vld [vmem:[%s11225_s1 + $0x304] ss:$16 sps:$4 sm:$0xff]   ;;  %v7494_v46 = vld [vmem:[%s11225_s1 + $0x30c] ss:$16 sps:$4 sm:$0xff]  }
  0x2b   :  { %4966 = vmatpush1.bf16.msra.mxu0 %v7409_v47  ;;  %5499 = vmatpush1.bf16.msra.mxu1 %v7410_v48  ;;  %v7489_v47 = vld [vmem:[%s11225_s1 + $0x300] ss:$16 sps:$4 sm:$0xff]   ;;  %v7492_v48 = vld [vmem:[%s11225_s1 + $0x308] ss:$16 sps:$4 sm:$0xff]  }
  0x2c   :  { %4967 = vmatprep.subr.bf16.mxu0 %v7411_v50  ;;  %5500 = vmatprep.subr.bf16.mxu1 %v7413_v51  ;;  %v7497_v50 = vld [vmem:[%s11225_s1 + $0x324] ss:$16 sps:$4 sm:$0xff]   ;;  %v7500_v51 = vld [vmem:[%s11225_s1 + $0x32c] ss:$16 sps:$4 sm:$0xff]  }
  0x2f   :  { %4968 = vmatpush1.bf16.msra.mxu0 %v7415_v53  ;;  %5501 = vmatpush1.bf16.msra.mxu1 %v7416_v55  ;;  %v7495_v53 = vld [vmem:[%s11225_s1 + $0x320] ss:$16 sps:$4 sm:$0xff]   ;;  %v7503_v55 = vld [vmem:[%s11225_s1 + $0x344] ss:$16 sps:$4 sm:$0xff]  }
  0x30   :  { %4969 = vmatprep.subr.bf16.mxu0 %v7417_v56  ;;  %5502 = vmatprep.subr.bf16.mxu1 %v7419_v57  ;;  %v7506_v56 = vld [vmem:[%s11225_s1 + $0x34c] ss:$16 sps:$4 sm:$0xff]   ;;  %v7501_v57 = vld [vmem:[%s11225_s1 + $0x340] ss:$16 sps:$4 sm:$0xff]  }
  0x33   :  { %4970 = vmatpush1.bf16.msra.mxu0 %v7421_v59  ;;  %5503 = vmatpush1.bf16.msra.mxu1 %v7422_v61  ;;  %v7509_v59 = vld [vmem:[%s11225_s1 + $0x364] ss:$16 sps:$4 sm:$0xff]   ;;  %v7507_v61 = vld [vmem:[%s11225_s1 + $0x360] ss:$16 sps:$4 sm:$0xff]  }
  0x34   :  { %4971 = vmatprep.subr.bf16.mxu0 %v7423_v62  ;;  %5504 = vmatprep.subr.bf16.mxu1 %v7425_v63  ;;  %v7510_v62 = vld [vmem:[%s11225_s1 + $0x368] ss:$16 sps:$4 sm:$0xff]   ;;  %v7515_v63 = vld [vmem:[%s11225_s1 + $0x384] ss:$16 sps:$4 sm:$0xff]  }
  0x37   :  { %4972 = vmatpush1.bf16.msra.mxu0 %v7427_v0  ;;  %5505 = vmatpush1.bf16.msra.mxu1 %v7428_v1  ;;  %v7518_v0 = vld [vmem:[%s11225_s1 + $0x38c] ss:$16 sps:$4 sm:$0xff]   ;;  %v7513_v1 = vld [vmem:[%s11225_s1 + $0x380] ss:$16 sps:$4 sm:$0xff]  }
  0x38   :  { %4973 = vmatprep.subr.bf16.mxu0 %v7429_v2  ;;  %5506 = vmatprep.subr.bf16.mxu1 %v7431_v3  ;;  %v7516_v2 = vld [vmem:[%s11225_s1 + $0x388] ss:$16 sps:$4 sm:$0xff]   ;;  %v7521_v3 = vld [vmem:[%s11225_s1 + $0x3a4] ss:$16 sps:$4 sm:$0xff]  }
  0x3b   :  { %4974 = vmatpush1.bf16.msra.mxu0 %v7433_v4  ;;  %5507 = vmatpush1.bf16.msra.mxu1 %v7434_v5  ;;  %v7524_v4 = vld [vmem:[%s11225_s1 + $0x3ac] ss:$16 sps:$4 sm:$0xff]   ;;  %v7519_v5 = vld [vmem:[%s11225_s1 + $0x3a0] ss:$16 sps:$4 sm:$0xff]  }
  0x3c   :  { %4975 = vmatprep.subr.bf16.mxu0 %v7435_v6  ;;  %5508 = vmatprep.subr.bf16.mxu1 %v7437_v7  ;;  %v7522_v6 = vld [vmem:[%s11225_s1 + $0x3a8] ss:$16 sps:$4 sm:$0xff]   ;;  %v7527_v7 = vld [vmem:[%s11225_s1 + $0x3c4] ss:$16 sps:$4 sm:$0xff]  }
  0x3f   :  { %4976 = vmatpush1.bf16.msra.mxu0 %v7439_v8  ;;  %5509 = vmatpush1.bf16.msra.mxu1 %v7440_v9  ;;  %v7530_v8 = vld [vmem:[%s11225_s1 + $0x3cc] ss:$16 sps:$4 sm:$0xff]   ;;  %v836_v9 = vcombine.high %v8761_v52, %v8761_v52 }
  0x40   :  { %4986 = vmatprep.subr.bf16.mxu0 %v7443_v10  ;;  %5519 = vmatprep.subr.bf16.mxu1 %v7446_v11  ;;  %v7525_v10 = vld [vmem:[%s11225_s1 + $0x3c0] ss:$16 sps:$4 sm:$0xff]   ;;  %v7528_v11 = vld [vmem:[%s11225_s1 + $0x3c8] ss:$16 sps:$4 sm:$0xff]   ;;  %v7536_v52 = vld [vmem:[%s11225_s1 + $0x3ec] ss:$16 sps:$4 sm:$0xff]  }
  0x42   :  { %4978 = vmatmul.mubr.bf16.vlgmr.msra.gmra.mrb[0].mxu0 %v8830_v13  ;;  %5511 = vmatmul.mubr.bf16.vlgmr.msra.gmra.mrb[0].mxu1 %v8830_v13 }
  0x43   :  { %4987 = vmatpush1.bf16.msra.mxu0 %v7441_v12  ;;  %5520 = vmatpush1.bf16.msra.mxu1 %v7444_v14  ;;  %v7533_v12 = vld [vmem:[%s11225_s1 + $0x3e4] ss:$16 sps:$4 sm:$0xff]   ;;  %v9014_v14 = vrot.slane %v836_v9, %v8750_v49  ;;  %v7612_v9 = vld [vmem:[%s11225_s1 + $0x588] ss:$16 sps:$4 sm:$0xff]  }
  0x44   :  { %4988 = vmatprep.subr.bf16.mxu0 %v7449_v15  ;;  %5521 = vmatprep.subr.bf16.mxu1 %v7452_v16  ;;  %v7531_v15 = vld [vmem:[%s11225_s1 + $0x3e0] ss:$16 sps:$4 sm:$0xff]   ;;  %v7534_v16 = vld [vmem:[%s11225_s1 + $0x3e8] ss:$16 sps:$4 sm:$0xff]  }
  0x45   :  { %5018 = vmatprep.mubr.bf16.mxu0 %v883_v17  ;;  %5551 = vmatprep.mubr.bf16.mxu1 %v883_v17  ;;  %v7539_v17 = vld [vmem:[%s11225_s1 + $0x404] ss:$16 sps:$4 sm:$0xff]  }
  0x47   :  { %4989 = vmatpush1.bf16.msra.mxu0 %v7447_v18  ;;  %5522 = vmatpush1.bf16.msra.mxu1 %v7450_v19  ;;  %v7542_v18 = vld [vmem:[%s11225_s1 + $0x40c] ss:$16 sps:$4 sm:$0xff]   ;;  %v852_v19 = vcombine.high %v9014_v14, %v9014_v14 }
  0x48   :  { %4990 = vmatprep.subr.bf16.mxu0 %v7455_v20  ;;  %5523 = vmatprep.subr.bf16.mxu1 %v7458_v21  ;;  %v7537_v20 = vld [vmem:[%s11225_s1 + $0x400] ss:$16 sps:$4 sm:$0xff]   ;;  %v881_v21 = vcombine.high %v8830_v13, %v8830_v13 }
  0x49   :  { %v7543_v13 = vld [vmem:[%s11225_s1 + $0x420] ss:$16 sps:$4 sm:$0xff]  }
  0x4b   :  { %4991 = vmatpush1.bf16.msra.mxu0 %v7453_v22  ;;  %5524 = vmatpush1.bf16.msra.mxu1 %v7456_v23  ;;  %v7540_v22 = vld [vmem:[%s11225_s1 + $0x408] ss:$16 sps:$4 sm:$0xff]   ;;  %v7545_v23 = vld [vmem:[%s11225_s1 + $0x424] ss:$16 sps:$4 sm:$0xff]  }
  0x4c   :  { %4992 = vmatprep.subr.bf16.mxu0 %v7461_v24  ;;  %5525 = vmatprep.subr.bf16.mxu1 %v7464_v25  ;;  %v7548_v24 = vld [vmem:[%s11225_s1 + $0x42c] ss:$16 sps:$4 sm:$0xff]   ;;  %v9045_v25 = vrot.slane %v852_v19, %v8750_v49  ;;  %v7629_v19 = vld [vmem:[%s11225_s1 + $0x5e4] ss:$16 sps:$4 sm:$0xff]  }
  0x4f   :  { %4993 = vmatpush1.bf16.msra.mxu0 %v7459_v26  ;;  %5526 = vmatpush1.bf16.msra.mxu1 %v7462_v27  ;;  %v7546_v26 = vld [vmem:[%s11225_s1 + $0x428] ss:$16 sps:$4 sm:$0xff]   ;;  %v7551_v27 = vld [vmem:[%s11225_s1 + $0x444] ss:$16 sps:$4 sm:$0xff]  }
  0x50   :  { %4994 = vmatprep.subr.bf16.mxu0 %v7467_v28  ;;  %5527 = vmatprep.subr.bf16.mxu1 %v7470_v29  ;;  %v7554_v28 = vld [vmem:[%s11225_s1 + $0x44c] ss:$16 sps:$4 sm:$0xff]   ;;  %v7549_v29 = vld [vmem:[%s11225_s1 + $0x440] ss:$16 sps:$4 sm:$0xff]  }
  0x53   :  { %4995 = vmatpush1.bf16.msra.mxu0 %v7465_v30  ;;  %5528 = vmatpush1.bf16.msra.mxu1 %v7468_v31  ;;  %v7552_v30 = vld [vmem:[%s11225_s1 + $0x448] ss:$16 sps:$4 sm:$0xff]   ;;  %v7557_v31 = vld [vmem:[%s11225_s1 + $0x464] ss:$16 sps:$4 sm:$0xff]  }
  0x54   :  { %4996 = vmatprep.subr.bf16.mxu0 %v7473_v32  ;;  %5529 = vmatprep.subr.bf16.mxu1 %v7476_v33  ;;  %v7560_v32 = vld [vmem:[%s11225_s1 + $0x46c] ss:$16 sps:$4 sm:$0xff]   ;;  %v7555_v33 = vld [vmem:[%s11225_s1 + $0x460] ss:$16 sps:$4 sm:$0xff]  }
  0x57   :  { %4997 = vmatpush1.bf16.msra.mxu0 %v7471_v34  ;;  %5530 = vmatpush1.bf16.msra.mxu1 %v7474_v35  ;;  %v7558_v34 = vld [vmem:[%s11225_s1 + $0x468] ss:$16 sps:$4 sm:$0xff]   ;;  %v7563_v35 = vld [vmem:[%s11225_s1 + $0x484] ss:$16 sps:$4 sm:$0xff]  }
  0x58   :  { %4998 = vmatprep.subr.bf16.mxu0 %v7479_v36  ;;  %5531 = vmatprep.subr.bf16.mxu1 %v7482_v37  ;;  %v7566_v36 = vld [vmem:[%s11225_s1 + $0x48c] ss:$16 sps:$4 sm:$0xff]   ;;  %v7561_v37 = vld [vmem:[%s11225_s1 + $0x480] ss:$16 sps:$4 sm:$0xff]  }
  0x5b   :  { %4999 = vmatpush1.bf16.msra.mxu0 %v7477_v38  ;;  %5532 = vmatpush1.bf16.msra.mxu1 %v7480_v39  ;;  %v7564_v38 = vld [vmem:[%s11225_s1 + $0x488] ss:$16 sps:$4 sm:$0xff]   ;;  %v7569_v39 = vld [vmem:[%s11225_s1 + $0x4a4] ss:$16 sps:$4 sm:$0xff]  }
  0x5c   :  { %5000 = vmatprep.subr.bf16.mxu0 %v7485_v40  ;;  %5533 = vmatprep.subr.bf16.mxu1 %v7488_v41  ;;  %v7572_v40 = vld [vmem:[%s11225_s1 + $0x4ac] ss:$16 sps:$4 sm:$0xff]   ;;  %v7567_v41 = vld [vmem:[%s11225_s1 + $0x4a0] ss:$16 sps:$4 sm:$0xff]  }
  0x5f   :  { %5001 = vmatpush1.bf16.msra.mxu0 %v7483_v43  ;;  %5534 = vmatpush1.bf16.msra.mxu1 %v7486_v44  ;;  %v7570_v43 = vld [vmem:[%s11225_s1 + $0x4a8] ss:$16 sps:$4 sm:$0xff]   ;;  %v7575_v44 = vld [vmem:[%s11225_s1 + $0x4c4] ss:$16 sps:$4 sm:$0xff]  }
  0x60   :  { %5002 = vmatprep.subr.bf16.mxu0 %v7491_v45  ;;  %5535 = vmatprep.subr.bf16.mxu1 %v7494_v46  ;;  %v7578_v45 = vld [vmem:[%s11225_s1 + $0x4cc] ss:$16 sps:$4 sm:$0xff]   ;;  %v7573_v46 = vld [vmem:[%s11225_s1 + $0x4c0] ss:$16 sps:$4 sm:$0xff]  }
  0x63   :  { %5003 = vmatpush1.bf16.msra.mxu0 %v7489_v47  ;;  %5536 = vmatpush1.bf16.msra.mxu1 %v7492_v48  ;;  %v7576_v47 = vld [vmem:[%s11225_s1 + $0x4c8] ss:$16 sps:$4 sm:$0xff]   ;;  %v7581_v48 = vld [vmem:[%s11225_s1 + $0x4e4] ss:$16 sps:$4 sm:$0xff]  }
  0x64   :  { %5004 = vmatprep.subr.bf16.mxu0 %v7497_v50  ;;  %5537 = vmatprep.subr.bf16.mxu1 %v7500_v51  ;;  %v7584_v50 = vld [vmem:[%s11225_s1 + $0x4ec] ss:$16 sps:$4 sm:$0xff]   ;;  %v7579_v51 = vld [vmem:[%s11225_s1 + $0x4e0] ss:$16 sps:$4 sm:$0xff]  }
  0x67   :  { %5005 = vmatpush1.bf16.msra.mxu0 %v7495_v53  ;;  %5538 = vmatpush1.bf16.msra.mxu1 %v7498_v54  ;;  %v7582_v53 = vld [vmem:[%s11225_s1 + $0x4e8] ss:$16 sps:$4 sm:$0xff]   ;;  %v7587_v54 = vld [vmem:[%s11225_s1 + $0x504] ss:$16 sps:$4 sm:$0xff]  }
  0x68   :  { %5006 = vmatprep.subr.bf16.mxu0 %v7503_v55  ;;  %5539 = vmatprep.subr.bf16.mxu1 %v7506_v56  ;;  %v7590_v55 = vld [vmem:[%s11225_s1 + $0x50c] ss:$16 sps:$4 sm:$0xff]   ;;  %v7585_v56 = vld [vmem:[%s11225_s1 + $0x500] ss:$16 sps:$4 sm:$0xff]  }
  0x6b   :  { %5007 = vmatpush1.bf16.msra.mxu0 %v7501_v57  ;;  %5540 = vmatpush1.bf16.msra.mxu1 %v7504_v58  ;;  %v7588_v57 = vld [vmem:[%s11225_s1 + $0x508] ss:$16 sps:$4 sm:$0xff]   ;;  %v7593_v58 = vld [vmem:[%s11225_s1 + $0x524] ss:$16 sps:$4 sm:$0xff]  }
  0x6c   :  { %5008 = vmatprep.subr.bf16.mxu0 %v7509_v59  ;;  %5541 = vmatprep.subr.bf16.mxu1 %v7512_v60  ;;  %v7596_v59 = vld [vmem:[%s11225_s1 + $0x52c] ss:$16 sps:$4 sm:$0xff]   ;;  %v7591_v60 = vld [vmem:[%s11225_s1 + $0x520] ss:$16 sps:$4 sm:$0xff]  }
  0x6f   :  { %5009 = vmatpush1.bf16.msra.mxu0 %v7507_v61  ;;  %5542 = vmatpush1.bf16.msra.mxu1 %v7510_v62  ;;  %v7594_v61 = vld [vmem:[%s11225_s1 + $0x528] ss:$16 sps:$4 sm:$0xff]   ;;  %v7599_v62 = vld [vmem:[%s11225_s1 + $0x544] ss:$16 sps:$4 sm:$0xff]  }
  0x70   :  { %5010 = vmatprep.subr.bf16.mxu0 %v7515_v63  ;;  %5543 = vmatprep.subr.bf16.mxu1 %v7518_v0  ;;  %v7602_v63 = vld [vmem:[%s11225_s1 + $0x54c] ss:$16 sps:$4 sm:$0xff]   ;;  %v7597_v0 = vld [vmem:[%s11225_s1 + $0x540] ss:$16 sps:$4 sm:$0xff]  }
  0x73   :  { %5011 = vmatpush1.bf16.msra.mxu0 %v7513_v1  ;;  %5544 = vmatpush1.bf16.msra.mxu1 %v7516_v2  ;;  %v7600_v1 = vld [vmem:[%s11225_s1 + $0x548] ss:$16 sps:$4 sm:$0xff]   ;;  %v7605_v2 = vld [vmem:[%s11225_s1 + $0x564] ss:$16 sps:$4 sm:$0xff]  }
  0x74   :  { %5012 = vmatprep.subr.bf16.mxu0 %v7521_v3  ;;  %5545 = vmatprep.subr.bf16.mxu1 %v7524_v4  ;;  %v7608_v3 = vld [vmem:[%s11225_s1 + $0x56c] ss:$16 sps:$4 sm:$0xff]   ;;  %v7603_v4 = vld [vmem:[%s11225_s1 + $0x560] ss:$16 sps:$4 sm:$0xff]  }
  0x77   :  { %5013 = vmatpush1.bf16.msra.mxu0 %v7519_v5  ;;  %5546 = vmatpush1.bf16.msra.mxu1 %v7522_v6  ;;  %v7606_v5 = vld [vmem:[%s11225_s1 + $0x568] ss:$16 sps:$4 sm:$0xff]   ;;  %v7611_v6 = vld [vmem:[%s11225_s1 + $0x584] ss:$16 sps:$4 sm:$0xff]  }
  0x78   :  { %5014 = vmatprep.subr.bf16.mxu0 %v7527_v7  ;;  %5547 = vmatprep.subr.bf16.mxu1 %v7530_v8  ;;  %v7614_v7 = vld [vmem:[%s11225_s1 + $0x58c] ss:$16 sps:$4 sm:$0xff]   ;;  %v7609_v8 = vld [vmem:[%s11225_s1 + $0x580] ss:$16 sps:$4 sm:$0xff]  }
  0x7b   :  { %5015 = vmatpush1.bf16.msra.mxu0 %v7525_v10  ;;  %5548 = vmatpush1.bf16.msra.mxu1 %v7528_v11  ;;  %v7617_v10 = vld [vmem:[%s11225_s1 + $0x5a4] ss:$16 sps:$4 sm:$0xff]   ;;  %v7620_v11 = vld [vmem:[%s11225_s1 + $0x5ac] ss:$16 sps:$4 sm:$0xff]  }
  0x7c   :  { %5016 = vmatprep.subr.bf16.mxu0 %v7533_v12  ;;  %5549 = vmatprep.subr.bf16.mxu1 %v7536_v52  ;;  %v7615_v12 = vld [vmem:[%s11225_s1 + $0x5a0] ss:$16 sps:$4 sm:$0xff]   ;;  %v7618_v52 = vld [vmem:[%s11225_s1 + $0x5a8] ss:$16 sps:$4 sm:$0xff]  }
  0x7f   :  { %5017 = vmatpush1.bf16.msra.mxu0 %v7531_v15  ;;  %5550 = vmatpush1.bf16.msra.mxu1 %v7534_v16  ;;  %v7623_v15 = vld [vmem:[%s11225_s1 + $0x5c4] ss:$16 sps:$4 sm:$0xff]   ;;  %v7626_v16 = vld [vmem:[%s11225_s1 + $0x5cc] ss:$16 sps:$4 sm:$0xff]  }
  0x80   :  { %5027 = vmatprep.subr.bf16.mxu0 %v7539_v17  ;;  %5560 = vmatprep.subr.bf16.mxu1 %v7542_v18  ;;  %v7621_v17 = vld [vmem:[%s11225_s1 + $0x5c0] ss:$16 sps:$4 sm:$0xff]   ;;  %v7624_v18 = vld [vmem:[%s11225_s1 + $0x5c8] ss:$16 sps:$4 sm:$0xff]  }
  0x82   :  { %5019 = vmatmul.mubr.bf16.vlgmr.msra.gmra.mrb[0].mxu0 %v881_v21  ;;  %5552 = vmatmul.mubr.bf16.vlgmr.msra.gmra.mrb[0].mxu1 %v881_v21  ;;  %v7627_v21 = vld [vmem:[%s11225_s1 + $0x5e0] ss:$16 sps:$4 sm:$0xff]  }
  0x83   :  { %5028 = vmatpush1.bf16.msra.mxu0 %v7537_v20  ;;  %5561 = vmatpush1.bf16.msra.mxu1 %v7540_v22  ;;  %v7632_v20 = vld [vmem:[%s11225_s1 + $0x5ec] ss:$16 sps:$4 sm:$0xff]   ;;  %v7630_v22 = vld [vmem:[%s11225_s1 + $0x5e8] ss:$16 sps:$4 sm:$0xff]  }
  0x84   :  { %5029 = vmatprep.subr.bf16.mxu0 %v7545_v23  ;;  %5562 = vmatprep.subr.bf16.mxu1 %v7548_v24  ;;  %v7636_v23 = vld [vmem:[%s11225_s1 + $0x604] ss:$16 sps:$4 sm:$0xff]   ;;  %v7639_v24 = vld [vmem:[%s11225_s1 + $0x60c] ss:$16 sps:$4 sm:$0xff]  }
  0x85   :  { %5059 = vmatprep.mubr.bf16.mxu0 %v9045_v25  ;;  %5592 = vmatprep.mubr.bf16.mxu1 %v9045_v25 }
  0x87   :  { %5030 = vmatpush1.bf16.msra.mxu0 %v7543_v13  ;;  %5563 = vmatpush1.bf16.msra.mxu1 %v7546_v26  ;;  %v7634_v13 = vld [vmem:[%s11225_s1 + $0x600] ss:$16 sps:$4 sm:$0xff]   ;;  %v9234_v26 = vrot.slane %v9014_v14, %v8750_v49  ;;  %v884_v14 = vcombine.high %v9045_v25, %v9045_v25  ;;  %v7648_v25 = vld [vmem:[%s11225_s1 + $0x644] ss:$16 sps:$4 sm:$0xff]  }
  0x88   :  { %5031 = vmatprep.subr.bf16.mxu0 %v7551_v27  ;;  %5564 = vmatprep.subr.bf16.mxu1 %v7554_v28  ;;  %v7637_v27 = vld [vmem:[%s11225_s1 + $0x608] ss:$16 sps:$4 sm:$0xff]   ;;  %v7642_v28 = vld [vmem:[%s11225_s1 + $0x624] ss:$16 sps:$4 sm:$0xff]  }
  0x8b   :  { %5032 = vmatpush1.bf16.msra.mxu0 %v7549_v29  ;;  %5565 = vmatpush1.bf16.msra.mxu1 %v7552_v30  ;;  %v7645_v29 = vld [vmem:[%s11225_s1 + $0x62c] ss:$16 sps:$4 sm:$0xff]   ;;  %v7640_v30 = vld [vmem:[%s11225_s1 + $0x620] ss:$16 sps:$4 sm:$0xff]  }
  0x8c   :  { %5033 = vmatprep.subr.bf16.mxu0 %v7557_v31  ;;  %5566 = vmatprep.subr.bf16.mxu1 %v7560_v32  ;;  %v7643_v31 = vld [vmem:[%s11225_s1 + $0x628] ss:$16 sps:$4 sm:$0xff]   ;;  %v7651_v32 = vld [vmem:[%s11225_s1 + $0x64c] ss:$16 sps:$4 sm:$0xff]  }
  0x8f   :  { %5034 = vmatpush1.bf16.msra.mxu0 %v7555_v33  ;;  %5567 = vmatpush1.bf16.msra.mxu1 %v7558_v34  ;;  %v7646_v33 = vld [vmem:[%s11225_s1 + $0x640] ss:$16 sps:$4 sm:$0xff]   ;;  %v7649_v34 = vld [vmem:[%s11225_s1 + $0x648] ss:$16 sps:$4 sm:$0xff]  }
  0x90   :  { %5035 = vmatprep.subr.bf16.mxu0 %v7563_v35  ;;  %5568 = vmatprep.subr.bf16.mxu1 %v7566_v36  ;;  %v7654_v35 = vld [vmem:[%s11225_s1 + $0x664] ss:$16 sps:$4 sm:$0xff]   ;;  %v7657_v36 = vld [vmem:[%s11225_s1 + $0x66c] ss:$16 sps:$4 sm:$0xff]  }
  0x93   :  { %5036 = vmatpush1.bf16.msra.mxu0 %v7561_v37  ;;  %5569 = vmatpush1.bf16.msra.mxu1 %v7564_v38  ;;  %v7652_v37 = vld [vmem:[%s11225_s1 + $0x660] ss:$16 sps:$4 sm:$0xff]   ;;  %v7655_v38 = vld [vmem:[%s11225_s1 + $0x668] ss:$16 sps:$4 sm:$0xff]  }
  0x94   :  { %5037 = vmatprep.subr.bf16.mxu0 %v7569_v39  ;;  %5570 = vmatprep.subr.bf16.mxu1 %v7572_v40  ;;  %v7660_v39 = vld [vmem:[%s11225_s1 + $0x684] ss:$16 sps:$4 sm:$0xff]   ;;  %v7663_v40 = vld [vmem:[%s11225_s1 + $0x68c] ss:$16 sps:$4 sm:$0xff]  }
  0x97   :  { %5038 = vmatpush1.bf16.msra.mxu0 %v7567_v41  ;;  %5571 = vmatpush1.bf16.msra.mxu1 %v7570_v43  ;;  %v7658_v41 = vld [vmem:[%s11225_s1 + $0x680] ss:$16 sps:$4 sm:$0xff]   ;;  %v7661_v43 = vld [vmem:[%s11225_s1 + $0x688] ss:$16 sps:$4 sm:$0xff]  }
  0x98   :  { %5039 = vmatprep.subr.bf16.mxu0 %v7575_v44  ;;  %5572 = vmatprep.subr.bf16.mxu1 %v7578_v45  ;;  %v7666_v44 = vld [vmem:[%s11225_s1 + $0x6a4] ss:$16 sps:$4 sm:$0xff]   ;;  %v7669_v45 = vld [vmem:[%s11225_s1 + $0x6ac] ss:$16 sps:$4 sm:$0xff]  }
  0x9b   :  { %5040 = vmatpush1.bf16.msra.mxu0 %v7573_v46  ;;  %5573 = vmatpush1.bf16.msra.mxu1 %v7576_v47  ;;  %v7664_v46 = vld [vmem:[%s11225_s1 + $0x6a0] ss:$16 sps:$4 sm:$0xff]   ;;  %v7667_v47 = vld [vmem:[%s11225_s1 + $0x6a8] ss:$16 sps:$4 sm:$0xff]  }
  0x9c   :  { %5041 = vmatprep.subr.bf16.mxu0 %v7581_v48  ;;  %5574 = vmatprep.subr.bf16.mxu1 %v7584_v50  ;;  %v7672_v48 = vld [vmem:[%s11225_s1 + $0x6c4] ss:$16 sps:$4 sm:$0xff]   ;;  %v7675_v50 = vld [vmem:[%s11225_s1 + $0x6cc] ss:$16 sps:$4 sm:$0xff]  }
  0x9f   :  { %5042 = vmatpush1.bf16.msra.mxu0 %v7579_v51  ;;  %5575 = vmatpush1.bf16.msra.mxu1 %v7582_v53  ;;  %v7670_v51 = vld [vmem:[%s11225_s1 + $0x6c0] ss:$16 sps:$4 sm:$0xff]   ;;  %v7673_v53 = vld [vmem:[%s11225_s1 + $0x6c8] ss:$16 sps:$4 sm:$0xff]  }
  0xa0   :  { %5043 = vmatprep.subr.bf16.mxu0 %v7587_v54  ;;  %5576 = vmatprep.subr.bf16.mxu1 %v7590_v55  ;;  %v7678_v54 = vld [vmem:[%s11225_s1 + $0x6e4] ss:$16 sps:$4 sm:$0xff]   ;;  %v7681_v55 = vld [vmem:[%s11225_s1 + $0x6ec] ss:$16 sps:$4 sm:$0xff]  }
  0xa3   :  { %5044 = vmatpush1.bf16.msra.mxu0 %v7585_v56  ;;  %5577 = vmatpush1.bf16.msra.mxu1 %v7588_v57  ;;  %v7676_v56 = vld [vmem:[%s11225_s1 + $0x6e0] ss:$16 sps:$4 sm:$0xff]   ;;  %v7679_v57 = vld [vmem:[%s11225_s1 + $0x6e8] ss:$16 sps:$4 sm:$0xff]  }
  0xa4   :  { %5045 = vmatprep.subr.bf16.mxu0 %v7593_v58  ;;  %5578 = vmatprep.subr.bf16.mxu1 %v7596_v59  ;;  %v7684_v58 = vld [vmem:[%s11225_s1 + $0x704] ss:$16 sps:$4 sm:$0xff]   ;;  %v7687_v59 = vld [vmem:[%s11225_s1 + $0x70c] ss:$16 sps:$4 sm:$0xff]  }
  0xa7   :  { %5046 = vmatpush1.bf16.msra.mxu0 %v7591_v60  ;;  %5579 = vmatpush1.bf16.msra.mxu1 %v7594_v61  ;;  %v7682_v60 = vld [vmem:[%s11225_s1 + $0x700] ss:$16 sps:$4 sm:$0xff]   ;;  %v7685_v61 = vld [vmem:[%s11225_s1 + $0x708] ss:$16 sps:$4 sm:$0xff]  }
  0xa8   :  { %5047 = vmatprep.subr.bf16.mxu0 %v7599_v62  ;;  %5580 = vmatprep.subr.bf16.mxu1 %v7602_v63  ;;  %v7690_v62 = vld [vmem:[%s11225_s1 + $0x724] ss:$16 sps:$4 sm:$0xff]   ;;  %v7693_v63 = vld [vmem:[%s11225_s1 + $0x72c] ss:$16 sps:$4 sm:$0xff]  }
  0xab   :  { %5048 = vmatpush1.bf16.msra.mxu0 %v7597_v0  ;;  %5581 = vmatpush1.bf16.msra.mxu1 %v7600_v1  ;;  %v7688_v0 = vld [vmem:[%s11225_s1 + $0x720] ss:$16 sps:$4 sm:$0xff]   ;;  %v7691_v1 = vld [vmem:[%s11225_s1 + $0x728] ss:$16 sps:$4 sm:$0xff]  }
  0xac   :  { %5049 = vmatprep.subr.bf16.mxu0 %v7605_v2  ;;  %5582 = vmatprep.subr.bf16.mxu1 %v7608_v3  ;;  %v7696_v2 = vld [vmem:[%s11225_s1 + $0x744] ss:$16 sps:$4 sm:$0xff]   ;;  %v7699_v3 = vld [vmem:[%s11225_s1 + $0x74c] ss:$16 sps:$4 sm:$0xff]  }
  0xaf   :  { %5050 = vmatpush1.bf16.msra.mxu0 %v7603_v4  ;;  %5583 = vmatpush1.bf16.msra.mxu1 %v7606_v5  ;;  %v7694_v4 = vld [vmem:[%s11225_s1 + $0x740] ss:$16 sps:$4 sm:$0xff]   ;;  %v7697_v5 = vld [vmem:[%s11225_s1 + $0x748] ss:$16 sps:$4 sm:$0xff]  }
  0xb0   :  { %5051 = vmatprep.subr.bf16.mxu0 %v7611_v6  ;;  %5584 = vmatprep.subr.bf16.mxu1 %v7614_v7  ;;  %v7702_v6 = vld [vmem:[%s11225_s1 + $0x764] ss:$16 sps:$4 sm:$0xff]   ;;  %v7705_v7 = vld [vmem:[%s11225_s1 + $0x76c] ss:$16 sps:$4 sm:$0xff]  }
  0xb3   :  { %5052 = vmatpush1.bf16.msra.mxu0 %v7609_v8  ;;  %5585 = vmatpush1.bf16.msra.mxu1 %v7612_v9  ;;  %v7700_v8 = vld [vmem:[%s11225_s1 + $0x760] ss:$16 sps:$4 sm:$0xff]   ;;  %v7703_v9 = vld [vmem:[%s11225_s1 + $0x768] ss:$16 sps:$4 sm:$0xff]  }
  0xb4   :  { %5053 = vmatprep.subr.bf16.mxu0 %v7617_v10  ;;  %5586 = vmatprep.subr.bf16.mxu1 %v7620_v11  ;;  %v7708_v10 = vld [vmem:[%s11225_s1 + $0x784] ss:$16 sps:$4 sm:$0xff]   ;;  %v7711_v11 = vld [vmem:[%s11225_s1 + $0x78c] ss:$16 sps:$4 sm:$0xff]  }
  0xb7   :  { %5054 = vmatpush1.bf16.msra.mxu0 %v7615_v12  ;;  %5587 = vmatpush1.bf16.msra.mxu1 %v7618_v52  ;;  %v7706_v12 = vld [vmem:[%s11225_s1 + $0x780] ss:$16 sps:$4 sm:$0xff]   ;;  %v7709_v52 = vld [vmem:[%s11225_s1 + $0x788] ss:$16 sps:$4 sm:$0xff]  }
  0xb8   :  { %5055 = vmatprep.subr.bf16.mxu0 %v7623_v15  ;;  %5588 = vmatprep.subr.bf16.mxu1 %v7626_v16  ;;  %v7714_v15 = vld [vmem:[%s11225_s1 + $0x7a4] ss:$16 sps:$4 sm:$0xff]   ;;  %v7717_v16 = vld [vmem:[%s11225_s1 + $0x7ac] ss:$16 sps:$4 sm:$0xff]  }
  0xbb   :  { %5056 = vmatpush1.bf16.msra.mxu0 %v7621_v17  ;;  %5589 = vmatpush1.bf16.msra.mxu1 %v7624_v18  ;;  %v7712_v17 = vld [vmem:[%s11225_s1 + $0x7a0] ss:$16 sps:$4 sm:$0xff]   ;;  %v7715_v18 = vld [vmem:[%s11225_s1 + $0x7a8] ss:$16 sps:$4 sm:$0xff]  }
  0xbc   :  { %5057 = vmatprep.subr.bf16.mxu0 %v7629_v19  ;;  %5590 = vmatprep.subr.bf16.mxu1 %v7632_v20  ;;  %v7720_v19 = vld [vmem:[%s11225_s1 + $0x7c4] ss:$16 sps:$4 sm:$0xff]   ;;  %v7723_v20 = vld [vmem:[%s11225_s1 + $0x7cc] ss:$16 sps:$4 sm:$0xff]  }
  0xbf   :  { %5058 = vmatpush1.bf16.msra.mxu0 %v7627_v21  ;;  %5591 = vmatpush1.bf16.msra.mxu1 %v7630_v22  ;;  %v9408_v21 = vld.sshfl [vmem:[%s11224_s0 + $0x8] sm:$0xff pattern:$0x75316420]  ;;  %v7718_v22 = vld [vmem:[%s11225_s1 + $0x7c0] ss:$16 sps:$4 sm:$0xff]  }
  0xc0   :  { %5068 = vmatprep.subr.bf16.mxu0 %v7636_v23  ;;  %5601 = vmatprep.subr.bf16.mxu1 %v7639_v24  ;;  %v7721_v23 = vld [vmem:[%s11225_s1 + $0x7c8] ss:$16 sps:$4 sm:$0xff]   ;;  %v7726_v24 = vld [vmem:[%s11225_s1 + $0x7e4] ss:$16 sps:$4 sm:$0xff]  }
  0xc2   :  { %5060 = vmatmul.mubr.bf16.vlgmr.msra.gmra.mrb[0].mxu0 %v9234_v26  ;;  %5593 = vmatmul.mubr.bf16.vlgmr.msra.gmra.mrb[0].mxu1 %v9234_v26 }
  0xc3   :  { %5069 = vmatpush1.bf16.msra.mxu0 %v7634_v13  ;;  %5602 = vmatpush1.bf16.msra.mxu1 %v7637_v27  ;;  %v7729_v13 = vld [vmem:[%s11225_s1 + $0x7ec] ss:$16 sps:$4 sm:$0xff]   ;;  %v7724_v27 = vld [vmem:[%s11225_s1 + $0x7e0] ss:$16 sps:$4 sm:$0xff]  }
  0xc4   :  { %5070 = vmatprep.subr.bf16.mxu0 %v7642_v28  ;;  %5603 = vmatprep.subr.bf16.mxu1 %v7645_v29  ;;  %v7727_v28 = vld [vmem:[%s11225_s1 + $0x7e8] ss:$16 sps:$4 sm:$0xff]   ;;  %v7732_v29 = vld [vmem:[%s11225_s1 + $0x804] ss:$16 sps:$4 sm:$0xff]  }
  0xc5   :  { %5100 = vmatprep.mubr.bf16.mxu0 %v884_v14  ;;  %5633 = vmatprep.mubr.bf16.mxu1 %v884_v14  ;;  %v7735_v14 = vld [vmem:[%s11225_s1 + $0x80c] ss:$16 sps:$4 sm:$0xff]  }
  0xc7   :  { %5071 = vmatpush1.bf16.msra.mxu0 %v7640_v30  ;;  %5604 = vmatpush1.bf16.msra.mxu1 %v7643_v31  ;;  %v900_v30 = vcombine.high %v9408_v21, %v9408_v21  ;;  %v882_v31 = vcombine.high %v9234_v26, %v9234_v26  ;;  %v7741_v26 = vld [vmem:[%s11225_s1 + $0x82c] ss:$16 sps:$4 sm:$0xff]  }
  0xc8   :  { %5072 = vmatprep.subr.bf16.mxu0 %v7648_v25  ;;  %5605 = vmatprep.subr.bf16.mxu1 %v7651_v32  ;;  %v7730_v25 = vld [vmem:[%s11225_s1 + $0x800] ss:$16 sps:$4 sm:$0xff]   ;;  %v7733_v32 = vld [vmem:[%s11225_s1 + $0x808] ss:$16 sps:$4 sm:$0xff]  }
  0xcb   :  { %5073 = vmatpush1.bf16.msra.mxu0 %v7646_v33  ;;  %5606 = vmatpush1.bf16.msra.mxu1 %v7649_v34  ;;  %v7738_v33 = vld [vmem:[%s11225_s1 + $0x824] ss:$16 sps:$4 sm:$0xff]   ;;  %v9451_v34 = vrot.slane %v900_v30, %v8750_v49 }
  0xcc   :  { %5074 = vmatprep.subr.bf16.mxu0 %v7654_v35  ;;  %5607 = vmatprep.subr.bf16.mxu1 %v7657_v36  ;;  %v7736_v35 = vld [vmem:[%s11225_s1 + $0x820] ss:$16 sps:$4 sm:$0xff]   ;;  %v7739_v36 = vld [vmem:[%s11225_s1 + $0x828] ss:$16 sps:$4 sm:$0xff]   ;;  %v7822_v30 = vld [vmem:[%s11225_s1 + $0x9e4] ss:$16 sps:$4 sm:$0xff]  }
  0xcf   :  { %5075 = vmatpush1.bf16.msra.mxu0 %v7652_v37  ;;  %5608 = vmatpush1.bf16.msra.mxu1 %v7655_v38  ;;  %v7744_v37 = vld [vmem:[%s11225_s1 + $0x844] ss:$16 sps:$4 sm:$0xff]   ;;  %v7747_v38 = vld [vmem:[%s11225_s1 + $0x84c] ss:$16 sps:$4 sm:$0xff]  }
  0xd0   :  { %5076 = vmatprep.subr.bf16.mxu0 %v7660_v39  ;;  %5609 = vmatprep.subr.bf16.mxu1 %v7663_v40  ;;  %v7742_v39 = vld [vmem:[%s11225_s1 + $0x840] ss:$16 sps:$4 sm:$0xff]   ;;  %v7745_v40 = vld [vmem:[%s11225_s1 + $0x848] ss:$16 sps:$4 sm:$0xff]  }
  0xd3   :  { %5077 = vmatpush1.bf16.msra.mxu0 %v7658_v41  ;;  %5610 = vmatpush1.bf16.msra.mxu1 %v7661_v43  ;;  %v7750_v41 = vld [vmem:[%s11225_s1 + $0x864] ss:$16 sps:$4 sm:$0xff]   ;;  %v7753_v43 = vld [vmem:[%s11225_s1 + $0x86c] ss:$16 sps:$4 sm:$0xff]  }
  0xd4   :  { %5078 = vmatprep.subr.bf16.mxu0 %v7666_v44  ;;  %5611 = vmatprep.subr.bf16.mxu1 %v7669_v45  ;;  %v7748_v44 = vld [vmem:[%s11225_s1 + $0x860] ss:$16 sps:$4 sm:$0xff]   ;;  %v7751_v45 = vld [vmem:[%s11225_s1 + $0x868] ss:$16 sps:$4 sm:$0xff]  }
  0xd7   :  { %5079 = vmatpush1.bf16.msra.mxu0 %v7664_v46  ;;  %5612 = vmatpush1.bf16.msra.mxu1 %v7667_v47  ;;  %v7756_v46 = vld [vmem:[%s11225_s1 + $0x884] ss:$16 sps:$4 sm:$0xff]   ;;  %v7759_v47 = vld [vmem:[%s11225_s1 + $0x88c] ss:$16 sps:$4 sm:$0xff]  }
  0xd8   :  { %5080 = vmatprep.subr.bf16.mxu0 %v7672_v48  ;;  %5613 = vmatprep.subr.bf16.mxu1 %v7675_v50  ;;  %v7754_v48 = vld [vmem:[%s11225_s1 + $0x880] ss:$16 sps:$4 sm:$0xff]   ;;  %v7757_v50 = vld [vmem:[%s11225_s1 + $0x888] ss:$16 sps:$4 sm:$0xff]  }
  0xdb   :  { %5081 = vmatpush1.bf16.msra.mxu0 %v7670_v51  ;;  %5614 = vmatpush1.bf16.msra.mxu1 %v7673_v53  ;;  %v7762_v51 = vld [vmem:[%s11225_s1 + $0x8a4] ss:$16 sps:$4 sm:$0xff]   ;;  %v7765_v53 = vld [vmem:[%s11225_s1 + $0x8ac] ss:$16 sps:$4 sm:$0xff]  }
  0xdc   :  { %5082 = vmatprep.subr.bf16.mxu0 %v7678_v54  ;;  %5615 = vmatprep.subr.bf16.mxu1 %v7681_v55  ;;  %v7760_v54 = vld [vmem:[%s11225_s1 + $0x8a0] ss:$16 sps:$4 sm:$0xff]   ;;  %v7763_v55 = vld [vmem:[%s11225_s1 + $0x8a8] ss:$16 sps:$4 sm:$0xff]  }
  0xdf   :  { %5083 = vmatpush1.bf16.msra.mxu0 %v7676_v56  ;;  %5616 = vmatpush1.bf16.msra.mxu1 %v7679_v57  ;;  %v7768_v56 = vld [vmem:[%s11225_s1 + $0x8c4] ss:$16 sps:$4 sm:$0xff]   ;;  %v7771_v57 = vld [vmem:[%s11225_s1 + $0x8cc] ss:$16 sps:$4 sm:$0xff]  }
  0xe0   :  { %5084 = vmatprep.subr.bf16.mxu0 %v7684_v58  ;;  %5617 = vmatprep.subr.bf16.mxu1 %v7687_v59  ;;  %v7766_v58 = vld [vmem:[%s11225_s1 + $0x8c0] ss:$16 sps:$4 sm:$0xff]   ;;  %v7769_v59 = vld [vmem:[%s11225_s1 + $0x8c8] ss:$16 sps:$4 sm:$0xff]  }
  0xe3   :  { %5085 = vmatpush1.bf16.msra.mxu0 %v7682_v60  ;;  %5618 = vmatpush1.bf16.msra.mxu1 %v7685_v61  ;;  %v7774_v60 = vld [vmem:[%s11225_s1 + $0x8e4] ss:$16 sps:$4 sm:$0xff]   ;;  %v7777_v61 = vld [vmem:[%s11225_s1 + $0x8ec] ss:$16 sps:$4 sm:$0xff]  }
  0xe4   :  { %5086 = vmatprep.subr.bf16.mxu0 %v7690_v62  ;;  %5619 = vmatprep.subr.bf16.mxu1 %v7693_v63  ;;  %v7772_v62 = vld [vmem:[%s11225_s1 + $0x8e0] ss:$16 sps:$4 sm:$0xff]   ;;  %v7775_v63 = vld [vmem:[%s11225_s1 + $0x8e8] ss:$16 sps:$4 sm:$0xff]  }
  0xe7   :  { %5087 = vmatpush1.bf16.msra.mxu0 %v7688_v0  ;;  %5620 = vmatpush1.bf16.msra.mxu1 %v7691_v1  ;;  %v7780_v0 = vld [vmem:[%s11225_s1 + $0x904] ss:$16 sps:$4 sm:$0xff]   ;;  %v7783_v1 = vld [vmem:[%s11225_s1 + $0x90c] ss:$16 sps:$4 sm:$0xff]  }
  0xe8   :  { %5088 = vmatprep.subr.bf16.mxu0 %v7696_v2  ;;  %5621 = vmatprep.subr.bf16.mxu1 %v7699_v3  ;;  %v7778_v2 = vld [vmem:[%s11225_s1 + $0x900] ss:$16 sps:$4 sm:$0xff]   ;;  %v7781_v3 = vld [vmem:[%s11225_s1 + $0x908] ss:$16 sps:$4 sm:$0xff]  }
  0xeb   :  { %5089 = vmatpush1.bf16.msra.mxu0 %v7694_v4  ;;  %5622 = vmatpush1.bf16.msra.mxu1 %v7697_v5  ;;  %v7786_v4 = vld [vmem:[%s11225_s1 + $0x924] ss:$16 sps:$4 sm:$0xff]   ;;  %v7789_v5 = vld [vmem:[%s11225_s1 + $0x92c] ss:$16 sps:$4 sm:$0xff]  }
  0xec   :  { %5090 = vmatprep.subr.bf16.mxu0 %v7702_v6  ;;  %5623 = vmatprep.subr.bf16.mxu1 %v7705_v7  ;;  %v7784_v6 = vld [vmem:[%s11225_s1 + $0x920] ss:$16 sps:$4 sm:$0xff]   ;;  %v7787_v7 = vld [vmem:[%s11225_s1 + $0x928] ss:$16 sps:$4 sm:$0xff]  }
  0xef   :  { %5091 = vmatpush1.bf16.msra.mxu0 %v7700_v8  ;;  %5624 = vmatpush1.bf16.msra.mxu1 %v7703_v9  ;;  %v7792_v8 = vld [vmem:[%s11225_s1 + $0x944] ss:$16 sps:$4 sm:$0xff]   ;;  %v7795_v9 = vld [vmem:[%s11225_s1 + $0x94c] ss:$16 sps:$4 sm:$0xff]  }
  0xf0   :  { %5092 = vmatprep.subr.bf16.mxu0 %v7708_v10  ;;  %5625 = vmatprep.subr.bf16.mxu1 %v7711_v11  ;;  %v7790_v10 = vld [vmem:[%s11225_s1 + $0x940] ss:$16 sps:$4 sm:$0xff]   ;;  %v7793_v11 = vld [vmem:[%s11225_s1 + $0x948] ss:$16 sps:$4 sm:$0xff]  }
  0xf3   :  { %5093 = vmatpush1.bf16.msra.mxu0 %v7706_v12  ;;  %5626 = vmatpush1.bf16.msra.mxu1 %v7709_v52  ;;  %v7798_v12 = vld [vmem:[%s11225_s1 + $0x964] ss:$16 sps:$4 sm:$0xff]   ;;  %v7801_v52 = vld [vmem:[%s11225_s1 + $0x96c] ss:$16 sps:$4 sm:$0xff]  }
  0xf4   :  { %5094 = vmatprep.subr.bf16.mxu0 %v7714_v15  ;;  %5627 = vmatprep.subr.bf16.mxu1 %v7717_v16  ;;  %v7796_v15 = vld [vmem:[%s11225_s1 + $0x960] ss:$16 sps:$4 sm:$0xff]   ;;  %v7799_v16 = vld [vmem:[%s11225_s1 + $0x968] ss:$16 sps:$4 sm:$0xff]  }
  0xf7   :  { %5095 = vmatpush1.bf16.msra.mxu0 %v7712_v17  ;;  %5628 = vmatpush1.bf16.msra.mxu1 %v7715_v18  ;;  %v7804_v17 = vld [vmem:[%s11225_s1 + $0x984] ss:$16 sps:$4 sm:$0xff]   ;;  %v7807_v18 = vld [vmem:[%s11225_s1 + $0x98c] ss:$16 sps:$4 sm:$0xff]  }
  0xf8   :  { %5096 = vmatprep.subr.bf16.mxu0 %v7720_v19  ;;  %5629 = vmatprep.subr.bf16.mxu1 %v7723_v20  ;;  %v7802_v19 = vld [vmem:[%s11225_s1 + $0x980] ss:$16 sps:$4 sm:$0xff]   ;;  %v7805_v20 = vld [vmem:[%s11225_s1 + $0x988] ss:$16 sps:$4 sm:$0xff]  }
  0xfb   :  { %5097 = vmatpush1.bf16.msra.mxu0 %v7718_v22  ;;  %5630 = vmatpush1.bf16.msra.mxu1 %v7721_v23  ;;  %v7810_v22 = vld [vmem:[%s11225_s1 + $0x9a4] ss:$16 sps:$4 sm:$0xff]   ;;  %v7813_v23 = vld [vmem:[%s11225_s1 + $0x9ac] ss:$16 sps:$4 sm:$0xff]  }
  0xfc   :  { %5098 = vmatprep.subr.bf16.mxu0 %v7726_v24  ;;  %5631 = vmatprep.subr.bf16.mxu1 %v7729_v13  ;;  %v7808_v24 = vld [vmem:[%s11225_s1 + $0x9a0] ss:$16 sps:$4 sm:$0xff]   ;;  %v7811_v13 = vld [vmem:[%s11225_s1 + $0x9a8] ss:$16 sps:$4 sm:$0xff]  }
  0xff   :  { %5099 = vmatpush1.bf16.msra.mxu0 %v7724_v27  ;;  %5632 = vmatpush1.bf16.msra.mxu1 %v7727_v28  ;;  %v7816_v27 = vld [vmem:[%s11225_s1 + $0x9c4] ss:$16 sps:$4 sm:$0xff]   ;;  %v7819_v28 = vld [vmem:[%s11225_s1 + $0x9cc] ss:$16 sps:$4 sm:$0xff]  }
 0x100   :  { %5109 = vmatprep.subr.bf16.mxu0 %v7732_v29  ;;  %5642 = vmatprep.subr.bf16.mxu1 %v7735_v14  ;;  %v7814_v29 = vld [vmem:[%s11225_s1 + $0x9c0] ss:$16 sps:$4 sm:$0xff]   ;;  %v7817_v14 = vld [vmem:[%s11225_s1 + $0x9c8] ss:$16 sps:$4 sm:$0xff]  }
 0x102   :  { %5101 = vmatmul.mubr.bf16.vlgmr.msra.gmra.mrb[0].mxu0 %v882_v31  ;;  %5634 = vmatmul.mubr.bf16.vlgmr.msra.gmra.mrb[0].mxu1 %v882_v31  ;;  %v7825_v31 = vld [vmem:[%s11225_s1 + $0x9ec] ss:$16 sps:$4 sm:$0xff]  }
 0x103   :  { %5110 = vmatpush1.bf16.msra.mxu0 %v7730_v25  ;;  %5643 = vmatpush1.bf16.msra.mxu1 %v7733_v32  ;;  %v7820_v25 = vld [vmem:[%s11225_s1 + $0x9e0] ss:$16 sps:$4 sm:$0xff]   ;;  %v7823_v32 = vld [vmem:[%s11225_s1 + $0x9e8] ss:$16 sps:$4 sm:$0xff]  }
 0x104   :  { %5111 = vmatprep.subr.bf16.mxu0 %v7738_v33  ;;  %5644 = vmatprep.subr.bf16.mxu1 %v7741_v26  ;;  %v7828_v33 = vld [vmem:[%s11225_s1 + $0xa04] ss:$16 sps:$4 sm:$0xff]   ;;  %v7831_v26 = vld [vmem:[%s11225_s1 + $0xa0c] ss:$16 sps:$4 sm:$0xff]  }
 0x105   :  { %5141 = vmatprep.mubr.bf16.mxu0 %v9451_v34  ;;  %5674 = vmatprep.mubr.bf16.mxu1 %v9451_v34 }
 0x107   :  { %5112 = vmatpush1.bf16.msra.mxu0 %v7736_v35  ;;  %5645 = vmatpush1.bf16.msra.mxu1 %v7739_v36  ;;  %v9637_v35 = vrot.slane %v9408_v21, %v8750_v49  ;;  %v7826_v36 = vld [vmem:[%s11225_s1 + $0xa00] ss:$16 sps:$4 sm:$0xff]   ;;  %v7837_v21 = vld [vmem:[%s11225_s1 + $0xa2c] ss:$16 sps:$4 sm:$0xff]  }
 0x108   :  { %5113 = vmatprep.subr.bf16.mxu0 %v7744_v37  ;;  %5646 = vmatprep.subr.bf16.mxu1 %v7747_v38  ;;  %v7829_v37 = vld [vmem:[%s11225_s1 + $0xa08] ss:$16 sps:$4 sm:$0xff]   ;;  %v7834_v38 = vld [vmem:[%s11225_s1 + $0xa24] ss:$16 sps:$4 sm:$0xff]  }
 0x10b   :  { %5114 = vmatpush1.bf16.msra.mxu0 %v7742_v39  ;;  %5647 = vmatpush1.bf16.msra.mxu1 %v7745_v40  ;;  %v932_v39 = vcombine.high %v9451_v34, %v9451_v34  ;;  %v7832_v40 = vld [vmem:[%s11225_s1 + $0xa20] ss:$16 sps:$4 sm:$0xff]   ;;  %v7840_v34 = vld [vmem:[%s11225_s1 + $0xa44] ss:$16 sps:$4 sm:$0xff]  }
 0x10c   :  { %5115 = vmatprep.subr.bf16.mxu0 %v7750_v41  ;;  %5648 = vmatprep.subr.bf16.mxu1 %v7753_v43  ;;  %v7835_v41 = vld [vmem:[%s11225_s1 + $0xa28] ss:$16 sps:$4 sm:$0xff]   ;;  %v7843_v43 = vld [vmem:[%s11225_s1 + $0xa4c] ss:$16 sps:$4 sm:$0xff]  }
 0x10f   :  { %5116 = vmatpush1.bf16.msra.mxu0 %v7748_v44  ;;  %5649 = vmatpush1.bf16.msra.mxu1 %v7751_v45  ;;  %v7838_v44 = vld [vmem:[%s11225_s1 + $0xa40] ss:$16 sps:$4 sm:$0xff]   ;;  %v7841_v45 = vld [vmem:[%s11225_s1 + $0xa48] ss:$16 sps:$4 sm:$0xff]  }
 0x110   :  { %5117 = vmatprep.subr.bf16.mxu0 %v7756_v46  ;;  %5650 = vmatprep.subr.bf16.mxu1 %v7759_v47  ;;  %v7846_v46 = vld [vmem:[%s11225_s1 + $0xa64] ss:$16 sps:$4 sm:$0xff]   ;;  %v7849_v47 = vld [vmem:[%s11225_s1 + $0xa6c] ss:$16 sps:$4 sm:$0xff]  }
 0x113   :  { %5118 = vmatpush1.bf16.msra.mxu0 %v7754_v48  ;;  %5651 = vmatpush1.bf16.msra.mxu1 %v7757_v50  ;;  %v7844_v48 = vld [vmem:[%s11225_s1 + $0xa60] ss:$16 sps:$4 sm:$0xff]   ;;  %v7847_v50 = vld [vmem:[%s11225_s1 + $0xa68] ss:$16 sps:$4 sm:$0xff]  }
 0x114   :  { %5119 = vmatprep.subr.bf16.mxu0 %v7762_v51  ;;  %5652 = vmatprep.subr.bf16.mxu1 %v7765_v53  ;;  %v7852_v51 = vld [vmem:[%s11225_s1 + $0xa84] ss:$16 sps:$4 sm:$0xff]   ;;  %v7855_v53 = vld [vmem:[%s11225_s1 + $0xa8c] ss:$16 sps:$4 sm:$0xff]  }
 0x117   :  { %5120 = vmatpush1.bf16.msra.mxu0 %v7760_v54  ;;  %5653 = vmatpush1.bf16.msra.mxu1 %v7763_v55  ;;  %v7850_v54 = vld [vmem:[%s11225_s1 + $0xa80] ss:$16 sps:$4 sm:$0xff]   ;;  %v7853_v55 = vld [vmem:[%s11225_s1 + $0xa88] ss:$16 sps:$4 sm:$0xff]  }
 0x118   :  { %5121 = vmatprep.subr.bf16.mxu0 %v7768_v56  ;;  %5654 = vmatprep.subr.bf16.mxu1 %v7771_v57  ;;  %v7858_v56 = vld [vmem:[%s11225_s1 + $0xaa4] ss:$16 sps:$4 sm:$0xff]   ;;  %v7861_v57 = vld [vmem:[%s11225_s1 + $0xaac] ss:$16 sps:$4 sm:$0xff]  }
 0x11b   :  { %5122 = vmatpush1.bf16.msra.mxu0 %v7766_v58  ;;  %5655 = vmatpush1.bf16.msra.mxu1 %v7769_v59  ;;  %v7856_v58 = vld [vmem:[%s11225_s1 + $0xaa0] ss:$16 sps:$4 sm:$0xff]   ;;  %v7859_v59 = vld [vmem:[%s11225_s1 + $0xaa8] ss:$16 sps:$4 sm:$0xff]  }
 0x11c   :  { %5123 = vmatprep.subr.bf16.mxu0 %v7774_v60  ;;  %5656 = vmatprep.subr.bf16.mxu1 %v7777_v61  ;;  %v7864_v60 = vld [vmem:[%s11225_s1 + $0xac4] ss:$16 sps:$4 sm:$0xff]   ;;  %v7867_v61 = vld [vmem:[%s11225_s1 + $0xacc] ss:$16 sps:$4 sm:$0xff]  }
 0x11f   :  { %5124 = vmatpush1.bf16.msra.mxu0 %v7772_v62  ;;  %5657 = vmatpush1.bf16.msra.mxu1 %v7775_v63  ;;  %v7862_v62 = vld [vmem:[%s11225_s1 + $0xac0] ss:$16 sps:$4 sm:$0xff]   ;;  %v7865_v63 = vld [vmem:[%s11225_s1 + $0xac8] ss:$16 sps:$4 sm:$0xff]  }
 0x120   :  { %5125 = vmatprep.subr.bf16.mxu0 %v7780_v0  ;;  %5658 = vmatprep.subr.bf16.mxu1 %v7783_v1  ;;  %v7870_v0 = vld [vmem:[%s11225_s1 + $0xae4] ss:$16 sps:$4 sm:$0xff]   ;;  %v7873_v1 = vld [vmem:[%s11225_s1 + $0xaec] ss:$16 sps:$4 sm:$0xff]  }
 0x123   :  { %5126 = vmatpush1.bf16.msra.mxu0 %v7778_v2  ;;  %5659 = vmatpush1.bf16.msra.mxu1 %v7781_v3  ;;  %v7868_v2 = vld [vmem:[%s11225_s1 + $0xae0] ss:$16 sps:$4 sm:$0xff]   ;;  %v7871_v3 = vld [vmem:[%s11225_s1 + $0xae8] ss:$16 sps:$4 sm:$0xff]  }
 0x124   :  { %5127 = vmatprep.subr.bf16.mxu0 %v7786_v4  ;;  %5660 = vmatprep.subr.bf16.mxu1 %v7789_v5  ;;  %v7876_v4 = vld [vmem:[%s11225_s1 + $0xb04] ss:$16 sps:$4 sm:$0xff]   ;;  %v7879_v5 = vld [vmem:[%s11225_s1 + $0xb0c] ss:$16 sps:$4 sm:$0xff]  }
 0x127   :  { %5128 = vmatpush1.bf16.msra.mxu0 %v7784_v6  ;;  %5661 = vmatpush1.bf16.msra.mxu1 %v7787_v7  ;;  %v7874_v6 = vld [vmem:[%s11225_s1 + $0xb00] ss:$16 sps:$4 sm:$0xff]   ;;  %v7877_v7 = vld [vmem:[%s11225_s1 + $0xb08] ss:$16 sps:$4 sm:$0xff]  }
 0x128   :  { %5129 = vmatprep.subr.bf16.mxu0 %v7792_v8  ;;  %5662 = vmatprep.subr.bf16.mxu1 %v7795_v9  ;;  %v7882_v8 = vld [vmem:[%s11225_s1 + $0xb24] ss:$16 sps:$4 sm:$0xff]   ;;  %v7885_v9 = vld [vmem:[%s11225_s1 + $0xb2c] ss:$16 sps:$4 sm:$0xff]  }
 0x12b   :  { %5130 = vmatpush1.bf16.msra.mxu0 %v7790_v10  ;;  %5663 = vmatpush1.bf16.msra.mxu1 %v7793_v11  ;;  %v7880_v10 = vld [vmem:[%s11225_s1 + $0xb20] ss:$16 sps:$4 sm:$0xff]   ;;  %v7883_v11 = vld [vmem:[%s11225_s1 + $0xb28] ss:$16 sps:$4 sm:$0xff]  }
 0x12c   :  { %5131 = vmatprep.subr.bf16.mxu0 %v7798_v12  ;;  %5664 = vmatprep.subr.bf16.mxu1 %v7801_v52  ;;  %v7888_v12 = vld [vmem:[%s11225_s1 + $0xb44] ss:$16 sps:$4 sm:$0xff]   ;;  %v7891_v52 = vld [vmem:[%s11225_s1 + $0xb4c] ss:$16 sps:$4 sm:$0xff]  }
 0x12f   :  { %5132 = vmatpush1.bf16.msra.mxu0 %v7796_v15  ;;  %5665 = vmatpush1.bf16.msra.mxu1 %v7799_v16  ;;  %v7886_v15 = vld [vmem:[%s11225_s1 + $0xb40] ss:$16 sps:$4 sm:$0xff]   ;;  %v7889_v16 = vld [vmem:[%s11225_s1 + $0xb48] ss:$16 sps:$4 sm:$0xff]  }
 0x130   :  { %5133 = vmatprep.subr.bf16.mxu0 %v7804_v17  ;;  %5666 = vmatprep.subr.bf16.mxu1 %v7807_v18  ;;  %v7894_v17 = vld [vmem:[%s11225_s1 + $0xb64] ss:$16 sps:$4 sm:$0xff]   ;;  %v7897_v18 = vld [vmem:[%s11225_s1 + $0xb6c] ss:$16 sps:$4 sm:$0xff]  }
 0x133   :  { %5134 = vmatpush1.bf16.msra.mxu0 %v7802_v19  ;;  %5667 = vmatpush1.bf16.msra.mxu1 %v7805_v20  ;;  %v7892_v19 = vld [vmem:[%s11225_s1 + $0xb60] ss:$16 sps:$4 sm:$0xff]   ;;  %v7895_v20 = vld [vmem:[%s11225_s1 + $0xb68] ss:$16 sps:$4 sm:$0xff]  }
 0x134   :  { %5135 = vmatprep.subr.bf16.mxu0 %v7810_v22  ;;  %5668 = vmatprep.subr.bf16.mxu1 %v7813_v23  ;;  %v7900_v22 = vld [vmem:[%s11225_s1 + $0xb84] ss:$16 sps:$4 sm:$0xff]   ;;  %v7903_v23 = vld [vmem:[%s11225_s1 + $0xb8c] ss:$16 sps:$4 sm:$0xff]  }
 0x137   :  { %5136 = vmatpush1.bf16.msra.mxu0 %v7808_v24  ;;  %5669 = vmatpush1.bf16.msra.mxu1 %v7811_v13  ;;  %v7898_v24 = vld [vmem:[%s11225_s1 + $0xb80] ss:$16 sps:$4 sm:$0xff]   ;;  %v7901_v13 = vld [vmem:[%s11225_s1 + $0xb88] ss:$16 sps:$4 sm:$0xff]  }
 0x138   :  { %5137 = vmatprep.subr.bf16.mxu0 %v7816_v27  ;;  %5670 = vmatprep.subr.bf16.mxu1 %v7819_v28  ;;  %v7906_v27 = vld [vmem:[%s11225_s1 + $0xba4] ss:$16 sps:$4 sm:$0xff]   ;;  %v7909_v28 = vld [vmem:[%s11225_s1 + $0xbac] ss:$16 sps:$4 sm:$0xff]  }
 0x13b   :  { %5138 = vmatpush1.bf16.msra.mxu0 %v7814_v29  ;;  %5671 = vmatpush1.bf16.msra.mxu1 %v7817_v14  ;;  %v7904_v29 = vld [vmem:[%s11225_s1 + $0xba0] ss:$16 sps:$4 sm:$0xff]   ;;  %v7907_v14 = vld [vmem:[%s11225_s1 + $0xba8] ss:$16 sps:$4 sm:$0xff]  }
 0x13c   :  { %5139 = vmatprep.subr.bf16.mxu0 %v7822_v30  ;;  %5672 = vmatprep.subr.bf16.mxu1 %v7825_v31  ;;  %v7912_v30 = vld [vmem:[%s11225_s1 + $0xbc4] ss:$16 sps:$4 sm:$0xff]   ;;  %v7915_v31 = vld [vmem:[%s11225_s1 + $0xbcc] ss:$16 sps:$4 sm:$0xff]  }
 0x13f   :  { %5140 = vmatpush1.bf16.msra.mxu0 %v7820_v25  ;;  %5673 = vmatpush1.bf16.msra.mxu1 %v7823_v32  ;;  %v8556_v25 = vld [vmem:[%s11224_s0 + $0x8] sm:$0xff] }
 0x140   :  { %5150 = vmatprep.subr.bf16.mxu0 %v7828_v33  ;;  %5683 = vmatprep.subr.bf16.mxu1 %v7831_v26  ;;  %v885_v32 = vcombine.high %v8556_v25, %v8556_v25  ;;  %v7910_v33 = vld [vmem:[%s11225_s1 + $0xbc0] ss:$16 sps:$4 sm:$0xff]   ;;  %v7913_v26 = vld [vmem:[%s11225_s1 + $0xbc8] ss:$16 sps:$4 sm:$0xff]  }
 0x141   :  { %v7994_v25 = vld [vmem:[%s11225_s1 + $0xd80] ss:$16 sps:$4 sm:$0xff]  }
 0x142   :  { %5142 = vmatmul.mubr.bf16.vlgmr.msra.gmra.mrb[0].mxu0 %v9637_v35  ;;  %5675 = vmatmul.mubr.bf16.vlgmr.msra.gmra.mrb[0].mxu1 %v9637_v35 }
 0x143   :  { %5151 = vmatpush1.bf16.msra.mxu0 %v7826_v36  ;;  %5684 = vmatpush1.bf16.msra.mxu1 %v7829_v37  ;;  %v7918_v36 = vld [vmem:[%s11225_s1 + $0xbe4] ss:$16 sps:$4 sm:$0xff]   ;;  %v7921_v37 = vld [vmem:[%s11225_s1 + $0xbec] ss:$16 sps:$4 sm:$0xff]  }
 0x144   :  { %5152 = vmatprep.subr.bf16.mxu0 %v7834_v38  ;;  %5685 = vmatprep.subr.bf16.mxu1 %v7837_v21  ;;  %v9827_v38 = vrot.slane %v885_v32, %v8750_v49  ;;  %v7916_v21 = vld [vmem:[%s11225_s1 + $0xbe0] ss:$16 sps:$4 sm:$0xff]   ;;  %v7997_v32 = vld [vmem:[%s11225_s1 + $0xd88] ss:$16 sps:$4 sm:$0xff]  }
 0x145   :  { %5182 = vmatprep.mubr.bf16.mxu0 %v932_v39  ;;  %5715 = vmatprep.mubr.bf16.mxu1 %v932_v39  ;;  %v7919_v39 = vld [vmem:[%s11225_s1 + $0xbe8] ss:$16 sps:$4 sm:$0xff]  }
 0x147   :  { %5153 = vmatpush1.bf16.msra.mxu0 %v7832_v40  ;;  %5686 = vmatpush1.bf16.msra.mxu1 %v7835_v41  ;;  %v7924_v40 = vld [vmem:[%s11225_s1 + $0xc04] ss:$16 sps:$4 sm:$0xff]   ;;  %v7927_v41 = vld [vmem:[%s11225_s1 + $0xc0c] ss:$16 sps:$4 sm:$0xff]  }
 0x148   :  { %5154 = vmatprep.subr.bf16.mxu0 %v7840_v34  ;;  %5687 = vmatprep.subr.bf16.mxu1 %v7843_v43  ;;  %v901_v34 = vcombine.high %v9827_v38, %v9827_v38  ;;  %v930_v43 = vcombine.high %v9637_v35, %v9637_v35  ;;  %v7933_v35 = vld [vmem:[%s11225_s1 + $0xc2c] ss:$16 sps:$4 sm:$0xff]  }
 0x14b   :  { %5155 = vmatpush1.bf16.msra.mxu0 %v7838_v44  ;;  %5688 = vmatpush1.bf16.msra.mxu1 %v7841_v45  ;;  %v7922_v44 = vld [vmem:[%s11225_s1 + $0xc00] ss:$16 sps:$4 sm:$0xff]   ;;  %v7925_v45 = vld [vmem:[%s11225_s1 + $0xc08] ss:$16 sps:$4 sm:$0xff]  }
 0x14c   :  { %5156 = vmatprep.subr.bf16.mxu0 %v7846_v46  ;;  %5689 = vmatprep.subr.bf16.mxu1 %v7849_v47  ;;  %v7930_v46 = vld [vmem:[%s11225_s1 + $0xc24] ss:$16 sps:$4 sm:$0xff]   ;;  %v9858_v47 = vrot.slane %v901_v34, %v8750_v49 }
 0x14d   :  { %v8014_v34 = vld [vmem:[%s11225_s1 + $0xde4] ss:$16 sps:$4 sm:$0xff]  }
 0x14f   :  { %5157 = vmatpush1.bf16.msra.mxu0 %v7844_v48  ;;  %5690 = vmatpush1.bf16.msra.mxu1 %v7847_v50  ;;  %v7928_v48 = vld [vmem:[%s11225_s1 + $0xc20] ss:$16 sps:$4 sm:$0xff]   ;;  %v7931_v50 = vld [vmem:[%s11225_s1 + $0xc28] ss:$16 sps:$4 sm:$0xff]  }
 0x150   :  { %5158 = vmatprep.subr.bf16.mxu0 %v7852_v51  ;;  %5691 = vmatprep.subr.bf16.mxu1 %v7855_v53  ;;  %v7936_v51 = vld [vmem:[%s11225_s1 + $0xc44] ss:$16 sps:$4 sm:$0xff]   ;;  %v7939_v53 = vld [vmem:[%s11225_s1 + $0xc4c] ss:$16 sps:$4 sm:$0xff]  }
 0x153   :  { %5159 = vmatpush1.bf16.msra.mxu0 %v7850_v54  ;;  %5692 = vmatpush1.bf16.msra.mxu1 %v7853_v55  ;;  %v7934_v54 = vld [vmem:[%s11225_s1 + $0xc40] ss:$16 sps:$4 sm:$0xff]   ;;  %v7937_v55 = vld [vmem:[%s11225_s1 + $0xc48] ss:$16 sps:$4 sm:$0xff]  }
 0x154   :  { %5160 = vmatprep.subr.bf16.mxu0 %v7858_v56  ;;  %5693 = vmatprep.subr.bf16.mxu1 %v7861_v57  ;;  %v7942_v56 = vld [vmem:[%s11225_s1 + $0xc64] ss:$16 sps:$4 sm:$0xff]   ;;  %v7945_v57 = vld [vmem:[%s11225_s1 + $0xc6c] ss:$16 sps:$4 sm:$0xff]  }
 0x157   :  { %5161 = vmatpush1.bf16.msra.mxu0 %v7856_v58  ;;  %5694 = vmatpush1.bf16.msra.mxu1 %v7859_v59  ;;  %v7940_v58 = vld [vmem:[%s11225_s1 + $0xc60] ss:$16 sps:$4 sm:$0xff]   ;;  %v7943_v59 = vld [vmem:[%s11225_s1 + $0xc68] ss:$16 sps:$4 sm:$0xff]  }
 0x158   :  { %5162 = vmatprep.subr.bf16.mxu0 %v7864_v60  ;;  %5695 = vmatprep.subr.bf16.mxu1 %v7867_v61  ;;  %v7948_v60 = vld [vmem:[%s11225_s1 + $0xc84] ss:$16 sps:$4 sm:$0xff]   ;;  %v7951_v61 = vld [vmem:[%s11225_s1 + $0xc8c] ss:$16 sps:$4 sm:$0xff]  }
 0x15b   :  { %5163 = vmatpush1.bf16.msra.mxu0 %v7862_v62  ;;  %5696 = vmatpush1.bf16.msra.mxu1 %v7865_v63  ;;  %v7946_v62 = vld [vmem:[%s11225_s1 + $0xc80] ss:$16 sps:$4 sm:$0xff]   ;;  %v7949_v63 = vld [vmem:[%s11225_s1 + $0xc88] ss:$16 sps:$4 sm:$0xff]  }
 0x15c   :  { %5164 = vmatprep.subr.bf16.mxu0 %v7870_v0  ;;  %5697 = vmatprep.subr.bf16.mxu1 %v7873_v1  ;;  %v7954_v0 = vld [vmem:[%s11225_s1 + $0xca4] ss:$16 sps:$4 sm:$0xff]   ;;  %v7957_v1 = vld [vmem:[%s11225_s1 + $0xcac] ss:$16 sps:$4 sm:$0xff]  }
 0x15f   :  { %5165 = vmatpush1.bf16.msra.mxu0 %v7868_v2  ;;  %5698 = vmatpush1.bf16.msra.mxu1 %v7871_v3  ;;  %v7952_v2 = vld [vmem:[%s11225_s1 + $0xca0] ss:$16 sps:$4 sm:$0xff]   ;;  %v7955_v3 = vld [vmem:[%s11225_s1 + $0xca8] ss:$16 sps:$4 sm:$0xff]  }
 0x160   :  { %5166 = vmatprep.subr.bf16.mxu0 %v7876_v4  ;;  %5699 = vmatprep.subr.bf16.mxu1 %v7879_v5  ;;  %v7960_v4 = vld [vmem:[%s11225_s1 + $0xcc4] ss:$16 sps:$4 sm:$0xff]   ;;  %v7963_v5 = vld [vmem:[%s11225_s1 + $0xccc] ss:$16 sps:$4 sm:$0xff]  }
 0x163   :  { %5167 = vmatpush1.bf16.msra.mxu0 %v7874_v6  ;;  %5700 = vmatpush1.bf16.msra.mxu1 %v7877_v7  ;;  %v7958_v6 = vld [vmem:[%s11225_s1 + $0xcc0] ss:$16 sps:$4 sm:$0xff]   ;;  %v7961_v7 = vld [vmem:[%s11225_s1 + $0xcc8] ss:$16 sps:$4 sm:$0xff]  }
 0x164   :  { %5168 = vmatprep.subr.bf16.mxu0 %v7882_v8  ;;  %5701 = vmatprep.subr.bf16.mxu1 %v7885_v9  ;;  %v7966_v8 = vld [vmem:[%s11225_s1 + $0xce4] ss:$16 sps:$4 sm:$0xff]   ;;  %v7969_v9 = vld [vmem:[%s11225_s1 + $0xcec] ss:$16 sps:$4 sm:$0xff]  }
 0x167   :  { %5169 = vmatpush1.bf16.msra.mxu0 %v7880_v10  ;;  %5702 = vmatpush1.bf16.msra.mxu1 %v7883_v11  ;;  %v7964_v10 = vld [vmem:[%s11225_s1 + $0xce0] ss:$16 sps:$4 sm:$0xff]   ;;  %v7967_v11 = vld [vmem:[%s11225_s1 + $0xce8] ss:$16 sps:$4 sm:$0xff]  }
 0x168   :  { %5170 = vmatprep.subr.bf16.mxu0 %v7888_v12  ;;  %5703 = vmatprep.subr.bf16.mxu1 %v7891_v52  ;;  %v7972_v12 = vld [vmem:[%s11225_s1 + $0xd04] ss:$16 sps:$4 sm:$0xff]   ;;  %v7975_v52 = vld [vmem:[%s11225_s1 + $0xd0c] ss:$16 sps:$4 sm:$0xff]  }
 0x16b   :  { %5171 = vmatpush1.bf16.msra.mxu0 %v7886_v15  ;;  %5704 = vmatpush1.bf16.msra.mxu1 %v7889_v16  ;;  %v7970_v15 = vld [vmem:[%s11225_s1 + $0xd00] ss:$16 sps:$4 sm:$0xff]   ;;  %v7973_v16 = vld [vmem:[%s11225_s1 + $0xd08] ss:$16 sps:$4 sm:$0xff]  }
 0x16c   :  { %5172 = vmatprep.subr.bf16.mxu0 %v7894_v17  ;;  %5705 = vmatprep.subr.bf16.mxu1 %v7897_v18  ;;  %v7978_v17 = vld [vmem:[%s11225_s1 + $0xd24] ss:$16 sps:$4 sm:$0xff]   ;;  %v7981_v18 = vld [vmem:[%s11225_s1 + $0xd2c] ss:$16 sps:$4 sm:$0xff]  }
 0x16f   :  { %5173 = vmatpush1.bf16.msra.mxu0 %v7892_v19  ;;  %5706 = vmatpush1.bf16.msra.mxu1 %v7895_v20  ;;  %v7976_v19 = vld [vmem:[%s11225_s1 + $0xd20] ss:$16 sps:$4 sm:$0xff]   ;;  %v7979_v20 = vld [vmem:[%s11225_s1 + $0xd28] ss:$16 sps:$4 sm:$0xff]  }
 0x170   :  { %5174 = vmatprep.subr.bf16.mxu0 %v7900_v22  ;;  %5707 = vmatprep.subr.bf16.mxu1 %v7903_v23  ;;  %v7984_v22 = vld [vmem:[%s11225_s1 + $0xd44] ss:$16 sps:$4 sm:$0xff]   ;;  %v7987_v23 = vld [vmem:[%s11225_s1 + $0xd4c] ss:$16 sps:$4 sm:$0xff]  }
 0x173   :  { %5175 = vmatpush1.bf16.msra.mxu0 %v7898_v24  ;;  %5708 = vmatpush1.bf16.msra.mxu1 %v7901_v13  ;;  %v7982_v24 = vld [vmem:[%s11225_s1 + $0xd40] ss:$16 sps:$4 sm:$0xff]   ;;  %v7985_v13 = vld [vmem:[%s11225_s1 + $0xd48] ss:$16 sps:$4 sm:$0xff]  }
 0x174   :  { %5176 = vmatprep.subr.bf16.mxu0 %v7906_v27  ;;  %5709 = vmatprep.subr.bf16.mxu1 %v7909_v28  ;;  %v7990_v27 = vld [vmem:[%s11225_s1 + $0xd64] ss:$16 sps:$4 sm:$0xff]   ;;  %v7993_v28 = vld [vmem:[%s11225_s1 + $0xd6c] ss:$16 sps:$4 sm:$0xff]  }
 0x177   :  { %5177 = vmatpush1.bf16.msra.mxu0 %v7904_v29  ;;  %5710 = vmatpush1.bf16.msra.mxu1 %v7907_v14  ;;  %v7988_v29 = vld [vmem:[%s11225_s1 + $0xd60] ss:$16 sps:$4 sm:$0xff]   ;;  %v7991_v14 = vld [vmem:[%s11225_s1 + $0xd68] ss:$16 sps:$4 sm:$0xff]  }
 0x178   :  { %5178 = vmatprep.subr.bf16.mxu0 %v7912_v30  ;;  %5711 = vmatprep.subr.bf16.mxu1 %v7915_v31  ;;  %v7996_v30 = vld [vmem:[%s11225_s1 + $0xd84] ss:$16 sps:$4 sm:$0xff]   ;;  %v7999_v31 = vld [vmem:[%s11225_s1 + $0xd8c] ss:$16 sps:$4 sm:$0xff]  }
 0x17b   :  { %5179 = vmatpush1.bf16.msra.mxu0 %v7910_v33  ;;  %5712 = vmatpush1.bf16.msra.mxu1 %v7913_v26  ;;  %v8002_v33 = vld [vmem:[%s11225_s1 + $0xda4] ss:$16 sps:$4 sm:$0xff]   ;;  %v8005_v26 = vld [vmem:[%s11225_s1 + $0xdac] ss:$16 sps:$4 sm:$0xff]  }
 0x17c   :  { %5180 = vmatprep.subr.bf16.mxu0 %v7918_v36  ;;  %5713 = vmatprep.subr.bf16.mxu1 %v7921_v37  ;;  %v8000_v36 = vld [vmem:[%s11225_s1 + $0xda0] ss:$16 sps:$4 sm:$0xff]   ;;  %v8003_v37 = vld [vmem:[%s11225_s1 + $0xda8] ss:$16 sps:$4 sm:$0xff]  }
 0x17f   :  { %5181 = vmatpush1.bf16.msra.mxu0 %v7916_v21  ;;  %5714 = vmatpush1.bf16.msra.mxu1 %v7919_v39  ;;  %v8008_v21 = vld [vmem:[%s11225_s1 + $0xdc4] ss:$16 sps:$4 sm:$0xff]   ;;  %v8011_v39 = vld [vmem:[%s11225_s1 + $0xdcc] ss:$16 sps:$4 sm:$0xff]  }
 0x180   :  { %5191 = vmatprep.subr.bf16.mxu0 %v7924_v40  ;;  %5724 = vmatprep.subr.bf16.mxu1 %v7927_v41  ;;  %v8006_v40 = vld [vmem:[%s11225_s1 + $0xdc0] ss:$16 sps:$4 sm:$0xff]   ;;  %v8009_v41 = vld [vmem:[%s11225_s1 + $0xdc8] ss:$16 sps:$4 sm:$0xff]  }
 0x182   :  { %5183 = vmatmul.mubr.bf16.vlgmr.msra.gmra.mrb[0].mxu0 %v930_v43  ;;  %5716 = vmatmul.mubr.bf16.vlgmr.msra.gmra.mrb[0].mxu1 %v930_v43  ;;  %v8017_v43 = vld [vmem:[%s11225_s1 + $0xdec] ss:$16 sps:$4 sm:$0xff]  }
 0x183   :  { %5192 = vmatpush1.bf16.msra.mxu0 %v7922_v44  ;;  %5725 = vmatpush1.bf16.msra.mxu1 %v7925_v45  ;;  %v8012_v44 = vld [vmem:[%s11225_s1 + $0xde0] ss:$16 sps:$4 sm:$0xff]   ;;  %v8015_v45 = vld [vmem:[%s11225_s1 + $0xde8] ss:$16 sps:$4 sm:$0xff]  }
 0x184   :  { %5193 = vmatprep.subr.bf16.mxu0 %v7930_v46  ;;  %5726 = vmatprep.subr.bf16.mxu1 %v7933_v35  ;;  %v8021_v46 = vld [vmem:[%s11225_s1 + $0xe04] ss:$16 sps:$4 sm:$0xff]   ;;  %v8024_v35 = vld [vmem:[%s11225_s1 + $0xe0c] ss:$16 sps:$4 sm:$0xff]  }
 0x185   :  { %5223 = vmatprep.mubr.bf16.mxu0 %v9858_v47  ;;  %5756 = vmatprep.mubr.bf16.mxu1 %v9858_v47 }
 0x187   :  { %5194 = vmatpush1.bf16.msra.mxu0 %v7928_v48  ;;  %5727 = vmatpush1.bf16.msra.mxu1 %v7931_v50  ;;  %v10044_v48 = vrot.slane %v9827_v38, %v8750_v49  ;;  %v8019_v50 = vld [vmem:[%s11225_s1 + $0xe00] ss:$16 sps:$4 sm:$0xff]   ;;  %v8030_v38 = vld [vmem:[%s11225_s1 + $0xe2c] ss:$16 sps:$4 sm:$0xff]  }
 0x188   :  { %5195 = vmatprep.subr.bf16.mxu0 %v7936_v51  ;;  %5728 = vmatprep.subr.bf16.mxu1 %v7939_v53  ;;  %v8022_v51 = vld [vmem:[%s11225_s1 + $0xe08] ss:$16 sps:$4 sm:$0xff]   ;;  %v8027_v53 = vld [vmem:[%s11225_s1 + $0xe24] ss:$16 sps:$4 sm:$0xff]  }
 0x18b   :  { %5196 = vmatpush1.bf16.msra.mxu0 %v7934_v54  ;;  %5729 = vmatpush1.bf16.msra.mxu1 %v7937_v55  ;;  %v933_v54 = vcombine.high %v9858_v47, %v9858_v47  ;;  %v8025_v55 = vld [vmem:[%s11225_s1 + $0xe20] ss:$16 sps:$4 sm:$0xff]   ;;  %v8033_v47 = vld [vmem:[%s11225_s1 + $0xe44] ss:$16 sps:$4 sm:$0xff]  }
 0x18c   :  { %5197 = vmatprep.subr.bf16.mxu0 %v7942_v56  ;;  %5730 = vmatprep.subr.bf16.mxu1 %v7945_v57  ;;  %v8028_v56 = vld [vmem:[%s11225_s1 + $0xe28] ss:$16 sps:$4 sm:$0xff]   ;;  %v8036_v57 = vld [vmem:[%s11225_s1 + $0xe4c] ss:$16 sps:$4 sm:$0xff]  }
 0x18f   :  { %5198 = vmatpush1.bf16.msra.mxu0 %v7940_v58  ;;  %5731 = vmatpush1.bf16.msra.mxu1 %v7943_v59  ;;  %v8031_v58 = vld [vmem:[%s11225_s1 + $0xe40] ss:$16 sps:$4 sm:$0xff]   ;;  %v8034_v59 = vld [vmem:[%s11225_s1 + $0xe48] ss:$16 sps:$4 sm:$0xff]  }
 0x190   :  { %5199 = vmatprep.subr.bf16.mxu0 %v7948_v60  ;;  %5732 = vmatprep.subr.bf16.mxu1 %v7951_v61  ;;  %v8039_v60 = vld [vmem:[%s11225_s1 + $0xe64] ss:$16 sps:$4 sm:$0xff]   ;;  %v8042_v61 = vld [vmem:[%s11225_s1 + $0xe6c] ss:$16 sps:$4 sm:$0xff]  }
 0x193   :  { %5200 = vmatpush1.bf16.msra.mxu0 %v7946_v62  ;;  %5733 = vmatpush1.bf16.msra.mxu1 %v7949_v63  ;;  %v8037_v62 = vld [vmem:[%s11225_s1 + $0xe60] ss:$16 sps:$4 sm:$0xff]   ;;  %v8040_v63 = vld [vmem:[%s11225_s1 + $0xe68] ss:$16 sps:$4 sm:$0xff]  }
 0x194   :  { %5201 = vmatprep.subr.bf16.mxu0 %v7954_v0  ;;  %5734 = vmatprep.subr.bf16.mxu1 %v7957_v1  ;;  %v8045_v0 = vld [vmem:[%s11225_s1 + $0xe84] ss:$16 sps:$4 sm:$0xff]   ;;  %v8048_v1 = vld [vmem:[%s11225_s1 + $0xe8c] ss:$16 sps:$4 sm:$0xff]  }
 0x197   :  { %5202 = vmatpush1.bf16.msra.mxu0 %v7952_v2  ;;  %5735 = vmatpush1.bf16.msra.mxu1 %v7955_v3  ;;  %v8043_v2 = vld [vmem:[%s11225_s1 + $0xe80] ss:$16 sps:$4 sm:$0xff]   ;;  %v8046_v3 = vld [vmem:[%s11225_s1 + $0xe88] ss:$16 sps:$4 sm:$0xff]  }
 0x198   :  { %5203 = vmatprep.subr.bf16.mxu0 %v7960_v4  ;;  %5736 = vmatprep.subr.bf16.mxu1 %v7963_v5  ;;  %v8051_v4 = vld [vmem:[%s11225_s1 + $0xea4] ss:$16 sps:$4 sm:$0xff]   ;;  %v8054_v5 = vld [vmem:[%s11225_s1 + $0xeac] ss:$16 sps:$4 sm:$0xff]  }
 0x19b   :  { %5204 = vmatpush1.bf16.msra.mxu0 %v7958_v6  ;;  %5737 = vmatpush1.bf16.msra.mxu1 %v7961_v7  ;;  %v8049_v6 = vld [vmem:[%s11225_s1 + $0xea0] ss:$16 sps:$4 sm:$0xff]   ;;  %v8052_v7 = vld [vmem:[%s11225_s1 + $0xea8] ss:$16 sps:$4 sm:$0xff]  }
 0x19c   :  { %5205 = vmatprep.subr.bf16.mxu0 %v7966_v8  ;;  %5738 = vmatprep.subr.bf16.mxu1 %v7969_v9  ;;  %v8057_v8 = vld [vmem:[%s11225_s1 + $0xec4] ss:$16 sps:$4 sm:$0xff]   ;;  %v8060_v9 = vld [vmem:[%s11225_s1 + $0xecc] ss:$16 sps:$4 sm:$0xff]  }
 0x19f   :  { %5206 = vmatpush1.bf16.msra.mxu0 %v7964_v10  ;;  %5739 = vmatpush1.bf16.msra.mxu1 %v7967_v11  ;;  %v8055_v10 = vld [vmem:[%s11225_s1 + $0xec0] ss:$16 sps:$4 sm:$0xff]   ;;  %v8058_v11 = vld [vmem:[%s11225_s1 + $0xec8] ss:$16 sps:$4 sm:$0xff]  }
 0x1a0   :  { %5207 = vmatprep.subr.bf16.mxu0 %v7972_v12  ;;  %5740 = vmatprep.subr.bf16.mxu1 %v7975_v52  ;;  %v8063_v12 = vld [vmem:[%s11225_s1 + $0xee4] ss:$16 sps:$4 sm:$0xff]   ;;  %v8066_v52 = vld [vmem:[%s11225_s1 + $0xeec] ss:$16 sps:$4 sm:$0xff]  }
 0x1a3   :  { %5208 = vmatpush1.bf16.msra.mxu0 %v7970_v15  ;;  %5741 = vmatpush1.bf16.msra.mxu1 %v7973_v16  ;;  %v8061_v15 = vld [vmem:[%s11225_s1 + $0xee0] ss:$16 sps:$4 sm:$0xff]   ;;  %v8064_v16 = vld [vmem:[%s11225_s1 + $0xee8] ss:$16 sps:$4 sm:$0xff]  }
 0x1a4   :  { %5209 = vmatprep.subr.bf16.mxu0 %v7978_v17  ;;  %5742 = vmatprep.subr.bf16.mxu1 %v7981_v18  ;;  %v8069_v17 = vld [vmem:[%s11225_s1 + $0xf04] ss:$16 sps:$4 sm:$0xff]   ;;  %v8072_v18 = vld [vmem:[%s11225_s1 + $0xf0c] ss:$16 sps:$4 sm:$0xff]  }
 0x1a7   :  { %5210 = vmatpush1.bf16.msra.mxu0 %v7976_v19  ;;  %5743 = vmatpush1.bf16.msra.mxu1 %v7979_v20  ;;  %v8067_v19 = vld [vmem:[%s11225_s1 + $0xf00] ss:$16 sps:$4 sm:$0xff]   ;;  %v8070_v20 = vld [vmem:[%s11225_s1 + $0xf08] ss:$16 sps:$4 sm:$0xff]  }
 0x1a8   :  { %5211 = vmatprep.subr.bf16.mxu0 %v7984_v22  ;;  %5744 = vmatprep.subr.bf16.mxu1 %v7987_v23  ;;  %v8075_v22 = vld [vmem:[%s11225_s1 + $0xf24] ss:$16 sps:$4 sm:$0xff]   ;;  %v8078_v23 = vld [vmem:[%s11225_s1 + $0xf2c] ss:$16 sps:$4 sm:$0xff]  }
 0x1ab   :  { %5212 = vmatpush1.bf16.msra.mxu0 %v7982_v24  ;;  %5745 = vmatpush1.bf16.msra.mxu1 %v7985_v13  ;;  %v8073_v24 = vld [vmem:[%s11225_s1 + $0xf20] ss:$16 sps:$4 sm:$0xff]   ;;  %v8076_v13 = vld [vmem:[%s11225_s1 + $0xf28] ss:$16 sps:$4 sm:$0xff]  }
 0x1ac   :  { %5213 = vmatprep.subr.bf16.mxu0 %v7990_v27  ;;  %5746 = vmatprep.subr.bf16.mxu1 %v7993_v28  ;;  %v8081_v27 = vld [vmem:[%s11225_s1 + $0xf44] ss:$16 sps:$4 sm:$0xff]   ;;  %v8084_v28 = vld [vmem:[%s11225_s1 + $0xf4c] ss:$16 sps:$4 sm:$0xff]  }
 0x1af   :  { %5214 = vmatpush1.bf16.msra.mxu0 %v7988_v29  ;;  %5747 = vmatpush1.bf16.msra.mxu1 %v7991_v14  ;;  %v8079_v29 = vld [vmem:[%s11225_s1 + $0xf40] ss:$16 sps:$4 sm:$0xff]   ;;  %v8082_v14 = vld [vmem:[%s11225_s1 + $0xf48] ss:$16 sps:$4 sm:$0xff]  }
 0x1b0   :  { %5215 = vmatprep.subr.bf16.mxu0 %v7996_v30  ;;  %5748 = vmatprep.subr.bf16.mxu1 %v7999_v31  ;;  %v8087_v30 = vld [vmem:[%s11225_s1 + $0xf64] ss:$16 sps:$4 sm:$0xff]   ;;  %v8090_v31 = vld [vmem:[%s11225_s1 + $0xf6c] ss:$16 sps:$4 sm:$0xff]  }
 0x1b3   :  { %5216 = vmatpush1.bf16.msra.mxu0 %v7994_v25  ;;  %5749 = vmatpush1.bf16.msra.mxu1 %v7997_v32 }
 0x1b4   :  { %5217 = vmatprep.subr.bf16.mxu0 %v8002_v33  ;;  %5750 = vmatprep.subr.bf16.mxu1 %v8005_v26 }
 0x1b7   :  { %5218 = vmatpush1.bf16.msra.mxu0 %v8000_v36  ;;  %5751 = vmatpush1.bf16.msra.mxu1 %v8003_v37 }
 0x1b8   :  { %5219 = vmatprep.subr.bf16.mxu0 %v8008_v21  ;;  %5752 = vmatprep.subr.bf16.mxu1 %v8011_v39 }
 0x1bb   :  { %5220 = vmatpush1.bf16.msra.mxu0 %v8006_v40  ;;  %5753 = vmatpush1.bf16.msra.mxu1 %v8009_v41 }
 0x1bc   :  { %5221 = vmatprep.subr.bf16.mxu0 %v8014_v34  ;;  %5754 = vmatprep.subr.bf16.mxu1 %v8017_v43 }
 0x1bf   :  { %5222 = vmatpush1.bf16.msra.mxu0 %v8012_v44  ;;  %5755 = vmatpush1.bf16.msra.mxu1 %v8015_v45 }
 0x1c0   :  { %5232 = vmatprep.subr.bf16.mxu0 %v8021_v46  ;;  %5765 = vmatprep.subr.bf16.mxu1 %v8024_v35 }
 0x1c2   :  { %5224 = vmatmul.mubr.bf16.vlgmr.msra.gmra.mrb[0].mxu0 %v10044_v48  ;;  %5757 = vmatmul.mubr.bf16.vlgmr.msra.gmra.mrb[0].mxu1 %v10044_v48 }
 0x1c3   :  { %5233 = vmatpush1.bf16.msra.mxu0 %v8019_v50  ;;  %5766 = vmatpush1.bf16.msra.mxu1 %v8022_v51 }
 0x1c4   :  { %5234 = vmatprep.subr.bf16.mxu0 %v8027_v53  ;;  %5767 = vmatprep.subr.bf16.mxu1 %v8030_v38 }
 0x1c5   :  { %5264 = vmatprep.mubr.bf16.mxu0 %v933_v54  ;;  %5797 = vmatprep.mubr.bf16.mxu1 %v933_v54 }
 0x1c7   :  { %5235 = vmatpush1.bf16.msra.mxu0 %v8025_v55  ;;  %5768 = vmatpush1.bf16.msra.mxu1 %v8028_v56 }
 0x1c8   :  { %5236 = vmatprep.subr.bf16.mxu0 %v8033_v47  ;;  %5769 = vmatprep.subr.bf16.mxu1 %v8036_v57 }
 0x1cb   :  { %5237 = vmatpush1.bf16.msra.mxu0 %v8031_v58  ;;  %5770 = vmatpush1.bf16.msra.mxu1 %v8034_v59 }
 0x1cc   :  { %5238 = vmatprep.subr.bf16.mxu0 %v8039_v60  ;;  %5771 = vmatprep.subr.bf16.mxu1 %v8042_v61 }
 0x1cf   :  { %5239 = vmatpush1.bf16.msra.mxu0 %v8037_v62  ;;  %5772 = vmatpush1.bf16.msra.mxu1 %v8040_v63 }
 0x1d0   :  { %5240 = vmatprep.subr.bf16.mxu0 %v8045_v0  ;;  %5773 = vmatprep.subr.bf16.mxu1 %v8048_v1 }
 0x1d3   :  { %5241 = vmatpush1.bf16.msra.mxu0 %v8043_v2  ;;  %5774 = vmatpush1.bf16.msra.mxu1 %v8046_v3 }
 0x1d4   :  { %5242 = vmatprep.subr.bf16.mxu0 %v8051_v4  ;;  %5775 = vmatprep.subr.bf16.mxu1 %v8054_v5 }
 0x1d7   :  { %5243 = vmatpush1.bf16.msra.mxu0 %v8049_v6  ;;  %5776 = vmatpush1.bf16.msra.mxu1 %v8052_v7 }
 0x1d8   :  { %5244 = vmatprep.subr.bf16.mxu0 %v8057_v8  ;;  %5777 = vmatprep.subr.bf16.mxu1 %v8060_v9 }
 0x1db   :  { %5245 = vmatpush1.bf16.msra.mxu0 %v8055_v10  ;;  %5778 = vmatpush1.bf16.msra.mxu1 %v8058_v11 }
 0x1dc   :  { %5246 = vmatprep.subr.bf16.mxu0 %v8063_v12  ;;  %5779 = vmatprep.subr.bf16.mxu1 %v8066_v52 }
 0x1df   :  { %5247 = vmatpush1.bf16.msra.mxu0 %v8061_v15  ;;  %5780 = vmatpush1.bf16.msra.mxu1 %v8064_v16 }
 0x1e0   :  { %5248 = vmatprep.subr.bf16.mxu0 %v8069_v17  ;;  %5781 = vmatprep.subr.bf16.mxu1 %v8072_v18 }
 0x1e3   :  { %5249 = vmatpush1.bf16.msra.mxu0 %v8067_v19  ;;  %5782 = vmatpush1.bf16.msra.mxu1 %v8070_v20 }
 0x1e4   :  { %5250 = vmatprep.subr.bf16.mxu0 %v8075_v22  ;;  %5783 = vmatprep.subr.bf16.mxu1 %v8078_v23 }
 0x1e7   :  { %5251 = vmatpush1.bf16.msra.mxu0 %v8073_v24  ;;  %5784 = vmatpush1.bf16.msra.mxu1 %v8076_v13 }
 0x1e8   :  { %5252 = vmatprep.subr.bf16.mxu0 %v8081_v27  ;;  %5785 = vmatprep.subr.bf16.mxu1 %v8084_v28 }
 0x1e9   :  { %10 = vsyncpa [#allocation3], 0  ;;  %v8085_v25 = vld [vmem:[%s11225_s1 + $0xf60] ss:$16 sps:$4 sm:$0xff]   ;;  %v8088_v32 = vld [vmem:[%s11225_s1 + $0xf68] ss:$16 sps:$4 sm:$0xff]   ;;  %v931_v47 = vcombine.high %v10044_v48, %v10044_v48 }
 0x1ea   :  { %v8093_v33 = vld [vmem:[%s11225_s1 + $0xf84] ss:$16 sps:$4 sm:$0xff]   ;;  %v8096_v26 = vld [vmem:[%s11225_s1 + $0xf8c] ss:$16 sps:$4 sm:$0xff]   ;;  %v8091_v36 = vld [vmem:[%s11225_s1 + $0xf80] ss:$16 sps:$4 sm:$0xff]  }
 0x1eb   :  { %5253 = vmatpush1.bf16.msra.mxu0 %v8079_v29  ;;  %5786 = vmatpush1.bf16.msra.mxu1 %v8082_v14  ;;  %v8094_v37 = vld [vmem:[%s11225_s1 + $0xf88] ss:$16 sps:$4 sm:$0xff]   ;;  %v8099_v21 = vld [vmem:[%s11225_s1 + $0xfa4] ss:$16 sps:$4 sm:$0xff]   ;;  %v8102_v39 = vld [vmem:[%s11225_s1 + $0xfac] ss:$16 sps:$4 sm:$0xff]  }
 0x1ec   :  { %5254 = vmatprep.subr.bf16.mxu0 %v8087_v30  ;;  %5787 = vmatprep.subr.bf16.mxu1 %v8090_v31  ;;  %v8097_v40 = vld [vmem:[%s11225_s1 + $0xfa0] ss:$16 sps:$4 sm:$0xff]   ;;  %v8100_v41 = vld [vmem:[%s11225_s1 + $0xfa8] ss:$16 sps:$4 sm:$0xff]   ;;  %v8105_v34 = vld [vmem:[%s11225_s1 + $0xfc4] ss:$16 sps:$4 sm:$0xff]  }
 0x1ed   :  { %v8108_v43 = vld [vmem:[%s11225_s1 + $0xfcc] ss:$16 sps:$4 sm:$0xff]   ;;  %v10221_v44 = vld [vmem:[%s11224_s0 + $0x10] sm:$0xff]  ;;  %v8106_v46 = vld [vmem:[%s11225_s1 + $0xfc8] ss:$16 sps:$4 sm:$0xff]   ;;  %vm4941_vm0 = vcmask 523264  }
 0x1ee   :  { %v8103_v45 = vld [vmem:[%s11225_s1 + $0xfc0] ss:$16 sps:$4 sm:$0xff]   ;;  %v8111_v35 = vld [vmem:[%s11225_s1 + $0xfe4] ss:$16 sps:$4 sm:$0xff]   ;;  %v8114_v50 = vld [vmem:[%s11225_s1 + $0xfec] ss:$16 sps:$4 sm:$0xff]   ;;  %v10237_v51 = vrot.slane %v10221_v44, %v8750_v49 }
 0x1ef   :  { %5255 = vmatpush1.bf16.msra.mxu0 %v8085_v25  ;;  %5788 = vmatpush1.bf16.msra.mxu1 %v8088_v32  ;;  %v8109_v53 = vld [vmem:[%s11225_s1 + $0xfe0] ss:$16 sps:$4 sm:$0xff]   ;;  %v8112_v38 = vld [vmem:[%s11225_s1 + $0xfe8] ss:$16 sps:$4 sm:$0xff]   ;;  %v8117_v54 = vld [vmem:[%s11225_s1 + $0x1004] ss:$16 sps:$4 sm:$0xff]  }
 0x1f0   :  { %5256 = vmatprep.subr.bf16.mxu0 %v8093_v33  ;;  %5789 = vmatprep.subr.bf16.mxu1 %v8096_v26  ;;  %v8120_v55 = vld [vmem:[%s11225_s1 + $0x100c] ss:$16 sps:$4 sm:$0xff]   ;;  %v949_v56 = vcombine.high %v10237_v51, %v10237_v51  ;;  %v8115_v57 = vld [vmem:[%s11225_s1 + $0x1000] ss:$16 sps:$4 sm:$0xff]   ;;  %v8118_v58 = vld [vmem:[%s11225_s1 + $0x1008] ss:$16 sps:$4 sm:$0xff]  }
 0x1f1   :  { %v8123_v59 = vld [vmem:[%s11225_s1 + $0x1024] ss:$16 sps:$4 sm:$0xff]   ;;  %v8126_v48 = vld [vmem:[%s11225_s1 + $0x102c] ss:$16 sps:$4 sm:$0xff]   ;;  %v8121_v61 = vld [vmem:[%s11225_s1 + $0x1020] ss:$16 sps:$4 sm:$0xff]  }
 0x1f2   :  { %v10268_v60 = vrot.slane %v949_v56, %v8750_v49  ;;  %v8124_v62 = vld [vmem:[%s11225_s1 + $0x1028] ss:$16 sps:$4 sm:$0xff]   ;;  %v8129_v63 = vld [vmem:[%s11225_s1 + $0x1044] ss:$16 sps:$4 sm:$0xff]   ;;  %v8132_v0 = vld [vmem:[%s11225_s1 + $0x104c] ss:$16 sps:$4 sm:$0xff]  }
 0x1f3   :  { %5257 = vmatpush1.bf16.msra.mxu0 %v8091_v36  ;;  %5790 = vmatpush1.bf16.msra.mxu1 %v8094_v37  ;;  %v8127_v1 = vld [vmem:[%s11225_s1 + $0x1040] ss:$16 sps:$4 sm:$0xff]   ;;  %v8130_v2 = vld [vmem:[%s11225_s1 + $0x1048] ss:$16 sps:$4 sm:$0xff]   ;;  %v8135_v3 = vld [vmem:[%s11225_s1 + $0x1064] ss:$16 sps:$4 sm:$0xff]  }
 0x1f4   :  { %5258 = vmatprep.subr.bf16.mxu0 %v8099_v21  ;;  %5791 = vmatprep.subr.bf16.mxu1 %v8102_v39  ;;  %v8138_v4 = vld [vmem:[%s11225_s1 + $0x106c] ss:$16 sps:$4 sm:$0xff]   ;;  %v8133_v5 = vld [vmem:[%s11225_s1 + $0x1060] ss:$16 sps:$4 sm:$0xff]   ;;  %v8136_v6 = vld [vmem:[%s11225_s1 + $0x1068] ss:$16 sps:$4 sm:$0xff]  }
 0x1f5   :  { %v8141_v7 = vld [vmem:[%s11225_s1 + $0x1084] ss:$16 sps:$4 sm:$0xff]   ;;  %v8144_v8 = vld [vmem:[%s11225_s1 + $0x108c] ss:$16 sps:$4 sm:$0xff]   ;;  %v8139_v9 = vld [vmem:[%s11225_s1 + $0x1080] ss:$16 sps:$4 sm:$0xff]  }
 0x1f6   :  { %v8142_v10 = vld [vmem:[%s11225_s1 + $0x1088] ss:$16 sps:$4 sm:$0xff]   ;;  %v8147_v11 = vld [vmem:[%s11225_s1 + $0x10a4] ss:$16 sps:$4 sm:$0xff]   ;;  %v8150_v12 = vld [vmem:[%s11225_s1 + $0x10ac] ss:$16 sps:$4 sm:$0xff]  }
 0x1f7   :  { %5259 = vmatpush1.bf16.msra.mxu0 %v8097_v40  ;;  %5792 = vmatpush1.bf16.msra.mxu1 %v8100_v41  ;;  %v8145_v52 = vld [vmem:[%s11225_s1 + $0x10a0] ss:$16 sps:$4 sm:$0xff]   ;;  %v8148_v15 = vld [vmem:[%s11225_s1 + $0x10a8] ss:$16 sps:$4 sm:$0xff]   ;;  %v8153_v16 = vld [vmem:[%s11225_s1 + $0x10c4] ss:$16 sps:$4 sm:$0xff]  }
 0x1f8   :  { %5260 = vmatprep.subr.bf16.mxu0 %v8105_v34  ;;  %5793 = vmatprep.subr.bf16.mxu1 %v8108_v43  ;;  %v8156_v17 = vld [vmem:[%s11225_s1 + $0x10cc] ss:$16 sps:$4 sm:$0xff]   ;;  %v8151_v18 = vld [vmem:[%s11225_s1 + $0x10c0] ss:$16 sps:$4 sm:$0xff]   ;;  %v8154_v19 = vld [vmem:[%s11225_s1 + $0x10c8] ss:$16 sps:$4 sm:$0xff]  }
 0x1f9   :  { %v8159_v20 = vld [vmem:[%s11225_s1 + $0x10e4] ss:$16 sps:$4 sm:$0xff]   ;;  %v8162_v22 = vld [vmem:[%s11225_s1 + $0x10ec] ss:$16 sps:$4 sm:$0xff]   ;;  %v8157_v23 = vld [vmem:[%s11225_s1 + $0x10e0] ss:$16 sps:$4 sm:$0xff]  }
 0x1fa   :  { %v8160_v24 = vld [vmem:[%s11225_s1 + $0x10e8] ss:$16 sps:$4 sm:$0xff]   ;;  %v8165_v13 = vld [vmem:[%s11225_s1 + $0x1104] ss:$16 sps:$4 sm:$0xff]   ;;  %v8168_v27 = vld [vmem:[%s11225_s1 + $0x110c] ss:$16 sps:$4 sm:$0xff]  }
 0x1fb   :  { %5261 = vmatpush1.bf16.msra.mxu0 %v8103_v45  ;;  %5794 = vmatpush1.bf16.msra.mxu1 %v8106_v46  ;;  %v8163_v28 = vld [vmem:[%s11225_s1 + $0x1100] ss:$16 sps:$4 sm:$0xff]   ;;  %v8166_v29 = vld [vmem:[%s11225_s1 + $0x1108] ss:$16 sps:$4 sm:$0xff]   ;;  %v8171_v14 = vld [vmem:[%s11225_s1 + $0x1124] ss:$16 sps:$4 sm:$0xff]  }
 0x1fc   :  { %5262 = vmatprep.subr.bf16.mxu0 %v8111_v35  ;;  %5795 = vmatprep.subr.bf16.mxu1 %v8114_v50  ;;  %v8174_v30 = vld [vmem:[%s11225_s1 + $0x112c] ss:$16 sps:$4 sm:$0xff]   ;;  %v8169_v31 = vld [vmem:[%s11225_s1 + $0x1120] ss:$16 sps:$4 sm:$0xff]   ;;  %v8172_v25 = vld [vmem:[%s11225_s1 + $0x1128] ss:$16 sps:$4 sm:$0xff]  }
 0x1fd   :  { %v8177_v32 = vld [vmem:[%s11225_s1 + $0x1144] ss:$16 sps:$4 sm:$0xff]   ;;  %v8180_v33 = vld [vmem:[%s11225_s1 + $0x114c] ss:$16 sps:$4 sm:$0xff]   ;;  %v8175_v26 = vld [vmem:[%s11225_s1 + $0x1140] ss:$16 sps:$4 sm:$0xff]  }
 0x1fe   :  { %v8178_v36 = vld [vmem:[%s11225_s1 + $0x1148] ss:$16 sps:$4 sm:$0xff]   ;;  %v8183_v37 = vld [vmem:[%s11225_s1 + $0x1164] ss:$16 sps:$4 sm:$0xff]   ;;  %v8186_v21 = vld [vmem:[%s11225_s1 + $0x116c] ss:$16 sps:$4 sm:$0xff]  }
 0x1ff   :  { %5263 = vmatpush1.bf16.msra.mxu0 %v8109_v53  ;;  %5796 = vmatpush1.bf16.msra.mxu1 %v8112_v38  ;;  %v8181_v39 = vld [vmem:[%s11225_s1 + $0x1160] ss:$16 sps:$4 sm:$0xff]   ;;  %v8184_v40 = vld [vmem:[%s11225_s1 + $0x1168] ss:$16 sps:$4 sm:$0xff]   ;;  %v8189_v41 = vld [vmem:[%s11225_s1 + $0x1184] ss:$16 sps:$4 sm:$0xff]  }
 0x200   :  { %5273 = vmatprep.subr.bf16.mxu0 %v8117_v54  ;;  %5806 = vmatprep.subr.bf16.mxu1 %v8120_v55  ;;  %v8192_v34 = vld [vmem:[%s11225_s1 + $0x118c] ss:$16 sps:$4 sm:$0xff]   ;;  %v8187_v43 = vld [vmem:[%s11225_s1 + $0x1180] ss:$16 sps:$4 sm:$0xff]   ;;  %v8190_v45 = vld [vmem:[%s11225_s1 + $0x1188] ss:$16 sps:$4 sm:$0xff]  }
 0x201   :  { %v8195_v46 = vld [vmem:[%s11225_s1 + $0x11a4] ss:$16 sps:$4 sm:$0xff]   ;;  %v8198_v35 = vld [vmem:[%s11225_s1 + $0x11ac] ss:$16 sps:$4 sm:$0xff]   ;;  %v8193_v50 = vld [vmem:[%s11225_s1 + $0x11a0] ss:$16 sps:$4 sm:$0xff]  }
 0x202   :  { %5265 = vmatmul.mubr.bf16.vlgmr.msra.gmra.mrb[0].mxu0 %v931_v47  ;;  %5798 = vmatmul.mubr.bf16.vlgmr.msra.gmra.mrb[0].mxu1 %v931_v47  ;;  %v8196_v53 = vld [vmem:[%s11225_s1 + $0x11a8] ss:$16 sps:$4 sm:$0xff]   ;;  %v8201_v38 = vld [vmem:[%s11225_s1 + $0x11c4] ss:$16 sps:$4 sm:$0xff]   ;;  %v8204_v54 = vld [vmem:[%s11225_s1 + $0x11cc] ss:$16 sps:$4 sm:$0xff]  }
 0x203   :  { %5274 = vmatpush1.bf16.msra.mxu0 %v8115_v57  ;;  %5807 = vmatpush1.bf16.msra.mxu1 %v8118_v58  ;;  %v8199_v55 = vld [vmem:[%s11225_s1 + $0x11c0] ss:$16 sps:$4 sm:$0xff]   ;;  %v8202_v56 = vld [vmem:[%s11225_s1 + $0x11c8] ss:$16 sps:$4 sm:$0xff]   ;;  %v8207_v47 = vld [vmem:[%s11225_s1 + $0x11e4] ss:$16 sps:$4 sm:$0xff]  }
 0x204   :  { %5275 = vmatprep.subr.bf16.mxu0 %v8123_v59  ;;  %5808 = vmatprep.subr.bf16.mxu1 %v8126_v48  ;;  %v8210_v57 = vld [vmem:[%s11225_s1 + $0x11ec] ss:$16 sps:$4 sm:$0xff]   ;;  %v8205_v58 = vld [vmem:[%s11225_s1 + $0x11e0] ss:$16 sps:$4 sm:$0xff]   ;;  %v8208_v59 = vld [vmem:[%s11225_s1 + $0x11e8] ss:$16 sps:$4 sm:$0xff]  }
 0x205   :  { %5305 = vmatprep.mubr.bf16.mxu0 %v10268_v60  ;;  %5838 = vmatprep.mubr.bf16.mxu1 %v10268_v60  ;;  %v8213_v48 = vld [vmem:[%s11225_s1 + $0x1204] ss:$16 sps:$4 sm:$0xff]   ;;  %s8584_s6 = smov [#allocation2]   ;;  %vm6362_vm1 = vcmask 25600  }
 0x206   :  { %s6370_s7 = sshll.u32 %s8584_s6, 4  ;;  %s6371_s7 = int_to_ptr.vmem [resolvable:$true] %s6370_s7 }
 0x207   :  { %5276 = vmatpush1.bf16.msra.mxu0 %v8121_v61  ;;  %5809 = vmatpush1.bf16.msra.mxu1 %v8124_v62  ;;  %v8216_v61 = vld [vmem:[%s11225_s1 + $0x120c] ss:$16 sps:$4 sm:$0xff]   ;;  %v10454_v62 = vrot.slane %v10237_v51, %v8750_v49  ;;  %s8558_s8 = scalar_lea.vmem %s6371_s7, 32  ;;  %p8563_p1 = scmp.lt.s32.totalorder %s6371_s7, %s6371_s7 }
 0x208   :  { %5277 = vmatprep.subr.bf16.mxu0 %v8129_v63  ;;  %5810 = vmatprep.subr.bf16.mxu1 %v8132_v0  ;;  %v8211_v63 = vld [vmem:[%s11225_s1 + $0x1200] ss:$16 sps:$4 sm:$0xff]   ;;  %v8214_v0 = vld [vmem:[%s11225_s1 + $0x1208] ss:$16 sps:$4 sm:$0xff]   ;;  %v8222_v51 = vld [vmem:[%s11225_s1 + $0x122c] ss:$16 sps:$4 sm:$0xff]   ;;  %p8559_p0 = scmp.ne.s32.totalorder %s6371_s7, %s8558_s8  ;;  %p8564_p2 = scmp.lt.s32.totalorder %s8558_s8, %s8558_s8 }
 0x20a   :  { %p8565_p3 = por %p8564_p2, %p8563_p1 }
 0x20b   :  { %5278 = vmatpush1.bf16.msra.mxu0 %v8127_v1  ;;  %5811 = vmatpush1.bf16.msra.mxu1 %v8130_v2  ;;  %v8219_v1 = vld [vmem:[%s11225_s1 + $0x1224] ss:$16 sps:$4 sm:$0xff]   ;;  %v981_v2 = vcombine.high %v10268_v60, %v10268_v60 }
 0x20c   :  { %5279 = vmatprep.subr.bf16.mxu0 %v8135_v3  ;;  %5812 = vmatprep.subr.bf16.mxu1 %v8138_v4  ;;  %v8217_v3 = vld [vmem:[%s11225_s1 + $0x1220] ss:$16 sps:$4 sm:$0xff]   ;;  %v8220_v4 = vld [vmem:[%s11225_s1 + $0x1228] ss:$16 sps:$4 sm:$0xff]   ;;  %v8225_v60 = vld [vmem:[%s11225_s1 + $0x1244] ss:$16 sps:$4 sm:$0xff]   ;;  %p8566_p4 = pnand %p8565_p3, %p8559_p0 }
 0x20f   :  { %5280 = vmatpush1.bf16.msra.mxu0 %v8133_v5  ;;  %5813 = vmatpush1.bf16.msra.mxu1 %v8136_v6  ;;  %v8228_v5 = vld [vmem:[%s11225_s1 + $0x124c] ss:$16 sps:$4 sm:$0xff]   ;;  %v8223_v6 = vld [vmem:[%s11225_s1 + $0x1240] ss:$16 sps:$4 sm:$0xff]  }
 0x210   :  { %5281 = vmatprep.subr.bf16.mxu0 %v8141_v7  ;;  %5814 = vmatprep.subr.bf16.mxu1 %v8144_v8  ;;  %v8226_v7 = vld [vmem:[%s11225_s1 + $0x1248] ss:$16 sps:$4 sm:$0xff]   ;;  %v8231_v8 = vld [vmem:[%s11225_s1 + $0x1264] ss:$16 sps:$4 sm:$0xff]  }
 0x213   :  { %5282 = vmatpush1.bf16.msra.mxu0 %v8139_v9  ;;  %5815 = vmatpush1.bf16.msra.mxu1 %v8142_v10  ;;  %v8234_v9 = vld [vmem:[%s11225_s1 + $0x126c] ss:$16 sps:$4 sm:$0xff]   ;;  %v8229_v10 = vld [vmem:[%s11225_s1 + $0x1260] ss:$16 sps:$4 sm:$0xff]  }
 0x214   :  { %5283 = vmatprep.subr.bf16.mxu0 %v8147_v11  ;;  %5816 = vmatprep.subr.bf16.mxu1 %v8150_v12  ;;  %v8232_v11 = vld [vmem:[%s11225_s1 + $0x1268] ss:$16 sps:$4 sm:$0xff]   ;;  %v8237_v12 = vld [vmem:[%s11225_s1 + $0x1284] ss:$16 sps:$4 sm:$0xff]  }
 0x217   :  { %5284 = vmatpush1.bf16.msra.mxu0 %v8145_v52  ;;  %5817 = vmatpush1.bf16.msra.mxu1 %v8148_v15  ;;  %v8240_v52 = vld [vmem:[%s11225_s1 + $0x128c] ss:$16 sps:$4 sm:$0xff]   ;;  %v8235_v15 = vld [vmem:[%s11225_s1 + $0x1280] ss:$16 sps:$4 sm:$0xff]  }
 0x218   :  { %5285 = vmatprep.subr.bf16.mxu0 %v8153_v16  ;;  %5818 = vmatprep.subr.bf16.mxu1 %v8156_v17  ;;  %v8238_v16 = vld [vmem:[%s11225_s1 + $0x1288] ss:$16 sps:$4 sm:$0xff]   ;;  %v8243_v17 = vld [vmem:[%s11225_s1 + $0x12a4] ss:$16 sps:$4 sm:$0xff]  }
 0x21b   :  { %5286 = vmatpush1.bf16.msra.mxu0 %v8151_v18  ;;  %5819 = vmatpush1.bf16.msra.mxu1 %v8154_v19  ;;  %v8246_v18 = vld [vmem:[%s11225_s1 + $0x12ac] ss:$16 sps:$4 sm:$0xff]   ;;  %v8241_v19 = vld [vmem:[%s11225_s1 + $0x12a0] ss:$16 sps:$4 sm:$0xff]  }
 0x21c   :  { %5287 = vmatprep.subr.bf16.mxu0 %v8159_v20  ;;  %5820 = vmatprep.subr.bf16.mxu1 %v8162_v22  ;;  %v8244_v20 = vld [vmem:[%s11225_s1 + $0x12a8] ss:$16 sps:$4 sm:$0xff]   ;;  %v8249_v22 = vld [vmem:[%s11225_s1 + $0x12c4] ss:$16 sps:$4 sm:$0xff]  }
 0x21f   :  { %5288 = vmatpush1.bf16.msra.mxu0 %v8157_v23  ;;  %5821 = vmatpush1.bf16.msra.mxu1 %v8160_v24  ;;  %v8252_v23 = vld [vmem:[%s11225_s1 + $0x12cc] ss:$16 sps:$4 sm:$0xff]   ;;  %v8247_v24 = vld [vmem:[%s11225_s1 + $0x12c0] ss:$16 sps:$4 sm:$0xff]  }
 0x220   :  { %5289 = vmatprep.subr.bf16.mxu0 %v8165_v13  ;;  %5822 = vmatprep.subr.bf16.mxu1 %v8168_v27  ;;  %v8250_v13 = vld [vmem:[%s11225_s1 + $0x12c8] ss:$16 sps:$4 sm:$0xff]   ;;  %v8255_v27 = vld [vmem:[%s11225_s1 + $0x12e4] ss:$16 sps:$4 sm:$0xff]  }
 0x223   :  { %5290 = vmatpush1.bf16.msra.mxu0 %v8163_v28  ;;  %5823 = vmatpush1.bf16.msra.mxu1 %v8166_v29  ;;  %v8258_v28 = vld [vmem:[%s11225_s1 + $0x12ec] ss:$16 sps:$4 sm:$0xff]   ;;  %v8253_v29 = vld [vmem:[%s11225_s1 + $0x12e0] ss:$16 sps:$4 sm:$0xff]  }
 0x224   :  { %5291 = vmatprep.subr.bf16.mxu0 %v8171_v14  ;;  %5824 = vmatprep.subr.bf16.mxu1 %v8174_v30  ;;  %v8256_v14 = vld [vmem:[%s11225_s1 + $0x12e8] ss:$16 sps:$4 sm:$0xff]   ;;  %v8261_v30 = vld [vmem:[%s11225_s1 + $0x1304] ss:$16 sps:$4 sm:$0xff]  }
 0x227   :  { %5292 = vmatpush1.bf16.msra.mxu0 %v8169_v31  ;;  %5825 = vmatpush1.bf16.msra.mxu1 %v8172_v25  ;;  %v8264_v31 = vld [vmem:[%s11225_s1 + $0x130c] ss:$16 sps:$4 sm:$0xff]   ;;  %v8259_v25 = vld [vmem:[%s11225_s1 + $0x1300] ss:$16 sps:$4 sm:$0xff]  }
 0x228   :  { %5293 = vmatprep.subr.bf16.mxu0 %v8177_v32  ;;  %5826 = vmatprep.subr.bf16.mxu1 %v8180_v33  ;;  %v8262_v32 = vld [vmem:[%s11225_s1 + $0x1308] ss:$16 sps:$4 sm:$0xff]   ;;  %v8267_v33 = vld [vmem:[%s11225_s1 + $0x1324] ss:$16 sps:$4 sm:$0xff]  }
 0x22b   :  { %5294 = vmatpush1.bf16.msra.mxu0 %v8175_v26  ;;  %5827 = vmatpush1.bf16.msra.mxu1 %v8178_v36  ;;  %v8270_v26 = vld [vmem:[%s11225_s1 + $0x132c] ss:$16 sps:$4 sm:$0xff]   ;;  %v8265_v36 = vld [vmem:[%s11225_s1 + $0x1320] ss:$16 sps:$4 sm:$0xff]  }
 0x22c   :  { %5295 = vmatprep.subr.bf16.mxu0 %v8183_v37  ;;  %5828 = vmatprep.subr.bf16.mxu1 %v8186_v21  ;;  %v8268_v37 = vld [vmem:[%s11225_s1 + $0x1328] ss:$16 sps:$4 sm:$0xff]   ;;  %v8273_v21 = vld [vmem:[%s11225_s1 + $0x1344] ss:$16 sps:$4 sm:$0xff]  }
 0x22f   :  { %5296 = vmatpush1.bf16.msra.mxu0 %v8181_v39  ;;  %5829 = vmatpush1.bf16.msra.mxu1 %v8184_v40  ;;  %v8276_v39 = vld [vmem:[%s11225_s1 + $0x134c] ss:$16 sps:$4 sm:$0xff]   ;;  %v8271_v40 = vld [vmem:[%s11225_s1 + $0x1340] ss:$16 sps:$4 sm:$0xff]  }
 0x230   :  { %5297 = vmatprep.subr.bf16.mxu0 %v8189_v41  ;;  %5830 = vmatprep.subr.bf16.mxu1 %v8192_v34  ;;  %v8274_v41 = vld [vmem:[%s11225_s1 + $0x1348] ss:$16 sps:$4 sm:$0xff]   ;;  %v8279_v34 = vld [vmem:[%s11225_s1 + $0x1364] ss:$16 sps:$4 sm:$0xff]  }
 0x233   :  { %5298 = vmatpush1.bf16.msra.mxu0 %v8187_v43  ;;  %5831 = vmatpush1.bf16.msra.mxu1 %v8190_v45  ;;  %v8282_v43 = vld [vmem:[%s11225_s1 + $0x136c] ss:$16 sps:$4 sm:$0xff]   ;;  %v8277_v45 = vld [vmem:[%s11225_s1 + $0x1360] ss:$16 sps:$4 sm:$0xff]  }
 0x234   :  { %5299 = vmatprep.subr.bf16.mxu0 %v8195_v46  ;;  %5832 = vmatprep.subr.bf16.mxu1 %v8198_v35  ;;  %v8280_v46 = vld [vmem:[%s11225_s1 + $0x1368] ss:$16 sps:$4 sm:$0xff]   ;;  %v8285_v35 = vld [vmem:[%s11225_s1 + $0x1384] ss:$16 sps:$4 sm:$0xff]  }
 0x237   :  { %5300 = vmatpush1.bf16.msra.mxu0 %v8193_v50  ;;  %5833 = vmatpush1.bf16.msra.mxu1 %v8196_v53  ;;  %v8288_v50 = vld [vmem:[%s11225_s1 + $0x138c] ss:$16 sps:$4 sm:$0xff]   ;;  %v8283_v53 = vld [vmem:[%s11225_s1 + $0x1380] ss:$16 sps:$4 sm:$0xff]  }
 0x238   :  { %5301 = vmatprep.subr.bf16.mxu0 %v8201_v38  ;;  %5834 = vmatprep.subr.bf16.mxu1 %v8204_v54  ;;  %v8286_v38 = vld [vmem:[%s11225_s1 + $0x1388] ss:$16 sps:$4 sm:$0xff]   ;;  %v8291_v54 = vld [vmem:[%s11225_s1 + $0x13a4] ss:$16 sps:$4 sm:$0xff]  }
 0x23b   :  { %5302 = vmatpush1.bf16.msra.mxu0 %v8199_v55  ;;  %5835 = vmatpush1.bf16.msra.mxu1 %v8202_v56  ;;  %v8294_v55 = vld [vmem:[%s11225_s1 + $0x13ac] ss:$16 sps:$4 sm:$0xff]   ;;  %v8289_v56 = vld [vmem:[%s11225_s1 + $0x13a0] ss:$16 sps:$4 sm:$0xff]  }
 0x23c   :  { %5303 = vmatprep.subr.bf16.mxu0 %v8207_v47  ;;  %5836 = vmatprep.subr.bf16.mxu1 %v8210_v57  ;;  %v8292_v47 = vld [vmem:[%s11225_s1 + $0x13a8] ss:$16 sps:$4 sm:$0xff]   ;;  %v8297_v57 = vld [vmem:[%s11225_s1 + $0x13c4] ss:$16 sps:$4 sm:$0xff]  }
 0x23f   :  { %5304 = vmatpush1.bf16.msra.mxu0 %v8205_v58  ;;  %5837 = vmatpush1.bf16.msra.mxu1 %v8208_v59  ;;  %v8300_v58 = vld [vmem:[%s11225_s1 + $0x13cc] ss:$16 sps:$4 sm:$0xff]   ;;  %v934_v59 = vcombine.high %v10221_v44, %v10221_v44 }
 0x240   :  { %5314 = vmatprep.subr.bf16.mxu0 %v8213_v48  ;;  %5847 = vmatprep.subr.bf16.mxu1 %v8216_v61  ;;  %v8295_v48 = vld [vmem:[%s11225_s1 + $0x13c0] ss:$16 sps:$4 sm:$0xff]   ;;  %v8298_v61 = vld [vmem:[%s11225_s1 + $0x13c8] ss:$16 sps:$4 sm:$0xff]   ;;  %v8306_v44 = vld [vmem:[%s11225_s1 + $0x13ec] ss:$16 sps:$4 sm:$0xff]  }
 0x242   :  { %5306 = vmatmul.mubr.bf16.vlgmr.msra.gmra.mrb[0].mxu0 %v10454_v62  ;;  %5839 = vmatmul.mubr.bf16.vlgmr.msra.gmra.mrb[0].mxu1 %v10454_v62 }
 0x243   :  { %5315 = vmatpush1.bf16.msra.mxu0 %v8211_v63  ;;  %5848 = vmatpush1.bf16.msra.mxu1 %v8214_v0  ;;  %v8303_v63 = vld [vmem:[%s11225_s1 + $0x13e4] ss:$16 sps:$4 sm:$0xff]   ;;  %v10643_v0 = vrot.slane %v934_v59, %v8750_v49  ;;  %v8382_v59 = vld [vmem:[%s11225_s1 + $0x1588] ss:$16 sps:$4 sm:$0xff]  }
 0x244   :  { %5316 = vmatprep.subr.bf16.mxu0 %v8219_v1  ;;  %5849 = vmatprep.subr.bf16.mxu1 %v8222_v51  ;;  %v8301_v1 = vld [vmem:[%s11225_s1 + $0x13e0] ss:$16 sps:$4 sm:$0xff]   ;;  %v8304_v51 = vld [vmem:[%s11225_s1 + $0x13e8] ss:$16 sps:$4 sm:$0xff]  }
 0x245   :  { %5346 = vmatprep.mubr.bf16.mxu0 %v981_v2  ;;  %5879 = vmatprep.mubr.bf16.mxu1 %v981_v2  ;;  %v8309_v2 = vld [vmem:[%s11225_s1 + $0x1404] ss:$16 sps:$4 sm:$0xff]  }
 0x247   :  { %5317 = vmatpush1.bf16.msra.mxu0 %v8217_v3  ;;  %5850 = vmatpush1.bf16.msra.mxu1 %v8220_v4  ;;  %v8312_v3 = vld [vmem:[%s11225_s1 + $0x140c] ss:$16 sps:$4 sm:$0xff]   ;;  %v950_v4 = vcombine.high %v10643_v0, %v10643_v0 }
 0x248   :  { %5318 = vmatprep.subr.bf16.mxu0 %v8225_v60  ;;  %5851 = vmatprep.subr.bf16.mxu1 %v8228_v5  ;;  %v979_v60 = vcombine.high %v10454_v62, %v10454_v62  ;;  %v8307_v5 = vld [vmem:[%s11225_s1 + $0x1400] ss:$16 sps:$4 sm:$0xff]   ;;  %v8318_v62 = vld [vmem:[%s11225_s1 + $0x142c] ss:$16 sps:$4 sm:$0xff]  }
 0x24b   :  { %5319 = vmatpush1.bf16.msra.mxu0 %v8223_v6  ;;  %5852 = vmatpush1.bf16.msra.mxu1 %v8226_v7  ;;  %v8310_v6 = vld [vmem:[%s11225_s1 + $0x1408] ss:$16 sps:$4 sm:$0xff]   ;;  %v8315_v7 = vld [vmem:[%s11225_s1 + $0x1424] ss:$16 sps:$4 sm:$0xff]  }
 0x24c   :  { %5320 = vmatprep.subr.bf16.mxu0 %v8231_v8  ;;  %5853 = vmatprep.subr.bf16.mxu1 %v8234_v9  ;;  %v10674_v8 = vrot.slane %v950_v4, %v8750_v49  ;;  %v8313_v9 = vld [vmem:[%s11225_s1 + $0x1420] ss:$16 sps:$4 sm:$0xff]   ;;  %v8399_v4 = vld [vmem:[%s11225_s1 + $0x15e4] ss:$16 sps:$4 sm:$0xff]  }
 0x24f   :  { %5321 = vmatpush1.bf16.msra.mxu0 %v8229_v10  ;;  %5854 = vmatpush1.bf16.msra.mxu1 %v8232_v11  ;;  %v8316_v10 = vld [vmem:[%s11225_s1 + $0x1428] ss:$16 sps:$4 sm:$0xff]   ;;  %v8321_v11 = vld [vmem:[%s11225_s1 + $0x1444] ss:$16 sps:$4 sm:$0xff]  }
 0x250   :  { %5322 = vmatprep.subr.bf16.mxu0 %v8237_v12  ;;  %5855 = vmatprep.subr.bf16.mxu1 %v8240_v52  ;;  %v8324_v12 = vld [vmem:[%s11225_s1 + $0x144c] ss:$16 sps:$4 sm:$0xff]   ;;  %v8319_v52 = vld [vmem:[%s11225_s1 + $0x1440] ss:$16 sps:$4 sm:$0xff]  }
 0x253   :  { %5323 = vmatpush1.bf16.msra.mxu0 %v8235_v15  ;;  %5856 = vmatpush1.bf16.msra.mxu1 %v8238_v16  ;;  %v8322_v15 = vld [vmem:[%s11225_s1 + $0x1448] ss:$16 sps:$4 sm:$0xff]   ;;  %v8327_v16 = vld [vmem:[%s11225_s1 + $0x1464] ss:$16 sps:$4 sm:$0xff]  }
 0x254   :  { %5324 = vmatprep.subr.bf16.mxu0 %v8243_v17  ;;  %5857 = vmatprep.subr.bf16.mxu1 %v8246_v18  ;;  %v8330_v17 = vld [vmem:[%s11225_s1 + $0x146c] ss:$16 sps:$4 sm:$0xff]   ;;  %v8325_v18 = vld [vmem:[%s11225_s1 + $0x1460] ss:$16 sps:$4 sm:$0xff]  }
 0x257   :  { %5325 = vmatpush1.bf16.msra.mxu0 %v8241_v19  ;;  %5858 = vmatpush1.bf16.msra.mxu1 %v8244_v20  ;;  %v8328_v19 = vld [vmem:[%s11225_s1 + $0x1468] ss:$16 sps:$4 sm:$0xff]   ;;  %v8333_v20 = vld [vmem:[%s11225_s1 + $0x1484] ss:$16 sps:$4 sm:$0xff]  }
 0x258   :  { %5326 = vmatprep.subr.bf16.mxu0 %v8249_v22  ;;  %5859 = vmatprep.subr.bf16.mxu1 %v8252_v23  ;;  %v8336_v22 = vld [vmem:[%s11225_s1 + $0x148c] ss:$16 sps:$4 sm:$0xff]   ;;  %v8331_v23 = vld [vmem:[%s11225_s1 + $0x1480] ss:$16 sps:$4 sm:$0xff]  }
 0x25b   :  { %5327 = vmatpush1.bf16.msra.mxu0 %v8247_v24  ;;  %5860 = vmatpush1.bf16.msra.mxu1 %v8250_v13  ;;  %v8334_v24 = vld [vmem:[%s11225_s1 + $0x1488] ss:$16 sps:$4 sm:$0xff]   ;;  %v8339_v13 = vld [vmem:[%s11225_s1 + $0x14a4] ss:$16 sps:$4 sm:$0xff]  }
 0x25c   :  { %5328 = vmatprep.subr.bf16.mxu0 %v8255_v27  ;;  %5861 = vmatprep.subr.bf16.mxu1 %v8258_v28  ;;  %v8342_v27 = vld [vmem:[%s11225_s1 + $0x14ac] ss:$16 sps:$4 sm:$0xff]   ;;  %v8337_v28 = vld [vmem:[%s11225_s1 + $0x14a0] ss:$16 sps:$4 sm:$0xff]  }
 0x25f   :  { %5329 = vmatpush1.bf16.msra.mxu0 %v8253_v29  ;;  %5862 = vmatpush1.bf16.msra.mxu1 %v8256_v14  ;;  %v8340_v29 = vld [vmem:[%s11225_s1 + $0x14a8] ss:$16 sps:$4 sm:$0xff]   ;;  %v8345_v14 = vld [vmem:[%s11225_s1 + $0x14c4] ss:$16 sps:$4 sm:$0xff]  }
 0x260   :  { %5330 = vmatprep.subr.bf16.mxu0 %v8261_v30  ;;  %5863 = vmatprep.subr.bf16.mxu1 %v8264_v31  ;;  %v8348_v30 = vld [vmem:[%s11225_s1 + $0x14cc] ss:$16 sps:$4 sm:$0xff]   ;;  %v8343_v31 = vld [vmem:[%s11225_s1 + $0x14c0] ss:$16 sps:$4 sm:$0xff]  }
 0x263   :  { %5331 = vmatpush1.bf16.msra.mxu0 %v8259_v25  ;;  %5864 = vmatpush1.bf16.msra.mxu1 %v8262_v32  ;;  %v8346_v25 = vld [vmem:[%s11225_s1 + $0x14c8] ss:$16 sps:$4 sm:$0xff]   ;;  %v8351_v32 = vld [vmem:[%s11225_s1 + $0x14e4] ss:$16 sps:$4 sm:$0xff]  }
 0x264   :  { %5332 = vmatprep.subr.bf16.mxu0 %v8267_v33  ;;  %5865 = vmatprep.subr.bf16.mxu1 %v8270_v26  ;;  %v8354_v33 = vld [vmem:[%s11225_s1 + $0x14ec] ss:$16 sps:$4 sm:$0xff]   ;;  %v8349_v26 = vld [vmem:[%s11225_s1 + $0x14e0] ss:$16 sps:$4 sm:$0xff]  }
 0x267   :  { %5333 = vmatpush1.bf16.msra.mxu0 %v8265_v36  ;;  %5866 = vmatpush1.bf16.msra.mxu1 %v8268_v37  ;;  %v8352_v36 = vld [vmem:[%s11225_s1 + $0x14e8] ss:$16 sps:$4 sm:$0xff]   ;;  %v8357_v37 = vld [vmem:[%s11225_s1 + $0x1504] ss:$16 sps:$4 sm:$0xff]  }
 0x268   :  { %5334 = vmatprep.subr.bf16.mxu0 %v8273_v21  ;;  %5867 = vmatprep.subr.bf16.mxu1 %v8276_v39  ;;  %v8360_v21 = vld [vmem:[%s11225_s1 + $0x150c] ss:$16 sps:$4 sm:$0xff]   ;;  %v8355_v39 = vld [vmem:[%s11225_s1 + $0x1500] ss:$16 sps:$4 sm:$0xff]  }
 0x26b   :  { %5335 = vmatpush1.bf16.msra.mxu0 %v8271_v40  ;;  %5868 = vmatpush1.bf16.msra.mxu1 %v8274_v41  ;;  %v8358_v40 = vld [vmem:[%s11225_s1 + $0x1508] ss:$16 sps:$4 sm:$0xff]   ;;  %v8363_v41 = vld [vmem:[%s11225_s1 + $0x1524] ss:$16 sps:$4 sm:$0xff]  }
 0x26c   :  { %5336 = vmatprep.subr.bf16.mxu0 %v8279_v34  ;;  %5869 = vmatprep.subr.bf16.mxu1 %v8282_v43  ;;  %v8366_v34 = vld [vmem:[%s11225_s1 + $0x152c] ss:$16 sps:$4 sm:$0xff]   ;;  %v8361_v43 = vld [vmem:[%s11225_s1 + $0x1520] ss:$16 sps:$4 sm:$0xff]  }
 0x26f   :  { %5337 = vmatpush1.bf16.msra.mxu0 %v8277_v45  ;;  %5870 = vmatpush1.bf16.msra.mxu1 %v8280_v46  ;;  %v8364_v45 = vld [vmem:[%s11225_s1 + $0x1528] ss:$16 sps:$4 sm:$0xff]   ;;  %v8369_v46 = vld [vmem:[%s11225_s1 + $0x1544] ss:$16 sps:$4 sm:$0xff]  }
 0x270   :  { %5338 = vmatprep.subr.bf16.mxu0 %v8285_v35  ;;  %5871 = vmatprep.subr.bf16.mxu1 %v8288_v50  ;;  %v8372_v35 = vld [vmem:[%s11225_s1 + $0x154c] ss:$16 sps:$4 sm:$0xff]   ;;  %v8367_v50 = vld [vmem:[%s11225_s1 + $0x1540] ss:$16 sps:$4 sm:$0xff]  }
 0x273   :  { %5339 = vmatpush1.bf16.msra.mxu0 %v8283_v53  ;;  %5872 = vmatpush1.bf16.msra.mxu1 %v8286_v38  ;;  %v8370_v53 = vld [vmem:[%s11225_s1 + $0x1548] ss:$16 sps:$4 sm:$0xff]   ;;  %v8375_v38 = vld [vmem:[%s11225_s1 + $0x1564] ss:$16 sps:$4 sm:$0xff]  }
 0x274   :  { %5340 = vmatprep.subr.bf16.mxu0 %v8291_v54  ;;  %5873 = vmatprep.subr.bf16.mxu1 %v8294_v55  ;;  %v8378_v54 = vld [vmem:[%s11225_s1 + $0x156c] ss:$16 sps:$4 sm:$0xff]   ;;  %v8373_v55 = vld [vmem:[%s11225_s1 + $0x1560] ss:$16 sps:$4 sm:$0xff]  }
 0x277   :  { %5341 = vmatpush1.bf16.msra.mxu0 %v8289_v56  ;;  %5874 = vmatpush1.bf16.msra.mxu1 %v8292_v47  ;;  %v8376_v56 = vld [vmem:[%s11225_s1 + $0x1568] ss:$16 sps:$4 sm:$0xff]   ;;  %v8381_v47 = vld [vmem:[%s11225_s1 + $0x1584] ss:$16 sps:$4 sm:$0xff]  }
 0x278   :  { %5342 = vmatprep.subr.bf16.mxu0 %v8297_v57  ;;  %5875 = vmatprep.subr.bf16.mxu1 %v8300_v58  ;;  %v8384_v57 = vld [vmem:[%s11225_s1 + $0x158c] ss:$16 sps:$4 sm:$0xff]   ;;  %v8379_v58 = vld [vmem:[%s11225_s1 + $0x1580] ss:$16 sps:$4 sm:$0xff]  }
 0x27b   :  { %5343 = vmatpush1.bf16.msra.mxu0 %v8295_v48  ;;  %5876 = vmatpush1.bf16.msra.mxu1 %v8298_v61  ;;  %v8387_v48 = vld [vmem:[%s11225_s1 + $0x15a4] ss:$16 sps:$4 sm:$0xff]   ;;  %v8390_v61 = vld [vmem:[%s11225_s1 + $0x15ac] ss:$16 sps:$4 sm:$0xff]  }
 0x27c   :  { %5344 = vmatprep.subr.bf16.mxu0 %v8303_v63  ;;  %5877 = vmatprep.subr.bf16.mxu1 %v8306_v44  ;;  %v8385_v63 = vld [vmem:[%s11225_s1 + $0x15a0] ss:$16 sps:$4 sm:$0xff]   ;;  %v8388_v44 = vld [vmem:[%s11225_s1 + $0x15a8] ss:$16 sps:$4 sm:$0xff]  }
 0x27f   :  { %5345 = vmatpush1.bf16.msra.mxu0 %v8301_v1  ;;  %5878 = vmatpush1.bf16.msra.mxu1 %v8304_v51  ;;  %v8393_v1 = vld [vmem:[%s11225_s1 + $0x15c4] ss:$16 sps:$4 sm:$0xff]   ;;  %v8396_v51 = vld [vmem:[%s11225_s1 + $0x15cc] ss:$16 sps:$4 sm:$0xff]  }
 0x280   :  { %5355 = vmatprep.subr.bf16.mxu0 %v8309_v2  ;;  %5888 = vmatprep.subr.bf16.mxu1 %v8312_v3  ;;  %v8391_v2 = vld [vmem:[%s11225_s1 + $0x15c0] ss:$16 sps:$4 sm:$0xff]   ;;  %v8394_v3 = vld [vmem:[%s11225_s1 + $0x15c8] ss:$16 sps:$4 sm:$0xff]  }
 0x282   :  { %5347 = vmatmul.mubr.bf16.vlgmr.msra.gmra.mrb[0].mxu0 %v979_v60  ;;  %5880 = vmatmul.mubr.bf16.vlgmr.msra.gmra.mrb[0].mxu1 %v979_v60  ;;  %v8402_v60 = vld [vmem:[%s11225_s1 + $0x15ec] ss:$16 sps:$4 sm:$0xff]  }
 0x283   :  { %5356 = vmatpush1.bf16.msra.mxu0 %v8307_v5  ;;  %5889 = vmatpush1.bf16.msra.mxu1 %v8310_v6  ;;  %v8397_v5 = vld [vmem:[%s11225_s1 + $0x15e0] ss:$16 sps:$4 sm:$0xff]   ;;  %v8400_v6 = vld [vmem:[%s11225_s1 + $0x15e8] ss:$16 sps:$4 sm:$0xff]  }
 0x284   :  { %5357 = vmatprep.subr.bf16.mxu0 %v8315_v7  ;;  %5890 = vmatprep.subr.bf16.mxu1 %v8318_v62  ;;  %v8406_v7 = vld [vmem:[%s11225_s1 + $0x1604] ss:$16 sps:$4 sm:$0xff]   ;;  %v8409_v62 = vld [vmem:[%s11225_s1 + $0x160c] ss:$16 sps:$4 sm:$0xff]  }
 0x285   :  { %5387 = vmatprep.mubr.bf16.mxu0 %v10674_v8  ;;  %5920 = vmatprep.mubr.bf16.mxu1 %v10674_v8 }
 0x287   :  { %5358 = vmatpush1.bf16.msra.mxu0 %v8313_v9  ;;  %5891 = vmatpush1.bf16.msra.mxu1 %v8316_v10  ;;  %v10860_v9 = vrot.slane %v10643_v0, %v8750_v49  ;;  %v8404_v10 = vld [vmem:[%s11225_s1 + $0x1600] ss:$16 sps:$4 sm:$0xff]   ;;  %v8415_v0 = vld [vmem:[%s11225_s1 + $0x162c] ss:$16 sps:$4 sm:$0xff]  }
 0x288   :  { %5359 = vmatprep.subr.bf16.mxu0 %v8321_v11  ;;  %5892 = vmatprep.subr.bf16.mxu1 %v8324_v12  ;;  %v8407_v11 = vld [vmem:[%s11225_s1 + $0x1608] ss:$16 sps:$4 sm:$0xff]   ;;  %v8412_v12 = vld [vmem:[%s11225_s1 + $0x1624] ss:$16 sps:$4 sm:$0xff]  }
 0x28b   :  { %5360 = vmatpush1.bf16.msra.mxu0 %v8319_v52  ;;  %5893 = vmatpush1.bf16.msra.mxu1 %v8322_v15  ;;  %v982_v52 = vcombine.high %v10674_v8, %v10674_v8  ;;  %v8410_v15 = vld [vmem:[%s11225_s1 + $0x1620] ss:$16 sps:$4 sm:$0xff]   ;;  %v8418_v8 = vld [vmem:[%s11225_s1 + $0x1644] ss:$16 sps:$4 sm:$0xff]  }
 0x28c   :  { %5361 = vmatprep.subr.bf16.mxu0 %v8327_v16  ;;  %5894 = vmatprep.subr.bf16.mxu1 %v8330_v17  ;;  %v8413_v16 = vld [vmem:[%s11225_s1 + $0x1628] ss:$16 sps:$4 sm:$0xff]   ;;  %v8421_v17 = vld [vmem:[%s11225_s1 + $0x164c] ss:$16 sps:$4 sm:$0xff]  }
 0x28f   :  { %5362 = vmatpush1.bf16.msra.mxu0 %v8325_v18  ;;  %5895 = vmatpush1.bf16.msra.mxu1 %v8328_v19  ;;  %v8416_v18 = vld [vmem:[%s11225_s1 + $0x1640] ss:$16 sps:$4 sm:$0xff]   ;;  %v8419_v19 = vld [vmem:[%s11225_s1 + $0x1648] ss:$16 sps:$4 sm:$0xff]  }
 0x290   :  { %5363 = vmatprep.subr.bf16.mxu0 %v8333_v20  ;;  %5896 = vmatprep.subr.bf16.mxu1 %v8336_v22  ;;  %v8424_v20 = vld [vmem:[%s11225_s1 + $0x1664] ss:$16 sps:$4 sm:$0xff]   ;;  %v8427_v22 = vld [vmem:[%s11225_s1 + $0x166c] ss:$16 sps:$4 sm:$0xff]  }
 0x293   :  { %5364 = vmatpush1.bf16.msra.mxu0 %v8331_v23  ;;  %5897 = vmatpush1.bf16.msra.mxu1 %v8334_v24  ;;  %v8422_v23 = vld [vmem:[%s11225_s1 + $0x1660] ss:$16 sps:$4 sm:$0xff]   ;;  %v8425_v24 = vld [vmem:[%s11225_s1 + $0x1668] ss:$16 sps:$4 sm:$0xff]  }
 0x294   :  { %5365 = vmatprep.subr.bf16.mxu0 %v8339_v13  ;;  %5898 = vmatprep.subr.bf16.mxu1 %v8342_v27  ;;  %v8430_v13 = vld [vmem:[%s11225_s1 + $0x1684] ss:$16 sps:$4 sm:$0xff]   ;;  %v8433_v27 = vld [vmem:[%s11225_s1 + $0x168c] ss:$16 sps:$4 sm:$0xff]  }
 0x297   :  { %5366 = vmatpush1.bf16.msra.mxu0 %v8337_v28  ;;  %5899 = vmatpush1.bf16.msra.mxu1 %v8340_v29  ;;  %v8428_v28 = vld [vmem:[%s11225_s1 + $0x1680] ss:$16 sps:$4 sm:$0xff]   ;;  %v8431_v29 = vld [vmem:[%s11225_s1 + $0x1688] ss:$16 sps:$4 sm:$0xff]  }
 0x298   :  { %5367 = vmatprep.subr.bf16.mxu0 %v8345_v14  ;;  %5900 = vmatprep.subr.bf16.mxu1 %v8348_v30  ;;  %v8436_v14 = vld [vmem:[%s11225_s1 + $0x16a4] ss:$16 sps:$4 sm:$0xff]   ;;  %v8439_v30 = vld [vmem:[%s11225_s1 + $0x16ac] ss:$16 sps:$4 sm:$0xff]  }
 0x29b   :  { %5368 = vmatpush1.bf16.msra.mxu0 %v8343_v31  ;;  %5901 = vmatpush1.bf16.msra.mxu1 %v8346_v25  ;;  %v8434_v31 = vld [vmem:[%s11225_s1 + $0x16a0] ss:$16 sps:$4 sm:$0xff]   ;;  %v8437_v25 = vld [vmem:[%s11225_s1 + $0x16a8] ss:$16 sps:$4 sm:$0xff]  }
 0x29c   :  { %5369 = vmatprep.subr.bf16.mxu0 %v8351_v32  ;;  %5902 = vmatprep.subr.bf16.mxu1 %v8354_v33  ;;  %v8442_v32 = vld [vmem:[%s11225_s1 + $0x16c4] ss:$16 sps:$4 sm:$0xff]   ;;  %v8445_v33 = vld [vmem:[%s11225_s1 + $0x16cc] ss:$16 sps:$4 sm:$0xff]  }
 0x29f   :  { %5370 = vmatpush1.bf16.msra.mxu0 %v8349_v26  ;;  %5903 = vmatpush1.bf16.msra.mxu1 %v8352_v36  ;;  %v8440_v26 = vld [vmem:[%s11225_s1 + $0x16c0] ss:$16 sps:$4 sm:$0xff]   ;;  %v8443_v36 = vld [vmem:[%s11225_s1 + $0x16c8] ss:$16 sps:$4 sm:$0xff]  }
 0x2a0   :  { %5371 = vmatprep.subr.bf16.mxu0 %v8357_v37  ;;  %5904 = vmatprep.subr.bf16.mxu1 %v8360_v21  ;;  %v8448_v37 = vld [vmem:[%s11225_s1 + $0x16e4] ss:$16 sps:$4 sm:$0xff]   ;;  %v8451_v21 = vld [vmem:[%s11225_s1 + $0x16ec] ss:$16 sps:$4 sm:$0xff]  }
 0x2a3   :  { %5372 = vmatpush1.bf16.msra.mxu0 %v8355_v39  ;;  %5905 = vmatpush1.bf16.msra.mxu1 %v8358_v40  ;;  %v8446_v39 = vld [vmem:[%s11225_s1 + $0x16e0] ss:$16 sps:$4 sm:$0xff]   ;;  %v8449_v40 = vld [vmem:[%s11225_s1 + $0x16e8] ss:$16 sps:$4 sm:$0xff]  }
 0x2a4   :  { %5373 = vmatprep.subr.bf16.mxu0 %v8363_v41  ;;  %5906 = vmatprep.subr.bf16.mxu1 %v8366_v34  ;;  %v8454_v41 = vld [vmem:[%s11225_s1 + $0x1704] ss:$16 sps:$4 sm:$0xff]   ;;  %v8457_v34 = vld [vmem:[%s11225_s1 + $0x170c] ss:$16 sps:$4 sm:$0xff]  }
 0x2a7   :  { %5374 = vmatpush1.bf16.msra.mxu0 %v8361_v43  ;;  %5907 = vmatpush1.bf16.msra.mxu1 %v8364_v45  ;;  %v8452_v43 = vld [vmem:[%s11225_s1 + $0x1700] ss:$16 sps:$4 sm:$0xff]   ;;  %v8455_v45 = vld [vmem:[%s11225_s1 + $0x1708] ss:$16 sps:$4 sm:$0xff]  }
 0x2a8   :  { %5375 = vmatprep.subr.bf16.mxu0 %v8369_v46  ;;  %5908 = vmatprep.subr.bf16.mxu1 %v8372_v35  ;;  %v8460_v46 = vld [vmem:[%s11225_s1 + $0x1724] ss:$16 sps:$4 sm:$0xff]   ;;  %v8463_v35 = vld [vmem:[%s11225_s1 + $0x172c] ss:$16 sps:$4 sm:$0xff]  }
 0x2ab   :  { %5376 = vmatpush1.bf16.msra.mxu0 %v8367_v50  ;;  %5909 = vmatpush1.bf16.msra.mxu1 %v8370_v53  ;;  %v8458_v50 = vld [vmem:[%s11225_s1 + $0x1720] ss:$16 sps:$4 sm:$0xff]   ;;  %v8461_v53 = vld [vmem:[%s11225_s1 + $0x1728] ss:$16 sps:$4 sm:$0xff]  }
 0x2ac   :  { %5377 = vmatprep.subr.bf16.mxu0 %v8375_v38  ;;  %5910 = vmatprep.subr.bf16.mxu1 %v8378_v54  ;;  %v8466_v38 = vld [vmem:[%s11225_s1 + $0x1744] ss:$16 sps:$4 sm:$0xff]   ;;  %v8469_v54 = vld [vmem:[%s11225_s1 + $0x174c] ss:$16 sps:$4 sm:$0xff]  }
 0x2af   :  { %5378 = vmatpush1.bf16.msra.mxu0 %v8373_v55  ;;  %5911 = vmatpush1.bf16.msra.mxu1 %v8376_v56  ;;  %v8464_v55 = vld [vmem:[%s11225_s1 + $0x1740] ss:$16 sps:$4 sm:$0xff]   ;;  %v8467_v56 = vld [vmem:[%s11225_s1 + $0x1748] ss:$16 sps:$4 sm:$0xff]  }
 0x2b0   :  { %5379 = vmatprep.subr.bf16.mxu0 %v8381_v47  ;;  %5912 = vmatprep.subr.bf16.mxu1 %v8384_v57  ;;  %v8472_v47 = vld [vmem:[%s11225_s1 + $0x1764] ss:$16 sps:$4 sm:$0xff]   ;;  %v8475_v57 = vld [vmem:[%s11225_s1 + $0x176c] ss:$16 sps:$4 sm:$0xff]  }
 0x2b3   :  { %5380 = vmatpush1.bf16.msra.mxu0 %v8379_v58  ;;  %5913 = vmatpush1.bf16.msra.mxu1 %v8382_v59  ;;  %v8470_v58 = vld [vmem:[%s11225_s1 + $0x1760] ss:$16 sps:$4 sm:$0xff]   ;;  %v8473_v59 = vld [vmem:[%s11225_s1 + $0x1768] ss:$16 sps:$4 sm:$0xff]  }
 0x2b4   :  { %5381 = vmatprep.subr.bf16.mxu0 %v8387_v48  ;;  %5914 = vmatprep.subr.bf16.mxu1 %v8390_v61  ;;  %v8478_v48 = vld [vmem:[%s11225_s1 + $0x1784] ss:$16 sps:$4 sm:$0xff]   ;;  %v8481_v61 = vld [vmem:[%s11225_s1 + $0x178c] ss:$16 sps:$4 sm:$0xff]  }
 0x2b7   :  { %5382 = vmatpush1.bf16.msra.mxu0 %v8385_v63  ;;  %5915 = vmatpush1.bf16.msra.mxu1 %v8388_v44  ;;  %v8476_v63 = vld [vmem:[%s11225_s1 + $0x1780] ss:$16 sps:$4 sm:$0xff]   ;;  %v8479_v44 = vld [vmem:[%s11225_s1 + $0x1788] ss:$16 sps:$4 sm:$0xff]  }
 0x2b8   :  { %5383 = vmatprep.subr.bf16.mxu0 %v8393_v1  ;;  %5916 = vmatprep.subr.bf16.mxu1 %v8396_v51  ;;  %v8484_v1 = vld [vmem:[%s11225_s1 + $0x17a4] ss:$16 sps:$4 sm:$0xff]   ;;  %v8487_v51 = vld [vmem:[%s11225_s1 + $0x17ac] ss:$16 sps:$4 sm:$0xff]  }
 0x2bb   :  { %5384 = vmatpush1.bf16.msra.mxu0 %v8391_v2  ;;  %5917 = vmatpush1.bf16.msra.mxu1 %v8394_v3  ;;  %v8482_v2 = vld [vmem:[%s11225_s1 + $0x17a0] ss:$16 sps:$4 sm:$0xff]   ;;  %v8485_v3 = vld [vmem:[%s11225_s1 + $0x17a8] ss:$16 sps:$4 sm:$0xff]  }
 0x2bc   :  { %5385 = vmatprep.subr.bf16.mxu0 %v8399_v4  ;;  %5918 = vmatprep.subr.bf16.mxu1 %v8402_v60  ;;  %v8490_v4 = vld [vmem:[%s11225_s1 + $0x17c4] ss:$16 sps:$4 sm:$0xff]   ;;  %v8493_v60 = vld [vmem:[%s11225_s1 + $0x17cc] ss:$16 sps:$4 sm:$0xff]  }
 0x2bf   :  { %5386 = vmatpush1.bf16.msra.mxu0 %v8397_v5  ;;  %5919 = vmatpush1.bf16.msra.mxu1 %v8400_v6  ;;  %v8488_v5 = vld [vmem:[%s11225_s1 + $0x17c0] ss:$16 sps:$4 sm:$0xff]   ;;  %v8491_v6 = vld [vmem:[%s11225_s1 + $0x17c8] ss:$16 sps:$4 sm:$0xff]  }
 0x2c0   :  { %5396 = vmatprep.subr.bf16.mxu0 %v8406_v7  ;;  %5929 = vmatprep.subr.bf16.mxu1 %v8409_v62  ;;  %v8496_v7 = vld [vmem:[%s11225_s1 + $0x17e4] ss:$16 sps:$4 sm:$0xff]   ;;  %v8499_v62 = vld [vmem:[%s11225_s1 + $0x17ec] ss:$16 sps:$4 sm:$0xff]  }
 0x2c2   :  { %5388 = vmatmul.mubr.bf16.vlgmr.msra.gmra.mrb[0].mxu0 %v10860_v9  ;;  %5921 = vmatmul.mubr.bf16.vlgmr.msra.gmra.mrb[0].mxu1 %v10860_v9 }
 0x2c3   :  { %5397 = vmatpush1.bf16.msra.mxu0 %v8404_v10  ;;  %5930 = vmatpush1.bf16.msra.mxu1 %v8407_v11  ;;  %v8494_v10 = vld [vmem:[%s11225_s1 + $0x17e0] ss:$16 sps:$4 sm:$0xff]   ;;  %v8497_v11 = vld [vmem:[%s11225_s1 + $0x17e8] ss:$16 sps:$4 sm:$0xff]  }
 0x2c4   :  { %5398 = vmatprep.subr.bf16.mxu0 %v8412_v12  ;;  %5931 = vmatprep.subr.bf16.mxu1 %v8415_v0  ;;  %v8502_v12 = vld [vmem:[%s11225_s1 + $0x1804] ss:$16 sps:$4 sm:$0xff]   ;;  %v8505_v0 = vld [vmem:[%s11225_s1 + $0x180c] ss:$16 sps:$4 sm:$0xff]  }
 0x2c5   :  { %5428 = vmatprep.mubr.bf16.mxu0 %v982_v52  ;;  %5961 = vmatprep.mubr.bf16.mxu1 %v982_v52  ;;  %v980_v52 = vcombine.high %v10860_v9, %v10860_v9  ;;  %v8511_v9 = vld [vmem:[%s11225_s1 + $0x182c] ss:$16 sps:$4 sm:$0xff]  }
 0x2c7   :  { %5399 = vmatpush1.bf16.msra.mxu0 %v8410_v15  ;;  %5932 = vmatpush1.bf16.msra.mxu1 %v8413_v16  ;;  %v8500_v15 = vld [vmem:[%s11225_s1 + $0x1800] ss:$16 sps:$4 sm:$0xff]   ;;  %v8503_v16 = vld [vmem:[%s11225_s1 + $0x1808] ss:$16 sps:$4 sm:$0xff]  }
 0x2c8   :  { %5400 = vmatprep.subr.bf16.mxu0 %v8418_v8  ;;  %5933 = vmatprep.subr.bf16.mxu1 %v8421_v17  ;;  %v8508_v8 = vld [vmem:[%s11225_s1 + $0x1824] ss:$16 sps:$4 sm:$0xff]   ;;  %v8506_v17 = vld [vmem:[%s11225_s1 + $0x1820] ss:$16 sps:$4 sm:$0xff]  }
 0x2cb   :  { %5401 = vmatpush1.bf16.msra.mxu0 %v8416_v18  ;;  %5934 = vmatpush1.bf16.msra.mxu1 %v8419_v19  ;;  %v8509_v18 = vld [vmem:[%s11225_s1 + $0x1828] ss:$16 sps:$4 sm:$0xff]   ;;  %v8514_v19 = vld [vmem:[%s11225_s1 + $0x1844] ss:$16 sps:$4 sm:$0xff]  }
 0x2cc   :  { %5402 = vmatprep.subr.bf16.mxu0 %v8424_v20  ;;  %5935 = vmatprep.subr.bf16.mxu1 %v8427_v22  ;;  %v8517_v20 = vld [vmem:[%s11225_s1 + $0x184c] ss:$16 sps:$4 sm:$0xff]   ;;  %v8583_v22 = vmov 0  }
 0x2cf   :  { %5403 = vmatpush1.bf16.msra.mxu0 %v8422_v23  ;;  %5936 = vmatpush1.bf16.msra.mxu1 %v8425_v24  ;;  %v8512_v23 = vld [vmem:[%s11225_s1 + $0x1840] ss:$16 sps:$4 sm:$0xff]   ;;  %v8515_v24 = vld [vmem:[%s11225_s1 + $0x1848] ss:$16 sps:$4 sm:$0xff]  }
 0x2d0   :  { %5404 = vmatprep.subr.bf16.mxu0 %v8430_v13  ;;  %5937 = vmatprep.subr.bf16.mxu1 %v8433_v27  ;;  %v8520_v13 = vld [vmem:[%s11225_s1 + $0x1864] ss:$16 sps:$4 sm:$0xff]   ;;  %v8523_v27 = vld [vmem:[%s11225_s1 + $0x186c] ss:$16 sps:$4 sm:$0xff]  }
 0x2d3   :  { %5405 = vmatpush1.bf16.msra.mxu0 %v8428_v28  ;;  %5938 = vmatpush1.bf16.msra.mxu1 %v8431_v29  ;;  %v8518_v28 = vld [vmem:[%s11225_s1 + $0x1860] ss:$16 sps:$4 sm:$0xff]   ;;  %v8521_v29 = vld [vmem:[%s11225_s1 + $0x1868] ss:$16 sps:$4 sm:$0xff]  }
 0x2d4   :  { %5406 = vmatprep.subr.bf16.mxu0 %v8436_v14  ;;  %5939 = vmatprep.subr.bf16.mxu1 %v8439_v30  ;;  %v6378_v14 = vld.sshfl [vmem:[%s11224_s0 + $0x18] sm:$0x1 pattern:$0x75316420]  ;;  %v8524_v30 = vld [vmem:[%s11227_s3 + $0x40] sm:$0xff]  }
 0x2d7   :  { %5407 = vmatpush1.bf16.msra.mxu0 %v8434_v31  ;;  %5940 = vmatpush1.bf16.msra.mxu1 %v8437_v25  ;;  %v8525_v31 = vld [vmem:[%s11227_s3 + $0xc0] sm:$0xff]   ;;  %v996_v25 = vrot.slane %v6378_v14, %v8750_v49  ;;  %v8529_v49 = vld [vmem:[%s11227_s3 + $0xc8] sm:$0xff]  }
 0x2d8   :  { %5408 = vmatprep.subr.bf16.mxu0 %v8442_v32  ;;  %5941 = vmatprep.subr.bf16.mxu1 %v8445_v33  ;;  %v8526_v32 = vld [vmem:[%s11227_s3] sm:$0xff]  }
 0x2d9   :  { %v8527_v33 = vld [vmem:[%s11227_s3 + $0x80] sm:$0xff]  }
 0x2db   :  { %5409 = vmatpush1.bf16.msra.mxu0 %v8440_v26  ;;  %5942 = vmatpush1.bf16.msra.mxu1 %v8443_v36  ;;  %v8528_v26 = vld [vmem:[%s11227_s3 + $0x48] sm:$0xff]  }
 0x2dc   :  { %5410 = vmatprep.subr.bf16.mxu0 %v8448_v37  ;;  %5943 = vmatprep.subr.bf16.mxu1 %v8451_v21  ;;  %v8530_v36 = vld [vmem:[%s11227_s3 + $0x8] sm:$0xff]   ;;  %v8532_v21 = vld [vmem:[%s11227_s3 + $0x50] sm:$0xff]  }
 0x2dd   :  { %v8531_v37 = vld [vmem:[%s11227_s3 + $0x88] sm:$0xff]  }
 0x2df   :  { %5411 = vmatpush1.bf16.msra.mxu0 %v8446_v39  ;;  %5944 = vmatpush1.bf16.msra.mxu1 %v8449_v40  ;;  %v8533_v39 = vld [vmem:[%s11227_s3 + $0xd0] sm:$0xff]  }
 0x2e0   :  { %5412 = vmatprep.subr.bf16.mxu0 %v8454_v41  ;;  %5945 = vmatprep.subr.bf16.mxu1 %v8457_v34  ;;  %v8534_v40 = vld [vmem:[%s11227_s3 + $0x10] sm:$0xff]   ;;  %v8536_v34 = vld [vmem:[%s11227_s3 + $0x58] sm:$0xff]  }
 0x2e1   :  { %v8535_v41 = vld [vmem:[%s11227_s3 + $0x90] sm:$0xff]  }
 0x2e3   :  { %5413 = vmatpush1.bf16.msra.mxu0 %v8452_v43  ;;  %5946 = vmatpush1.bf16.msra.mxu1 %v8455_v45  ;;  %v8537_v43 = vld [vmem:[%s11227_s3 + $0xd8] sm:$0xff]  }
 0x2e4   :  { %5414 = vmatprep.subr.bf16.mxu0 %v8460_v46  ;;  %5947 = vmatprep.subr.bf16.mxu1 %v8463_v35  ;;  %v8538_v45 = vld [vmem:[%s11227_s3 + $0x18] sm:$0xff]   ;;  %v8540_v35 = vld [vmem:[%s11227_s3 + $0x60] sm:$0xff]  }
 0x2e5   :  { %v8539_v46 = vld [vmem:[%s11227_s3 + $0x98] sm:$0xff]  }
 0x2e7   :  { %5415 = vmatpush1.bf16.msra.mxu0 %v8458_v50  ;;  %5948 = vmatpush1.bf16.msra.mxu1 %v8461_v53  ;;  %v8541_v50 = vld [vmem:[%s11227_s3 + $0xe0] sm:$0xff]  }
 0x2e8   :  { %5416 = vmatprep.subr.bf16.mxu0 %v8466_v38  ;;  %5949 = vmatprep.subr.bf16.mxu1 %v8469_v54  ;;  %v8542_v53 = vld [vmem:[%s11227_s3 + $0x20] sm:$0xff]   ;;  %v8544_v54 = vld [vmem:[%s11227_s3 + $0x68] sm:$0xff]  }
 0x2e9   :  { %v8543_v38 = vld [vmem:[%s11227_s3 + $0xa0] sm:$0xff]  }
 0x2eb   :  { %5417 = vmatpush1.bf16.msra.mxu0 %v8464_v55  ;;  %5950 = vmatpush1.bf16.msra.mxu1 %v8467_v56  ;;  %v8545_v55 = vld [vmem:[%s11227_s3 + $0xe8] sm:$0xff]  }
 0x2ec   :  { %5418 = vmatprep.subr.bf16.mxu0 %v8472_v47  ;;  %5951 = vmatprep.subr.bf16.mxu1 %v8475_v57  ;;  %v8546_v56 = vld [vmem:[%s11227_s3 + $0x28] sm:$0xff]   ;;  %v8548_v57 = vld [vmem:[%s11227_s3 + $0x70] sm:$0xff]  }
 0x2ed   :  { %v8547_v47 = vld [vmem:[%s11227_s3 + $0xa8] sm:$0xff]  }
 0x2ef   :  { %5419 = vmatpush1.bf16.msra.mxu0 %v8470_v58  ;;  %5952 = vmatpush1.bf16.msra.mxu1 %v8473_v59  ;;  %v8549_v58 = vld [vmem:[%s11227_s3 + $0xf0] sm:$0xff]  }
 0x2f0   :  { %5420 = vmatprep.subr.bf16.mxu0 %v8478_v48  ;;  %5953 = vmatprep.subr.bf16.mxu1 %v8481_v61  ;;  %v8550_v59 = vld [vmem:[%s11227_s3 + $0x30] sm:$0xff]   ;;  %v8552_v61 = vld [vmem:[%s11227_s3 + $0x78] sm:$0xff]  }
 0x2f1   :  { %v8551_v48 = vld [vmem:[%s11227_s3 + $0xb0] sm:$0xff]  }
 0x2f3   :  { %5421 = vmatpush1.bf16.msra.mxu0 %v8476_v63  ;;  %5954 = vmatpush1.bf16.msra.mxu1 %v8479_v44  ;;  %v8553_v63 = vld [vmem:[%s11227_s3 + $0xf8] sm:$0xff]  }
 0x2f4   :  { %5422 = vmatprep.subr.bf16.mxu0 %v8484_v1  ;;  %5955 = vmatprep.subr.bf16.mxu1 %v8487_v51  ;;  %v8554_v44 = vld [vmem:[%s11227_s3 + $0x38] sm:$0xff]   ;;  %v814_v51 = vsub.s32 0, %v8732_v42 }
 0x2f5   :  { %v8555_v1 = vld [vmem:[%s11227_s3 + $0xb8] sm:$0xff]  }
 0x2f7   :  { %5423 = vmatpush1.bf16.msra.mxu0 %v8482_v2  ;;  %5956 = vmatpush1.bf16.msra.mxu1 %v8485_v3  ;;  %v822_v2 = vsub.s32 2, %v8732_v42  ;;  %v810_v3 = vld [vmem:[%s11226_s2] sm:$0xf] }
 0x2f8   :  { %5424 = vmatprep.subr.bf16.mxu0 %v8490_v4  ;;  %5957 = vmatprep.subr.bf16.mxu1 %v8493_v60  ;;  %v818_v4 = vsub.s32 1, %v8732_v42  ;;  %v826_v60 = vsub.s32 3, %v8732_v42 }
 0x2fb   :  { %5425 = vmatpush1.bf16.msra.mxu0 %v8488_v5  ;;  %5958 = vmatpush1.bf16.msra.mxu1 %v8491_v6  ;;  %v815_v5 = vrot.slane %v810_v3, %v814_v51  ;;  %v823_v6 = vrot.slane %v810_v3, %v822_v2 }
 0x2fc   :  { %5426 = vmatprep.subr.bf16.mxu0 %v8496_v7  ;;  %5959 = vmatprep.subr.bf16.mxu1 %v8499_v62  ;;  %v819_v7 = vrot.slane %v810_v3, %v818_v4  ;;  %v827_v62 = vrot.slane %v810_v3, %v826_v60 }
 0x2ff   :  { %5427 = vmatpush1.bf16.msra.mxu0 %v8494_v10  ;;  %5960 = vmatpush1.bf16.msra.mxu1 %v8497_v11 }
 0x300   :  { %5437 = vmatprep.subr.bf16.mxu0 %v8502_v12  ;;  %5970 = vmatprep.subr.bf16.mxu1 %v8505_v0 }
 0x302   :  { %5429 = vmatmul.mubr.bf16.vlgmr.msra.gmra.mrb[0].mxu0 %v980_v52  ;;  %5962 = vmatmul.mubr.bf16.vlgmr.msra.gmra.mrb[0].mxu1 %v980_v52 }
 0x303   :  { %5438 = vmatpush1.bf16.msra.mxu0 %v8500_v15  ;;  %5971 = vmatpush1.bf16.msra.mxu1 %v8503_v16 }
 0x304   :  { %5439 = vmatprep.subr.bf16.mxu0 %v8508_v8  ;;  %5972 = vmatprep.subr.bf16.mxu1 %v8511_v9 }
 0x305   :  { %5469 = vmatprep.mubr.bf16.mxu0 %v8583_v22  ;;  %6002 = vmatprep.mubr.bf16.mxu1 %v8583_v22 }
 0x307   :  { %5440 = vmatpush1.bf16.msra.mxu0 %v8506_v17  ;;  %5973 = vmatpush1.bf16.msra.mxu1 %v8509_v18 }
 0x308   :  { %5441 = vmatprep.subr.bf16.mxu0 %v8514_v19  ;;  %5974 = vmatprep.subr.bf16.mxu1 %v8517_v20 }
 0x30b   :  { %5442 = vmatpush1.bf16.msra.mxu0 %v8512_v23  ;;  %5975 = vmatpush1.bf16.msra.mxu1 %v8515_v24 }
 0x30c   :  { %5443 = vmatprep.subr.bf16.mxu0 %v8520_v13  ;;  %5976 = vmatprep.subr.bf16.mxu1 %v8523_v27 }
 0x30f   :  { %5444 = vmatpush1.bf16.msra.mxu0 %v8518_v28  ;;  %5977 = vmatpush1.bf16.msra.mxu1 %v8521_v29 }
 0x310   :  { %7198 = vmatprep.subr.bf16.mxu0 %v8524_v30  ;;  %7220 = vmatprep.subr.bf16.mxu1 %v8525_v31  ;;  %v7165_v30 = vld [vmem:[%s11228_s4] ss:$0 sm:$0xff] }
 0x312   :  { %7163 = vmatmul.mubr.msk.bf16.vlgmr.msra.gmra.mrb[0].mxu0 %vm4941_vm0, %v996_v25  ;;  %7164 = vmatmul.mubr.msk.bf16.vlgmr.msra.gmra.mrb[0].mxu1 %vm4941_vm0, %v996_v25 }
 0x313   :  { %7199 = vmatpush3.bf16.msra.mxu0 %v8526_v32  ;;  %7221 = vmatpush3.bf16.msra.mxu1 %v8527_v33 }
 0x314   :  { %7200 = vmatprep.subr.bf16.mxu0 %v8528_v26  ;;  %7222 = vmatprep.subr.bf16.mxu1 %v8529_v49 }
 0x317   :  { %7201 = vmatpush3.bf16.msra.mxu0 %v8530_v36  ;;  %7223 = vmatpush3.bf16.msra.mxu1 %v8531_v37 }
 0x318   :  { %7202 = vmatprep.subr.bf16.mxu0 %v8532_v21  ;;  %7224 = vmatprep.subr.bf16.mxu1 %v8533_v39 }
 0x31b   :  { %7203 = vmatpush3.bf16.msra.mxu0 %v8534_v40  ;;  %7225 = vmatpush3.bf16.msra.mxu1 %v8535_v41 }
 0x31c   :  { %7204 = vmatprep.subr.bf16.mxu0 %v8536_v34  ;;  %7226 = vmatprep.subr.bf16.mxu1 %v8537_v43 }
 0x31f   :  { %7205 = vmatpush3.bf16.msra.mxu0 %v8538_v45  ;;  %7227 = vmatpush3.bf16.msra.mxu1 %v8539_v46 }
 0x320   :  { %7206 = vmatprep.subr.bf16.mxu0 %v8540_v35  ;;  %7228 = vmatprep.subr.bf16.mxu1 %v8541_v50 }
 0x323   :  { %7207 = vmatpush3.bf16.msra.mxu0 %v8542_v53  ;;  %7229 = vmatpush3.bf16.msra.mxu1 %v8543_v38 }
 0x324   :  { %7208 = vmatprep.subr.bf16.mxu0 %v8544_v54  ;;  %7230 = vmatprep.subr.bf16.mxu1 %v8545_v55 }
 0x327   :  { %7209 = vmatpush3.bf16.msra.mxu0 %v8546_v56  ;;  %7231 = vmatpush3.bf16.msra.mxu1 %v8547_v47 }
 0x328   :  { %7210 = vmatprep.subr.bf16.mxu0 %v8548_v57  ;;  %7232 = vmatprep.subr.bf16.mxu1 %v8549_v58 }
 0x32b   :  { %7211 = vmatpush3.bf16.msra.mxu0 %v8550_v59  ;;  %7233 = vmatpush3.bf16.msra.mxu1 %v8551_v48 }
 0x32c   :  { %7212 = vmatprep.subr.bf16.mxu0 %v8552_v61  ;;  %7234 = vmatprep.subr.bf16.mxu1 %v8553_v63 }
 0x32f   :  { %7213 = vmatpush3.bf16.msra.mxu0 %v8554_v44  ;;  %7235 = vmatpush3.bf16.msra.mxu1 %v8555_v1 }
 0x3e5   :  { %v5471_v10 = vpop.f32.mrb[0].mxu0  ;;  %v6004_v11 = vpop.f32.mrb[0].mxu1 }
 0x3e6   :  { %v7242_v12 = vadd.f32 %v5471_v10, %v815_v5  ;;  %v7244_v0 = vadd.f32 %v6004_v11, %v823_v6  ;;  %v5473_v52 = vpop.f32.mrb[1].mxu0  ;;  %v6006_v15 = vpop.f32.mrb[1].mxu1 }
 0x3e7   :  { %v7243_v16 = vadd.f32 %v5473_v52, %v819_v7  ;;  %v7245_v8 = vadd.f32 %v6006_v15, %v827_v62  ;;  %v5475_v9 = vpop.f32.mrb[2].mxu0  ;;  %v6008_v17 = vpop.f32.mrb[2].mxu1 }
 0x3e8   :  { %v6011_v18 = vmax.f32 %v7242_v12, 0.0  ;;  %v6013_v19 = vmax.f32 %v7244_v0, 0.0  ;;  %v5476_v20 = vpop.f32.mrb[3].mxu0  ;;  %v6009_v22 = vpop.f32.mrb[3].mxu1 }
 0x3e9   :  { %v6012_v23 = vmax.f32 %v7243_v16, 0.0  ;;  %v6014_v42 = vmax.f32 %v7245_v8, 0.0 }
 0x3ea   :  { %v6015_v27 = vpack.c.bf16 %v6011_v18, %v6011_v18  ;;  %v6017_v28 = vpack.c.bf16 %v6013_v19, %v6013_v19 }
 0x3eb   :  { %v6016_v24 = vpack.c.bf16 %v6012_v23, %v6012_v23  ;;  %v6018_v13 = vpack.c.bf16 %v6014_v42, %v6014_v42 }
 0x3ed   :  { %6314 = vmatprep.mubr.bf16.mxu0 %v6016_v24  ;;  %6354 = vmatprep.mubr.bf16.mxu1 %v6018_v13 }
 0x3ee   :  { %6315 = vmatmul.mubr.bf16.vlgmr.msra.gmra.mrb[4].mxu0 %v6015_v27  ;;  %6355 = vmatmul.mubr.bf16.vlgmr.msra.gmra.mrb[4].mxu1 %v6017_v28 }
 0x4c1   :  { %v7214_v29 = vpop.f32.mrb[4].mxu0  ;;  %v7236_v14 = vpop.f32.mrb[4].mxu1 }
 0x4c2   :  { %v7215_v31 = vpop.f32.mrb[5].mxu0  ;;  %v7237_v25 = vpop.f32.mrb[5].mxu1 }
 0x4c3   :  { %v7216_v32 = vadd.f32 %v7215_v31, %v7214_v29  ;;  %v7238_v33 = vadd.f32 %v7237_v25, %v7236_v14  ;;  %v7217_v26 = vpop.f32.mrb[6].mxu0  ;;  %v7239_v49 = vpop.f32.mrb[6].mxu1 }
 0x4c4   :  { %v7218_v36 = vpop.f32.mrb[7].mxu0  ;;  %v7240_v37 = vpop.f32.mrb[7].mxu1 }
 0x4c5   :  { %v6317_v21 = vadd.f32 %v7216_v32, %v7165_v30 }
 0x4c7   :  { %v6357_v39 = vadd.f32 %v7238_v33, %v6317_v21 }
 0x4c9   :  { %6363 = vst.msk [vmem:[#allocation2] sm:$0x3] %vm6362_vm1, %v6357_v39 }
 0x4ca   :  { %8569 = shalt.err (!%p8566_p4)
}
 0x4cb   :  { %s8570_s10 = scalar_lea.hbm %s11229_s5, 32 }
 0x4cc   :  { %p8571_p5 = scmp.ne.s32.totalorder %s11229_s5, %s8570_s10  ;;  %p8574_p6 = scmp.lt.u32.totalorder %s8570_s10, %s11229_s5 }
 0x4ce   :  { %p8576_p7 = pnand %p8574_p6, %p8571_p5 }
 0x4d0   :  { %8579 = shalt.err (!%p8576_p7)
}
 0x4d1   :  { %6373 = dma.vmem_to_hbm [thread:$0]  %s6371_s7, 32, %s11229_s5, [#allocation3]  }
 0x4d2   :  { %8580 = dma.done.wait [#allocation3], 32  }
 0x4d3   :  { %8581 = vsyncadd [#allocation3], 4294967264 }
 0x4d4   :  { %6377 = vsyncpa [#allocation3], 1 }

</bundles_post_ra>
